<compile_context>
chip_gen: v5e
topology: v5e:2x2
jax: 0.10.0
libtpu: 0.0.40
codegen_flags: <defaults>
</compile_context>

<pallas_src>
import functools
import math

import jax
import jax.numpy as jnp
from jax.experimental import pallas as pl
from jax.experimental.pallas import tpu as pltpu

LANE = 128                  # TPU lane width: feature dims zero-padded to this
LN_EPS = 1e-5               # torch.nn.LayerNorm default
MXU_DTYPE = jnp.bfloat16    # matmul-operand dtype (accumulation is f32)
ACT_DTYPE = jnp.bfloat16    # inter-kernel activation dtype
VMEM_LIMIT = 48 * 1024 * 1024   # conservative for v7x (64 MiB physical VMEM)


def _round_up(x, m):
    return ((x + m - 1) // m) * m


# ----------------------------------------------------------------------------
# In-kernel helpers (operate on traced values; called from kernel bodies)
# ----------------------------------------------------------------------------

def _ln(y, g, b, d_real, eps):
    """LayerNorm over the last dim. Padded lanes of y are exactly zero, so
    dividing sums by the *real* feature count gives correct mean / E[x^2];
    zero-padded gamma/beta re-zero the pad lanes afterwards."""
    s1 = jnp.sum(y, axis=-1, keepdims=True)
    s2 = jnp.sum(y * y, axis=-1, keepdims=True)
    mean = s1 / d_real
    var = s2 / d_real - mean * mean
    return (y - mean) * jax.lax.rsqrt(var + eps) * g + b


def _causal_mask(sq, sk):
    qi = jax.lax.broadcasted_iota(jnp.int32, (sq, sk), 0)
    ki = jax.lax.broadcasted_iota(jnp.int32, (sq, sk), 1)
    return jnp.where(ki <= qi, 0.0, -1e30).astype(jnp.float32)


def _mha(q, k, v, *, heads, dh, mask=None):
    """q:(Sq,dp) k,v:(Sk,dp) f32 (1/sqrt(dh) already folded into Wq).
    Returns the concatenated head outputs (Sq, heads*dh) in f32."""
    outs = []
    for h in range(heads):                       # static unrolled head loop
        lo = h * dh
        qh = q[:, lo:lo + dh].astype(MXU_DTYPE)
        kh = k[:, lo:lo + dh].astype(MXU_DTYPE)
        vh = v[:, lo:lo + dh].astype(MXU_DTYPE)
        # contract the head dim of both operands (no materialized K transpose)
        s = jax.lax.dot_general(qh, kh, (((1,), (1,)), ((), ())),
                                preferred_element_type=jnp.float32)
        if mask is not None:
            s = s + mask                          # f32 additive mask (0 / -1e30)
        m = jnp.max(s, axis=-1, keepdims=True)
        p = jnp.exp(s - m)
        denom = jnp.sum(p, axis=-1, keepdims=True)
        p = p * pl.reciprocal(denom, approx=True)   # EUP divide (free slot)
        outs.append(jnp.dot(p.astype(MXU_DTYPE), vh,
                            preferred_element_type=jnp.float32))
    return jnp.concatenate(outs, axis=-1)         # (Sq, heads*dh) f32


# ----------------------------------------------------------------------------
# Fused encoder layer: QKV -> MHA -> Wo + LN -> FFN -> LN   (grid=(B,))
# ----------------------------------------------------------------------------

def _encoder_layer_kernel(x_ref, wqkv_ref, bqkv_ref, wo_ref, bo_ref,
                          g1_ref, be1_ref, w1_ref, b1_ref, w2_ref, b2_ref,
                          g2_ref, be2_ref, o_ref,
                          *, heads, dh, dp, d_real, eps):
    x = x_ref[0]                                            # (S, dp) bf16
    x32 = x.astype(jnp.float32)

    # --- self-attention ---
    qkv = jnp.dot(x, wqkv_ref[...],
                  preferred_element_type=jnp.float32) + bqkv_ref[...]
    ctx = _mha(qkv[:, :dp], qkv[:, dp:2 * dp], qkv[:, 2 * dp:],
               heads=heads, dh=dh, mask=None)
    attn = jnp.dot(ctx.astype(MXU_DTYPE), wo_ref[0:heads * dh, :],
                   preferred_element_type=jnp.float32) + bo_ref[...]
    y1 = _ln(x32 + attn, g1_ref[...], be1_ref[...], d_real, eps)

    # --- feed-forward ---
    h = jnp.maximum(jnp.dot(y1.astype(MXU_DTYPE), w1_ref[...],
                            preferred_element_type=jnp.float32) + b1_ref[...],
                    0.0)
    y2 = jnp.dot(h.astype(MXU_DTYPE), w2_ref[...],
                 preferred_element_type=jnp.float32) + b2_ref[...]
    y2 = _ln(y1 + y2, g2_ref[...], be2_ref[...], d_real, eps)

    o_ref[0] = y2.astype(o_ref.dtype)        # single lane-dense (S, dp) store


def encoder_layer(x, lp, *, heads, dh, d_real):
    B, S, dp = x.shape
    names = ("wqkv", "bqkv", "wo", "bo", "ln1_g", "ln1_b",
             "w1", "b1", "w2", "b2", "ln2_g", "ln2_b")
    weights = [lp[n] for n in names]
    in_specs = ([pl.BlockSpec((1, S, dp), lambda b: (b, 0, 0))] +
                [pl.BlockSpec(w.shape, lambda b: (0, 0)) for w in weights])
    return pl.pallas_call(
        functools.partial(_encoder_layer_kernel, heads=heads, dh=dh, dp=dp,
                          d_real=d_real, eps=LN_EPS),
        out_shape=jax.ShapeDtypeStruct((B, S, dp), ACT_DTYPE),
        grid=(B,),
        in_specs=in_specs,
        out_specs=pl.BlockSpec((1, S, dp), lambda b: (b, 0, 0)),
        compiler_params=pltpu.CompilerParams(
            dimension_semantics=("parallel",),
            vmem_limit_bytes=VMEM_LIMIT),
    )(x, *weights)


# ----------------------------------------------------------------------------
# Fused decoder layer: causal self-attn + LN -> cross-attn + LN -> FFN + LN
# ----------------------------------------------------------------------------

def _decoder_layer_kernel(x_ref, enc_ref,
                          sa_wqkv_ref, sa_bqkv_ref, sa_wo_ref, sa_bo_ref,
                          g1_ref, be1_ref,
                          ca_wq_ref, ca_bq_ref, ca_wkv_ref, ca_bkv_ref,
                          ca_wo_ref, ca_bo_ref, g2_ref, be2_ref,
                          w1_ref, b1_ref, w2_ref, b2_ref, g3_ref, be3_ref,
                          o_ref, *, heads, dh, dp, d_real, eps):
    x = x_ref[0]                                            # (S_tgt, dp) bf16
    enc = enc_ref[0]                                        # (S_src, dp) bf16
    x32 = x.astype(jnp.float32)
    sq = x.shape[0]
    mask = _causal_mask(sq, sq)          # built once, shared by all heads

    # --- masked self-attention ---
    qkv = jnp.dot(x, sa_wqkv_ref[...],
                  preferred_element_type=jnp.float32) + sa_bqkv_ref[...]
    ctx = _mha(qkv[:, :dp], qkv[:, dp:2 * dp], qkv[:, 2 * dp:],
               heads=heads, dh=dh, mask=mask)
    attn = jnp.dot(ctx.astype(MXU_DTYPE), sa_wo_ref[0:heads * dh, :],
                   preferred_element_type=jnp.float32) + sa_bo_ref[...]
    y1 = _ln(x32 + attn, g1_ref[...], be1_ref[...], d_real, eps)

    # --- cross-attention (encoder output as K/V) ---
    q = jnp.dot(y1.astype(MXU_DTYPE), ca_wq_ref[...],
                preferred_element_type=jnp.float32) + ca_bq_ref[...]
    kv = jnp.dot(enc, ca_wkv_ref[...],
                 preferred_element_type=jnp.float32) + ca_bkv_ref[...]
    ctx2 = _mha(q, kv[:, :dp], kv[:, dp:], heads=heads, dh=dh, mask=None)
    attn2 = jnp.dot(ctx2.astype(MXU_DTYPE), ca_wo_ref[0:heads * dh, :],
                    preferred_element_type=jnp.float32) + ca_bo_ref[...]
    y2 = _ln(y1 + attn2, g2_ref[...], be2_ref[...], d_real, eps)

    # --- feed-forward ---
    h = jnp.maximum(jnp.dot(y2.astype(MXU_DTYPE), w1_ref[...],
                            preferred_element_type=jnp.float32) + b1_ref[...],
                    0.0)
    y3 = jnp.dot(h.astype(MXU_DTYPE), w2_ref[...],
                 preferred_element_type=jnp.float32) + b2_ref[...]
    y3 = _ln(y2 + y3, g3_ref[...], be3_ref[...], d_real, eps)

    o_ref[0] = y3.astype(o_ref.dtype)        # single lane-dense (S, dp) store


def decoder_layer(x, enc, lp, *, heads, dh, d_real):
    B, S_tgt, dp = x.shape
    S_src = enc.shape[1]
    names = ("sa_wqkv", "sa_bqkv", "sa_wo", "sa_bo", "ln1_g", "ln1_b",
             "ca_wq", "ca_bq", "ca_wkv", "ca_bkv", "ca_wo", "ca_bo",
             "ln2_g", "ln2_b", "w1", "b1", "w2", "b2", "ln3_g", "ln3_b")
    weights = [lp[n] for n in names]
    in_specs = ([pl.BlockSpec((1, S_tgt, dp), lambda b: (b, 0, 0)),
                 pl.BlockSpec((1, S_src, dp), lambda b: (b, 0, 0))] +
                [pl.BlockSpec(w.shape, lambda b: (0, 0)) for w in weights])
    return pl.pallas_call(
        functools.partial(_decoder_layer_kernel, heads=heads, dh=dh, dp=dp,
                          d_real=d_real, eps=LN_EPS),
        out_shape=jax.ShapeDtypeStruct((B, S_tgt, dp), ACT_DTYPE),
        grid=(B,),
        in_specs=in_specs,
        out_specs=pl.BlockSpec((1, S_tgt, dp), lambda b: (b, 0, 0)),
        compiler_params=pltpu.CompilerParams(
            dimension_semantics=("parallel",),
            vmem_limit_bytes=VMEM_LIMIT),
    )(x, enc, *weights)


# ----------------------------------------------------------------------------
# Final LayerNorm fused into the vocab projection (output trimmed via shape)
# ----------------------------------------------------------------------------

def _final_proj_kernel(x_ref, g_ref, b_ref, w_ref, wb_ref, o_ref,
                       *, d_real, eps):
    x = x_ref[0].astype(jnp.float32)                       # (S, dp)
    y = _ln(x, g_ref[...], b_ref[...], d_real, eps)
    o_ref[0] = (jnp.dot(y.astype(MXU_DTYPE), w_ref[...],
                        preferred_element_type=jnp.float32)
                + wb_ref[...]).astype(o_ref.dtype)


def final_projection(x, gamma, beta, w, b, *, d_real):
    # TODO(synk): at large d_model/vocab, tile this over row/vocab blocks
    # instead of whole-row residency.
    B, S, dp = x.shape
    V = w.shape[1]
    in_specs = [pl.BlockSpec((1, S, dp), lambda i: (i, 0, 0)),
                pl.BlockSpec(gamma.shape, lambda i: (0, 0)),
                pl.BlockSpec(beta.shape, lambda i: (0, 0)),
                pl.BlockSpec(w.shape, lambda i: (0, 0)),
                pl.BlockSpec(b.shape, lambda i: (0, 0))]
    return pl.pallas_call(
        functools.partial(_final_proj_kernel, d_real=d_real, eps=LN_EPS),
        out_shape=jax.ShapeDtypeStruct((B, S, V), jnp.float32),
        grid=(B,),
        in_specs=in_specs,
        out_specs=pl.BlockSpec((1, S, V), lambda i: (i, 0, 0)),
        compiler_params=pltpu.CompilerParams(
            dimension_semantics=("parallel",),
            vmem_limit_bytes=VMEM_LIMIT),
    )(x, gamma, beta, w, b)


# ----------------------------------------------------------------------------
# Model glue (embedding gather + PE in XLA, everything else in Pallas)
# ----------------------------------------------------------------------------

def embed(tokens, table, pe):
    # sqrt(d_model) scale is pre-folded into `table` at parameter-pack time.
    S = tokens.shape[1]
    return (table[tokens] + pe[None, :S, :]).astype(ACT_DTYPE)


def transformer_forward(params, src, tgt, *, num_heads, d_model, tgt_vocab):
    # TODO(synk): optional src_mask / tgt_mask padding masks not supported
    # (reference default is None); decoder self-attention causality is built in.
    # Dropout omitted (eval-mode identity).
    dh = d_model // num_heads
    enc_p, dec_p = params["encoder"], params["decoder"]

    enc = embed(src, enc_p["embed"], enc_p["pe"])
    for lp in enc_p["layers"]:
        enc = encoder_layer(enc, lp, heads=num_heads, dh=dh, d_real=d_model)

    dec = embed(tgt, dec_p["embed"], dec_p["pe"])
    for lp in dec_p["layers"]:
        dec = decoder_layer(dec, enc, lp, heads=num_heads, dh=dh,
                            d_real=d_model)

    assert params["out_w"].shape[1] == tgt_vocab
    return final_projection(dec, params["norm_g"], params["norm_b"],
                            params["out_w"], params["out_b"], d_real=d_model)


# ----------------------------------------------------------------------------
# Parameter construction: xavier_uniform for dim>1, zeros bias, ones/zeros LN,
# packed + zero-padded to lane-dense shapes, weights stored bf16.
# ----------------------------------------------------------------------------

def _xavier(key, shape):
    bound = math.sqrt(6.0 / (shape[0] + shape[1]))
    return jax.random.uniform(key, shape, jnp.float32, -bound, bound)


def _pad2(a, rows, cols, dtype=jnp.float32):
    out = jnp.zeros((rows, cols), jnp.float32)
    out = out.at[:a.shape[0], :a.shape[1]].set(a)
    return out.astype(dtype)


def _pad_row(a, cols):
    return jnp.zeros((1, cols), jnp.float32).at[0, :a.shape[0]].set(a)


def _sinusoidal_pe(max_len, d, dp):
    pos = jnp.arange(max_len, dtype=jnp.float32)[:, None]
    i = jnp.arange(0, d, 2, dtype=jnp.float32)
    div = jnp.exp(-math.log(10000.0) * i / d)
    pe = jnp.zeros((max_len, dp), jnp.float32)
    pe = pe.at[:, 0:d:2].set(jnp.sin(pos * div))
    pe = pe.at[:, 1:d:2].set(jnp.cos(pos * div))
    return pe


def make_params(key, src_vocab, tgt_vocab, d, heads, f, num_layers, max_len):
    dh = d // heads
    dp = _round_up(d, LANE)
    fp = _round_up(f, LANE)
    keys = jax.random.split(key, 2 * num_layers + 3)
    scale_q = 1.0 / math.sqrt(dh)        # folded into Wq  (q.k / sqrt(dh))
    emb_scale = math.sqrt(d)             # folded into the embedding table

    def ln_pair():
        return (_pad_row(jnp.ones((d,), jnp.float32), dp),
                jnp.zeros((1, dp), jnp.float32))

    def self_attn(k):
        kq, kk, kv, ko = jax.random.split(k, 4)
        wqkv = jnp.concatenate([_pad2(_xavier(kq, (d, d)) * scale_q, dp, dp),
                                _pad2(_xavier(kk, (d, d)), dp, dp),
                                _pad2(_xavier(kv, (d, d)), dp, dp)], axis=1)
        return {"wqkv": wqkv.astype(MXU_DTYPE),
                "bqkv": jnp.zeros((1, 3 * dp), jnp.float32),
                "wo": _pad2(_xavier(ko, (d, d)), dp, dp, MXU_DTYPE),
                "bo": jnp.zeros((1, dp), jnp.float32)}

    def cross_attn(k):
        kq, kk, kv, ko = jax.random.split(k, 4)
        wkv = jnp.concatenate([_pad2(_xavier(kk, (d, d)), dp, dp),
                               _pad2(_xavier(kv, (d, d)), dp, dp)], axis=1)
        return {"wq": _pad2(_xavier(kq, (d, d)) * scale_q, dp, dp, MXU_DTYPE),
                "bq": jnp.zeros((1, dp), jnp.float32),
                "wkv": wkv.astype(MXU_DTYPE),
                "bkv": jnp.zeros((1, 2 * dp), jnp.float32),
                "wo": _pad2(_xavier(ko, (d, d)), dp, dp, MXU_DTYPE),
                "bo": jnp.zeros((1, dp), jnp.float32)}

    def ffn(k):
        k1, k2 = jax.random.split(k)
        return {"w1": _pad2(_xavier(k1, (d, f)), dp, fp, MXU_DTYPE),
                "b1": jnp.zeros((1, fp), jnp.float32),
                "w2": _pad2(_xavier(k2, (f, d)), fp, dp, MXU_DTYPE),
                "b2": jnp.zeros((1, dp), jnp.float32)}

    def enc_layer(k):
        k1, k2 = jax.random.split(k)
        sa, ff = self_attn(k1), ffn(k2)
        g1, b1 = ln_pair(); g2, b2 = ln_pair()
        return {"wqkv": sa["wqkv"], "bqkv": sa["bqkv"],
                "wo": sa["wo"], "bo": sa["bo"],
                "ln1_g": g1, "ln1_b": b1,
                "w1": ff["w1"], "b1": ff["b1"],
                "w2": ff["w2"], "b2": ff["b2"],
                "ln2_g": g2, "ln2_b": b2}

    def dec_layer(k):
        k1, k2, k3 = jax.random.split(k, 3)
        sa, ca, ff = self_attn(k1), cross_attn(k2), ffn(k3)
        g1, b1 = ln_pair(); g2, b2 = ln_pair(); g3, b3 = ln_pair()
        return {"sa_wqkv": sa["wqkv"], "sa_bqkv": sa["bqkv"],
                "sa_wo": sa["wo"], "sa_bo": sa["bo"],
                "ln1_g": g1, "ln1_b": b1,
                "ca_wq": ca["wq"], "ca_bq": ca["bq"],
                "ca_wkv": ca["wkv"], "ca_bkv": ca["bkv"],
                "ca_wo": ca["wo"], "ca_bo": ca["bo"],
                "ln2_g": g2, "ln2_b": b2,
                "w1": ff["w1"], "b1": ff["b1"],
                "w2": ff["w2"], "b2": ff["b2"],
                "ln3_g": g3, "ln3_b": b3}

    pe = _sinusoidal_pe(max_len, d, dp)
    norm_g, norm_b = ln_pair()
    return {
        "encoder": {"embed": _pad2(_xavier(keys[-3], (src_vocab, d)) * emb_scale,
                                   src_vocab, dp),
                    "pe": pe,
                    "layers": [enc_layer(keys[i]) for i in range(num_layers)]},
        "decoder": {"embed": _pad2(_xavier(keys[-2], (tgt_vocab, d)) * emb_scale,
                                   tgt_vocab, dp),
                    "pe": pe,
                    "layers": [dec_layer(keys[num_layers + i])
                               for i in range(num_layers)]},
        "norm_g": norm_g, "norm_b": norm_b,
        "out_w": _pad2(_xavier(keys[-1], (d, tgt_vocab)), dp, tgt_vocab,
                       MXU_DTYPE),
        "out_b": jnp.zeros((1, tgt_vocab), jnp.float32),
    }


# ----------------------------------------------------------------------------
# main
# ----------------------------------------------------------------------------

if __name__ == "__main__":
    SRC_VOCAB, TGT_VOCAB = 40, 48
    EMBED_DIM, NUM_HEADS, FF_DIM, NUM_LAYERS, MAX_LEN = 32, 4, 64, 2, 16
    B, S_SRC, S_TGT = 2, 8, 8

    root = jax.random.PRNGKey(0)
    kp, ks, kt = jax.random.split(root, 3)
    params = make_params(kp, SRC_VOCAB, TGT_VOCAB, EMBED_DIM, NUM_HEADS,
                         FF_DIM, NUM_LAYERS, MAX_LEN)

    src = jax.random.randint(ks, (B, S_SRC), 0, SRC_VOCAB, dtype=jnp.int32)
    tgt = jax.random.randint(kt, (B, S_TGT), 0, TGT_VOCAB, dtype=jnp.int32)

    fwd = jax.jit(functools.partial(transformer_forward, num_heads=NUM_HEADS,
                                    d_model=EMBED_DIM, tgt_vocab=TGT_VOCAB))
    logits = fwd(params, src, tgt)
    jax.block_until_ready(logits)

    assert logits.shape == (B, S_TGT, TGT_VOCAB), logits.shape
    assert bool(jnp.all(jnp.isfinite(logits)))
    print("KERNEL_OK")
</pallas_src>

<mosaic_0001>
module attributes {stable_mosaic.version = 11 : i64} {
  func.func @_encoder_layer_kernel(%arg0: i32, %arg1: memref<1x8x128xbf16, #tpu.memory_space<vmem>>, %arg2: memref<128x384xbf16, #tpu.memory_space<vmem>>, %arg3: memref<1x384xf32, #tpu.memory_space<vmem>>, %arg4: memref<128x128xbf16, #tpu.memory_space<vmem>>, %arg5: memref<1x128xf32, #tpu.memory_space<vmem>>, %arg6: memref<1x128xf32, #tpu.memory_space<vmem>>, %arg7: memref<1x128xf32, #tpu.memory_space<vmem>>, %arg8: memref<128x128xbf16, #tpu.memory_space<vmem>>, %arg9: memref<1x128xf32, #tpu.memory_space<vmem>>, %arg10: memref<128x128xbf16, #tpu.memory_space<vmem>>, %arg11: memref<1x128xf32, #tpu.memory_space<vmem>>, %arg12: memref<1x128xf32, #tpu.memory_space<vmem>>, %arg13: memref<1x128xf32, #tpu.memory_space<vmem>>, %arg14: memref<1x8x128xbf16, #tpu.memory_space<vmem>>) attributes {dimension_semantics = [#tpu.dimension_semantics<parallel>], iteration_bounds = array<i64: 2>, scalar_prefetch = 0 : i64, scratch_operands = 0 : i64, tpu.core_type = #tpu.core_type<tc>, window_params = [{transform_indices = @transform_0, window_bounds = array<i64: 1, 8, 128>}, {pipeline_mode = #tpu.pipeline_mode<synchronous>, transform_indices = @transform_1, window_bounds = array<i64: 128, 384>}, {pipeline_mode = #tpu.pipeline_mode<synchronous>, transform_indices = @transform_2, window_bounds = array<i64: 1, 384>}, {pipeline_mode = #tpu.pipeline_mode<synchronous>, transform_indices = @transform_3, window_bounds = array<i64: 128, 128>}, {pipeline_mode = #tpu.pipeline_mode<synchronous>, transform_indices = @transform_4, window_bounds = array<i64: 1, 128>}, {pipeline_mode = #tpu.pipeline_mode<synchronous>, transform_indices = @transform_5, window_bounds = array<i64: 1, 128>}, {pipeline_mode = #tpu.pipeline_mode<synchronous>, transform_indices = @transform_6, window_bounds = array<i64: 1, 128>}, {pipeline_mode = #tpu.pipeline_mode<synchronous>, transform_indices = @transform_7, window_bounds = array<i64: 128, 128>}, {pipeline_mode = #tpu.pipeline_mode<synchronous>, transform_indices = @transform_8, window_bounds = array<i64: 1, 128>}, {pipeline_mode = #tpu.pipeline_mode<synchronous>, transform_indices = @transform_9, window_bounds = array<i64: 128, 128>}, {pipeline_mode = #tpu.pipeline_mode<synchronous>, transform_indices = @transform_10, window_bounds = array<i64: 1, 128>}, {pipeline_mode = #tpu.pipeline_mode<synchronous>, transform_indices = @transform_11, window_bounds = array<i64: 1, 128>}, {pipeline_mode = #tpu.pipeline_mode<synchronous>, transform_indices = @transform_12, window_bounds = array<i64: 1, 128>}, {transform_indices = @transform_13, window_bounds = array<i64: 1, 8, 128>}]} {
    %c0 = arith.constant 0 : index
    %c0_0 = arith.constant 0 : index
    %c0_1 = arith.constant 0 : index
    %0 = vector.load %arg1[%c0, %c0_0, %c0_1] : memref<1x8x128xbf16, #tpu.memory_space<vmem>>, vector<1x8x128xbf16>
    %1 = vector.shape_cast %0 : vector<1x8x128xbf16> to vector<8x128xbf16>
    %2 = arith.extf %1 : vector<8x128xbf16> to vector<8x128xf32>
    %c0_2 = arith.constant 0 : index
    %c0_3 = arith.constant 0 : index
    %3 = vector.load %arg2[%c0_2, %c0_3] : memref<128x384xbf16, #tpu.memory_space<vmem>>, vector<128x384xbf16>
    %cst = arith.constant dense<0.000000e+00> : vector<8x384xf32>
    %4 = tpu.matmul %1, %3, %cst {dimension_numbers = #tpu.dot_dimension_numbers<[1], [0], [0], [1], [0, 0, 1, 1], [], []>} : vector<8x128xbf16>, vector<128x384xbf16>, vector<8x384xf32> -> vector<8x384xf32>
    %c0_4 = arith.constant 0 : index
    %c0_5 = arith.constant 0 : index
    %5 = vector.load %arg3[%c0_4, %c0_5] : memref<1x384xf32, #tpu.memory_space<vmem>>, vector<1x384xf32>
    %6 = vector.broadcast %5 : vector<1x384xf32> to vector<8x384xf32>
    %7 = arith.addf %4, %6 : vector<8x384xf32>
    %8 = vector.extract_strided_slice %7 {offsets = [0, 0], sizes = [8, 128], strides = [1, 1]} : vector<8x384xf32> to vector<8x128xf32>
    %9 = vector.extract_strided_slice %7 {offsets = [0, 128], sizes = [8, 128], strides = [1, 1]} : vector<8x384xf32> to vector<8x128xf32>
    %10 = vector.extract_strided_slice %7 {offsets = [0, 256], sizes = [8, 128], strides = [1, 1]} : vector<8x384xf32> to vector<8x128xf32>
    %11 = vector.extract_strided_slice %8 {offsets = [0, 0], sizes = [8, 8], strides = [1, 1]} : vector<8x128xf32> to vector<8x8xf32>
    %12 = arith.truncf %11 : vector<8x8xf32> to vector<8x8xbf16>
    %13 = vector.extract_strided_slice %9 {offsets = [0, 0], sizes = [8, 8], strides = [1, 1]} : vector<8x128xf32> to vector<8x8xf32>
    %14 = arith.truncf %13 : vector<8x8xf32> to vector<8x8xbf16>
    %15 = vector.extract_strided_slice %10 {offsets = [0, 0], sizes = [8, 8], strides = [1, 1]} : vector<8x128xf32> to vector<8x8xf32>
    %16 = arith.truncf %15 : vector<8x8xf32> to vector<8x8xbf16>
    %cst_6 = arith.constant dense<0.000000e+00> : vector<8x8xf32>
    %17 = tpu.matmul %12, %14, %cst_6 {dimension_numbers = #tpu.dot_dimension_numbers<[1], [1], [0], [0], [0, 0, 1, 0], [], []>} : vector<8x8xbf16>, vector<8x8xbf16>, vector<8x8xf32> -> vector<8x8xf32>
    %cst_7 = arith.constant dense<0xFF800000> : vector<8xf32>
    %18 = vector.multi_reduction <maximumf>, %17, %cst_7 [1] : vector<8x8xf32> to vector<8xf32>
    %19 = vector.shape_cast %18 : vector<8xf32> to vector<8x1xf32>
    %20 = vector.broadcast %19 : vector<8x1xf32> to vector<8x8xf32>
    %21 = arith.subf %17, %20 : vector<8x8xf32>
    %22 = math.exp %21 : vector<8x8xf32>
    %cst_8 = arith.constant dense<0.000000e+00> : vector<8xf32>
    %23 = vector.multi_reduction <add>, %22, %cst_8 [1] : vector<8x8xf32> to vector<8xf32>
    %24 = vector.shape_cast %23 : vector<8xf32> to vector<8x1xf32>
    %25 = tpu.reciprocal %24 {approx = true} : vector<8x1xf32> -> vector<8x1xf32>
    %26 = vector.broadcast %25 : vector<8x1xf32> to vector<8x8xf32>
    %27 = arith.mulf %22, %26 : vector<8x8xf32>
    %28 = arith.truncf %27 : vector<8x8xf32> to vector<8x8xbf16>
    %cst_9 = arith.constant dense<0.000000e+00> : vector<8x8xf32>
    %29 = tpu.matmul %28, %16, %cst_9 {dimension_numbers = #tpu.dot_dimension_numbers<[1], [0], [0], [1], [0, 0, 1, 1], [], []>} : vector<8x8xbf16>, vector<8x8xbf16>, vector<8x8xf32> -> vector<8x8xf32>
    %30 = vector.extract_strided_slice %8 {offsets = [0, 8], sizes = [8, 8], strides = [1, 1]} : vector<8x128xf32> to vector<8x8xf32>
    %31 = arith.truncf %30 : vector<8x8xf32> to vector<8x8xbf16>
    %32 = vector.extract_strided_slice %9 {offsets = [0, 8], sizes = [8, 8], strides = [1, 1]} : vector<8x128xf32> to vector<8x8xf32>
    %33 = arith.truncf %32 : vector<8x8xf32> to vector<8x8xbf16>
    %34 = vector.extract_strided_slice %10 {offsets = [0, 8], sizes = [8, 8], strides = [1, 1]} : vector<8x128xf32> to vector<8x8xf32>
    %35 = arith.truncf %34 : vector<8x8xf32> to vector<8x8xbf16>
    %cst_10 = arith.constant dense<0.000000e+00> : vector<8x8xf32>
    %36 = tpu.matmul %31, %33, %cst_10 {dimension_numbers = #tpu.dot_dimension_numbers<[1], [1], [0], [0], [0, 0, 1, 0], [], []>} : vector<8x8xbf16>, vector<8x8xbf16>, vector<8x8xf32> -> vector<8x8xf32>
    %cst_11 = arith.constant dense<0xFF800000> : vector<8xf32>
    %37 = vector.multi_reduction <maximumf>, %36, %cst_11 [1] : vector<8x8xf32> to vector<8xf32>
    %38 = vector.shape_cast %37 : vector<8xf32> to vector<8x1xf32>
    %39 = vector.broadcast %38 : vector<8x1xf32> to vector<8x8xf32>
    %40 = arith.subf %36, %39 : vector<8x8xf32>
    %41 = math.exp %40 : vector<8x8xf32>
    %cst_12 = arith.constant dense<0.000000e+00> : vector<8xf32>
    %42 = vector.multi_reduction <add>, %41, %cst_12 [1] : vector<8x8xf32> to vector<8xf32>
    %43 = vector.shape_cast %42 : vector<8xf32> to vector<8x1xf32>
    %44 = tpu.reciprocal %43 {approx = true} : vector<8x1xf32> -> vector<8x1xf32>
    %45 = vector.broadcast %44 : vector<8x1xf32> to vector<8x8xf32>
    %46 = arith.mulf %41, %45 : vector<8x8xf32>
    %47 = arith.truncf %46 : vector<8x8xf32> to vector<8x8xbf16>
    %cst_13 = arith.constant dense<0.000000e+00> : vector<8x8xf32>
    %48 = tpu.matmul %47, %35, %cst_13 {dimension_numbers = #tpu.dot_dimension_numbers<[1], [0], [0], [1], [0, 0, 1, 1], [], []>} : vector<8x8xbf16>, vector<8x8xbf16>, vector<8x8xf32> -> vector<8x8xf32>
    %49 = vector.extract_strided_slice %8 {offsets = [0, 16], sizes = [8, 8], strides = [1, 1]} : vector<8x128xf32> to vector<8x8xf32>
    %50 = arith.truncf %49 : vector<8x8xf32> to vector<8x8xbf16>
    %51 = vector.extract_strided_slice %9 {offsets = [0, 16], sizes = [8, 8], strides = [1, 1]} : vector<8x128xf32> to vector<8x8xf32>
    %52 = arith.truncf %51 : vector<8x8xf32> to vector<8x8xbf16>
    %53 = vector.extract_strided_slice %10 {offsets = [0, 16], sizes = [8, 8], strides = [1, 1]} : vector<8x128xf32> to vector<8x8xf32>
    %54 = arith.truncf %53 : vector<8x8xf32> to vector<8x8xbf16>
    %cst_14 = arith.constant dense<0.000000e+00> : vector<8x8xf32>
    %55 = tpu.matmul %50, %52, %cst_14 {dimension_numbers = #tpu.dot_dimension_numbers<[1], [1], [0], [0], [0, 0, 1, 0], [], []>} : vector<8x8xbf16>, vector<8x8xbf16>, vector<8x8xf32> -> vector<8x8xf32>
    %cst_15 = arith.constant dense<0xFF800000> : vector<8xf32>
    %56 = vector.multi_reduction <maximumf>, %55, %cst_15 [1] : vector<8x8xf32> to vector<8xf32>
    %57 = vector.shape_cast %56 : vector<8xf32> to vector<8x1xf32>
    %58 = vector.broadcast %57 : vector<8x1xf32> to vector<8x8xf32>
    %59 = arith.subf %55, %58 : vector<8x8xf32>
    %60 = math.exp %59 : vector<8x8xf32>
    %cst_16 = arith.constant dense<0.000000e+00> : vector<8xf32>
    %61 = vector.multi_reduction <add>, %60, %cst_16 [1] : vector<8x8xf32> to vector<8xf32>
    %62 = vector.shape_cast %61 : vector<8xf32> to vector<8x1xf32>
    %63 = tpu.reciprocal %62 {approx = true} : vector<8x1xf32> -> vector<8x1xf32>
    %64 = vector.broadcast %63 : vector<8x1xf32> to vector<8x8xf32>
    %65 = arith.mulf %60, %64 : vector<8x8xf32>
    %66 = arith.truncf %65 : vector<8x8xf32> to vector<8x8xbf16>
    %cst_17 = arith.constant dense<0.000000e+00> : vector<8x8xf32>
    %67 = tpu.matmul %66, %54, %cst_17 {dimension_numbers = #tpu.dot_dimension_numbers<[1], [0], [0], [1], [0, 0, 1, 1], [], []>} : vector<8x8xbf16>, vector<8x8xbf16>, vector<8x8xf32> -> vector<8x8xf32>
    %68 = vector.extract_strided_slice %8 {offsets = [0, 24], sizes = [8, 8], strides = [1, 1]} : vector<8x128xf32> to vector<8x8xf32>
    %69 = arith.truncf %68 : vector<8x8xf32> to vector<8x8xbf16>
    %70 = vector.extract_strided_slice %9 {offsets = [0, 24], sizes = [8, 8], strides = [1, 1]} : vector<8x128xf32> to vector<8x8xf32>
    %71 = arith.truncf %70 : vector<8x8xf32> to vector<8x8xbf16>
    %72 = vector.extract_strided_slice %10 {offsets = [0, 24], sizes = [8, 8], strides = [1, 1]} : vector<8x128xf32> to vector<8x8xf32>
    %73 = arith.truncf %72 : vector<8x8xf32> to vector<8x8xbf16>
    %cst_18 = arith.constant dense<0.000000e+00> : vector<8x8xf32>
    %74 = tpu.matmul %69, %71, %cst_18 {dimension_numbers = #tpu.dot_dimension_numbers<[1], [1], [0], [0], [0, 0, 1, 0], [], []>} : vector<8x8xbf16>, vector<8x8xbf16>, vector<8x8xf32> -> vector<8x8xf32>
    %cst_19 = arith.constant dense<0xFF800000> : vector<8xf32>
    %75 = vector.multi_reduction <maximumf>, %74, %cst_19 [1] : vector<8x8xf32> to vector<8xf32>
    %76 = vector.shape_cast %75 : vector<8xf32> to vector<8x1xf32>
    %77 = vector.broadcast %76 : vector<8x1xf32> to vector<8x8xf32>
    %78 = arith.subf %74, %77 : vector<8x8xf32>
    %79 = math.exp %78 : vector<8x8xf32>
    %cst_20 = arith.constant dense<0.000000e+00> : vector<8xf32>
    %80 = vector.multi_reduction <add>, %79, %cst_20 [1] : vector<8x8xf32> to vector<8xf32>
    %81 = vector.shape_cast %80 : vector<8xf32> to vector<8x1xf32>
    %82 = tpu.reciprocal %81 {approx = true} : vector<8x1xf32> -> vector<8x1xf32>
    %83 = vector.broadcast %82 : vector<8x1xf32> to vector<8x8xf32>
    %84 = arith.mulf %79, %83 : vector<8x8xf32>
    %85 = arith.truncf %84 : vector<8x8xf32> to vector<8x8xbf16>
    %cst_21 = arith.constant dense<0.000000e+00> : vector<8x8xf32>
    %86 = tpu.matmul %85, %73, %cst_21 {dimension_numbers = #tpu.dot_dimension_numbers<[1], [0], [0], [1], [0, 0, 1, 1], [], []>} : vector<8x8xbf16>, vector<8x8xbf16>, vector<8x8xf32> -> vector<8x8xf32>
    %87 = tpu.concatenate %29, %48, %67, %86 in 1 : vector<8x8xf32>, vector<8x8xf32>, vector<8x8xf32>, vector<8x8xf32> -> vector<8x32xf32>
    %88 = arith.truncf %87 : vector<8x32xf32> to vector<8x32xbf16>
    %c0_22 = arith.constant 0 : index
    %c0_23 = arith.constant 0 : index
    %89 = vector.load %arg4[%c0_22, %c0_23] : memref<128x128xbf16, #tpu.memory_space<vmem>>, vector<32x128xbf16>
    %cst_24 = arith.constant dense<0.000000e+00> : vector<8x128xf32>
    %90 = tpu.matmul %88, %89, %cst_24 {dimension_numbers = #tpu.dot_dimension_numbers<[1], [0], [0], [1], [0, 0, 1, 1], [], []>} : vector<8x32xbf16>, vector<32x128xbf16>, vector<8x128xf32> -> vector<8x128xf32>
    %c0_25 = arith.constant 0 : index
    %c0_26 = arith.constant 0 : index
    %91 = vector.load %arg5[%c0_25, %c0_26] : memref<1x128xf32, #tpu.memory_space<vmem>>, vector<1x128xf32>
    %92 = vector.broadcast %91 : vector<1x128xf32> to vector<8x128xf32>
    %93 = arith.addf %90, %92 : vector<8x128xf32>
    %94 = arith.addf %2, %93 : vector<8x128xf32>
    %c0_27 = arith.constant 0 : index
    %c0_28 = arith.constant 0 : index
    %95 = vector.load %arg6[%c0_27, %c0_28] : memref<1x128xf32, #tpu.memory_space<vmem>>, vector<1x128xf32>
    %c0_29 = arith.constant 0 : index
    %c0_30 = arith.constant 0 : index
    %96 = vector.load %arg7[%c0_29, %c0_30] : memref<1x128xf32, #tpu.memory_space<vmem>>, vector<1x128xf32>
    %cst_31 = arith.constant dense<0.000000e+00> : vector<8xf32>
    %97 = vector.multi_reduction <add>, %94, %cst_31 [1] : vector<8x128xf32> to vector<8xf32>
    %98 = vector.shape_cast %97 : vector<8xf32> to vector<8x1xf32>
    %99 = arith.mulf %94, %94 : vector<8x128xf32>
    %cst_32 = arith.constant dense<0.000000e+00> : vector<8xf32>
    %100 = vector.multi_reduction <add>, %99, %cst_32 [1] : vector<8x128xf32> to vector<8xf32>
    %101 = vector.shape_cast %100 : vector<8xf32> to vector<8x1xf32>
    %cst_33 = arith.constant 3.200000e+01 : f32
    %102 = vector.broadcast %cst_33 : f32 to vector<8x1xf32>
    %103 = arith.divf %98, %102 : vector<8x1xf32>
    %cst_34 = arith.constant 3.200000e+01 : f32
    %104 = vector.broadcast %cst_34 : f32 to vector<8x1xf32>
    %105 = arith.divf %101, %104 : vector<8x1xf32>
    %106 = arith.mulf %103, %103 : vector<8x1xf32>
    %107 = arith.subf %105, %106 : vector<8x1xf32>
    %108 = vector.broadcast %103 : vector<8x1xf32> to vector<8x128xf32>
    %109 = arith.subf %94, %108 : vector<8x128xf32>
    %cst_35 = arith.constant 9.99999974E-6 : f32
    %110 = vector.broadcast %cst_35 : f32 to vector<8x1xf32>
    %111 = arith.addf %107, %110 : vector<8x1xf32>
    %112 = math.rsqrt %111 : vector<8x1xf32>
    %113 = vector.broadcast %112 : vector<8x1xf32> to vector<8x128xf32>
    %114 = arith.mulf %109, %113 : vector<8x128xf32>
    %115 = vector.broadcast %95 : vector<1x128xf32> to vector<8x128xf32>
    %116 = arith.mulf %114, %115 : vector<8x128xf32>
    %117 = vector.broadcast %96 : vector<1x128xf32> to vector<8x128xf32>
    %118 = arith.addf %116, %117 : vector<8x128xf32>
    %119 = arith.truncf %118 : vector<8x128xf32> to vector<8x128xbf16>
    %c0_36 = arith.constant 0 : index
    %c0_37 = arith.constant 0 : index
    %120 = vector.load %arg8[%c0_36, %c0_37] : memref<128x128xbf16, #tpu.memory_space<vmem>>, vector<128x128xbf16>
    %cst_38 = arith.constant dense<0.000000e+00> : vector<8x128xf32>
    %121 = tpu.matmul %119, %120, %cst_38 {dimension_numbers = #tpu.dot_dimension_numbers<[1], [0], [0], [1], [0, 0, 1, 1], [], []>} : vector<8x128xbf16>, vector<128x128xbf16>, vector<8x128xf32> -> vector<8x128xf32>
    %c0_39 = arith.constant 0 : index
    %c0_40 = arith.constant 0 : index
    %122 = vector.load %arg9[%c0_39, %c0_40] : memref<1x128xf32, #tpu.memory_space<vmem>>, vector<1x128xf32>
    %123 = vector.broadcast %122 : vector<1x128xf32> to vector<8x128xf32>
    %124 = arith.addf %121, %123 : vector<8x128xf32>
    %cst_41 = arith.constant 0.000000e+00 : f32
    %125 = vector.broadcast %cst_41 : f32 to vector<8x128xf32>
    %126 = arith.maximumf %124, %125 : vector<8x128xf32>
    %127 = arith.truncf %126 : vector<8x128xf32> to vector<8x128xbf16>
    %c0_42 = arith.constant 0 : index
    %c0_43 = arith.constant 0 : index
    %128 = vector.load %arg10[%c0_42, %c0_43] : memref<128x128xbf16, #tpu.memory_space<vmem>>, vector<128x128xbf16>
    %cst_44 = arith.constant dense<0.000000e+00> : vector<8x128xf32>
    %129 = tpu.matmul %127, %128, %cst_44 {dimension_numbers = #tpu.dot_dimension_numbers<[1], [0], [0], [1], [0, 0, 1, 1], [], []>} : vector<8x128xbf16>, vector<128x128xbf16>, vector<8x128xf32> -> vector<8x128xf32>
    %c0_45 = arith.constant 0 : index
    %c0_46 = arith.constant 0 : index
    %130 = vector.load %arg11[%c0_45, %c0_46] : memref<1x128xf32, #tpu.memory_space<vmem>>, vector<1x128xf32>
    %131 = vector.broadcast %130 : vector<1x128xf32> to vector<8x128xf32>
    %132 = arith.addf %129, %131 : vector<8x128xf32>
    %133 = arith.addf %118, %132 : vector<8x128xf32>
    %c0_47 = arith.constant 0 : index
    %c0_48 = arith.constant 0 : index
    %134 = vector.load %arg12[%c0_47, %c0_48] : memref<1x128xf32, #tpu.memory_space<vmem>>, vector<1x128xf32>
    %c0_49 = arith.constant 0 : index
    %c0_50 = arith.constant 0 : index
    %135 = vector.load %arg13[%c0_49, %c0_50] : memref<1x128xf32, #tpu.memory_space<vmem>>, vector<1x128xf32>
    %cst_51 = arith.constant dense<0.000000e+00> : vector<8xf32>
    %136 = vector.multi_reduction <add>, %133, %cst_51 [1] : vector<8x128xf32> to vector<8xf32>
    %137 = vector.shape_cast %136 : vector<8xf32> to vector<8x1xf32>
    %138 = arith.mulf %133, %133 : vector<8x128xf32>
    %cst_52 = arith.constant dense<0.000000e+00> : vector<8xf32>
    %139 = vector.multi_reduction <add>, %138, %cst_52 [1] : vector<8x128xf32> to vector<8xf32>
    %140 = vector.shape_cast %139 : vector<8xf32> to vector<8x1xf32>
    %cst_53 = arith.constant 3.200000e+01 : f32
    %141 = vector.broadcast %cst_53 : f32 to vector<8x1xf32>
    %142 = arith.divf %137, %141 : vector<8x1xf32>
    %cst_54 = arith.constant 3.200000e+01 : f32
    %143 = vector.broadcast %cst_54 : f32 to vector<8x1xf32>
    %144 = arith.divf %140, %143 : vector<8x1xf32>
    %145 = arith.mulf %142, %142 : vector<8x1xf32>
    %146 = arith.subf %144, %145 : vector<8x1xf32>
    %147 = vector.broadcast %142 : vector<8x1xf32> to vector<8x128xf32>
    %148 = arith.subf %133, %147 : vector<8x128xf32>
    %cst_55 = arith.constant 9.99999974E-6 : f32
    %149 = vector.broadcast %cst_55 : f32 to vector<8x1xf32>
    %150 = arith.addf %146, %149 : vector<8x1xf32>
    %151 = math.rsqrt %150 : vector<8x1xf32>
    %152 = vector.broadcast %151 : vector<8x1xf32> to vector<8x128xf32>
    %153 = arith.mulf %148, %152 : vector<8x128xf32>
    %154 = vector.broadcast %134 : vector<1x128xf32> to vector<8x128xf32>
    %155 = arith.mulf %153, %154 : vector<8x128xf32>
    %156 = vector.broadcast %135 : vector<1x128xf32> to vector<8x128xf32>
    %157 = arith.addf %155, %156 : vector<8x128xf32>
    %158 = arith.truncf %157 : vector<8x128xf32> to vector<8x128xbf16>
    %c0_56 = arith.constant 0 : index
    %c0_57 = arith.constant 0 : index
    %c0_58 = arith.constant 0 : index
    %159 = vector.load %arg14[%c0_56, %c0_57, %c0_58] : memref<1x8x128xbf16, #tpu.memory_space<vmem>>, vector<1x8x128xbf16>
    %160 = vector.shape_cast %159 : vector<1x8x128xbf16> to vector<8x128xbf16>
    %161 = vector.shape_cast %158 : vector<8x128xbf16> to vector<1x8x128xbf16>
    tpu.vector_store %arg14[%c0_56, %c0_57, %c0_58], %161 {strides = array<i32>} : memref<1x8x128xbf16, #tpu.memory_space<vmem>>, vector<1x8x128xbf16>,
    return
  }
  func.func @transform_0(%arg0: i32) -> (i32, i32, i32) {
    %c0_i32 = arith.constant 0 : i32
    %c0_i32_0 = arith.constant 0 : i32
    %c0_i32_1 = arith.constant 0 : i32
    return %arg0, %c0_i32, %c0_i32_0 : i32, i32, i32
  }
  func.func @transform_1(%arg0: i32) -> (i32, i32) {
    %c0_i32 = arith.constant 0 : i32
    %c0_i32_0 = arith.constant 0 : i32
    %c0_i32_1 = arith.constant 0 : i32
    return %c0_i32, %c0_i32_0 : i32, i32
  }
  func.func @transform_2(%arg0: i32) -> (i32, i32) {
    %c0_i32 = arith.constant 0 : i32
    %c0_i32_0 = arith.constant 0 : i32
    %c0_i32_1 = arith.constant 0 : i32
    return %c0_i32, %c0_i32_0 : i32, i32
  }
  func.func @transform_3(%arg0: i32) -> (i32, i32) {
    %c0_i32 = arith.constant 0 : i32
    %c0_i32_0 = arith.constant 0 : i32
    %c0_i32_1 = arith.constant 0 : i32
    return %c0_i32, %c0_i32_0 : i32, i32
  }
  func.func @transform_4(%arg0: i32) -> (i32, i32) {
    %c0_i32 = arith.constant 0 : i32
    %c0_i32_0 = arith.constant 0 : i32
    %c0_i32_1 = arith.constant 0 : i32
    return %c0_i32, %c0_i32_0 : i32, i32
  }
  func.func @transform_5(%arg0: i32) -> (i32, i32) {
    %c0_i32 = arith.constant 0 : i32
    %c0_i32_0 = arith.constant 0 : i32
    %c0_i32_1 = arith.constant 0 : i32
    return %c0_i32, %c0_i32_0 : i32, i32
  }
  func.func @transform_6(%arg0: i32) -> (i32, i32) {
    %c0_i32 = arith.constant 0 : i32
    %c0_i32_0 = arith.constant 0 : i32
    %c0_i32_1 = arith.constant 0 : i32
    return %c0_i32, %c0_i32_0 : i32, i32
  }
  func.func @transform_7(%arg0: i32) -> (i32, i32) {
    %c0_i32 = arith.constant 0 : i32
    %c0_i32_0 = arith.constant 0 : i32
    %c0_i32_1 = arith.constant 0 : i32
    return %c0_i32, %c0_i32_0 : i32, i32
  }
  func.func @transform_8(%arg0: i32) -> (i32, i32) {
    %c0_i32 = arith.constant 0 : i32
    %c0_i32_0 = arith.constant 0 : i32
    %c0_i32_1 = arith.constant 0 : i32
    return %c0_i32, %c0_i32_0 : i32, i32
  }
  func.func @transform_9(%arg0: i32) -> (i32, i32) {
    %c0_i32 = arith.constant 0 : i32
    %c0_i32_0 = arith.constant 0 : i32
    %c0_i32_1 = arith.constant 0 : i32
    return %c0_i32, %c0_i32_0 : i32, i32
  }
  func.func @transform_10(%arg0: i32) -> (i32, i32) {
    %c0_i32 = arith.constant 0 : i32
    %c0_i32_0 = arith.constant 0 : i32
    %c0_i32_1 = arith.constant 0 : i32
    return %c0_i32, %c0_i32_0 : i32, i32
  }
  func.func @transform_11(%arg0: i32) -> (i32, i32) {
    %c0_i32 = arith.constant 0 : i32
    %c0_i32_0 = arith.constant 0 : i32
    %c0_i32_1 = arith.constant 0 : i32
    return %c0_i32, %c0_i32_0 : i32, i32
  }
  func.func @transform_12(%arg0: i32) -> (i32, i32) {
    %c0_i32 = arith.constant 0 : i32
    %c0_i32_0 = arith.constant 0 : i32
    %c0_i32_1 = arith.constant 0 : i32
    return %c0_i32, %c0_i32_0 : i32, i32
  }
  func.func @transform_13(%arg0: i32) -> (i32, i32, i32) {
    %c0_i32 = arith.constant 0 : i32
    %c0_i32_0 = arith.constant 0 : i32
    %c0_i32_1 = arith.constant 0 : i32
    return %arg0, %c0_i32, %c0_i32_0 : i32, i32, i32
  }
}

module attributes {stable_mosaic.version = 11 : i64} {
  func.func @_decoder_layer_kernel(%arg0: i32, %arg1: memref<1x8x128xbf16, #tpu.memory_space<vmem>>, %arg2: memref<1x8x128xbf16, #tpu.memory_space<vmem>>, %arg3: memref<128x384xbf16, #tpu.memory_space<vmem>>, %arg4: memref<1x384xf32, #tpu.memory_space<vmem>>, %arg5: memref<128x128xbf16, #tpu.memory_space<vmem>>, %arg6: memref<1x128xf32, #tpu.memory_space<vmem>>, %arg7: memref<1x128xf32, #tpu.memory_space<vmem>>, %arg8: memref<1x128xf32, #tpu.memory_space<vmem>>, %arg9: memref<128x128xbf16, #tpu.memory_space<vmem>>, %arg10: memref<1x128xf32, #tpu.memory_space<vmem>>, %arg11: memref<128x256xbf16, #tpu.memory_space<vmem>>, %arg12: memref<1x256xf32, #tpu.memory_space<vmem>>, %arg13: memref<128x128xbf16, #tpu.memory_space<vmem>>, %arg14: memref<1x128xf32, #tpu.memory_space<vmem>>, %arg15: memref<1x128xf32, #tpu.memory_space<vmem>>, %arg16: memref<1x128xf32, #tpu.memory_space<vmem>>, %arg17: memref<128x128xbf16, #tpu.memory_space<vmem>>, %arg18: memref<1x128xf32, #tpu.memory_space<vmem>>, %arg19: memref<128x128xbf16, #tpu.memory_space<vmem>>, %arg20: memref<1x128xf32, #tpu.memory_space<vmem>>, %arg21: memref<1x128xf32, #tpu.memory_space<vmem>>, %arg22: memref<1x128xf32, #tpu.memory_space<vmem>>, %arg23: memref<1x8x128xbf16, #tpu.memory_space<vmem>>) attributes {dimension_semantics = [#tpu.dimension_semantics<parallel>], iteration_bounds = array<i64: 2>, scalar_prefetch = 0 : i64, scratch_operands = 0 : i64, tpu.core_type = #tpu.core_type<tc>, window_params = [{transform_indices = @transform_0, window_bounds = array<i64: 1, 8, 128>}, {transform_indices = @transform_1, window_bounds = array<i64: 1, 8, 128>}, {pipeline_mode = #tpu.pipeline_mode<synchronous>, transform_indices = @transform_2, window_bounds = array<i64: 128, 384>}, {pipeline_mode = #tpu.pipeline_mode<synchronous>, transform_indices = @transform_3, window_bounds = array<i64: 1, 384>}, {pipeline_mode = #tpu.pipeline_mode<synchronous>, transform_indices = @transform_4, window_bounds = array<i64: 128, 128>}, {pipeline_mode = #tpu.pipeline_mode<synchronous>, transform_indices = @transform_5, window_bounds = array<i64: 1, 128>}, {pipeline_mode = #tpu.pipeline_mode<synchronous>, transform_indices = @transform_6, window_bounds = array<i64: 1, 128>}, {pipeline_mode = #tpu.pipeline_mode<synchronous>, transform_indices = @transform_7, window_bounds = array<i64: 1, 128>}, {pipeline_mode = #tpu.pipeline_mode<synchronous>, transform_indices = @transform_8, window_bounds = array<i64: 128, 128>}, {pipeline_mode = #tpu.pipeline_mode<synchronous>, transform_indices = @transform_9, window_bounds = array<i64: 1, 128>}, {pipeline_mode = #tpu.pipeline_mode<synchronous>, transform_indices = @transform_10, window_bounds = array<i64: 128, 256>}, {pipeline_mode = #tpu.pipeline_mode<synchronous>, transform_indices = @transform_11, window_bounds = array<i64: 1, 256>}, {pipeline_mode = #tpu.pipeline_mode<synchronous>, transform_indices = @transform_12, window_bounds = array<i64: 128, 128>}, {pipeline_mode = #tpu.pipeline_mode<synchronous>, transform_indices = @transform_13, window_bounds = array<i64: 1, 128>}, {pipeline_mode = #tpu.pipeline_mode<synchronous>, transform_indices = @transform_14, window_bounds = array<i64: 1, 128>}, {pipeline_mode = #tpu.pipeline_mode<synchronous>, transform_indices = @transform_15, window_bounds = array<i64: 1, 128>}, {pipeline_mode = #tpu.pipeline_mode<synchronous>, transform_indices = @transform_16, window_bounds = array<i64: 128, 128>}, {pipeline_mode = #tpu.pipeline_mode<synchronous>, transform_indices = @transform_17, window_bounds = array<i64: 1, 128>}, {pipeline_mode = #tpu.pipeline_mode<synchronous>, transform_indices = @transform_18, window_bounds = array<i64: 128, 128>}, {pipeline_mode = #tpu.pipeline_mode<synchronous>, transform_indices = @transform_19, window_bounds = array<i64: 1, 128>}, {pipeline_mode = #tpu.pipeline_mode<synchronous>, transform_indices = @transform_20, window_bounds = array<i64: 1, 128>}, {pipeline_mode = #tpu.pipeline_mode<synchronous>, transform_indices = @transform_21, window_bounds = array<i64: 1, 128>}, {transform_indices = @transform_22, window_bounds = array<i64: 1, 8, 128>}]} {
    %c0 = arith.constant 0 : index
    %c0_0 = arith.constant 0 : index
    %c0_1 = arith.constant 0 : index
    %0 = vector.load %arg1[%c0, %c0_0, %c0_1] : memref<1x8x128xbf16, #tpu.memory_space<vmem>>, vector<1x8x128xbf16>
    %1 = vector.shape_cast %0 : vector<1x8x128xbf16> to vector<8x128xbf16>
    %c0_2 = arith.constant 0 : index
    %c0_3 = arith.constant 0 : index
    %c0_4 = arith.constant 0 : index
    %2 = vector.load %arg2[%c0_2, %c0_3, %c0_4] : memref<1x8x128xbf16, #tpu.memory_space<vmem>>, vector<1x8x128xbf16>
    %3 = vector.shape_cast %2 : vector<1x8x128xbf16> to vector<8x128xbf16>
    %4 = arith.extf %1 : vector<8x128xbf16> to vector<8x128xf32>
    %5 = tpu.iota {dimensions = array<i32: 0>} : vector<8x8xi32>
    %6 = tpu.iota {dimensions = array<i32: 1>} : vector<8x8xi32>
    %7 = arith.cmpi sle, %6, %5 : vector<8x8xi32>
    %cst = arith.constant 0.000000e+00 : f32
    %cst_5 = arith.constant -1.000000e+30 : f32
    %8 = vector.broadcast %cst : f32 to vector<8x8xf32>
    %9 = vector.broadcast %cst_5 : f32 to vector<8x8xf32>
    %10 = arith.select %7, %8, %9 : vector<8x8xi1>, vector<8x8xf32>
    %c0_6 = arith.constant 0 : index
    %c0_7 = arith.constant 0 : index
    %11 = vector.load %arg3[%c0_6, %c0_7] : memref<128x384xbf16, #tpu.memory_space<vmem>>, vector<128x384xbf16>
    %cst_8 = arith.constant dense<0.000000e+00> : vector<8x384xf32>
    %12 = tpu.matmul %1, %11, %cst_8 {dimension_numbers = #tpu.dot_dimension_numbers<[1], [0], [0], [1], [0, 0, 1, 1], [], []>} : vector<8x128xbf16>, vector<128x384xbf16>, vector<8x384xf32> -> vector<8x384xf32>
    %c0_9 = arith.constant 0 : index
    %c0_10 = arith.constant 0 : index
    %13 = vector.load %arg4[%c0_9, %c0_10] : memref<1x384xf32, #tpu.memory_space<vmem>>, vector<1x384xf32>
    %14 = vector.broadcast %13 : vector<1x384xf32> to vector<8x384xf32>
    %15 = arith.addf %12, %14 : vector<8x384xf32>
    %16 = vector.extract_strided_slice %15 {offsets = [0, 0], sizes = [8, 128], strides = [1, 1]} : vector<8x384xf32> to vector<8x128xf32>
    %17 = vector.extract_strided_slice %15 {offsets = [0, 128], sizes = [8, 128], strides = [1, 1]} : vector<8x384xf32> to vector<8x128xf32>
    %18 = vector.extract_strided_slice %15 {offsets = [0, 256], sizes = [8, 128], strides = [1, 1]} : vector<8x384xf32> to vector<8x128xf32>
    %19 = vector.extract_strided_slice %16 {offsets = [0, 0], sizes = [8, 8], strides = [1, 1]} : vector<8x128xf32> to vector<8x8xf32>
    %20 = arith.truncf %19 : vector<8x8xf32> to vector<8x8xbf16>
    %21 = vector.extract_strided_slice %17 {offsets = [0, 0], sizes = [8, 8], strides = [1, 1]} : vector<8x128xf32> to vector<8x8xf32>
    %22 = arith.truncf %21 : vector<8x8xf32> to vector<8x8xbf16>
    %23 = vector.extract_strided_slice %18 {offsets = [0, 0], sizes = [8, 8], strides = [1, 1]} : vector<8x128xf32> to vector<8x8xf32>
    %24 = arith.truncf %23 : vector<8x8xf32> to vector<8x8xbf16>
    %cst_11 = arith.constant dense<0.000000e+00> : vector<8x8xf32>
    %25 = tpu.matmul %20, %22, %cst_11 {dimension_numbers = #tpu.dot_dimension_numbers<[1], [1], [0], [0], [0, 0, 1, 0], [], []>} : vector<8x8xbf16>, vector<8x8xbf16>, vector<8x8xf32> -> vector<8x8xf32>
    %26 = arith.addf %25, %10 : vector<8x8xf32>
    %cst_12 = arith.constant dense<0xFF800000> : vector<8xf32>
    %27 = vector.multi_reduction <maximumf>, %26, %cst_12 [1] : vector<8x8xf32> to vector<8xf32>
    %28 = vector.shape_cast %27 : vector<8xf32> to vector<8x1xf32>
    %29 = vector.broadcast %28 : vector<8x1xf32> to vector<8x8xf32>
    %30 = arith.subf %26, %29 : vector<8x8xf32>
    %31 = math.exp %30 : vector<8x8xf32>
    %cst_13 = arith.constant dense<0.000000e+00> : vector<8xf32>
    %32 = vector.multi_reduction <add>, %31, %cst_13 [1] : vector<8x8xf32> to vector<8xf32>
    %33 = vector.shape_cast %32 : vector<8xf32> to vector<8x1xf32>
    %34 = tpu.reciprocal %33 {approx = true} : vector<8x1xf32> -> vector<8x1xf32>
    %35 = vector.broadcast %34 : vector<8x1xf32> to vector<8x8xf32>
    %36 = arith.mulf %31, %35 : vector<8x8xf32>
    %37 = arith.truncf %36 : vector<8x8xf32> to vector<8x8xbf16>
    %cst_14 = arith.constant dense<0.000000e+00> : vector<8x8xf32>
    %38 = tpu.matmul %37, %24, %cst_14 {dimension_numbers = #tpu.dot_dimension_numbers<[1], [0], [0], [1], [0, 0, 1, 1], [], []>} : vector<8x8xbf16>, vector<8x8xbf16>, vector<8x8xf32> -> vector<8x8xf32>
    %39 = vector.extract_strided_slice %16 {offsets = [0, 8], sizes = [8, 8], strides = [1, 1]} : vector<8x128xf32> to vector<8x8xf32>
    %40 = arith.truncf %39 : vector<8x8xf32> to vector<8x8xbf16>
    %41 = vector.extract_strided_slice %17 {offsets = [0, 8], sizes = [8, 8], strides = [1, 1]} : vector<8x128xf32> to vector<8x8xf32>
    %42 = arith.truncf %41 : vector<8x8xf32> to vector<8x8xbf16>
    %43 = vector.extract_strided_slice %18 {offsets = [0, 8], sizes = [8, 8], strides = [1, 1]} : vector<8x128xf32> to vector<8x8xf32>
    %44 = arith.truncf %43 : vector<8x8xf32> to vector<8x8xbf16>
    %cst_15 = arith.constant dense<0.000000e+00> : vector<8x8xf32>
    %45 = tpu.matmul %40, %42, %cst_15 {dimension_numbers = #tpu.dot_dimension_numbers<[1], [1], [0], [0], [0, 0, 1, 0], [], []>} : vector<8x8xbf16>, vector<8x8xbf16>, vector<8x8xf32> -> vector<8x8xf32>
    %46 = arith.addf %45, %10 : vector<8x8xf32>
    %cst_16 = arith.constant dense<0xFF800000> : vector<8xf32>
    %47 = vector.multi_reduction <maximumf>, %46, %cst_16 [1] : vector<8x8xf32> to vector<8xf32>
    %48 = vector.shape_cast %47 : vector<8xf32> to vector<8x1xf32>
    %49 = vector.broadcast %48 : vector<8x1xf32> to vector<8x8xf32>
    %50 = arith.subf %46, %49 : vector<8x8xf32>
    %51 = math.exp %50 : vector<8x8xf32>
    %cst_17 = arith.constant dense<0.000000e+00> : vector<8xf32>
    %52 = vector.multi_reduction <add>, %51, %cst_17 [1] : vector<8x8xf32> to vector<8xf32>
    %53 = vector.shape_cast %52 : vector<8xf32> to vector<8x1xf32>
    %54 = tpu.reciprocal %53 {approx = true} : vector<8x1xf32> -> vector<8x1xf32>
    %55 = vector.broadcast %54 : vector<8x1xf32> to vector<8x8xf32>
    %56 = arith.mulf %51, %55 : vector<8x8xf32>
    %57 = arith.truncf %56 : vector<8x8xf32> to vector<8x8xbf16>
    %cst_18 = arith.constant dense<0.000000e+00> : vector<8x8xf32>
    %58 = tpu.matmul %57, %44, %cst_18 {dimension_numbers = #tpu.dot_dimension_numbers<[1], [0], [0], [1], [0, 0, 1, 1], [], []>} : vector<8x8xbf16>, vector<8x8xbf16>, vector<8x8xf32> -> vector<8x8xf32>
    %59 = vector.extract_strided_slice %16 {offsets = [0, 16], sizes = [8, 8], strides = [1, 1]} : vector<8x128xf32> to vector<8x8xf32>
    %60 = arith.truncf %59 : vector<8x8xf32> to vector<8x8xbf16>
    %61 = vector.extract_strided_slice %17 {offsets = [0, 16], sizes = [8, 8], strides = [1, 1]} : vector<8x128xf32> to vector<8x8xf32>
    %62 = arith.truncf %61 : vector<8x8xf32> to vector<8x8xbf16>
    %63 = vector.extract_strided_slice %18 {offsets = [0, 16], sizes = [8, 8], strides = [1, 1]} : vector<8x128xf32> to vector<8x8xf32>
    %64 = arith.truncf %63 : vector<8x8xf32> to vector<8x8xbf16>
    %cst_19 = arith.constant dense<0.000000e+00> : vector<8x8xf32>
    %65 = tpu.matmul %60, %62, %cst_19 {dimension_numbers = #tpu.dot_dimension_numbers<[1], [1], [0], [0], [0, 0, 1, 0], [], []>} : vector<8x8xbf16>, vector<8x8xbf16>, vector<8x8xf32> -> vector<8x8xf32>
    %66 = arith.addf %65, %10 : vector<8x8xf32>
    %cst_20 = arith.constant dense<0xFF800000> : vector<8xf32>
    %67 = vector.multi_reduction <maximumf>, %66, %cst_20 [1] : vector<8x8xf32> to vector<8xf32>
    %68 = vector.shape_cast %67 : vector<8xf32> to vector<8x1xf32>
    %69 = vector.broadcast %68 : vector<8x1xf32> to vector<8x8xf32>
    %70 = arith.subf %66, %69 : vector<8x8xf32>
    %71 = math.exp %70 : vector<8x8xf32>
    %cst_21 = arith.constant dense<0.000000e+00> : vector<8xf32>
    %72 = vector.multi_reduction <add>, %71, %cst_21 [1] : vector<8x8xf32> to vector<8xf32>
    %73 = vector.shape_cast %72 : vector<8xf32> to vector<8x1xf32>
    %74 = tpu.reciprocal %73 {approx = true} : vector<8x1xf32> -> vector<8x1xf32>
    %75 = vector.broadcast %74 : vector<8x1xf32> to vector<8x8xf32>
    %76 = arith.mulf %71, %75 : vector<8x8xf32>
    %77 = arith.truncf %76 : vector<8x8xf32> to vector<8x8xbf16>
    %cst_22 = arith.constant dense<0.000000e+00> : vector<8x8xf32>
    %78 = tpu.matmul %77, %64, %cst_22 {dimension_numbers = #tpu.dot_dimension_numbers<[1], [0], [0], [1], [0, 0, 1, 1], [], []>} : vector<8x8xbf16>, vector<8x8xbf16>, vector<8x8xf32> -> vector<8x8xf32>
    %79 = vector.extract_strided_slice %16 {offsets = [0, 24], sizes = [8, 8], strides = [1, 1]} : vector<8x128xf32> to vector<8x8xf32>
    %80 = arith.truncf %79 : vector<8x8xf32> to vector<8x8xbf16>
    %81 = vector.extract_strided_slice %17 {offsets = [0, 24], sizes = [8, 8], strides = [1, 1]} : vector<8x128xf32> to vector<8x8xf32>
    %82 = arith.truncf %81 : vector<8x8xf32> to vector<8x8xbf16>
    %83 = vector.extract_strided_slice %18 {offsets = [0, 24], sizes = [8, 8], strides = [1, 1]} : vector<8x128xf32> to vector<8x8xf32>
    %84 = arith.truncf %83 : vector<8x8xf32> to vector<8x8xbf16>
    %cst_23 = arith.constant dense<0.000000e+00> : vector<8x8xf32>
    %85 = tpu.matmul %80, %82, %cst_23 {dimension_numbers = #tpu.dot_dimension_numbers<[1], [1], [0], [0], [0, 0, 1, 0], [], []>} : vector<8x8xbf16>, vector<8x8xbf16>, vector<8x8xf32> -> vector<8x8xf32>
    %86 = arith.addf %85, %10 : vector<8x8xf32>
    %cst_24 = arith.constant dense<0xFF800000> : vector<8xf32>
    %87 = vector.multi_reduction <maximumf>, %86, %cst_24 [1] : vector<8x8xf32> to vector<8xf32>
    %88 = vector.shape_cast %87 : vector<8xf32> to vector<8x1xf32>
    %89 = vector.broadcast %88 : vector<8x1xf32> to vector<8x8xf32>
    %90 = arith.subf %86, %89 : vector<8x8xf32>
    %91 = math.exp %90 : vector<8x8xf32>
    %cst_25 = arith.constant dense<0.000000e+00> : vector<8xf32>
    %92 = vector.multi_reduction <add>, %91, %cst_25 [1] : vector<8x8xf32> to vector<8xf32>
    %93 = vector.shape_cast %92 : vector<8xf32> to vector<8x1xf32>
    %94 = tpu.reciprocal %93 {approx = true} : vector<8x1xf32> -> vector<8x1xf32>
    %95 = vector.broadcast %94 : vector<8x1xf32> to vector<8x8xf32>
    %96 = arith.mulf %91, %95 : vector<8x8xf32>
    %97 = arith.truncf %96 : vector<8x8xf32> to vector<8x8xbf16>
    %cst_26 = arith.constant dense<0.000000e+00> : vector<8x8xf32>
    %98 = tpu.matmul %97, %84, %cst_26 {dimension_numbers = #tpu.dot_dimension_numbers<[1], [0], [0], [1], [0, 0, 1, 1], [], []>} : vector<8x8xbf16>, vector<8x8xbf16>, vector<8x8xf32> -> vector<8x8xf32>
    %99 = tpu.concatenate %38, %58, %78, %98 in 1 : vector<8x8xf32>, vector<8x8xf32>, vector<8x8xf32>, vector<8x8xf32> -> vector<8x32xf32>
    %100 = arith.truncf %99 : vector<8x32xf32> to vector<8x32xbf16>
    %c0_27 = arith.constant 0 : index
    %c0_28 = arith.constant 0 : index
    %101 = vector.load %arg5[%c0_27, %c0_28] : memref<128x128xbf16, #tpu.memory_space<vmem>>, vector<32x128xbf16>
    %cst_29 = arith.constant dense<0.000000e+00> : vector<8x128xf32>
    %102 = tpu.matmul %100, %101, %cst_29 {dimension_numbers = #tpu.dot_dimension_numbers<[1], [0], [0], [1], [0, 0, 1, 1], [], []>} : vector<8x32xbf16>, vector<32x128xbf16>, vector<8x128xf32> -> vector<8x128xf32>
    %c0_30 = arith.constant 0 : index
    %c0_31 = arith.constant 0 : index
    %103 = vector.load %arg6[%c0_30, %c0_31] : memref<1x128xf32, #tpu.memory_space<vmem>>, vector<1x128xf32>
    %104 = vector.broadcast %103 : vector<1x128xf32> to vector<8x128xf32>
    %105 = arith.addf %102, %104 : vector<8x128xf32>
    %106 = arith.addf %4, %105 : vector<8x128xf32>
    %c0_32 = arith.constant 0 : index
    %c0_33 = arith.constant 0 : index
    %107 = vector.load %arg7[%c0_32, %c0_33] : memref<1x128xf32, #tpu.memory_space<vmem>>, vector<1x128xf32>
    %c0_34 = arith.constant 0 : index
    %c0_35 = arith.constant 0 : index
    %108 = vector.load %arg8[%c0_34, %c0_35] : memref<1x128xf32, #tpu.memory_space<vmem>>, vector<1x128xf32>
    %cst_36 = arith.constant dense<0.000000e+00> : vector<8xf32>
    %109 = vector.multi_reduction <add>, %106, %cst_36 [1] : vector<8x128xf32> to vector<8xf32>
    %110 = vector.shape_cast %109 : vector<8xf32> to vector<8x1xf32>
    %111 = arith.mulf %106, %106 : vector<8x128xf32>
    %cst_37 = arith.constant dense<0.000000e+00> : vector<8xf32>
    %112 = vector.multi_reduction <add>, %111, %cst_37 [1] : vector<8x128xf32> to vector<8xf32>
    %113 = vector.shape_cast %112 : vector<8xf32> to vector<8x1xf32>
    %cst_38 = arith.constant 3.200000e+01 : f32
    %114 = vector.broadcast %cst_38 : f32 to vector<8x1xf32>
    %115 = arith.divf %110, %114 : vector<8x1xf32>
    %cst_39 = arith.constant 3.200000e+01 : f32
    %116 = vector.broadcast %cst_39 : f32 to vector<8x1xf32>
    %117 = arith.divf %113, %116 : vector<8x1xf32>
    %118 = arith.mulf %115, %115 : vector<8x1xf32>
    %119 = arith.subf %117, %118 : vector<8x1xf32>
    %120 = vector.broadcast %115 : vector<8x1xf32> to vector<8x128xf32>
    %121 = arith.subf %106, %120 : vector<8x128xf32>
    %cst_40 = arith.constant 9.99999974E-6 : f32
    %122 = vector.broadcast %cst_40 : f32 to vector<8x1xf32>
    %123 = arith.addf %119, %122 : vector<8x1xf32>
    %124 = math.rsqrt %123 : vector<8x1xf32>
    %125 = vector.broadcast %124 : vector<8x1xf32> to vector<8x128xf32>
    %126 = arith.mulf %121, %125 : vector<8x128xf32>
    %127 = vector.broadcast %107 : vector<1x128xf32> to vector<8x128xf32>
    %128 = arith.mulf %126, %127 : vector<8x128xf32>
    %129 = vector.broadcast %108 : vector<1x128xf32> to vector<8x128xf32>
    %130 = arith.addf %128, %129 : vector<8x128xf32>
    %131 = arith.truncf %130 : vector<8x128xf32> to vector<8x128xbf16>
    %c0_41 = arith.constant 0 : index
    %c0_42 = arith.constant 0 : index
    %132 = vector.load %arg9[%c0_41, %c0_42] : memref<128x128xbf16, #tpu.memory_space<vmem>>, vector<128x128xbf16>
    %cst_43 = arith.constant dense<0.000000e+00> : vector<8x128xf32>
    %133 = tpu.matmul %131, %132, %cst_43 {dimension_numbers = #tpu.dot_dimension_numbers<[1], [0], [0], [1], [0, 0, 1, 1], [], []>} : vector<8x128xbf16>, vector<128x128xbf16>, vector<8x128xf32> -> vector<8x128xf32>
    %c0_44 = arith.constant 0 : index
    %c0_45 = arith.constant 0 : index
    %134 = vector.load %arg10[%c0_44, %c0_45] : memref<1x128xf32, #tpu.memory_space<vmem>>, vector<1x128xf32>
    %135 = vector.broadcast %134 : vector<1x128xf32> to vector<8x128xf32>
    %136 = arith.addf %133, %135 : vector<8x128xf32>
    %c0_46 = arith.constant 0 : index
    %c0_47 = arith.constant 0 : index
    %137 = vector.load %arg11[%c0_46, %c0_47] : memref<128x256xbf16, #tpu.memory_space<vmem>>, vector<128x256xbf16>
    %cst_48 = arith.constant dense<0.000000e+00> : vector<8x256xf32>
    %138 = tpu.matmul %3, %137, %cst_48 {dimension_numbers = #tpu.dot_dimension_numbers<[1], [0], [0], [1], [0, 0, 1, 1], [], []>} : vector<8x128xbf16>, vector<128x256xbf16>, vector<8x256xf32> -> vector<8x256xf32>
    %c0_49 = arith.constant 0 : index
    %c0_50 = arith.constant 0 : index
    %139 = vector.load %arg12[%c0_49, %c0_50] : memref<1x256xf32, #tpu.memory_space<vmem>>, vector<1x256xf32>
    %140 = vector.broadcast %139 : vector<1x256xf32> to vector<8x256xf32>
    %141 = arith.addf %138, %140 : vector<8x256xf32>
    %142 = vector.extract_strided_slice %141 {offsets = [0, 0], sizes = [8, 128], strides = [1, 1]} : vector<8x256xf32> to vector<8x128xf32>
    %143 = vector.extract_strided_slice %141 {offsets = [0, 128], sizes = [8, 128], strides = [1, 1]} : vector<8x256xf32> to vector<8x128xf32>
    %144 = vector.extract_strided_slice %136 {offsets = [0, 0], sizes = [8, 8], strides = [1, 1]} : vector<8x128xf32> to vector<8x8xf32>
    %145 = arith.truncf %144 : vector<8x8xf32> to vector<8x8xbf16>
    %146 = vector.extract_strided_slice %142 {offsets = [0, 0], sizes = [8, 8], strides = [1, 1]} : vector<8x128xf32> to vector<8x8xf32>
    %147 = arith.truncf %146 : vector<8x8xf32> to vector<8x8xbf16>
    %148 = vector.extract_strided_slice %143 {offsets = [0, 0], sizes = [8, 8], strides = [1, 1]} : vector<8x128xf32> to vector<8x8xf32>
    %149 = arith.truncf %148 : vector<8x8xf32> to vector<8x8xbf16>
    %cst_51 = arith.constant dense<0.000000e+00> : vector<8x8xf32>
    %150 = tpu.matmul %145, %147, %cst_51 {dimension_numbers = #tpu.dot_dimension_numbers<[1], [1], [0], [0], [0, 0, 1, 0], [], []>} : vector<8x8xbf16>, vector<8x8xbf16>, vector<8x8xf32> -> vector<8x8xf32>
    %cst_52 = arith.constant dense<0xFF800000> : vector<8xf32>
    %151 = vector.multi_reduction <maximumf>, %150, %cst_52 [1] : vector<8x8xf32> to vector<8xf32>
    %152 = vector.shape_cast %151 : vector<8xf32> to vector<8x1xf32>
    %153 = vector.broadcast %152 : vector<8x1xf32> to vector<8x8xf32>
    %154 = arith.subf %150, %153 : vector<8x8xf32>
    %155 = math.exp %154 : vector<8x8xf32>
    %cst_53 = arith.constant dense<0.000000e+00> : vector<8xf32>
    %156 = vector.multi_reduction <add>, %155, %cst_53 [1] : vector<8x8xf32> to vector<8xf32>
    %157 = vector.shape_cast %156 : vector<8xf32> to vector<8x1xf32>
    %158 = tpu.reciprocal %157 {approx = true} : vector<8x1xf32> -> vector<8x1xf32>
    %159 = vector.broadcast %158 : vector<8x1xf32> to vector<8x8xf32>
    %160 = arith.mulf %155, %159 : vector<8x8xf32>
    %161 = arith.truncf %160 : vector<8x8xf32> to vector<8x8xbf16>
    %cst_54 = arith.constant dense<0.000000e+00> : vector<8x8xf32>
    %162 = tpu.matmul %161, %149, %cst_54 {dimension_numbers = #tpu.dot_dimension_numbers<[1], [0], [0], [1], [0, 0, 1, 1], [], []>} : vector<8x8xbf16>, vector<8x8xbf16>, vector<8x8xf32> -> vector<8x8xf32>
    %163 = vector.extract_strided_slice %136 {offsets = [0, 8], sizes = [8, 8], strides = [1, 1]} : vector<8x128xf32> to vector<8x8xf32>
    %164 = arith.truncf %163 : vector<8x8xf32> to vector<8x8xbf16>
    %165 = vector.extract_strided_slice %142 {offsets = [0, 8], sizes = [8, 8], strides = [1, 1]} : vector<8x128xf32> to vector<8x8xf32>
    %166 = arith.truncf %165 : vector<8x8xf32> to vector<8x8xbf16>
    %167 = vector.extract_strided_slice %143 {offsets = [0, 8], sizes = [8, 8], strides = [1, 1]} : vector<8x128xf32> to vector<8x8xf32>
    %168 = arith.truncf %167 : vector<8x8xf32> to vector<8x8xbf16>
    %cst_55 = arith.constant dense<0.000000e+00> : vector<8x8xf32>
    %169 = tpu.matmul %164, %166, %cst_55 {dimension_numbers = #tpu.dot_dimension_numbers<[1], [1], [0], [0], [0, 0, 1, 0], [], []>} : vector<8x8xbf16>, vector<8x8xbf16>, vector<8x8xf32> -> vector<8x8xf32>
    %cst_56 = arith.constant dense<0xFF800000> : vector<8xf32>
    %170 = vector.multi_reduction <maximumf>, %169, %cst_56 [1] : vector<8x8xf32> to vector<8xf32>
    %171 = vector.shape_cast %170 : vector<8xf32> to vector<8x1xf32>
    %172 = vector.broadcast %171 : vector<8x1xf32> to vector<8x8xf32>
    %173 = arith.subf %169, %172 : vector<8x8xf32>
    %174 = math.exp %173 : vector<8x8xf32>
    %cst_57 = arith.constant dense<0.000000e+00> : vector<8xf32>
    %175 = vector.multi_reduction <add>, %174, %cst_57 [1] : vector<8x8xf32> to vector<8xf32>
    %176 = vector.shape_cast %175 : vector<8xf32> to vector<8x1xf32>
    %177 = tpu.reciprocal %176 {approx = true} : vector<8x1xf32> -> vector<8x1xf32>
    %178 = vector.broadcast %177 : vector<8x1xf32> to vector<8x8xf32>
    %179 = arith.mulf %174, %178 : vector<8x8xf32>
    %180 = arith.truncf %179 : vector<8x8xf32> to vector<8x8xbf16>
    %cst_58 = arith.constant dense<0.000000e+00> : vector<8x8xf32>
    %181 = tpu.matmul %180, %168, %cst_58 {dimension_numbers = #tpu.dot_dimension_numbers<[1], [0], [0], [1], [0, 0, 1, 1], [], []>} : vector<8x8xbf16>, vector<8x8xbf16>, vector<8x8xf32> -> vector<8x8xf32>
    %182 = vector.extract_strided_slice %136 {offsets = [0, 16], sizes = [8, 8], strides = [1, 1]} : vector<8x128xf32> to vector<8x8xf32>
    %183 = arith.truncf %182 : vector<8x8xf32> to vector<8x8xbf16>
    %184 = vector.extract_strided_slice %142 {offsets = [0, 16], sizes = [8, 8], strides = [1, 1]} : vector<8x128xf32> to vector<8x8xf32>
    %185 = arith.truncf %184 : vector<8x8xf32> to vector<8x8xbf16>
    %186 = vector.extract_strided_slice %143 {offsets = [0, 16], sizes = [8, 8], strides = [1, 1]} : vector<8x128xf32> to vector<8x8xf32>
    %187 = arith.truncf %186 : vector<8x8xf32> to vector<8x8xbf16>
    %cst_59 = arith.constant dense<0.000000e+00> : vector<8x8xf32>
    %188 = tpu.matmul %183, %185, %cst_59 {dimension_numbers = #tpu.dot_dimension_numbers<[1], [1], [0], [0], [0, 0, 1, 0], [], []>} : vector<8x8xbf16>, vector<8x8xbf16>, vector<8x8xf32> -> vector<8x8xf32>
    %cst_60 = arith.constant dense<0xFF800000> : vector<8xf32>
    %189 = vector.multi_reduction <maximumf>, %188, %cst_60 [1] : vector<8x8xf32> to vector<8xf32>
    %190 = vector.shape_cast %189 : vector<8xf32> to vector<8x1xf32>
    %191 = vector.broadcast %190 : vector<8x1xf32> to vector<8x8xf32>
    %192 = arith.subf %188, %191 : vector<8x8xf32>
    %193 = math.exp %192 : vector<8x8xf32>
    %cst_61 = arith.constant dense<0.000000e+00> : vector<8xf32>
    %194 = vector.multi_reduction <add>, %193, %cst_61 [1] : vector<8x8xf32> to vector<8xf32>
    %195 = vector.shape_cast %194 : vector<8xf32> to vector<8x1xf32>
    %196 = tpu.reciprocal %195 {approx = true} : vector<8x1xf32> -> vector<8x1xf32>
    %197 = vector.broadcast %196 : vector<8x1xf32> to vector<8x8xf32>
    %198 = arith.mulf %193, %197 : vector<8x8xf32>
    %199 = arith.truncf %198 : vector<8x8xf32> to vector<8x8xbf16>
    %cst_62 = arith.constant dense<0.000000e+00> : vector<8x8xf32>
    %200 = tpu.matmul %199, %187, %cst_62 {dimension_numbers = #tpu.dot_dimension_numbers<[1], [0], [0], [1], [0, 0, 1, 1], [], []>} : vector<8x8xbf16>, vector<8x8xbf16>, vector<8x8xf32> -> vector<8x8xf32>
    %201 = vector.extract_strided_slice %136 {offsets = [0, 24], sizes = [8, 8], strides = [1, 1]} : vector<8x128xf32> to vector<8x8xf32>
    %202 = arith.truncf %201 : vector<8x8xf32> to vector<8x8xbf16>
    %203 = vector.extract_strided_slice %142 {offsets = [0, 24], sizes = [8, 8], strides = [1, 1]} : vector<8x128xf32> to vector<8x8xf32>
    %204 = arith.truncf %203 : vector<8x8xf32> to vector<8x8xbf16>
    %205 = vector.extract_strided_slice %143 {offsets = [0, 24], sizes = [8, 8], strides = [1, 1]} : vector<8x128xf32> to vector<8x8xf32>
    %206 = arith.truncf %205 : vector<8x8xf32> to vector<8x8xbf16>
    %cst_63 = arith.constant dense<0.000000e+00> : vector<8x8xf32>
    %207 = tpu.matmul %202, %204, %cst_63 {dimension_numbers = #tpu.dot_dimension_numbers<[1], [1], [0], [0], [0, 0, 1, 0], [], []>} : vector<8x8xbf16>, vector<8x8xbf16>, vector<8x8xf32> -> vector<8x8xf32>
    %cst_64 = arith.constant dense<0xFF800000> : vector<8xf32>
    %208 = vector.multi_reduction <maximumf>, %207, %cst_64 [1] : vector<8x8xf32> to vector<8xf32>
    %209 = vector.shape_cast %208 : vector<8xf32> to vector<8x1xf32>
    %210 = vector.broadcast %209 : vector<8x1xf32> to vector<8x8xf32>
    %211 = arith.subf %207, %210 : vector<8x8xf32>
    %212 = math.exp %211 : vector<8x8xf32>
    %cst_65 = arith.constant dense<0.000000e+00> : vector<8xf32>
    %213 = vector.multi_reduction <add>, %212, %cst_65 [1] : vector<8x8xf32> to vector<8xf32>
    %214 = vector.shape_cast %213 : vector<8xf32> to vector<8x1xf32>
    %215 = tpu.reciprocal %214 {approx = true} : vector<8x1xf32> -> vector<8x1xf32>
    %216 = vector.broadcast %215 : vector<8x1xf32> to vector<8x8xf32>
    %217 = arith.mulf %212, %216 : vector<8x8xf32>
    %218 = arith.truncf %217 : vector<8x8xf32> to vector<8x8xbf16>
    %cst_66 = arith.constant dense<0.000000e+00> : vector<8x8xf32>
    %219 = tpu.matmul %218, %206, %cst_66 {dimension_numbers = #tpu.dot_dimension_numbers<[1], [0], [0], [1], [0, 0, 1, 1], [], []>} : vector<8x8xbf16>, vector<8x8xbf16>, vector<8x8xf32> -> vector<8x8xf32>
    %220 = tpu.concatenate %162, %181, %200, %219 in 1 : vector<8x8xf32>, vector<8x8xf32>, vector<8x8xf32>, vector<8x8xf32> -> vector<8x32xf32>
    %221 = arith.truncf %220 : vector<8x32xf32> to vector<8x32xbf16>
    %c0_67 = arith.constant 0 : index
    %c0_68 = arith.constant 0 : index
    %222 = vector.load %arg13[%c0_67, %c0_68] : memref<128x128xbf16, #tpu.memory_space<vmem>>, vector<32x128xbf16>
    %cst_69 = arith.constant dense<0.000000e+00> : vector<8x128xf32>
    %223 = tpu.matmul %221, %222, %cst_69 {dimension_numbers = #tpu.dot_dimension_numbers<[1], [0], [0], [1], [0, 0, 1, 1], [], []>} : vector<8x32xbf16>, vector<32x128xbf16>, vector<8x128xf32> -> vector<8x128xf32>
    %c0_70 = arith.constant 0 : index
    %c0_71 = arith.constant 0 : index
    %224 = vector.load %arg14[%c0_70, %c0_71] : memref<1x128xf32, #tpu.memory_space<vmem>>, vector<1x128xf32>
    %225 = vector.broadcast %224 : vector<1x128xf32> to vector<8x128xf32>
    %226 = arith.addf %223, %225 : vector<8x128xf32>
    %227 = arith.addf %130, %226 : vector<8x128xf32>
    %c0_72 = arith.constant 0 : index
    %c0_73 = arith.constant 0 : index
    %228 = vector.load %arg15[%c0_72, %c0_73] : memref<1x128xf32, #tpu.memory_space<vmem>>, vector<1x128xf32>
    %c0_74 = arith.constant 0 : index
    %c0_75 = arith.constant 0 : index
    %229 = vector.load %arg16[%c0_74, %c0_75] : memref<1x128xf32, #tpu.memory_space<vmem>>, vector<1x128xf32>
    %cst_76 = arith.constant dense<0.000000e+00> : vector<8xf32>
    %230 = vector.multi_reduction <add>, %227, %cst_76 [1] : vector<8x128xf32> to vector<8xf32>
    %231 = vector.shape_cast %230 : vector<8xf32> to vector<8x1xf32>
    %232 = arith.mulf %227, %227 : vector<8x128xf32>
    %cst_77 = arith.constant dense<0.000000e+00> : vector<8xf32>
    %233 = vector.multi_reduction <add>, %232, %cst_77 [1] : vector<8x128xf32> to vector<8xf32>
    %234 = vector.shape_cast %233 : vector<8xf32> to vector<8x1xf32>
    %cst_78 = arith.constant 3.200000e+01 : f32
    %235 = vector.broadcast %cst_78 : f32 to vector<8x1xf32>
    %236 = arith.divf %231, %235 : vector<8x1xf32>
    %cst_79 = arith.constant 3.200000e+01 : f32
    %237 = vector.broadcast %cst_79 : f32 to vector<8x1xf32>
    %238 = arith.divf %234, %237 : vector<8x1xf32>
    %239 = arith.mulf %236, %236 : vector<8x1xf32>
    %240 = arith.subf %238, %239 : vector<8x1xf32>
    %241 = vector.broadcast %236 : vector<8x1xf32> to vector<8x128xf32>
    %242 = arith.subf %227, %241 : vector<8x128xf32>
    %cst_80 = arith.constant 9.99999974E-6 : f32
    %243 = vector.broadcast %cst_80 : f32 to vector<8x1xf32>
    %244 = arith.addf %240, %243 : vector<8x1xf32>
    %245 = math.rsqrt %244 : vector<8x1xf32>
    %246 = vector.broadcast %245 : vector<8x1xf32> to vector<8x128xf32>
    %247 = arith.mulf %242, %246 : vector<8x128xf32>
    %248 = vector.broadcast %228 : vector<1x128xf32> to vector<8x128xf32>
    %249 = arith.mulf %247, %248 : vector<8x128xf32>
    %250 = vector.broadcast %229 : vector<1x128xf32> to vector<8x128xf32>
    %251 = arith.addf %249, %250 : vector<8x128xf32>
    %252 = arith.truncf %251 : vector<8x128xf32> to vector<8x128xbf16>
    %c0_81 = arith.constant 0 : index
    %c0_82 = arith.constant 0 : index
    %253 = vector.load %arg17[%c0_81, %c0_82] : memref<128x128xbf16, #tpu.memory_space<vmem>>, vector<128x128xbf16>
    %cst_83 = arith.constant dense<0.000000e+00> : vector<8x128xf32>
    %254 = tpu.matmul %252, %253, %cst_83 {dimension_numbers = #tpu.dot_dimension_numbers<[1], [0], [0], [1], [0, 0, 1, 1], [], []>} : vector<8x128xbf16>, vector<128x128xbf16>, vector<8x128xf32> -> vector<8x128xf32>
    %c0_84 = arith.constant 0 : index
    %c0_85 = arith.constant 0 : index
    %255 = vector.load %arg18[%c0_84, %c0_85] : memref<1x128xf32, #tpu.memory_space<vmem>>, vector<1x128xf32>
    %256 = vector.broadcast %255 : vector<1x128xf32> to vector<8x128xf32>
    %257 = arith.addf %254, %256 : vector<8x128xf32>
    %cst_86 = arith.constant 0.000000e+00 : f32
    %258 = vector.broadcast %cst_86 : f32 to vector<8x128xf32>
    %259 = arith.maximumf %257, %258 : vector<8x128xf32>
    %260 = arith.truncf %259 : vector<8x128xf32> to vector<8x128xbf16>
    %c0_87 = arith.constant 0 : index
    %c0_88 = arith.constant 0 : index
    %261 = vector.load %arg19[%c0_87, %c0_88] : memref<128x128xbf16, #tpu.memory_space<vmem>>, vector<128x128xbf16>
    %cst_89 = arith.constant dense<0.000000e+00> : vector<8x128xf32>
    %262 = tpu.matmul %260, %261, %cst_89 {dimension_numbers = #tpu.dot_dimension_numbers<[1], [0], [0], [1], [0, 0, 1, 1], [], []>} : vector<8x128xbf16>, vector<128x128xbf16>, vector<8x128xf32> -> vector<8x128xf32>
    %c0_90 = arith.constant 0 : index
    %c0_91 = arith.constant 0 : index
    %263 = vector.load %arg20[%c0_90, %c0_91] : memref<1x128xf32, #tpu.memory_space<vmem>>, vector<1x128xf32>
    %264 = vector.broadcast %263 : vector<1x128xf32> to vector<8x128xf32>
    %265 = arith.addf %262, %264 : vector<8x128xf32>
    %266 = arith.addf %251, %265 : vector<8x128xf32>
    %c0_92 = arith.constant 0 : index
    %c0_93 = arith.constant 0 : index
    %267 = vector.load %arg21[%c0_92, %c0_93] : memref<1x128xf32, #tpu.memory_space<vmem>>, vector<1x128xf32>
    %c0_94 = arith.constant 0 : index
    %c0_95 = arith.constant 0 : index
    %268 = vector.load %arg22[%c0_94, %c0_95] : memref<1x128xf32, #tpu.memory_space<vmem>>, vector<1x128xf32>
    %cst_96 = arith.constant dense<0.000000e+00> : vector<8xf32>
    %269 = vector.multi_reduction <add>, %266, %cst_96 [1] : vector<8x128xf32> to vector<8xf32>
    %270 = vector.shape_cast %269 : vector<8xf32> to vector<8x1xf32>
    %271 = arith.mulf %266, %266 : vector<8x128xf32>
    %cst_97 = arith.constant dense<0.000000e+00> : vector<8xf32>
    %272 = vector.multi_reduction <add>, %271, %cst_97 [1] : vector<8x128xf32> to vector<8xf32>
    %273 = vector.shape_cast %272 : vector<8xf32> to vector<8x1xf32>
    %cst_98 = arith.constant 3.200000e+01 : f32
    %274 = vector.broadcast %cst_98 : f32 to vector<8x1xf32>
    %275 = arith.divf %270, %274 : vector<8x1xf32>
    %cst_99 = arith.constant 3.200000e+01 : f32
    %276 = vector.broadcast %cst_99 : f32 to vector<8x1xf32>
    %277 = arith.divf %273, %276 : vector<8x1xf32>
    %278 = arith.mulf %275, %275 : vector<8x1xf32>
    %279 = arith.subf %277, %278 : vector<8x1xf32>
    %280 = vector.broadcast %275 : vector<8x1xf32> to vector<8x128xf32>
    %281 = arith.subf %266, %280 : vector<8x128xf32>
    %cst_100 = arith.constant 9.99999974E-6 : f32
    %282 = vector.broadcast %cst_100 : f32 to vector<8x1xf32>
    %283 = arith.addf %279, %282 : vector<8x1xf32>
    %284 = math.rsqrt %283 : vector<8x1xf32>
    %285 = vector.broadcast %284 : vector<8x1xf32> to vector<8x128xf32>
    %286 = arith.mulf %281, %285 : vector<8x128xf32>
    %287 = vector.broadcast %267 : vector<1x128xf32> to vector<8x128xf32>
    %288 = arith.mulf %286, %287 : vector<8x128xf32>
    %289 = vector.broadcast %268 : vector<1x128xf32> to vector<8x128xf32>
    %290 = arith.addf %288, %289 : vector<8x128xf32>
    %291 = arith.truncf %290 : vector<8x128xf32> to vector<8x128xbf16>
    %c0_101 = arith.constant 0 : index
    %c0_102 = arith.constant 0 : index
    %c0_103 = arith.constant 0 : index
    %292 = vector.load %arg23[%c0_101, %c0_102, %c0_103] : memref<1x8x128xbf16, #tpu.memory_space<vmem>>, vector<1x8x128xbf16>
    %293 = vector.shape_cast %292 : vector<1x8x128xbf16> to vector<8x128xbf16>
    %294 = vector.shape_cast %291 : vector<8x128xbf16> to vector<1x8x128xbf16>
    tpu.vector_store %arg23[%c0_101, %c0_102, %c0_103], %294 {strides = array<i32>} : memref<1x8x128xbf16, #tpu.memory_space<vmem>>, vector<1x8x128xbf16>,
    return
  }
  func.func @transform_0(%arg0: i32) -> (i32, i32, i32) {
    %c0_i32 = arith.constant 0 : i32
    %c0_i32_0 = arith.constant 0 : i32
    %c0_i32_1 = arith.constant 0 : i32
    return %arg0, %c0_i32, %c0_i32_0 : i32, i32, i32
  }
  func.func @transform_1(%arg0: i32) -> (i32, i32, i32) {
    %c0_i32 = arith.constant 0 : i32
    %c0_i32_0 = arith.constant 0 : i32
    %c0_i32_1 = arith.constant 0 : i32
    return %arg0, %c0_i32, %c0_i32_0 : i32, i32, i32
  }
  func.func @transform_2(%arg0: i32) -> (i32, i32) {
    %c0_i32 = arith.constant 0 : i32
    %c0_i32_0 = arith.constant 0 : i32
    %c0_i32_1 = arith.constant 0 : i32
    return %c0_i32, %c0_i32_0 : i32, i32
  }
  func.func @transform_3(%arg0: i32) -> (i32, i32) {
    %c0_i32 = arith.constant 0 : i32
    %c0_i32_0 = arith.constant 0 : i32
    %c0_i32_1 = arith.constant 0 : i32
    return %c0_i32, %c0_i32_0 : i32, i32
  }
  func.func @transform_4(%arg0: i32) -> (i32, i32) {
    %c0_i32 = arith.constant 0 : i32
    %c0_i32_0 = arith.constant 0 : i32
    %c0_i32_1 = arith.constant 0 : i32
    return %c0_i32, %c0_i32_0 : i32, i32
  }
  func.func @transform_5(%arg0: i32) -> (i32, i32) {
    %c0_i32 = arith.constant 0 : i32
    %c0_i32_0 = arith.constant 0 : i32
    %c0_i32_1 = arith.constant 0 : i32
    return %c0_i32, %c0_i32_0 : i32, i32
  }
  func.func @transform_6(%arg0: i32) -> (i32, i32) {
    %c0_i32 = arith.constant 0 : i32
    %c0_i32_0 = arith.constant 0 : i32
    %c0_i32_1 = arith.constant 0 : i32
    return %c0_i32, %c0_i32_0 : i32, i32
  }
  func.func @transform_7(%arg0: i32) -> (i32, i32) {
    %c0_i32 = arith.constant 0 : i32
    %c0_i32_0 = arith.constant 0 : i32
    %c0_i32_1 = arith.constant 0 : i32
    return %c0_i32, %c0_i32_0 : i32, i32
  }
  func.func @transform_8(%arg0: i32) -> (i32, i32) {
    %c0_i32 = arith.constant 0 : i32
    %c0_i32_0 = arith.constant 0 : i32
    %c0_i32_1 = arith.constant 0 : i32
    return %c0_i32, %c0_i32_0 : i32, i32
  }
  func.func @transform_9(%arg0: i32) -> (i32, i32) {
    %c0_i32 = arith.constant 0 : i32
    %c0_i32_0 = arith.constant 0 : i32
    %c0_i32_1 = arith.constant 0 : i32
    return %c0_i32, %c0_i32_0 : i32, i32
  }
  func.func @transform_10(%arg0: i32) -> (i32, i32) {
    %c0_i32 = arith.constant 0 : i32
    %c0_i32_0 = arith.constant 0 : i32
    %c0_i32_1 = arith.constant 0 : i32
    return %c0_i32, %c0_i32_0 : i32, i32
  }
  func.func @transform_11(%arg0: i32) -> (i32, i32) {
    %c0_i32 = arith.constant 0 : i32
    %c0_i32_0 = arith.constant 0 : i32
    %c0_i32_1 = arith.constant 0 : i32
    return %c0_i32, %c0_i32_0 : i32, i32
  }
  func.func @transform_12(%arg0: i32) -> (i32, i32) {
    %c0_i32 = arith.constant 0 : i32
    %c0_i32_0 = arith.constant 0 : i32
    %c0_i32_1 = arith.constant 0 : i32
    return %c0_i32, %c0_i32_0 : i32, i32
  }
  func.func @transform_13(%arg0: i32) -> (i32, i32) {
    %c0_i32 = arith.constant 0 : i32
    %c0_i32_0 = arith.constant 0 : i32
    %c0_i32_1 = arith.constant 0 : i32
    return %c0_i32, %c0_i32_0 : i32, i32
  }
  func.func @transform_14(%arg0: i32) -> (i32, i32) {
    %c0_i32 = arith.constant 0 : i32
    %c0_i32_0 = arith.constant 0 : i32
    %c0_i32_1 = arith.constant 0 : i32
    return %c0_i32, %c0_i32_0 : i32, i32
  }
  func.func @transform_15(%arg0: i32) -> (i32, i32) {
    %c0_i32 = arith.constant 0 : i32
    %c0_i32_0 = arith.constant 0 : i32
    %c0_i32_1 = arith.constant 0 : i32
    return %c0_i32, %c0_i32_0 : i32, i32
  }
  func.func @transform_16(%arg0: i32) -> (i32, i32) {
    %c0_i32 = arith.constant 0 : i32
    %c0_i32_0 = arith.constant 0 : i32
    %c0_i32_1 = arith.constant 0 : i32
    return %c0_i32, %c0_i32_0 : i32, i32
  }
  func.func @transform_17(%arg0: i32) -> (i32, i32) {
    %c0_i32 = arith.constant 0 : i32
    %c0_i32_0 = arith.constant 0 : i32
    %c0_i32_1 = arith.constant 0 : i32
    return %c0_i32, %c0_i32_0 : i32, i32
  }
  func.func @transform_18(%arg0: i32) -> (i32, i32) {
    %c0_i32 = arith.constant 0 : i32
    %c0_i32_0 = arith.constant 0 : i32
    %c0_i32_1 = arith.constant 0 : i32
    return %c0_i32, %c0_i32_0 : i32, i32
  }
  func.func @transform_19(%arg0: i32) -> (i32, i32) {
    %c0_i32 = arith.constant 0 : i32
    %c0_i32_0 = arith.constant 0 : i32
    %c0_i32_1 = arith.constant 0 : i32
    return %c0_i32, %c0_i32_0 : i32, i32
  }
  func.func @transform_20(%arg0: i32) -> (i32, i32) {
    %c0_i32 = arith.constant 0 : i32
    %c0_i32_0 = arith.constant 0 : i32
    %c0_i32_1 = arith.constant 0 : i32
    return %c0_i32, %c0_i32_0 : i32, i32
  }
  func.func @transform_21(%arg0: i32) -> (i32, i32) {
    %c0_i32 = arith.constant 0 : i32
    %c0_i32_0 = arith.constant 0 : i32
    %c0_i32_1 = arith.constant 0 : i32
    return %c0_i32, %c0_i32_0 : i32, i32
  }
  func.func @transform_22(%arg0: i32) -> (i32, i32, i32) {
    %c0_i32 = arith.constant 0 : i32
    %c0_i32_0 = arith.constant 0 : i32
    %c0_i32_1 = arith.constant 0 : i32
    return %arg0, %c0_i32, %c0_i32_0 : i32, i32, i32
  }
}

module attributes {stable_mosaic.version = 11 : i64} {
  func.func @_encoder_layer_kernel(%arg0: i32, %arg1: memref<1x8x128xbf16, #tpu.memory_space<vmem>>, %arg2: memref<128x384xbf16, #tpu.memory_space<vmem>>, %arg3: memref<1x384xf32, #tpu.memory_space<vmem>>, %arg4: memref<128x128xbf16, #tpu.memory_space<vmem>>, %arg5: memref<1x128xf32, #tpu.memory_space<vmem>>, %arg6: memref<1x128xf32, #tpu.memory_space<vmem>>, %arg7: memref<1x128xf32, #tpu.memory_space<vmem>>, %arg8: memref<128x128xbf16, #tpu.memory_space<vmem>>, %arg9: memref<1x128xf32, #tpu.memory_space<vmem>>, %arg10: memref<128x128xbf16, #tpu.memory_space<vmem>>, %arg11: memref<1x128xf32, #tpu.memory_space<vmem>>, %arg12: memref<1x128xf32, #tpu.memory_space<vmem>>, %arg13: memref<1x128xf32, #tpu.memory_space<vmem>>, %arg14: memref<1x8x128xbf16, #tpu.memory_space<vmem>>) attributes {dimension_semantics = [#tpu.dimension_semantics<parallel>], iteration_bounds = array<i64: 2>, scalar_prefetch = 0 : i64, scratch_operands = 0 : i64, tpu.core_type = #tpu.core_type<tc>, window_params = [{transform_indices = @transform_0, window_bounds = array<i64: 1, 8, 128>}, {pipeline_mode = #tpu.pipeline_mode<synchronous>, transform_indices = @transform_1, window_bounds = array<i64: 128, 384>}, {pipeline_mode = #tpu.pipeline_mode<synchronous>, transform_indices = @transform_2, window_bounds = array<i64: 1, 384>}, {pipeline_mode = #tpu.pipeline_mode<synchronous>, transform_indices = @transform_3, window_bounds = array<i64: 128, 128>}, {pipeline_mode = #tpu.pipeline_mode<synchronous>, transform_indices = @transform_4, window_bounds = array<i64: 1, 128>}, {pipeline_mode = #tpu.pipeline_mode<synchronous>, transform_indices = @transform_5, window_bounds = array<i64: 1, 128>}, {pipeline_mode = #tpu.pipeline_mode<synchronous>, transform_indices = @transform_6, window_bounds = array<i64: 1, 128>}, {pipeline_mode = #tpu.pipeline_mode<synchronous>, transform_indices = @transform_7, window_bounds = array<i64: 128, 128>}, {pipeline_mode = #tpu.pipeline_mode<synchronous>, transform_indices = @transform_8, window_bounds = array<i64: 1, 128>}, {pipeline_mode = #tpu.pipeline_mode<synchronous>, transform_indices = @transform_9, window_bounds = array<i64: 128, 128>}, {pipeline_mode = #tpu.pipeline_mode<synchronous>, transform_indices = @transform_10, window_bounds = array<i64: 1, 128>}, {pipeline_mode = #tpu.pipeline_mode<synchronous>, transform_indices = @transform_11, window_bounds = array<i64: 1, 128>}, {pipeline_mode = #tpu.pipeline_mode<synchronous>, transform_indices = @transform_12, window_bounds = array<i64: 1, 128>}, {transform_indices = @transform_13, window_bounds = array<i64: 1, 8, 128>}]} {
    %c0 = arith.constant 0 : index
    %c0_0 = arith.constant 0 : index
    %c0_1 = arith.constant 0 : index
    %0 = vector.load %arg1[%c0, %c0_0, %c0_1] : memref<1x8x128xbf16, #tpu.memory_space<vmem>>, vector<1x8x128xbf16>
    %1 = vector.shape_cast %0 : vector<1x8x128xbf16> to vector<8x128xbf16>
    %2 = arith.extf %1 : vector<8x128xbf16> to vector<8x128xf32>
    %c0_2 = arith.constant 0 : index
    %c0_3 = arith.constant 0 : index
    %3 = vector.load %arg2[%c0_2, %c0_3] : memref<128x384xbf16, #tpu.memory_space<vmem>>, vector<128x384xbf16>
    %cst = arith.constant dense<0.000000e+00> : vector<8x384xf32>
    %4 = tpu.matmul %1, %3, %cst {dimension_numbers = #tpu.dot_dimension_numbers<[1], [0], [0], [1], [0, 0, 1, 1], [], []>} : vector<8x128xbf16>, vector<128x384xbf16>, vector<8x384xf32> -> vector<8x384xf32>
    %c0_4 = arith.constant 0 : index
    %c0_5 = arith.constant 0 : index
    %5 = vector.load %arg3[%c0_4, %c0_5] : memref<1x384xf32, #tpu.memory_space<vmem>>, vector<1x384xf32>
    %6 = vector.broadcast %5 : vector<1x384xf32> to vector<8x384xf32>
    %7 = arith.addf %4, %6 : vector<8x384xf32>
    %8 = vector.extract_strided_slice %7 {offsets = [0, 0], sizes = [8, 128], strides = [1, 1]} : vector<8x384xf32> to vector<8x128xf32>
    %9 = vector.extract_strided_slice %7 {offsets = [0, 128], sizes = [8, 128], strides = [1, 1]} : vector<8x384xf32> to vector<8x128xf32>
    %10 = vector.extract_strided_slice %7 {offsets = [0, 256], sizes = [8, 128], strides = [1, 1]} : vector<8x384xf32> to vector<8x128xf32>
    %11 = vector.extract_strided_slice %8 {offsets = [0, 0], sizes = [8, 8], strides = [1, 1]} : vector<8x128xf32> to vector<8x8xf32>
    %12 = arith.truncf %11 : vector<8x8xf32> to vector<8x8xbf16>
    %13 = vector.extract_strided_slice %9 {offsets = [0, 0], sizes = [8, 8], strides = [1, 1]} : vector<8x128xf32> to vector<8x8xf32>
    %14 = arith.truncf %13 : vector<8x8xf32> to vector<8x8xbf16>
    %15 = vector.extract_strided_slice %10 {offsets = [0, 0], sizes = [8, 8], strides = [1, 1]} : vector<8x128xf32> to vector<8x8xf32>
    %16 = arith.truncf %15 : vector<8x8xf32> to vector<8x8xbf16>
    %cst_6 = arith.constant dense<0.000000e+00> : vector<8x8xf32>
    %17 = tpu.matmul %12, %14, %cst_6 {dimension_numbers = #tpu.dot_dimension_numbers<[1], [1], [0], [0], [0, 0, 1, 0], [], []>} : vector<8x8xbf16>, vector<8x8xbf16>, vector<8x8xf32> -> vector<8x8xf32>
    %cst_7 = arith.constant dense<0xFF800000> : vector<8xf32>
    %18 = vector.multi_reduction <maximumf>, %17, %cst_7 [1] : vector<8x8xf32> to vector<8xf32>
    %19 = vector.shape_cast %18 : vector<8xf32> to vector<8x1xf32>
    %20 = vector.broadcast %19 : vector<8x1xf32> to vector<8x8xf32>
    %21 = arith.subf %17, %20 : vector<8x8xf32>
    %22 = math.exp %21 : vector<8x8xf32>
    %cst_8 = arith.constant dense<0.000000e+00> : vector<8xf32>
    %23 = vector.multi_reduction <add>, %22, %cst_8 [1] : vector<8x8xf32> to vector<8xf32>
    %24 = vector.shape_cast %23 : vector<8xf32> to vector<8x1xf32>
    %25 = tpu.reciprocal %24 {approx = true} : vector<8x1xf32> -> vector<8x1xf32>
    %26 = vector.broadcast %25 : vector<8x1xf32> to vector<8x8xf32>
    %27 = arith.mulf %22, %26 : vector<8x8xf32>
    %28 = arith.truncf %27 : vector<8x8xf32> to vector<8x8xbf16>
    %cst_9 = arith.constant dense<0.000000e+00> : vector<8x8xf32>
    %29 = tpu.matmul %28, %16, %cst_9 {dimension_numbers = #tpu.dot_dimension_numbers<[1], [0], [0], [1], [0, 0, 1, 1], [], []>} : vector<8x8xbf16>, vector<8x8xbf16>, vector<8x8xf32> -> vector<8x8xf32>
    %30 = vector.extract_strided_slice %8 {offsets = [0, 8], sizes = [8, 8], strides = [1, 1]} : vector<8x128xf32> to vector<8x8xf32>
    %31 = arith.truncf %30 : vector<8x8xf32> to vector<8x8xbf16>
    %32 = vector.extract_strided_slice %9 {offsets = [0, 8], sizes = [8, 8], strides = [1, 1]} : vector<8x128xf32> to vector<8x8xf32>
    %33 = arith.truncf %32 : vector<8x8xf32> to vector<8x8xbf16>
    %34 = vector.extract_strided_slice %10 {offsets = [0, 8], sizes = [8, 8], strides = [1, 1]} : vector<8x128xf32> to vector<8x8xf32>
    %35 = arith.truncf %34 : vector<8x8xf32> to vector<8x8xbf16>
    %cst_10 = arith.constant dense<0.000000e+00> : vector<8x8xf32>
    %36 = tpu.matmul %31, %33, %cst_10 {dimension_numbers = #tpu.dot_dimension_numbers<[1], [1], [0], [0], [0, 0, 1, 0], [], []>} : vector<8x8xbf16>, vector<8x8xbf16>, vector<8x8xf32> -> vector<8x8xf32>
    %cst_11 = arith.constant dense<0xFF800000> : vector<8xf32>
    %37 = vector.multi_reduction <maximumf>, %36, %cst_11 [1] : vector<8x8xf32> to vector<8xf32>
    %38 = vector.shape_cast %37 : vector<8xf32> to vector<8x1xf32>
    %39 = vector.broadcast %38 : vector<8x1xf32> to vector<8x8xf32>
    %40 = arith.subf %36, %39 : vector<8x8xf32>
    %41 = math.exp %40 : vector<8x8xf32>
    %cst_12 = arith.constant dense<0.000000e+00> : vector<8xf32>
    %42 = vector.multi_reduction <add>, %41, %cst_12 [1] : vector<8x8xf32> to vector<8xf32>
    %43 = vector.shape_cast %42 : vector<8xf32> to vector<8x1xf32>
    %44 = tpu.reciprocal %43 {approx = true} : vector<8x1xf32> -> vector<8x1xf32>
    %45 = vector.broadcast %44 : vector<8x1xf32> to vector<8x8xf32>
    %46 = arith.mulf %41, %45 : vector<8x8xf32>
    %47 = arith.truncf %46 : vector<8x8xf32> to vector<8x8xbf16>
    %cst_13 = arith.constant dense<0.000000e+00> : vector<8x8xf32>
    %48 = tpu.matmul %47, %35, %cst_13 {dimension_numbers = #tpu.dot_dimension_numbers<[1], [0], [0], [1], [0, 0, 1, 1], [], []>} : vector<8x8xbf16>, vector<8x8xbf16>, vector<8x8xf32> -> vector<8x8xf32>
    %49 = vector.extract_strided_slice %8 {offsets = [0, 16], sizes = [8, 8], strides = [1, 1]} : vector<8x128xf32> to vector<8x8xf32>
    %50 = arith.truncf %49 : vector<8x8xf32> to vector<8x8xbf16>
    %51 = vector.extract_strided_slice %9 {offsets = [0, 16], sizes = [8, 8], strides = [1, 1]} : vector<8x128xf32> to vector<8x8xf32>
    %52 = arith.truncf %51 : vector<8x8xf32> to vector<8x8xbf16>
    %53 = vector.extract_strided_slice %10 {offsets = [0, 16], sizes = [8, 8], strides = [1, 1]} : vector<8x128xf32> to vector<8x8xf32>
    %54 = arith.truncf %53 : vector<8x8xf32> to vector<8x8xbf16>
    %cst_14 = arith.constant dense<0.000000e+00> : vector<8x8xf32>
    %55 = tpu.matmul %50, %52, %cst_14 {dimension_numbers = #tpu.dot_dimension_numbers<[1], [1], [0], [0], [0, 0, 1, 0], [], []>} : vector<8x8xbf16>, vector<8x8xbf16>, vector<8x8xf32> -> vector<8x8xf32>
    %cst_15 = arith.constant dense<0xFF800000> : vector<8xf32>
    %56 = vector.multi_reduction <maximumf>, %55, %cst_15 [1] : vector<8x8xf32> to vector<8xf32>
    %57 = vector.shape_cast %56 : vector<8xf32> to vector<8x1xf32>
    %58 = vector.broadcast %57 : vector<8x1xf32> to vector<8x8xf32>
    %59 = arith.subf %55, %58 : vector<8x8xf32>
    %60 = math.exp %59 : vector<8x8xf32>
    %cst_16 = arith.constant dense<0.000000e+00> : vector<8xf32>
    %61 = vector.multi_reduction <add>, %60, %cst_16 [1] : vector<8x8xf32> to vector<8xf32>
    %62 = vector.shape_cast %61 : vector<8xf32> to vector<8x1xf32>
    %63 = tpu.reciprocal %62 {approx = true} : vector<8x1xf32> -> vector<8x1xf32>
    %64 = vector.broadcast %63 : vector<8x1xf32> to vector<8x8xf32>
    %65 = arith.mulf %60, %64 : vector<8x8xf32>
    %66 = arith.truncf %65 : vector<8x8xf32> to vector<8x8xbf16>
    %cst_17 = arith.constant dense<0.000000e+00> : vector<8x8xf32>
    %67 = tpu.matmul %66, %54, %cst_17 {dimension_numbers = #tpu.dot_dimension_numbers<[1], [0], [0], [1], [0, 0, 1, 1], [], []>} : vector<8x8xbf16>, vector<8x8xbf16>, vector<8x8xf32> -> vector<8x8xf32>
    %68 = vector.extract_strided_slice %8 {offsets = [0, 24], sizes = [8, 8], strides = [1, 1]} : vector<8x128xf32> to vector<8x8xf32>
    %69 = arith.truncf %68 : vector<8x8xf32> to vector<8x8xbf16>
    %70 = vector.extract_strided_slice %9 {offsets = [0, 24], sizes = [8, 8], strides = [1, 1]} : vector<8x128xf32> to vector<8x8xf32>
    %71 = arith.truncf %70 : vector<8x8xf32> to vector<8x8xbf16>
    %72 = vector.extract_strided_slice %10 {offsets = [0, 24], sizes = [8, 8], strides = [1, 1]} : vector<8x128xf32> to vector<8x8xf32>
    %73 = arith.truncf %72 : vector<8x8xf32> to vector<8x8xbf16>
    %cst_18 = arith.constant dense<0.000000e+00> : vector<8x8xf32>
    %74 = tpu.matmul %69, %71, %cst_18 {dimension_numbers = #tpu.dot_dimension_numbers<[1], [1], [0], [0], [0, 0, 1, 0], [], []>} : vector<8x8xbf16>, vector<8x8xbf16>, vector<8x8xf32> -> vector<8x8xf32>
    %cst_19 = arith.constant dense<0xFF800000> : vector<8xf32>
    %75 = vector.multi_reduction <maximumf>, %74, %cst_19 [1] : vector<8x8xf32> to vector<8xf32>
    %76 = vector.shape_cast %75 : vector<8xf32> to vector<8x1xf32>
    %77 = vector.broadcast %76 : vector<8x1xf32> to vector<8x8xf32>
    %78 = arith.subf %74, %77 : vector<8x8xf32>
    %79 = math.exp %78 : vector<8x8xf32>
    %cst_20 = arith.constant dense<0.000000e+00> : vector<8xf32>
    %80 = vector.multi_reduction <add>, %79, %cst_20 [1] : vector<8x8xf32> to vector<8xf32>
    %81 = vector.shape_cast %80 : vector<8xf32> to vector<8x1xf32>
    %82 = tpu.reciprocal %81 {approx = true} : vector<8x1xf32> -> vector<8x1xf32>
    %83 = vector.broadcast %82 : vector<8x1xf32> to vector<8x8xf32>
    %84 = arith.mulf %79, %83 : vector<8x8xf32>
    %85 = arith.truncf %84 : vector<8x8xf32> to vector<8x8xbf16>
    %cst_21 = arith.constant dense<0.000000e+00> : vector<8x8xf32>
    %86 = tpu.matmul %85, %73, %cst_21 {dimension_numbers = #tpu.dot_dimension_numbers<[1], [0], [0], [1], [0, 0, 1, 1], [], []>} : vector<8x8xbf16>, vector<8x8xbf16>, vector<8x8xf32> -> vector<8x8xf32>
    %87 = tpu.concatenate %29, %48, %67, %86 in 1 : vector<8x8xf32>, vector<8x8xf32>, vector<8x8xf32>, vector<8x8xf32> -> vector<8x32xf32>
    %88 = arith.truncf %87 : vector<8x32xf32> to vector<8x32xbf16>
    %c0_22 = arith.constant 0 : index
    %c0_23 = arith.constant 0 : index
    %89 = vector.load %arg4[%c0_22, %c0_23] : memref<128x128xbf16, #tpu.memory_space<vmem>>, vector<32x128xbf16>
    %cst_24 = arith.constant dense<0.000000e+00> : vector<8x128xf32>
    %90 = tpu.matmul %88, %89, %cst_24 {dimension_numbers = #tpu.dot_dimension_numbers<[1], [0], [0], [1], [0, 0, 1, 1], [], []>} : vector<8x32xbf16>, vector<32x128xbf16>, vector<8x128xf32> -> vector<8x128xf32>
    %c0_25 = arith.constant 0 : index
    %c0_26 = arith.constant 0 : index
    %91 = vector.load %arg5[%c0_25, %c0_26] : memref<1x128xf32, #tpu.memory_space<vmem>>, vector<1x128xf32>
    %92 = vector.broadcast %91 : vector<1x128xf32> to vector<8x128xf32>
    %93 = arith.addf %90, %92 : vector<8x128xf32>
    %94 = arith.addf %2, %93 : vector<8x128xf32>
    %c0_27 = arith.constant 0 : index
    %c0_28 = arith.constant 0 : index
    %95 = vector.load %arg6[%c0_27, %c0_28] : memref<1x128xf32, #tpu.memory_space<vmem>>, vector<1x128xf32>
    %c0_29 = arith.constant 0 : index
    %c0_30 = arith.constant 0 : index
    %96 = vector.load %arg7[%c0_29, %c0_30] : memref<1x128xf32, #tpu.memory_space<vmem>>, vector<1x128xf32>
    %cst_31 = arith.constant dense<0.000000e+00> : vector<8xf32>
    %97 = vector.multi_reduction <add>, %94, %cst_31 [1] : vector<8x128xf32> to vector<8xf32>
    %98 = vector.shape_cast %97 : vector<8xf32> to vector<8x1xf32>
    %99 = arith.mulf %94, %94 : vector<8x128xf32>
    %cst_32 = arith.constant dense<0.000000e+00> : vector<8xf32>
    %100 = vector.multi_reduction <add>, %99, %cst_32 [1] : vector<8x128xf32> to vector<8xf32>
    %101 = vector.shape_cast %100 : vector<8xf32> to vector<8x1xf32>
    %cst_33 = arith.constant 3.200000e+01 : f32
    %102 = vector.broadcast %cst_33 : f32 to vector<8x1xf32>
    %103 = arith.divf %98, %102 : vector<8x1xf32>
    %cst_34 = arith.constant 3.200000e+01 : f32
    %104 = vector.broadcast %cst_34 : f32 to vector<8x1xf32>
    %105 = arith.divf %101, %104 : vector<8x1xf32>
    %106 = arith.mulf %103, %103 : vector<8x1xf32>
    %107 = arith.subf %105, %106 : vector<8x1xf32>
    %108 = vector.broadcast %103 : vector<8x1xf32> to vector<8x128xf32>
    %109 = arith.subf %94, %108 : vector<8x128xf32>
    %cst_35 = arith.constant 9.99999974E-6 : f32
    %110 = vector.broadcast %cst_35 : f32 to vector<8x1xf32>
    %111 = arith.addf %107, %110 : vector<8x1xf32>
    %112 = math.rsqrt %111 : vector<8x1xf32>
    %113 = vector.broadcast %112 : vector<8x1xf32> to vector<8x128xf32>
    %114 = arith.mulf %109, %113 : vector<8x128xf32>
    %115 = vector.broadcast %95 : vector<1x128xf32> to vector<8x128xf32>
    %116 = arith.mulf %114, %115 : vector<8x128xf32>
    %117 = vector.broadcast %96 : vector<1x128xf32> to vector<8x128xf32>
    %118 = arith.addf %116, %117 : vector<8x128xf32>
    %119 = arith.truncf %118 : vector<8x128xf32> to vector<8x128xbf16>
    %c0_36 = arith.constant 0 : index
    %c0_37 = arith.constant 0 : index
    %120 = vector.load %arg8[%c0_36, %c0_37] : memref<128x128xbf16, #tpu.memory_space<vmem>>, vector<128x128xbf16>
    %cst_38 = arith.constant dense<0.000000e+00> : vector<8x128xf32>
    %121 = tpu.matmul %119, %120, %cst_38 {dimension_numbers = #tpu.dot_dimension_numbers<[1], [0], [0], [1], [0, 0, 1, 1], [], []>} : vector<8x128xbf16>, vector<128x128xbf16>, vector<8x128xf32> -> vector<8x128xf32>
    %c0_39 = arith.constant 0 : index
    %c0_40 = arith.constant 0 : index
    %122 = vector.load %arg9[%c0_39, %c0_40] : memref<1x128xf32, #tpu.memory_space<vmem>>, vector<1x128xf32>
    %123 = vector.broadcast %122 : vector<1x128xf32> to vector<8x128xf32>
    %124 = arith.addf %121, %123 : vector<8x128xf32>
    %cst_41 = arith.constant 0.000000e+00 : f32
    %125 = vector.broadcast %cst_41 : f32 to vector<8x128xf32>
    %126 = arith.maximumf %124, %125 : vector<8x128xf32>
    %127 = arith.truncf %126 : vector<8x128xf32> to vector<8x128xbf16>
    %c0_42 = arith.constant 0 : index
    %c0_43 = arith.constant 0 : index
    %128 = vector.load %arg10[%c0_42, %c0_43] : memref<128x128xbf16, #tpu.memory_space<vmem>>, vector<128x128xbf16>
    %cst_44 = arith.constant dense<0.000000e+00> : vector<8x128xf32>
    %129 = tpu.matmul %127, %128, %cst_44 {dimension_numbers = #tpu.dot_dimension_numbers<[1], [0], [0], [1], [0, 0, 1, 1], [], []>} : vector<8x128xbf16>, vector<128x128xbf16>, vector<8x128xf32> -> vector<8x128xf32>
    %c0_45 = arith.constant 0 : index
    %c0_46 = arith.constant 0 : index
    %130 = vector.load %arg11[%c0_45, %c0_46] : memref<1x128xf32, #tpu.memory_space<vmem>>, vector<1x128xf32>
    %131 = vector.broadcast %130 : vector<1x128xf32> to vector<8x128xf32>
    %132 = arith.addf %129, %131 : vector<8x128xf32>
    %133 = arith.addf %118, %132 : vector<8x128xf32>
    %c0_47 = arith.constant 0 : index
    %c0_48 = arith.constant 0 : index
    %134 = vector.load %arg12[%c0_47, %c0_48] : memref<1x128xf32, #tpu.memory_space<vmem>>, vector<1x128xf32>
    %c0_49 = arith.constant 0 : index
    %c0_50 = arith.constant 0 : index
    %135 = vector.load %arg13[%c0_49, %c0_50] : memref<1x128xf32, #tpu.memory_space<vmem>>, vector<1x128xf32>
    %cst_51 = arith.constant dense<0.000000e+00> : vector<8xf32>
    %136 = vector.multi_reduction <add>, %133, %cst_51 [1] : vector<8x128xf32> to vector<8xf32>
    %137 = vector.shape_cast %136 : vector<8xf32> to vector<8x1xf32>
    %138 = arith.mulf %133, %133 : vector<8x128xf32>
    %cst_52 = arith.constant dense<0.000000e+00> : vector<8xf32>
    %139 = vector.multi_reduction <add>, %138, %cst_52 [1] : vector<8x128xf32> to vector<8xf32>
    %140 = vector.shape_cast %139 : vector<8xf32> to vector<8x1xf32>
    %cst_53 = arith.constant 3.200000e+01 : f32
    %141 = vector.broadcast %cst_53 : f32 to vector<8x1xf32>
    %142 = arith.divf %137, %141 : vector<8x1xf32>
    %cst_54 = arith.constant 3.200000e+01 : f32
    %143 = vector.broadcast %cst_54 : f32 to vector<8x1xf32>
    %144 = arith.divf %140, %143 : vector<8x1xf32>
    %145 = arith.mulf %142, %142 : vector<8x1xf32>
    %146 = arith.subf %144, %145 : vector<8x1xf32>
    %147 = vector.broadcast %142 : vector<8x1xf32> to vector<8x128xf32>
    %148 = arith.subf %133, %147 : vector<8x128xf32>
    %cst_55 = arith.constant 9.99999974E-6 : f32
    %149 = vector.broadcast %cst_55 : f32 to vector<8x1xf32>
    %150 = arith.addf %146, %149 : vector<8x1xf32>
    %151 = math.rsqrt %150 : vector<8x1xf32>
    %152 = vector.broadcast %151 : vector<8x1xf32> to vector<8x128xf32>
    %153 = arith.mulf %148, %152 : vector<8x128xf32>
    %154 = vector.broadcast %134 : vector<1x128xf32> to vector<8x128xf32>
    %155 = arith.mulf %153, %154 : vector<8x128xf32>
    %156 = vector.broadcast %135 : vector<1x128xf32> to vector<8x128xf32>
    %157 = arith.addf %155, %156 : vector<8x128xf32>
    %158 = arith.truncf %157 : vector<8x128xf32> to vector<8x128xbf16>
    %c0_56 = arith.constant 0 : index
    %c0_57 = arith.constant 0 : index
    %c0_58 = arith.constant 0 : index
    %159 = vector.load %arg14[%c0_56, %c0_57, %c0_58] : memref<1x8x128xbf16, #tpu.memory_space<vmem>>, vector<1x8x128xbf16>
    %160 = vector.shape_cast %159 : vector<1x8x128xbf16> to vector<8x128xbf16>
    %161 = vector.shape_cast %158 : vector<8x128xbf16> to vector<1x8x128xbf16>
    tpu.vector_store %arg14[%c0_56, %c0_57, %c0_58], %161 {strides = array<i32>} : memref<1x8x128xbf16, #tpu.memory_space<vmem>>, vector<1x8x128xbf16>,
    return
  }
  func.func @transform_0(%arg0: i32) -> (i32, i32, i32) {
    %c0_i32 = arith.constant 0 : i32
    %c0_i32_0 = arith.constant 0 : i32
    %c0_i32_1 = arith.constant 0 : i32
    return %arg0, %c0_i32, %c0_i32_0 : i32, i32, i32
  }
  func.func @transform_1(%arg0: i32) -> (i32, i32) {
    %c0_i32 = arith.constant 0 : i32
    %c0_i32_0 = arith.constant 0 : i32
    %c0_i32_1 = arith.constant 0 : i32
    return %c0_i32, %c0_i32_0 : i32, i32
  }
  func.func @transform_2(%arg0: i32) -> (i32, i32) {
    %c0_i32 = arith.constant 0 : i32
    %c0_i32_0 = arith.constant 0 : i32
    %c0_i32_1 = arith.constant 0 : i32
    return %c0_i32, %c0_i32_0 : i32, i32
  }
  func.func @transform_3(%arg0: i32) -> (i32, i32) {
    %c0_i32 = arith.constant 0 : i32
    %c0_i32_0 = arith.constant 0 : i32
    %c0_i32_1 = arith.constant 0 : i32
    return %c0_i32, %c0_i32_0 : i32, i32
  }
  func.func @transform_4(%arg0: i32) -> (i32, i32) {
    %c0_i32 = arith.constant 0 : i32
    %c0_i32_0 = arith.constant 0 : i32
    %c0_i32_1 = arith.constant 0 : i32
    return %c0_i32, %c0_i32_0 : i32, i32
  }
  func.func @transform_5(%arg0: i32) -> (i32, i32) {
    %c0_i32 = arith.constant 0 : i32
    %c0_i32_0 = arith.constant 0 : i32
    %c0_i32_1 = arith.constant 0 : i32
    return %c0_i32, %c0_i32_0 : i32, i32
  }
  func.func @transform_6(%arg0: i32) -> (i32, i32) {
    %c0_i32 = arith.constant 0 : i32
    %c0_i32_0 = arith.constant 0 : i32
    %c0_i32_1 = arith.constant 0 : i32
    return %c0_i32, %c0_i32_0 : i32, i32
  }
  func.func @transform_7(%arg0: i32) -> (i32, i32) {
    %c0_i32 = arith.constant 0 : i32
    %c0_i32_0 = arith.constant 0 : i32
    %c0_i32_1 = arith.constant 0 : i32
    return %c0_i32, %c0_i32_0 : i32, i32
  }
  func.func @transform_8(%arg0: i32) -> (i32, i32) {
    %c0_i32 = arith.constant 0 : i32
    %c0_i32_0 = arith.constant 0 : i32
    %c0_i32_1 = arith.constant 0 : i32
    return %c0_i32, %c0_i32_0 : i32, i32
  }
  func.func @transform_9(%arg0: i32) -> (i32, i32) {
    %c0_i32 = arith.constant 0 : i32
    %c0_i32_0 = arith.constant 0 : i32
    %c0_i32_1 = arith.constant 0 : i32
    return %c0_i32, %c0_i32_0 : i32, i32
  }
  func.func @transform_10(%arg0: i32) -> (i32, i32) {
    %c0_i32 = arith.constant 0 : i32
    %c0_i32_0 = arith.constant 0 : i32
    %c0_i32_1 = arith.constant 0 : i32
    return %c0_i32, %c0_i32_0 : i32, i32
  }
  func.func @transform_11(%arg0: i32) -> (i32, i32) {
    %c0_i32 = arith.constant 0 : i32
    %c0_i32_0 = arith.constant 0 : i32
    %c0_i32_1 = arith.constant 0 : i32
    return %c0_i32, %c0_i32_0 : i32, i32
  }
  func.func @transform_12(%arg0: i32) -> (i32, i32) {
    %c0_i32 = arith.constant 0 : i32
    %c0_i32_0 = arith.constant 0 : i32
    %c0_i32_1 = arith.constant 0 : i32
    return %c0_i32, %c0_i32_0 : i32, i32
  }
  func.func @transform_13(%arg0: i32) -> (i32, i32, i32) {
    %c0_i32 = arith.constant 0 : i32
    %c0_i32_0 = arith.constant 0 : i32
    %c0_i32_1 = arith.constant 0 : i32
    return %arg0, %c0_i32, %c0_i32_0 : i32, i32, i32
  }
}

module attributes {stable_mosaic.version = 11 : i64} {
  func.func @_decoder_layer_kernel(%arg0: i32, %arg1: memref<1x8x128xbf16, #tpu.memory_space<vmem>>, %arg2: memref<1x8x128xbf16, #tpu.memory_space<vmem>>, %arg3: memref<128x384xbf16, #tpu.memory_space<vmem>>, %arg4: memref<1x384xf32, #tpu.memory_space<vmem>>, %arg5: memref<128x128xbf16, #tpu.memory_space<vmem>>, %arg6: memref<1x128xf32, #tpu.memory_space<vmem>>, %arg7: memref<1x128xf32, #tpu.memory_space<vmem>>, %arg8: memref<1x128xf32, #tpu.memory_space<vmem>>, %arg9: memref<128x128xbf16, #tpu.memory_space<vmem>>, %arg10: memref<1x128xf32, #tpu.memory_space<vmem>>, %arg11: memref<128x256xbf16, #tpu.memory_space<vmem>>, %arg12: memref<1x256xf32, #tpu.memory_space<vmem>>, %arg13: memref<128x128xbf16, #tpu.memory_space<vmem>>, %arg14: memref<1x128xf32, #tpu.memory_space<vmem>>, %arg15: memref<1x128xf32, #tpu.memory_space<vmem>>, %arg16: memref<1x128xf32, #tpu.memory_space<vmem>>, %arg17: memref<128x128xbf16, #tpu.memory_space<vmem>>, %arg18: memref<1x128xf32, #tpu.memory_space<vmem>>, %arg19: memref<128x128xbf16, #tpu.memory_space<vmem>>, %arg20: memref<1x128xf32, #tpu.memory_space<vmem>>, %arg21: memref<1x128xf32, #tpu.memory_space<vmem>>, %arg22: memref<1x128xf32, #tpu.memory_space<vmem>>, %arg23: memref<1x8x128xbf16, #tpu.memory_space<vmem>>) attributes {dimension_semantics = [#tpu.dimension_semantics<parallel>], iteration_bounds = array<i64: 2>, scalar_prefetch = 0 : i64, scratch_operands = 0 : i64, tpu.core_type = #tpu.core_type<tc>, window_params = [{transform_indices = @transform_0, window_bounds = array<i64: 1, 8, 128>}, {transform_indices = @transform_1, window_bounds = array<i64: 1, 8, 128>}, {pipeline_mode = #tpu.pipeline_mode<synchronous>, transform_indices = @transform_2, window_bounds = array<i64: 128, 384>}, {pipeline_mode = #tpu.pipeline_mode<synchronous>, transform_indices = @transform_3, window_bounds = array<i64: 1, 384>}, {pipeline_mode = #tpu.pipeline_mode<synchronous>, transform_indices = @transform_4, window_bounds = array<i64: 128, 128>}, {pipeline_mode = #tpu.pipeline_mode<synchronous>, transform_indices = @transform_5, window_bounds = array<i64: 1, 128>}, {pipeline_mode = #tpu.pipeline_mode<synchronous>, transform_indices = @transform_6, window_bounds = array<i64: 1, 128>}, {pipeline_mode = #tpu.pipeline_mode<synchronous>, transform_indices = @transform_7, window_bounds = array<i64: 1, 128>}, {pipeline_mode = #tpu.pipeline_mode<synchronous>, transform_indices = @transform_8, window_bounds = array<i64: 128, 128>}, {pipeline_mode = #tpu.pipeline_mode<synchronous>, transform_indices = @transform_9, window_bounds = array<i64: 1, 128>}, {pipeline_mode = #tpu.pipeline_mode<synchronous>, transform_indices = @transform_10, window_bounds = array<i64: 128, 256>}, {pipeline_mode = #tpu.pipeline_mode<synchronous>, transform_indices = @transform_11, window_bounds = array<i64: 1, 256>}, {pipeline_mode = #tpu.pipeline_mode<synchronous>, transform_indices = @transform_12, window_bounds = array<i64: 128, 128>}, {pipeline_mode = #tpu.pipeline_mode<synchronous>, transform_indices = @transform_13, window_bounds = array<i64: 1, 128>}, {pipeline_mode = #tpu.pipeline_mode<synchronous>, transform_indices = @transform_14, window_bounds = array<i64: 1, 128>}, {pipeline_mode = #tpu.pipeline_mode<synchronous>, transform_indices = @transform_15, window_bounds = array<i64: 1, 128>}, {pipeline_mode = #tpu.pipeline_mode<synchronous>, transform_indices = @transform_16, window_bounds = array<i64: 128, 128>}, {pipeline_mode = #tpu.pipeline_mode<synchronous>, transform_indices = @transform_17, window_bounds = array<i64: 1, 128>}, {pipeline_mode = #tpu.pipeline_mode<synchronous>, transform_indices = @transform_18, window_bounds = array<i64: 128, 128>}, {pipeline_mode = #tpu.pipeline_mode<synchronous>, transform_indices = @transform_19, window_bounds = array<i64: 1, 128>}, {pipeline_mode = #tpu.pipeline_mode<synchronous>, transform_indices = @transform_20, window_bounds = array<i64: 1, 128>}, {pipeline_mode = #tpu.pipeline_mode<synchronous>, transform_indices = @transform_21, window_bounds = array<i64: 1, 128>}, {transform_indices = @transform_22, window_bounds = array<i64: 1, 8, 128>}]} {
    %c0 = arith.constant 0 : index
    %c0_0 = arith.constant 0 : index
    %c0_1 = arith.constant 0 : index
    %0 = vector.load %arg1[%c0, %c0_0, %c0_1] : memref<1x8x128xbf16, #tpu.memory_space<vmem>>, vector<1x8x128xbf16>
    %1 = vector.shape_cast %0 : vector<1x8x128xbf16> to vector<8x128xbf16>
    %c0_2 = arith.constant 0 : index
    %c0_3 = arith.constant 0 : index
    %c0_4 = arith.constant 0 : index
    %2 = vector.load %arg2[%c0_2, %c0_3, %c0_4] : memref<1x8x128xbf16, #tpu.memory_space<vmem>>, vector<1x8x128xbf16>
    %3 = vector.shape_cast %2 : vector<1x8x128xbf16> to vector<8x128xbf16>
    %4 = arith.extf %1 : vector<8x128xbf16> to vector<8x128xf32>
    %5 = tpu.iota {dimensions = array<i32: 0>} : vector<8x8xi32>
    %6 = tpu.iota {dimensions = array<i32: 1>} : vector<8x8xi32>
    %7 = arith.cmpi sle, %6, %5 : vector<8x8xi32>
    %cst = arith.constant 0.000000e+00 : f32
    %cst_5 = arith.constant -1.000000e+30 : f32
    %8 = vector.broadcast %cst : f32 to vector<8x8xf32>
    %9 = vector.broadcast %cst_5 : f32 to vector<8x8xf32>
    %10 = arith.select %7, %8, %9 : vector<8x8xi1>, vector<8x8xf32>
    %c0_6 = arith.constant 0 : index
    %c0_7 = arith.constant 0 : index
    %11 = vector.load %arg3[%c0_6, %c0_7] : memref<128x384xbf16, #tpu.memory_space<vmem>>, vector<128x384xbf16>
    %cst_8 = arith.constant dense<0.000000e+00> : vector<8x384xf32>
    %12 = tpu.matmul %1, %11, %cst_8 {dimension_numbers = #tpu.dot_dimension_numbers<[1], [0], [0], [1], [0, 0, 1, 1], [], []>} : vector<8x128xbf16>, vector<128x384xbf16>, vector<8x384xf32> -> vector<8x384xf32>
    %c0_9 = arith.constant 0 : index
    %c0_10 = arith.constant 0 : index
    %13 = vector.load %arg4[%c0_9, %c0_10] : memref<1x384xf32, #tpu.memory_space<vmem>>, vector<1x384xf32>
    %14 = vector.broadcast %13 : vector<1x384xf32> to vector<8x384xf32>
    %15 = arith.addf %12, %14 : vector<8x384xf32>
    %16 = vector.extract_strided_slice %15 {offsets = [0, 0], sizes = [8, 128], strides = [1, 1]} : vector<8x384xf32> to vector<8x128xf32>
    %17 = vector.extract_strided_slice %15 {offsets = [0, 128], sizes = [8, 128], strides = [1, 1]} : vector<8x384xf32> to vector<8x128xf32>
    %18 = vector.extract_strided_slice %15 {offsets = [0, 256], sizes = [8, 128], strides = [1, 1]} : vector<8x384xf32> to vector<8x128xf32>
    %19 = vector.extract_strided_slice %16 {offsets = [0, 0], sizes = [8, 8], strides = [1, 1]} : vector<8x128xf32> to vector<8x8xf32>
    %20 = arith.truncf %19 : vector<8x8xf32> to vector<8x8xbf16>
    %21 = vector.extract_strided_slice %17 {offsets = [0, 0], sizes = [8, 8], strides = [1, 1]} : vector<8x128xf32> to vector<8x8xf32>
    %22 = arith.truncf %21 : vector<8x8xf32> to vector<8x8xbf16>
    %23 = vector.extract_strided_slice %18 {offsets = [0, 0], sizes = [8, 8], strides = [1, 1]} : vector<8x128xf32> to vector<8x8xf32>
    %24 = arith.truncf %23 : vector<8x8xf32> to vector<8x8xbf16>
    %cst_11 = arith.constant dense<0.000000e+00> : vector<8x8xf32>
    %25 = tpu.matmul %20, %22, %cst_11 {dimension_numbers = #tpu.dot_dimension_numbers<[1], [1], [0], [0], [0, 0, 1, 0], [], []>} : vector<8x8xbf16>, vector<8x8xbf16>, vector<8x8xf32> -> vector<8x8xf32>
    %26 = arith.addf %25, %10 : vector<8x8xf32>
    %cst_12 = arith.constant dense<0xFF800000> : vector<8xf32>
    %27 = vector.multi_reduction <maximumf>, %26, %cst_12 [1] : vector<8x8xf32> to vector<8xf32>
    %28 = vector.shape_cast %27 : vector<8xf32> to vector<8x1xf32>
    %29 = vector.broadcast %28 : vector<8x1xf32> to vector<8x8xf32>
    %30 = arith.subf %26, %29 : vector<8x8xf32>
    %31 = math.exp %30 : vector<8x8xf32>
    %cst_13 = arith.constant dense<0.000000e+00> : vector<8xf32>
    %32 = vector.multi_reduction <add>, %31, %cst_13 [1] : vector<8x8xf32> to vector<8xf32>
    %33 = vector.shape_cast %32 : vector<8xf32> to vector<8x1xf32>
    %34 = tpu.reciprocal %33 {approx = true} : vector<8x1xf32> -> vector<8x1xf32>
    %35 = vector.broadcast %34 : vector<8x1xf32> to vector<8x8xf32>
    %36 = arith.mulf %31, %35 : vector<8x8xf32>
    %37 = arith.truncf %36 : vector<8x8xf32> to vector<8x8xbf16>
    %cst_14 = arith.constant dense<0.000000e+00> : vector<8x8xf32>
    %38 = tpu.matmul %37, %24, %cst_14 {dimension_numbers = #tpu.dot_dimension_numbers<[1], [0], [0], [1], [0, 0, 1, 1], [], []>} : vector<8x8xbf16>, vector<8x8xbf16>, vector<8x8xf32> -> vector<8x8xf32>
    %39 = vector.extract_strided_slice %16 {offsets = [0, 8], sizes = [8, 8], strides = [1, 1]} : vector<8x128xf32> to vector<8x8xf32>
    %40 = arith.truncf %39 : vector<8x8xf32> to vector<8x8xbf16>
    %41 = vector.extract_strided_slice %17 {offsets = [0, 8], sizes = [8, 8], strides = [1, 1]} : vector<8x128xf32> to vector<8x8xf32>
    %42 = arith.truncf %41 : vector<8x8xf32> to vector<8x8xbf16>
    %43 = vector.extract_strided_slice %18 {offsets = [0, 8], sizes = [8, 8], strides = [1, 1]} : vector<8x128xf32> to vector<8x8xf32>
    %44 = arith.truncf %43 : vector<8x8xf32> to vector<8x8xbf16>
    %cst_15 = arith.constant dense<0.000000e+00> : vector<8x8xf32>
    %45 = tpu.matmul %40, %42, %cst_15 {dimension_numbers = #tpu.dot_dimension_numbers<[1], [1], [0], [0], [0, 0, 1, 0], [], []>} : vector<8x8xbf16>, vector<8x8xbf16>, vector<8x8xf32> -> vector<8x8xf32>
    %46 = arith.addf %45, %10 : vector<8x8xf32>
    %cst_16 = arith.constant dense<0xFF800000> : vector<8xf32>
    %47 = vector.multi_reduction <maximumf>, %46, %cst_16 [1] : vector<8x8xf32> to vector<8xf32>
    %48 = vector.shape_cast %47 : vector<8xf32> to vector<8x1xf32>
    %49 = vector.broadcast %48 : vector<8x1xf32> to vector<8x8xf32>
    %50 = arith.subf %46, %49 : vector<8x8xf32>
    %51 = math.exp %50 : vector<8x8xf32>
    %cst_17 = arith.constant dense<0.000000e+00> : vector<8xf32>
    %52 = vector.multi_reduction <add>, %51, %cst_17 [1] : vector<8x8xf32> to vector<8xf32>
    %53 = vector.shape_cast %52 : vector<8xf32> to vector<8x1xf32>
    %54 = tpu.reciprocal %53 {approx = true} : vector<8x1xf32> -> vector<8x1xf32>
    %55 = vector.broadcast %54 : vector<8x1xf32> to vector<8x8xf32>
    %56 = arith.mulf %51, %55 : vector<8x8xf32>
    %57 = arith.truncf %56 : vector<8x8xf32> to vector<8x8xbf16>
    %cst_18 = arith.constant dense<0.000000e+00> : vector<8x8xf32>
    %58 = tpu.matmul %57, %44, %cst_18 {dimension_numbers = #tpu.dot_dimension_numbers<[1], [0], [0], [1], [0, 0, 1, 1], [], []>} : vector<8x8xbf16>, vector<8x8xbf16>, vector<8x8xf32> -> vector<8x8xf32>
    %59 = vector.extract_strided_slice %16 {offsets = [0, 16], sizes = [8, 8], strides = [1, 1]} : vector<8x128xf32> to vector<8x8xf32>
    %60 = arith.truncf %59 : vector<8x8xf32> to vector<8x8xbf16>
    %61 = vector.extract_strided_slice %17 {offsets = [0, 16], sizes = [8, 8], strides = [1, 1]} : vector<8x128xf32> to vector<8x8xf32>
    %62 = arith.truncf %61 : vector<8x8xf32> to vector<8x8xbf16>
    %63 = vector.extract_strided_slice %18 {offsets = [0, 16], sizes = [8, 8], strides = [1, 1]} : vector<8x128xf32> to vector<8x8xf32>
    %64 = arith.truncf %63 : vector<8x8xf32> to vector<8x8xbf16>
    %cst_19 = arith.constant dense<0.000000e+00> : vector<8x8xf32>
    %65 = tpu.matmul %60, %62, %cst_19 {dimension_numbers = #tpu.dot_dimension_numbers<[1], [1], [0], [0], [0, 0, 1, 0], [], []>} : vector<8x8xbf16>, vector<8x8xbf16>, vector<8x8xf32> -> vector<8x8xf32>
    %66 = arith.addf %65, %10 : vector<8x8xf32>
    %cst_20 = arith.constant dense<0xFF800000> : vector<8xf32>
    %67 = vector.multi_reduction <maximumf>, %66, %cst_20 [1] : vector<8x8xf32> to vector<8xf32>
    %68 = vector.shape_cast %67 : vector<8xf32> to vector<8x1xf32>
    %69 = vector.broadcast %68 : vector<8x1xf32> to vector<8x8xf32>
    %70 = arith.subf %66, %69 : vector<8x8xf32>
    %71 = math.exp %70 : vector<8x8xf32>
    %cst_21 = arith.constant dense<0.000000e+00> : vector<8xf32>
    %72 = vector.multi_reduction <add>, %71, %cst_21 [1] : vector<8x8xf32> to vector<8xf32>
    %73 = vector.shape_cast %72 : vector<8xf32> to vector<8x1xf32>
    %74 = tpu.reciprocal %73 {approx = true} : vector<8x1xf32> -> vector<8x1xf32>
    %75 = vector.broadcast %74 : vector<8x1xf32> to vector<8x8xf32>
    %76 = arith.mulf %71, %75 : vector<8x8xf32>
    %77 = arith.truncf %76 : vector<8x8xf32> to vector<8x8xbf16>
    %cst_22 = arith.constant dense<0.000000e+00> : vector<8x8xf32>
    %78 = tpu.matmul %77, %64, %cst_22 {dimension_numbers = #tpu.dot_dimension_numbers<[1], [0], [0], [1], [0, 0, 1, 1], [], []>} : vector<8x8xbf16>, vector<8x8xbf16>, vector<8x8xf32> -> vector<8x8xf32>
    %79 = vector.extract_strided_slice %16 {offsets = [0, 24], sizes = [8, 8], strides = [1, 1]} : vector<8x128xf32> to vector<8x8xf32>
    %80 = arith.truncf %79 : vector<8x8xf32> to vector<8x8xbf16>
    %81 = vector.extract_strided_slice %17 {offsets = [0, 24], sizes = [8, 8], strides = [1, 1]} : vector<8x128xf32> to vector<8x8xf32>
    %82 = arith.truncf %81 : vector<8x8xf32> to vector<8x8xbf16>
    %83 = vector.extract_strided_slice %18 {offsets = [0, 24], sizes = [8, 8], strides = [1, 1]} : vector<8x128xf32> to vector<8x8xf32>
    %84 = arith.truncf %83 : vector<8x8xf32> to vector<8x8xbf16>
    %cst_23 = arith.constant dense<0.000000e+00> : vector<8x8xf32>
    %85 = tpu.matmul %80, %82, %cst_23 {dimension_numbers = #tpu.dot_dimension_numbers<[1], [1], [0], [0], [0, 0, 1, 0], [], []>} : vector<8x8xbf16>, vector<8x8xbf16>, vector<8x8xf32> -> vector<8x8xf32>
    %86 = arith.addf %85, %10 : vector<8x8xf32>
    %cst_24 = arith.constant dense<0xFF800000> : vector<8xf32>
    %87 = vector.multi_reduction <maximumf>, %86, %cst_24 [1] : vector<8x8xf32> to vector<8xf32>
    %88 = vector.shape_cast %87 : vector<8xf32> to vector<8x1xf32>
    %89 = vector.broadcast %88 : vector<8x1xf32> to vector<8x8xf32>
    %90 = arith.subf %86, %89 : vector<8x8xf32>
    %91 = math.exp %90 : vector<8x8xf32>
    %cst_25 = arith.constant dense<0.000000e+00> : vector<8xf32>
    %92 = vector.multi_reduction <add>, %91, %cst_25 [1] : vector<8x8xf32> to vector<8xf32>
    %93 = vector.shape_cast %92 : vector<8xf32> to vector<8x1xf32>
    %94 = tpu.reciprocal %93 {approx = true} : vector<8x1xf32> -> vector<8x1xf32>
    %95 = vector.broadcast %94 : vector<8x1xf32> to vector<8x8xf32>
    %96 = arith.mulf %91, %95 : vector<8x8xf32>
    %97 = arith.truncf %96 : vector<8x8xf32> to vector<8x8xbf16>
    %cst_26 = arith.constant dense<0.000000e+00> : vector<8x8xf32>
    %98 = tpu.matmul %97, %84, %cst_26 {dimension_numbers = #tpu.dot_dimension_numbers<[1], [0], [0], [1], [0, 0, 1, 1], [], []>} : vector<8x8xbf16>, vector<8x8xbf16>, vector<8x8xf32> -> vector<8x8xf32>
    %99 = tpu.concatenate %38, %58, %78, %98 in 1 : vector<8x8xf32>, vector<8x8xf32>, vector<8x8xf32>, vector<8x8xf32> -> vector<8x32xf32>
    %100 = arith.truncf %99 : vector<8x32xf32> to vector<8x32xbf16>
    %c0_27 = arith.constant 0 : index
    %c0_28 = arith.constant 0 : index
    %101 = vector.load %arg5[%c0_27, %c0_28] : memref<128x128xbf16, #tpu.memory_space<vmem>>, vector<32x128xbf16>
    %cst_29 = arith.constant dense<0.000000e+00> : vector<8x128xf32>
    %102 = tpu.matmul %100, %101, %cst_29 {dimension_numbers = #tpu.dot_dimension_numbers<[1], [0], [0], [1], [0, 0, 1, 1], [], []>} : vector<8x32xbf16>, vector<32x128xbf16>, vector<8x128xf32> -> vector<8x128xf32>
    %c0_30 = arith.constant 0 : index
    %c0_31 = arith.constant 0 : index
    %103 = vector.load %arg6[%c0_30, %c0_31] : memref<1x128xf32, #tpu.memory_space<vmem>>, vector<1x128xf32>
    %104 = vector.broadcast %103 : vector<1x128xf32> to vector<8x128xf32>
    %105 = arith.addf %102, %104 : vector<8x128xf32>
    %106 = arith.addf %4, %105 : vector<8x128xf32>
    %c0_32 = arith.constant 0 : index
    %c0_33 = arith.constant 0 : index
    %107 = vector.load %arg7[%c0_32, %c0_33] : memref<1x128xf32, #tpu.memory_space<vmem>>, vector<1x128xf32>
    %c0_34 = arith.constant 0 : index
    %c0_35 = arith.constant 0 : index
    %108 = vector.load %arg8[%c0_34, %c0_35] : memref<1x128xf32, #tpu.memory_space<vmem>>, vector<1x128xf32>
    %cst_36 = arith.constant dense<0.000000e+00> : vector<8xf32>
    %109 = vector.multi_reduction <add>, %106, %cst_36 [1] : vector<8x128xf32> to vector<8xf32>
    %110 = vector.shape_cast %109 : vector<8xf32> to vector<8x1xf32>
    %111 = arith.mulf %106, %106 : vector<8x128xf32>
    %cst_37 = arith.constant dense<0.000000e+00> : vector<8xf32>
    %112 = vector.multi_reduction <add>, %111, %cst_37 [1] : vector<8x128xf32> to vector<8xf32>
    %113 = vector.shape_cast %112 : vector<8xf32> to vector<8x1xf32>
    %cst_38 = arith.constant 3.200000e+01 : f32
    %114 = vector.broadcast %cst_38 : f32 to vector<8x1xf32>
    %115 = arith.divf %110, %114 : vector<8x1xf32>
    %cst_39 = arith.constant 3.200000e+01 : f32
    %116 = vector.broadcast %cst_39 : f32 to vector<8x1xf32>
    %117 = arith.divf %113, %116 : vector<8x1xf32>
    %118 = arith.mulf %115, %115 : vector<8x1xf32>
    %119 = arith.subf %117, %118 : vector<8x1xf32>
    %120 = vector.broadcast %115 : vector<8x1xf32> to vector<8x128xf32>
    %121 = arith.subf %106, %120 : vector<8x128xf32>
    %cst_40 = arith.constant 9.99999974E-6 : f32
    %122 = vector.broadcast %cst_40 : f32 to vector<8x1xf32>
    %123 = arith.addf %119, %122 : vector<8x1xf32>
    %124 = math.rsqrt %123 : vector<8x1xf32>
    %125 = vector.broadcast %124 : vector<8x1xf32> to vector<8x128xf32>
    %126 = arith.mulf %121, %125 : vector<8x128xf32>
    %127 = vector.broadcast %107 : vector<1x128xf32> to vector<8x128xf32>
    %128 = arith.mulf %126, %127 : vector<8x128xf32>
    %129 = vector.broadcast %108 : vector<1x128xf32> to vector<8x128xf32>
    %130 = arith.addf %128, %129 : vector<8x128xf32>
    %131 = arith.truncf %130 : vector<8x128xf32> to vector<8x128xbf16>
    %c0_41 = arith.constant 0 : index
    %c0_42 = arith.constant 0 : index
    %132 = vector.load %arg9[%c0_41, %c0_42] : memref<128x128xbf16, #tpu.memory_space<vmem>>, vector<128x128xbf16>
    %cst_43 = arith.constant dense<0.000000e+00> : vector<8x128xf32>
    %133 = tpu.matmul %131, %132, %cst_43 {dimension_numbers = #tpu.dot_dimension_numbers<[1], [0], [0], [1], [0, 0, 1, 1], [], []>} : vector<8x128xbf16>, vector<128x128xbf16>, vector<8x128xf32> -> vector<8x128xf32>
    %c0_44 = arith.constant 0 : index
    %c0_45 = arith.constant 0 : index
    %134 = vector.load %arg10[%c0_44, %c0_45] : memref<1x128xf32, #tpu.memory_space<vmem>>, vector<1x128xf32>
    %135 = vector.broadcast %134 : vector<1x128xf32> to vector<8x128xf32>
    %136 = arith.addf %133, %135 : vector<8x128xf32>
    %c0_46 = arith.constant 0 : index
    %c0_47 = arith.constant 0 : index
    %137 = vector.load %arg11[%c0_46, %c0_47] : memref<128x256xbf16, #tpu.memory_space<vmem>>, vector<128x256xbf16>
    %cst_48 = arith.constant dense<0.000000e+00> : vector<8x256xf32>
    %138 = tpu.matmul %3, %137, %cst_48 {dimension_numbers = #tpu.dot_dimension_numbers<[1], [0], [0], [1], [0, 0, 1, 1], [], []>} : vector<8x128xbf16>, vector<128x256xbf16>, vector<8x256xf32> -> vector<8x256xf32>
    %c0_49 = arith.constant 0 : index
    %c0_50 = arith.constant 0 : index
    %139 = vector.load %arg12[%c0_49, %c0_50] : memref<1x256xf32, #tpu.memory_space<vmem>>, vector<1x256xf32>
    %140 = vector.broadcast %139 : vector<1x256xf32> to vector<8x256xf32>
    %141 = arith.addf %138, %140 : vector<8x256xf32>
    %142 = vector.extract_strided_slice %141 {offsets = [0, 0], sizes = [8, 128], strides = [1, 1]} : vector<8x256xf32> to vector<8x128xf32>
    %143 = vector.extract_strided_slice %141 {offsets = [0, 128], sizes = [8, 128], strides = [1, 1]} : vector<8x256xf32> to vector<8x128xf32>
    %144 = vector.extract_strided_slice %136 {offsets = [0, 0], sizes = [8, 8], strides = [1, 1]} : vector<8x128xf32> to vector<8x8xf32>
    %145 = arith.truncf %144 : vector<8x8xf32> to vector<8x8xbf16>
    %146 = vector.extract_strided_slice %142 {offsets = [0, 0], sizes = [8, 8], strides = [1, 1]} : vector<8x128xf32> to vector<8x8xf32>
    %147 = arith.truncf %146 : vector<8x8xf32> to vector<8x8xbf16>
    %148 = vector.extract_strided_slice %143 {offsets = [0, 0], sizes = [8, 8], strides = [1, 1]} : vector<8x128xf32> to vector<8x8xf32>
    %149 = arith.truncf %148 : vector<8x8xf32> to vector<8x8xbf16>
    %cst_51 = arith.constant dense<0.000000e+00> : vector<8x8xf32>
    %150 = tpu.matmul %145, %147, %cst_51 {dimension_numbers = #tpu.dot_dimension_numbers<[1], [1], [0], [0], [0, 0, 1, 0], [], []>} : vector<8x8xbf16>, vector<8x8xbf16>, vector<8x8xf32> -> vector<8x8xf32>
    %cst_52 = arith.constant dense<0xFF800000> : vector<8xf32>
    %151 = vector.multi_reduction <maximumf>, %150, %cst_52 [1] : vector<8x8xf32> to vector<8xf32>
    %152 = vector.shape_cast %151 : vector<8xf32> to vector<8x1xf32>
    %153 = vector.broadcast %152 : vector<8x1xf32> to vector<8x8xf32>
    %154 = arith.subf %150, %153 : vector<8x8xf32>
    %155 = math.exp %154 : vector<8x8xf32>
    %cst_53 = arith.constant dense<0.000000e+00> : vector<8xf32>
    %156 = vector.multi_reduction <add>, %155, %cst_53 [1] : vector<8x8xf32> to vector<8xf32>
    %157 = vector.shape_cast %156 : vector<8xf32> to vector<8x1xf32>
    %158 = tpu.reciprocal %157 {approx = true} : vector<8x1xf32> -> vector<8x1xf32>
    %159 = vector.broadcast %158 : vector<8x1xf32> to vector<8x8xf32>
    %160 = arith.mulf %155, %159 : vector<8x8xf32>
    %161 = arith.truncf %160 : vector<8x8xf32> to vector<8x8xbf16>
    %cst_54 = arith.constant dense<0.000000e+00> : vector<8x8xf32>
    %162 = tpu.matmul %161, %149, %cst_54 {dimension_numbers = #tpu.dot_dimension_numbers<[1], [0], [0], [1], [0, 0, 1, 1], [], []>} : vector<8x8xbf16>, vector<8x8xbf16>, vector<8x8xf32> -> vector<8x8xf32>
    %163 = vector.extract_strided_slice %136 {offsets = [0, 8], sizes = [8, 8], strides = [1, 1]} : vector<8x128xf32> to vector<8x8xf32>
    %164 = arith.truncf %163 : vector<8x8xf32> to vector<8x8xbf16>
    %165 = vector.extract_strided_slice %142 {offsets = [0, 8], sizes = [8, 8], strides = [1, 1]} : vector<8x128xf32> to vector<8x8xf32>
    %166 = arith.truncf %165 : vector<8x8xf32> to vector<8x8xbf16>
    %167 = vector.extract_strided_slice %143 {offsets = [0, 8], sizes = [8, 8], strides = [1, 1]} : vector<8x128xf32> to vector<8x8xf32>
    %168 = arith.truncf %167 : vector<8x8xf32> to vector<8x8xbf16>
    %cst_55 = arith.constant dense<0.000000e+00> : vector<8x8xf32>
    %169 = tpu.matmul %164, %166, %cst_55 {dimension_numbers = #tpu.dot_dimension_numbers<[1], [1], [0], [0], [0, 0, 1, 0], [], []>} : vector<8x8xbf16>, vector<8x8xbf16>, vector<8x8xf32> -> vector<8x8xf32>
    %cst_56 = arith.constant dense<0xFF800000> : vector<8xf32>
    %170 = vector.multi_reduction <maximumf>, %169, %cst_56 [1] : vector<8x8xf32> to vector<8xf32>
    %171 = vector.shape_cast %170 : vector<8xf32> to vector<8x1xf32>
    %172 = vector.broadcast %171 : vector<8x1xf32> to vector<8x8xf32>
    %173 = arith.subf %169, %172 : vector<8x8xf32>
    %174 = math.exp %173 : vector<8x8xf32>
    %cst_57 = arith.constant dense<0.000000e+00> : vector<8xf32>
    %175 = vector.multi_reduction <add>, %174, %cst_57 [1] : vector<8x8xf32> to vector<8xf32>
    %176 = vector.shape_cast %175 : vector<8xf32> to vector<8x1xf32>
    %177 = tpu.reciprocal %176 {approx = true} : vector<8x1xf32> -> vector<8x1xf32>
    %178 = vector.broadcast %177 : vector<8x1xf32> to vector<8x8xf32>
    %179 = arith.mulf %174, %178 : vector<8x8xf32>
    %180 = arith.truncf %179 : vector<8x8xf32> to vector<8x8xbf16>
    %cst_58 = arith.constant dense<0.000000e+00> : vector<8x8xf32>
    %181 = tpu.matmul %180, %168, %cst_58 {dimension_numbers = #tpu.dot_dimension_numbers<[1], [0], [0], [1], [0, 0, 1, 1], [], []>} : vector<8x8xbf16>, vector<8x8xbf16>, vector<8x8xf32> -> vector<8x8xf32>
    %182 = vector.extract_strided_slice %136 {offsets = [0, 16], sizes = [8, 8], strides = [1, 1]} : vector<8x128xf32> to vector<8x8xf32>
    %183 = arith.truncf %182 : vector<8x8xf32> to vector<8x8xbf16>
    %184 = vector.extract_strided_slice %142 {offsets = [0, 16], sizes = [8, 8], strides = [1, 1]} : vector<8x128xf32> to vector<8x8xf32>
    %185 = arith.truncf %184 : vector<8x8xf32> to vector<8x8xbf16>
    %186 = vector.extract_strided_slice %143 {offsets = [0, 16], sizes = [8, 8], strides = [1, 1]} : vector<8x128xf32> to vector<8x8xf32>
    %187 = arith.truncf %186 : vector<8x8xf32> to vector<8x8xbf16>
    %cst_59 = arith.constant dense<0.000000e+00> : vector<8x8xf32>
    %188 = tpu.matmul %183, %185, %cst_59 {dimension_numbers = #tpu.dot_dimension_numbers<[1], [1], [0], [0], [0, 0, 1, 0], [], []>} : vector<8x8xbf16>, vector<8x8xbf16>, vector<8x8xf32> -> vector<8x8xf32>
    %cst_60 = arith.constant dense<0xFF800000> : vector<8xf32>
    %189 = vector.multi_reduction <maximumf>, %188, %cst_60 [1] : vector<8x8xf32> to vector<8xf32>
    %190 = vector.shape_cast %189 : vector<8xf32> to vector<8x1xf32>
    %191 = vector.broadcast %190 : vector<8x1xf32> to vector<8x8xf32>
    %192 = arith.subf %188, %191 : vector<8x8xf32>
    %193 = math.exp %192 : vector<8x8xf32>
    %cst_61 = arith.constant dense<0.000000e+00> : vector<8xf32>
    %194 = vector.multi_reduction <add>, %193, %cst_61 [1] : vector<8x8xf32> to vector<8xf32>
    %195 = vector.shape_cast %194 : vector<8xf32> to vector<8x1xf32>
    %196 = tpu.reciprocal %195 {approx = true} : vector<8x1xf32> -> vector<8x1xf32>
    %197 = vector.broadcast %196 : vector<8x1xf32> to vector<8x8xf32>
    %198 = arith.mulf %193, %197 : vector<8x8xf32>
    %199 = arith.truncf %198 : vector<8x8xf32> to vector<8x8xbf16>
    %cst_62 = arith.constant dense<0.000000e+00> : vector<8x8xf32>
    %200 = tpu.matmul %199, %187, %cst_62 {dimension_numbers = #tpu.dot_dimension_numbers<[1], [0], [0], [1], [0, 0, 1, 1], [], []>} : vector<8x8xbf16>, vector<8x8xbf16>, vector<8x8xf32> -> vector<8x8xf32>
    %201 = vector.extract_strided_slice %136 {offsets = [0, 24], sizes = [8, 8], strides = [1, 1]} : vector<8x128xf32> to vector<8x8xf32>
    %202 = arith.truncf %201 : vector<8x8xf32> to vector<8x8xbf16>
    %203 = vector.extract_strided_slice %142 {offsets = [0, 24], sizes = [8, 8], strides = [1, 1]} : vector<8x128xf32> to vector<8x8xf32>
    %204 = arith.truncf %203 : vector<8x8xf32> to vector<8x8xbf16>
    %205 = vector.extract_strided_slice %143 {offsets = [0, 24], sizes = [8, 8], strides = [1, 1]} : vector<8x128xf32> to vector<8x8xf32>
    %206 = arith.truncf %205 : vector<8x8xf32> to vector<8x8xbf16>
    %cst_63 = arith.constant dense<0.000000e+00> : vector<8x8xf32>
    %207 = tpu.matmul %202, %204, %cst_63 {dimension_numbers = #tpu.dot_dimension_numbers<[1], [1], [0], [0], [0, 0, 1, 0], [], []>} : vector<8x8xbf16>, vector<8x8xbf16>, vector<8x8xf32> -> vector<8x8xf32>
    %cst_64 = arith.constant dense<0xFF800000> : vector<8xf32>
    %208 = vector.multi_reduction <maximumf>, %207, %cst_64 [1] : vector<8x8xf32> to vector<8xf32>
    %209 = vector.shape_cast %208 : vector<8xf32> to vector<8x1xf32>
    %210 = vector.broadcast %209 : vector<8x1xf32> to vector<8x8xf32>
    %211 = arith.subf %207, %210 : vector<8x8xf32>
    %212 = math.exp %211 : vector<8x8xf32>
    %cst_65 = arith.constant dense<0.000000e+00> : vector<8xf32>
    %213 = vector.multi_reduction <add>, %212, %cst_65 [1] : vector<8x8xf32> to vector<8xf32>
    %214 = vector.shape_cast %213 : vector<8xf32> to vector<8x1xf32>
    %215 = tpu.reciprocal %214 {approx = true} : vector<8x1xf32> -> vector<8x1xf32>
    %216 = vector.broadcast %215 : vector<8x1xf32> to vector<8x8xf32>
    %217 = arith.mulf %212, %216 : vector<8x8xf32>
    %218 = arith.truncf %217 : vector<8x8xf32> to vector<8x8xbf16>
    %cst_66 = arith.constant dense<0.000000e+00> : vector<8x8xf32>
    %219 = tpu.matmul %218, %206, %cst_66 {dimension_numbers = #tpu.dot_dimension_numbers<[1], [0], [0], [1], [0, 0, 1, 1], [], []>} : vector<8x8xbf16>, vector<8x8xbf16>, vector<8x8xf32> -> vector<8x8xf32>
    %220 = tpu.concatenate %162, %181, %200, %219 in 1 : vector<8x8xf32>, vector<8x8xf32>, vector<8x8xf32>, vector<8x8xf32> -> vector<8x32xf32>
    %221 = arith.truncf %220 : vector<8x32xf32> to vector<8x32xbf16>
    %c0_67 = arith.constant 0 : index
    %c0_68 = arith.constant 0 : index
    %222 = vector.load %arg13[%c0_67, %c0_68] : memref<128x128xbf16, #tpu.memory_space<vmem>>, vector<32x128xbf16>
    %cst_69 = arith.constant dense<0.000000e+00> : vector<8x128xf32>
    %223 = tpu.matmul %221, %222, %cst_69 {dimension_numbers = #tpu.dot_dimension_numbers<[1], [0], [0], [1], [0, 0, 1, 1], [], []>} : vector<8x32xbf16>, vector<32x128xbf16>, vector<8x128xf32> -> vector<8x128xf32>
    %c0_70 = arith.constant 0 : index
    %c0_71 = arith.constant 0 : index
    %224 = vector.load %arg14[%c0_70, %c0_71] : memref<1x128xf32, #tpu.memory_space<vmem>>, vector<1x128xf32>
    %225 = vector.broadcast %224 : vector<1x128xf32> to vector<8x128xf32>
    %226 = arith.addf %223, %225 : vector<8x128xf32>
    %227 = arith.addf %130, %226 : vector<8x128xf32>
    %c0_72 = arith.constant 0 : index
    %c0_73 = arith.constant 0 : index
    %228 = vector.load %arg15[%c0_72, %c0_73] : memref<1x128xf32, #tpu.memory_space<vmem>>, vector<1x128xf32>
    %c0_74 = arith.constant 0 : index
    %c0_75 = arith.constant 0 : index
    %229 = vector.load %arg16[%c0_74, %c0_75] : memref<1x128xf32, #tpu.memory_space<vmem>>, vector<1x128xf32>
    %cst_76 = arith.constant dense<0.000000e+00> : vector<8xf32>
    %230 = vector.multi_reduction <add>, %227, %cst_76 [1] : vector<8x128xf32> to vector<8xf32>
    %231 = vector.shape_cast %230 : vector<8xf32> to vector<8x1xf32>
    %232 = arith.mulf %227, %227 : vector<8x128xf32>
    %cst_77 = arith.constant dense<0.000000e+00> : vector<8xf32>
    %233 = vector.multi_reduction <add>, %232, %cst_77 [1] : vector<8x128xf32> to vector<8xf32>
    %234 = vector.shape_cast %233 : vector<8xf32> to vector<8x1xf32>
    %cst_78 = arith.constant 3.200000e+01 : f32
    %235 = vector.broadcast %cst_78 : f32 to vector<8x1xf32>
    %236 = arith.divf %231, %235 : vector<8x1xf32>
    %cst_79 = arith.constant 3.200000e+01 : f32
    %237 = vector.broadcast %cst_79 : f32 to vector<8x1xf32>
    %238 = arith.divf %234, %237 : vector<8x1xf32>
    %239 = arith.mulf %236, %236 : vector<8x1xf32>
    %240 = arith.subf %238, %239 : vector<8x1xf32>
    %241 = vector.broadcast %236 : vector<8x1xf32> to vector<8x128xf32>
    %242 = arith.subf %227, %241 : vector<8x128xf32>
    %cst_80 = arith.constant 9.99999974E-6 : f32
    %243 = vector.broadcast %cst_80 : f32 to vector<8x1xf32>
    %244 = arith.addf %240, %243 : vector<8x1xf32>
    %245 = math.rsqrt %244 : vector<8x1xf32>
    %246 = vector.broadcast %245 : vector<8x1xf32> to vector<8x128xf32>
    %247 = arith.mulf %242, %246 : vector<8x128xf32>
    %248 = vector.broadcast %228 : vector<1x128xf32> to vector<8x128xf32>
    %249 = arith.mulf %247, %248 : vector<8x128xf32>
    %250 = vector.broadcast %229 : vector<1x128xf32> to vector<8x128xf32>
    %251 = arith.addf %249, %250 : vector<8x128xf32>
    %252 = arith.truncf %251 : vector<8x128xf32> to vector<8x128xbf16>
    %c0_81 = arith.constant 0 : index
    %c0_82 = arith.constant 0 : index
    %253 = vector.load %arg17[%c0_81, %c0_82] : memref<128x128xbf16, #tpu.memory_space<vmem>>, vector<128x128xbf16>
    %cst_83 = arith.constant dense<0.000000e+00> : vector<8x128xf32>
    %254 = tpu.matmul %252, %253, %cst_83 {dimension_numbers = #tpu.dot_dimension_numbers<[1], [0], [0], [1], [0, 0, 1, 1], [], []>} : vector<8x128xbf16>, vector<128x128xbf16>, vector<8x128xf32> -> vector<8x128xf32>
    %c0_84 = arith.constant 0 : index
    %c0_85 = arith.constant 0 : index
    %255 = vector.load %arg18[%c0_84, %c0_85] : memref<1x128xf32, #tpu.memory_space<vmem>>, vector<1x128xf32>
    %256 = vector.broadcast %255 : vector<1x128xf32> to vector<8x128xf32>
    %257 = arith.addf %254, %256 : vector<8x128xf32>
    %cst_86 = arith.constant 0.000000e+00 : f32
    %258 = vector.broadcast %cst_86 : f32 to vector<8x128xf32>
    %259 = arith.maximumf %257, %258 : vector<8x128xf32>
    %260 = arith.truncf %259 : vector<8x128xf32> to vector<8x128xbf16>
    %c0_87 = arith.constant 0 : index
    %c0_88 = arith.constant 0 : index
    %261 = vector.load %arg19[%c0_87, %c0_88] : memref<128x128xbf16, #tpu.memory_space<vmem>>, vector<128x128xbf16>
    %cst_89 = arith.constant dense<0.000000e+00> : vector<8x128xf32>
    %262 = tpu.matmul %260, %261, %cst_89 {dimension_numbers = #tpu.dot_dimension_numbers<[1], [0], [0], [1], [0, 0, 1, 1], [], []>} : vector<8x128xbf16>, vector<128x128xbf16>, vector<8x128xf32> -> vector<8x128xf32>
    %c0_90 = arith.constant 0 : index
    %c0_91 = arith.constant 0 : index
    %263 = vector.load %arg20[%c0_90, %c0_91] : memref<1x128xf32, #tpu.memory_space<vmem>>, vector<1x128xf32>
    %264 = vector.broadcast %263 : vector<1x128xf32> to vector<8x128xf32>
    %265 = arith.addf %262, %264 : vector<8x128xf32>
    %266 = arith.addf %251, %265 : vector<8x128xf32>
    %c0_92 = arith.constant 0 : index
    %c0_93 = arith.constant 0 : index
    %267 = vector.load %arg21[%c0_92, %c0_93] : memref<1x128xf32, #tpu.memory_space<vmem>>, vector<1x128xf32>
    %c0_94 = arith.constant 0 : index
    %c0_95 = arith.constant 0 : index
    %268 = vector.load %arg22[%c0_94, %c0_95] : memref<1x128xf32, #tpu.memory_space<vmem>>, vector<1x128xf32>
    %cst_96 = arith.constant dense<0.000000e+00> : vector<8xf32>
    %269 = vector.multi_reduction <add>, %266, %cst_96 [1] : vector<8x128xf32> to vector<8xf32>
    %270 = vector.shape_cast %269 : vector<8xf32> to vector<8x1xf32>
    %271 = arith.mulf %266, %266 : vector<8x128xf32>
    %cst_97 = arith.constant dense<0.000000e+00> : vector<8xf32>
    %272 = vector.multi_reduction <add>, %271, %cst_97 [1] : vector<8x128xf32> to vector<8xf32>
    %273 = vector.shape_cast %272 : vector<8xf32> to vector<8x1xf32>
    %cst_98 = arith.constant 3.200000e+01 : f32
    %274 = vector.broadcast %cst_98 : f32 to vector<8x1xf32>
    %275 = arith.divf %270, %274 : vector<8x1xf32>
    %cst_99 = arith.constant 3.200000e+01 : f32
    %276 = vector.broadcast %cst_99 : f32 to vector<8x1xf32>
    %277 = arith.divf %273, %276 : vector<8x1xf32>
    %278 = arith.mulf %275, %275 : vector<8x1xf32>
    %279 = arith.subf %277, %278 : vector<8x1xf32>
    %280 = vector.broadcast %275 : vector<8x1xf32> to vector<8x128xf32>
    %281 = arith.subf %266, %280 : vector<8x128xf32>
    %cst_100 = arith.constant 9.99999974E-6 : f32
    %282 = vector.broadcast %cst_100 : f32 to vector<8x1xf32>
    %283 = arith.addf %279, %282 : vector<8x1xf32>
    %284 = math.rsqrt %283 : vector<8x1xf32>
    %285 = vector.broadcast %284 : vector<8x1xf32> to vector<8x128xf32>
    %286 = arith.mulf %281, %285 : vector<8x128xf32>
    %287 = vector.broadcast %267 : vector<1x128xf32> to vector<8x128xf32>
    %288 = arith.mulf %286, %287 : vector<8x128xf32>
    %289 = vector.broadcast %268 : vector<1x128xf32> to vector<8x128xf32>
    %290 = arith.addf %288, %289 : vector<8x128xf32>
    %291 = arith.truncf %290 : vector<8x128xf32> to vector<8x128xbf16>
    %c0_101 = arith.constant 0 : index
    %c0_102 = arith.constant 0 : index
    %c0_103 = arith.constant 0 : index
    %292 = vector.load %arg23[%c0_101, %c0_102, %c0_103] : memref<1x8x128xbf16, #tpu.memory_space<vmem>>, vector<1x8x128xbf16>
    %293 = vector.shape_cast %292 : vector<1x8x128xbf16> to vector<8x128xbf16>
    %294 = vector.shape_cast %291 : vector<8x128xbf16> to vector<1x8x128xbf16>
    tpu.vector_store %arg23[%c0_101, %c0_102, %c0_103], %294 {strides = array<i32>} : memref<1x8x128xbf16, #tpu.memory_space<vmem>>, vector<1x8x128xbf16>,
    return
  }
  func.func @transform_0(%arg0: i32) -> (i32, i32, i32) {
    %c0_i32 = arith.constant 0 : i32
    %c0_i32_0 = arith.constant 0 : i32
    %c0_i32_1 = arith.constant 0 : i32
    return %arg0, %c0_i32, %c0_i32_0 : i32, i32, i32
  }
  func.func @transform_1(%arg0: i32) -> (i32, i32, i32) {
    %c0_i32 = arith.constant 0 : i32
    %c0_i32_0 = arith.constant 0 : i32
    %c0_i32_1 = arith.constant 0 : i32
    return %arg0, %c0_i32, %c0_i32_0 : i32, i32, i32
  }
  func.func @transform_2(%arg0: i32) -> (i32, i32) {
    %c0_i32 = arith.constant 0 : i32
    %c0_i32_0 = arith.constant 0 : i32
    %c0_i32_1 = arith.constant 0 : i32
    return %c0_i32, %c0_i32_0 : i32, i32
  }
  func.func @transform_3(%arg0: i32) -> (i32, i32) {
    %c0_i32 = arith.constant 0 : i32
    %c0_i32_0 = arith.constant 0 : i32
    %c0_i32_1 = arith.constant 0 : i32
    return %c0_i32, %c0_i32_0 : i32, i32
  }
  func.func @transform_4(%arg0: i32) -> (i32, i32) {
    %c0_i32 = arith.constant 0 : i32
    %c0_i32_0 = arith.constant 0 : i32
    %c0_i32_1 = arith.constant 0 : i32
    return %c0_i32, %c0_i32_0 : i32, i32
  }
  func.func @transform_5(%arg0: i32) -> (i32, i32) {
    %c0_i32 = arith.constant 0 : i32
    %c0_i32_0 = arith.constant 0 : i32
    %c0_i32_1 = arith.constant 0 : i32
    return %c0_i32, %c0_i32_0 : i32, i32
  }
  func.func @transform_6(%arg0: i32) -> (i32, i32) {
    %c0_i32 = arith.constant 0 : i32
    %c0_i32_0 = arith.constant 0 : i32
    %c0_i32_1 = arith.constant 0 : i32
    return %c0_i32, %c0_i32_0 : i32, i32
  }
  func.func @transform_7(%arg0: i32) -> (i32, i32) {
    %c0_i32 = arith.constant 0 : i32
    %c0_i32_0 = arith.constant 0 : i32
    %c0_i32_1 = arith.constant 0 : i32
    return %c0_i32, %c0_i32_0 : i32, i32
  }
  func.func @transform_8(%arg0: i32) -> (i32, i32) {
    %c0_i32 = arith.constant 0 : i32
    %c0_i32_0 = arith.constant 0 : i32
    %c0_i32_1 = arith.constant 0 : i32
    return %c0_i32, %c0_i32_0 : i32, i32
  }
  func.func @transform_9(%arg0: i32) -> (i32, i32) {
    %c0_i32 = arith.constant 0 : i32
    %c0_i32_0 = arith.constant 0 : i32
    %c0_i32_1 = arith.constant 0 : i32
    return %c0_i32, %c0_i32_0 : i32, i32
  }
  func.func @transform_10(%arg0: i32) -> (i32, i32) {
    %c0_i32 = arith.constant 0 : i32
    %c0_i32_0 = arith.constant 0 : i32
    %c0_i32_1 = arith.constant 0 : i32
    return %c0_i32, %c0_i32_0 : i32, i32
  }
  func.func @transform_11(%arg0: i32) -> (i32, i32) {
    %c0_i32 = arith.constant 0 : i32
    %c0_i32_0 = arith.constant 0 : i32
    %c0_i32_1 = arith.constant 0 : i32
    return %c0_i32, %c0_i32_0 : i32, i32
  }
  func.func @transform_12(%arg0: i32) -> (i32, i32) {
    %c0_i32 = arith.constant 0 : i32
    %c0_i32_0 = arith.constant 0 : i32
    %c0_i32_1 = arith.constant 0 : i32
    return %c0_i32, %c0_i32_0 : i32, i32
  }
  func.func @transform_13(%arg0: i32) -> (i32, i32) {
    %c0_i32 = arith.constant 0 : i32
    %c0_i32_0 = arith.constant 0 : i32
    %c0_i32_1 = arith.constant 0 : i32
    return %c0_i32, %c0_i32_0 : i32, i32
  }
  func.func @transform_14(%arg0: i32) -> (i32, i32) {
    %c0_i32 = arith.constant 0 : i32
    %c0_i32_0 = arith.constant 0 : i32
    %c0_i32_1 = arith.constant 0 : i32
    return %c0_i32, %c0_i32_0 : i32, i32
  }
  func.func @transform_15(%arg0: i32) -> (i32, i32) {
    %c0_i32 = arith.constant 0 : i32
    %c0_i32_0 = arith.constant 0 : i32
    %c0_i32_1 = arith.constant 0 : i32
    return %c0_i32, %c0_i32_0 : i32, i32
  }
  func.func @transform_16(%arg0: i32) -> (i32, i32) {
    %c0_i32 = arith.constant 0 : i32
    %c0_i32_0 = arith.constant 0 : i32
    %c0_i32_1 = arith.constant 0 : i32
    return %c0_i32, %c0_i32_0 : i32, i32
  }
  func.func @transform_17(%arg0: i32) -> (i32, i32) {
    %c0_i32 = arith.constant 0 : i32
    %c0_i32_0 = arith.constant 0 : i32
    %c0_i32_1 = arith.constant 0 : i32
    return %c0_i32, %c0_i32_0 : i32, i32
  }
  func.func @transform_18(%arg0: i32) -> (i32, i32) {
    %c0_i32 = arith.constant 0 : i32
    %c0_i32_0 = arith.constant 0 : i32
    %c0_i32_1 = arith.constant 0 : i32
    return %c0_i32, %c0_i32_0 : i32, i32
  }
  func.func @transform_19(%arg0: i32) -> (i32, i32) {
    %c0_i32 = arith.constant 0 : i32
    %c0_i32_0 = arith.constant 0 : i32
    %c0_i32_1 = arith.constant 0 : i32
    return %c0_i32, %c0_i32_0 : i32, i32
  }
  func.func @transform_20(%arg0: i32) -> (i32, i32) {
    %c0_i32 = arith.constant 0 : i32
    %c0_i32_0 = arith.constant 0 : i32
    %c0_i32_1 = arith.constant 0 : i32
    return %c0_i32, %c0_i32_0 : i32, i32
  }
  func.func @transform_21(%arg0: i32) -> (i32, i32) {
    %c0_i32 = arith.constant 0 : i32
    %c0_i32_0 = arith.constant 0 : i32
    %c0_i32_1 = arith.constant 0 : i32
    return %c0_i32, %c0_i32_0 : i32, i32
  }
  func.func @transform_22(%arg0: i32) -> (i32, i32, i32) {
    %c0_i32 = arith.constant 0 : i32
    %c0_i32_0 = arith.constant 0 : i32
    %c0_i32_1 = arith.constant 0 : i32
    return %arg0, %c0_i32, %c0_i32_0 : i32, i32, i32
  }
}

module attributes {stable_mosaic.version = 11 : i64} {
  func.func @_final_proj_kernel(%arg0: i32, %arg1: memref<1x8x128xbf16, #tpu.memory_space<vmem>>, %arg2: memref<1x128xf32, #tpu.memory_space<vmem>>, %arg3: memref<1x128xf32, #tpu.memory_space<vmem>>, %arg4: memref<128x48xbf16, #tpu.memory_space<vmem>>, %arg5: memref<1x48xf32, #tpu.memory_space<vmem>>, %arg6: memref<1x8x48xf32, #tpu.memory_space<vmem>>) attributes {dimension_semantics = [#tpu.dimension_semantics<parallel>], iteration_bounds = array<i64: 2>, scalar_prefetch = 0 : i64, scratch_operands = 0 : i64, tpu.core_type = #tpu.core_type<tc>, window_params = [{transform_indices = @transform_0, window_bounds = array<i64: 1, 8, 128>}, {pipeline_mode = #tpu.pipeline_mode<synchronous>, transform_indices = @transform_1, window_bounds = array<i64: 1, 128>}, {pipeline_mode = #tpu.pipeline_mode<synchronous>, transform_indices = @transform_2, window_bounds = array<i64: 1, 128>}, {pipeline_mode = #tpu.pipeline_mode<synchronous>, transform_indices = @transform_3, window_bounds = array<i64: 128, 48>}, {pipeline_mode = #tpu.pipeline_mode<synchronous>, transform_indices = @transform_4, window_bounds = array<i64: 1, 48>}, {transform_indices = @transform_5, window_bounds = array<i64: 1, 8, 48>}]} {
    %c0 = arith.constant 0 : index
    %c0_0 = arith.constant 0 : index
    %c0_1 = arith.constant 0 : index
    %0 = vector.load %arg1[%c0, %c0_0, %c0_1] : memref<1x8x128xbf16, #tpu.memory_space<vmem>>, vector<1x8x128xbf16>
    %1 = vector.shape_cast %0 : vector<1x8x128xbf16> to vector<8x128xbf16>
    %2 = arith.extf %1 : vector<8x128xbf16> to vector<8x128xf32>
    %c0_2 = arith.constant 0 : index
    %c0_3 = arith.constant 0 : index
    %3 = vector.load %arg2[%c0_2, %c0_3] : memref<1x128xf32, #tpu.memory_space<vmem>>, vector<1x128xf32>
    %c0_4 = arith.constant 0 : index
    %c0_5 = arith.constant 0 : index
    %4 = vector.load %arg3[%c0_4, %c0_5] : memref<1x128xf32, #tpu.memory_space<vmem>>, vector<1x128xf32>
    %cst = arith.constant dense<0.000000e+00> : vector<8xf32>
    %5 = vector.multi_reduction <add>, %2, %cst [1] : vector<8x128xf32> to vector<8xf32>
    %6 = vector.shape_cast %5 : vector<8xf32> to vector<8x1xf32>
    %7 = arith.mulf %2, %2 : vector<8x128xf32>
    %cst_6 = arith.constant dense<0.000000e+00> : vector<8xf32>
    %8 = vector.multi_reduction <add>, %7, %cst_6 [1] : vector<8x128xf32> to vector<8xf32>
    %9 = vector.shape_cast %8 : vector<8xf32> to vector<8x1xf32>
    %cst_7 = arith.constant 3.200000e+01 : f32
    %10 = vector.broadcast %cst_7 : f32 to vector<8x1xf32>
    %11 = arith.divf %6, %10 : vector<8x1xf32>
    %cst_8 = arith.constant 3.200000e+01 : f32
    %12 = vector.broadcast %cst_8 : f32 to vector<8x1xf32>
    %13 = arith.divf %9, %12 : vector<8x1xf32>
    %14 = arith.mulf %11, %11 : vector<8x1xf32>
    %15 = arith.subf %13, %14 : vector<8x1xf32>
    %16 = vector.broadcast %11 : vector<8x1xf32> to vector<8x128xf32>
    %17 = arith.subf %2, %16 : vector<8x128xf32>
    %cst_9 = arith.constant 9.99999974E-6 : f32
    %18 = vector.broadcast %cst_9 : f32 to vector<8x1xf32>
    %19 = arith.addf %15, %18 : vector<8x1xf32>
    %20 = math.rsqrt %19 : vector<8x1xf32>
    %21 = vector.broadcast %20 : vector<8x1xf32> to vector<8x128xf32>
    %22 = arith.mulf %17, %21 : vector<8x128xf32>
    %23 = vector.broadcast %3 : vector<1x128xf32> to vector<8x128xf32>
    %24 = arith.mulf %22, %23 : vector<8x128xf32>
    %25 = vector.broadcast %4 : vector<1x128xf32> to vector<8x128xf32>
    %26 = arith.addf %24, %25 : vector<8x128xf32>
    %27 = arith.truncf %26 : vector<8x128xf32> to vector<8x128xbf16>
    %c0_10 = arith.constant 0 : index
    %c0_11 = arith.constant 0 : index
    %28 = vector.load %arg4[%c0_10, %c0_11] : memref<128x48xbf16, #tpu.memory_space<vmem>>, vector<128x48xbf16>
    %cst_12 = arith.constant dense<0.000000e+00> : vector<8x48xf32>
    %29 = tpu.matmul %27, %28, %cst_12 {dimension_numbers = #tpu.dot_dimension_numbers<[1], [0], [0], [1], [0, 0, 1, 1], [], []>} : vector<8x128xbf16>, vector<128x48xbf16>, vector<8x48xf32> -> vector<8x48xf32>
    %c0_13 = arith.constant 0 : index
    %c0_14 = arith.constant 0 : index
    %30 = vector.load %arg5[%c0_13, %c0_14] : memref<1x48xf32, #tpu.memory_space<vmem>>, vector<1x48xf32>
    %31 = vector.broadcast %30 : vector<1x48xf32> to vector<8x48xf32>
    %32 = arith.addf %29, %31 : vector<8x48xf32>
    %c0_15 = arith.constant 0 : index
    %c0_16 = arith.constant 0 : index
    %c0_17 = arith.constant 0 : index
    %33 = vector.load %arg6[%c0_15, %c0_16, %c0_17] : memref<1x8x48xf32, #tpu.memory_space<vmem>>, vector<1x8x48xf32>
    %34 = vector.shape_cast %33 : vector<1x8x48xf32> to vector<8x48xf32>
    %35 = vector.shape_cast %32 : vector<8x48xf32> to vector<1x8x48xf32>
    tpu.vector_store %arg6[%c0_15, %c0_16, %c0_17], %35 {strides = array<i32>} : memref<1x8x48xf32, #tpu.memory_space<vmem>>, vector<1x8x48xf32>,
    return
  }
  func.func @transform_0(%arg0: i32) -> (i32, i32, i32) {
    %c0_i32 = arith.constant 0 : i32
    %c0_i32_0 = arith.constant 0 : i32
    %c0_i32_1 = arith.constant 0 : i32
    return %arg0, %c0_i32, %c0_i32_0 : i32, i32, i32
  }
  func.func @transform_1(%arg0: i32) -> (i32, i32) {
    %c0_i32 = arith.constant 0 : i32
    %c0_i32_0 = arith.constant 0 : i32
    %c0_i32_1 = arith.constant 0 : i32
    return %c0_i32, %c0_i32_0 : i32, i32
  }
  func.func @transform_2(%arg0: i32) -> (i32, i32) {
    %c0_i32 = arith.constant 0 : i32
    %c0_i32_0 = arith.constant 0 : i32
    %c0_i32_1 = arith.constant 0 : i32
    return %c0_i32, %c0_i32_0 : i32, i32
  }
  func.func @transform_3(%arg0: i32) -> (i32, i32) {
    %c0_i32 = arith.constant 0 : i32
    %c0_i32_0 = arith.constant 0 : i32
    %c0_i32_1 = arith.constant 0 : i32
    return %c0_i32, %c0_i32_0 : i32, i32
  }
  func.func @transform_4(%arg0: i32) -> (i32, i32) {
    %c0_i32 = arith.constant 0 : i32
    %c0_i32_0 = arith.constant 0 : i32
    %c0_i32_1 = arith.constant 0 : i32
    return %c0_i32, %c0_i32_0 : i32, i32
  }
  func.func @transform_5(%arg0: i32) -> (i32, i32, i32) {
    %c0_i32 = arith.constant 0 : i32
    %c0_i32_0 = arith.constant 0 : i32
    %c0_i32_1 = arith.constant 0 : i32
    return %arg0, %c0_i32, %c0_i32_0 : i32, i32, i32
  }
}

</mosaic_0001>

<bundles_post_ra>
// kernel: transformer_forward.6
= control target key start
LH: loop header
LB: loop body
LE: loop exit
PB: predicated region body
PF: predicated region fallthrough
CT: control target
= control target key end

     0   :  { %s2040_s0 = inlined_call_operand.vmem [shape: bf16[2,8,128], index: 0, kind: input, shape index: {}]   ;;  %s2041_s1 = inlined_call_operand.hbm [shape: bf16[128,384], index: 1, kind: input, shape index: {}]   ;;  %s2042_s2 = inlined_call_operand.vmem [shape: f32[1,384], index: 2, kind: input, shape index: {}]   ;;  %s2043_s3 = inlined_call_operand.hbm [shape: bf16[128,128], index: 3, kind: input, shape index: {}]   ;;  %s2044_s4 = inlined_call_operand.vmem [shape: f32[1,128], index: 4, kind: input, shape index: {}]   ;;  %s2045_s5 = inlined_call_operand.vmem [shape: f32[1,128], index: 5, kind: input, shape index: {}]   ;;  %s2046_s6 = inlined_call_operand.vmem [shape: f32[1,128], index: 6, kind: input, shape index: {}]   ;;  %s2047_s7 = inlined_call_operand.hbm [shape: bf16[128,128], index: 7, kind: input, shape index: {}]   ;;  %s2048_s8 = inlined_call_operand.vmem [shape: f32[1,128], index: 8, kind: input, shape index: {}]   ;;  %s2049_s9 = inlined_call_operand.hbm [shape: bf16[128,128], index: 9, kind: input, shape index: {}]   ;;  %s2050_s10 = inlined_call_operand.vmem [shape: f32[1,128], index: 10, kind: input, shape index: {}]   ;;  %s2051_s11 = inlined_call_operand.vmem [shape: f32[1,128], index: 11, kind: input, shape index: {}]   ;;  %s2052_s12 = inlined_call_operand.vmem [shape: f32[1,128], index: 12, kind: input, shape index: {}]   ;;  %s2053_s13 = inlined_call_operand.vmem [shape: bf16[2,8,128], index: 13, kind: output, shape index: {}]  }
   0x1   :  { %2055 = sst [smem:[#allocation13_spill]] %s2041_s1 }
   0x2   :  { %2056 = sst [smem:[#allocation14_spill]] %s2043_s3 }
   0x3   :  { %18 = vsyncpa [#allocation3], 0 }
   0x4   :  { %19 = vsyncpa [#allocation5], 0 }
   0x5   :  { %20 = vsyncpa [#allocation8], 0  ;;  %s1878_s25 = smov 0  }
   0x6 LB: > { %2057 = sst [smem:[#allocation12_spill]] %s1791_s25  ;;  %s1887_s29 = sadd.s32 4294967295, %s1791_s25   ;;  %s1791_s25 = sphi %s1878_s25, %s26_s25  }
   0x7   : > { %s2058_s3 = sld [smem:[#allocation14_spill]]  ;;  %p1330_p0 = scmp.ge.s32.totalorder %s1791_s25, 1 }
   0x8   : > { %p335_p1 = scmp.lt.s32.totalorder %s1791_s25, 3  ;;  %p1593_p2 = scmp.eq.s32.totalorder %s1887_s29, 0 }
   0x9   : > { %s1793_s14 = smov [#allocation4]   ;;  %s2060_s1 = sld [smem:[#allocation13_spill]] }
   0xa   : > { %p1892_p3 = pnand %p1330_p0, %p335_p1  ;;  %s365_s15 = sshll.u32 %s1793_s14, 4  ;;  %s366_s15 = int_to_ptr.vmem [resolvable:$true] %s365_s15 }
   0xb   : > { %s1794_s20 = smov [#allocation2]   ;;  %s1795_s22 = smov 64  }
   0xc   : > { %p1580_p4 = pneg %p1892_p3  ;;  %s348_s21 = sshll.u32 %s1794_s20, 4  ;;  %s349_s21 = int_to_ptr.vmem [resolvable:$true] %s348_s21 }
   0xd   : > { %s363_s28 = sshll.u32 %s2058_s3, 4  ;;  %s1796_s23 = smov 4   ;;  %s364_s28 = int_to_ptr.hbm [resolvable:$true] %s363_s28 }
   0xe   : > { %p1903_p5 = pnand %p1593_p2, %p1580_p4  ;;  %s386_s27 = sshll.u32 %s2047_s7, 4  ;;  %s387_s27 = int_to_ptr.hbm [resolvable:$true] %s386_s27 }
   0xf   : > { %s346_s18 = sshll.u32 %s2060_s1, 4  ;;  %s1797_s14 = smov 192   ;;  %s347_s18 = int_to_ptr.hbm [resolvable:$true] %s346_s18 }
  0x10   : > { %1586 = dma.hbm_to_vmem [thread:$0]  (!%p1903_p5), %s364_s28, 1024, %s366_s15, [#allocation5], %s1795_s22, %s1795_s22, %s1796_s23  }
  0x11   : > { %s1798_s16 = smov 12   ;;  %s1799_s17 = smov [#allocation6]  }
  0x12   : > { %1583 = dma.hbm_to_vmem [thread:$0]  (!%p1903_p5), %s347_s18, 3072, %s349_s21, [#allocation3], %s1797_s14, %s1797_s14, %s1798_s16  }
  0x13   : > { %s388_s1 = sshll.u32 %s1799_s17, 4  ;;  %s403_s20 = sshll.u32 %s2049_s9, 4  ;;  %s389_s1 = int_to_ptr.vmem [resolvable:$true] %s388_s1  ;;  %s404_s20 = int_to_ptr.hbm [resolvable:$true] %s403_s20 }
  0x14   : > { %1589 = dma.hbm_to_vmem [thread:$0]  (!%p1903_p5), %s387_s27, 1024, %s389_s1, [#allocation5], %s1795_s22, %s1795_s22, %s1796_s23  }
  0x15   : > { %s1800_s28 = smov [#allocation7]   ;;  %437 = sbr.rel (%p1892_p3) target bundleno = 1973 (0x7b5), region = 72 }
  0x16   : > { %s405_s15 = sshll.u32 %s1800_s28, 4  ;;  %s406_s15 = int_to_ptr.vmem [resolvable:$true] %s405_s15 }
  0x17   : > { %1592 = dma.hbm_to_vmem [thread:$0]  (!%p1903_p5), %s404_s20, 1024, %s406_s15, [#allocation8], %s1795_s22, %s1795_s22, %s1796_s23  }
  0x1a   : > { %1778 = dma.done.wait (%p1593_p2), [#allocation3], 3072  }
  0x1b   : > { %1780 = vsyncadd (%p1593_p2), [#allocation3], 4294964224 }
  0x1c   : > { %1782 = dma.done.wait (%p1593_p2), [#allocation5], 2048  }
  0x1d   : > { %1784 = vsyncadd (%p1593_p2), [#allocation5], 4294965248 }
  0x1e   : > { %1786 = dma.done.wait (%p1593_p2), [#allocation8], 1024  }
  0x1f   : > { %1788 = vsyncadd (%p1593_p2), [#allocation8], 4294966272  ;;  %v1429_v0 = vld [vmem:[#allocation2 + $0xa8] sm:$0xf]  ;;  %v1544_v1 = vld [vmem:[#allocation2 + $0xb0] sm:$0xf0] }
  0x20   : > { %v1543_v2 = vld [vmem:[#allocation2 + $0xac] sm:$0xf]  ;;  %v1430_v3 = vor.u32 %v1544_v1, %v1429_v0  ;;  %v1431_v4 = vld [vmem:[#allocation2 + $0xb4] sm:$0xf0]  ;;  %v1417_v5 = vld [vmem:[#allocation2 + $0x90] sm:$0xf] }
  0x21   : > { %v1541_v6 = vld [vmem:[#allocation2 + $0x98] sm:$0xf0]  ;;  %v1434_v7 = vor.u32 %v1543_v2, %v1431_v4  ;;  %v1540_v8 = vld [vmem:[#allocation2 + $0x94] sm:$0xf]  ;;  %v1419_v9 = vld [vmem:[#allocation2 + $0x9c] sm:$0xf0] }
  0x22   : > { %674 = vmatpush.bf16.msra.mxu0 %v1430_v3  ;;  %v1418_v10 = vor.u32 %v1541_v6, %v1417_v5  ;;  %v1422_v11 = vor.u32 %v1540_v8, %v1419_v9  ;;  %v1405_v12 = vld [vmem:[#allocation2 + $0x78] sm:$0xf]  ;;  %v1538_v13 = vld [vmem:[#allocation2 + $0x80] sm:$0xf0]  ;;  %v1537_v14 = vld [vmem:[#allocation2 + $0x7c] sm:$0xf] }
  0x23   : > { %687 = vmatpush.bf16.msra.mxu1 %v1434_v7  ;;  %v1407_v15 = vld [vmem:[#allocation2 + $0x84] sm:$0xf0]  ;;  %v1406_v16 = vor.u32 %v1538_v13, %v1405_v12  ;;  %v1393_v18 = vld [vmem:[#allocation2 + $0x60] sm:$0xf]  ;;  %v1535_v19 = vld [vmem:[#allocation2 + $0x68] sm:$0xf0] }
  0x24   : > { %v1410_v17 = vor.u32 %v1537_v14, %v1407_v15  ;;  %v1534_v20 = vld [vmem:[#allocation2 + $0x64] sm:$0xf]  ;;  %v1395_v21 = vld [vmem:[#allocation2 + $0x6c] sm:$0xf0]  ;;  %v1394_v22 = vor.u32 %v1535_v19, %v1393_v18  ;;  %v1545_v24 = vld [vmem:[#allocation2 + $0xb8] sm:$0xf0] }
  0x25   : > { %v1437_v23 = vld [vmem:[#allocation2 + $0xb0] sm:$0xf]  ;;  %v1425_v25 = vld [vmem:[#allocation2 + $0x98] sm:$0xf]  ;;  %v1398_v26 = vor.u32 %v1534_v20, %v1395_v21  ;;  %v1381_v27 = vld [vmem:[#allocation2 + $0x48] sm:$0xf] }
  0x26   : > { %675 = vmatpush.bf16.msra.mxu0 %v1418_v10  ;;  %v1532_v28 = vld [vmem:[#allocation2 + $0x50] sm:$0xf0]  ;;  %v1438_v29 = vor.u32 %v1545_v24, %v1437_v23  ;;  %v1542_v30 = vld [vmem:[#allocation2 + $0xa0] sm:$0xf0]  ;;  %v1531_v31 = vld [vmem:[#allocation2 + $0x4c] sm:$0xf] }
  0x27   : > { %688 = vmatpush.bf16.msra.mxu1 %v1422_v11  ;;  %v1383_v32 = vld [vmem:[#allocation2 + $0x54] sm:$0xf0]  ;;  %p495_p6 = scmp.lt.s32.totalorder %s1887_s29, 1  ;;  %v1426_v33 = vor.u32 %v1542_v30, %v1425_v25  ;;  %v1382_v34 = vor.u32 %v1532_v28, %v1381_v27  ;;  %v1369_v35 = vld [vmem:[#allocation2 + $0x30] sm:$0xf]  ;;  %vm716_vm0 = vcmask 64512  }
  0x28   : > { %700 = vmatpush.bf16.msra.mxu2 %v1438_v29  ;;  %v1413_v36 = vld [vmem:[#allocation2 + $0x80] sm:$0xf]  ;;  %v1539_v37 = vld [vmem:[#allocation2 + $0x88] sm:$0xf0]  ;;  %v1386_v38 = vor.u32 %v1531_v31, %v1383_v32  ;;  %v1529_v39 = vld [vmem:[#allocation2 + $0x38] sm:$0xf0] }
  0x29   : > { %v1528_v40 = vld [vmem:[#allocation2 + $0x34] sm:$0xf]  ;;  %v1371_v41 = vld [vmem:[#allocation2 + $0x3c] sm:$0xf0]  ;;  %v1414_v42 = vor.u32 %v1539_v37, %v1413_v36  ;;  %v1370_v43 = vor.u32 %v1529_v39, %v1369_v35  ;;  %v1401_v44 = vld [vmem:[#allocation2 + $0x68] sm:$0xf] }
  0x2a   : > { %676 = vmatpush.bf16.msra.mxu0 %v1406_v16  ;;  %v1536_v45 = vld [vmem:[#allocation2 + $0x70] sm:$0xf0]  ;;  %v1374_v46 = vor.u32 %v1528_v40, %v1371_v41  ;;  %v1357_v47 = vld [vmem:[#allocation2 + $0x18] sm:$0xf]  ;;  %v1526_v48 = vld [vmem:[#allocation2 + $0x20] sm:$0xf0] }
  0x2b   : > { %689 = vmatpush.bf16.msra.mxu1 %v1410_v17  ;;  %v1525_v49 = vld [vmem:[#allocation2 + $0x1c] sm:$0xf]  ;;  %v1359_v50 = vld [vmem:[#allocation2 + $0x24] sm:$0xf0]  ;;  %s2064_s29 = smov (!%p495_p6, %s1887_s29), 1  ;;  %v1402_v51 = vor.u32 %v1536_v45, %v1401_v44  ;;  %v1358_v52 = vor.u32 %v1526_v48, %v1357_v47  ;;  %s1801_s21 = smov 112  }
  0x2c   : > { %701 = vmatpush.bf16.msra.mxu2 %v1426_v33  ;;  %v1389_v53 = vld [vmem:[#allocation2 + $0x50] sm:$0xf]  ;;  %v1533_v54 = vld [vmem:[#allocation2 + $0x58] sm:$0xf0]  ;;  %v1362_v55 = vor.u32 %v1525_v49, %v1359_v50  ;;  %v1345_v56 = vld [vmem:[#allocation2] sm:$0xf] }
  0x2d   : > { %v1523_v57 = vld [vmem:[#allocation2 + $0x8] sm:$0xf0]  ;;  %v1522_v58 = vld [vmem:[#allocation2 + $0x4] sm:$0xf]  ;;  %v1347_v59 = vld [vmem:[#allocation2 + $0xc] sm:$0xf0]  ;;  %v1390_v60 = vor.u32 %v1533_v54, %v1389_v53 }
  0x2e   : > { %677 = vmatpush.bf16.msra.mxu0 %v1394_v22  ;;  %s1341_s1 = sshll.u32 %s2064_s29, 2  ;;  %v1346_v61 = vor.u32 %v1523_v57, %v1345_v56  ;;  %v1377_v62 = vld [vmem:[#allocation2 + $0x38] sm:$0xf]  ;;  %v1530_v63 = vld [vmem:[#allocation2 + $0x40] sm:$0xf0]  ;;  %v1350_v0 = vor.u32 %v1522_v58, %v1347_v59  ;;  %s1802_s22 = smov 120  }
  0x2f   : > { %690 = vmatpush.bf16.msra.mxu1 %v1398_v26  ;;  %s498_s30 = scalar_lea.vmem %s2040_s0, %s1341_s1  ;;  %v1378_v1 = vor.u32 %v1530_v63, %v1377_v62  ;;  %v1365_v3 = vld [vmem:[#allocation2 + $0x20] sm:$0xf]  ;;  %v1527_v4 = vld [vmem:[#allocation2 + $0x28] sm:$0xf0]  ;;  %v1353_v6 = vld [vmem:[#allocation2 + $0x8] sm:$0xf] }
  0x30   : > { %702 = vmatpush.bf16.msra.mxu2 %v1414_v42  ;;  %v1947_v2 = vld [vmem:[%s498_s30] sm:$0xf]  ;;  %v1366_v5 = vor.u32 %v1527_v4, %v1365_v3  ;;  %v1524_v7 = vld [vmem:[#allocation2 + $0x10] sm:$0xf0]  ;;  %s1803_s23 = smov 104   ;;  %vm751_vm1 = vcmask 1043456  }
  0x31   : > { %v1354_v8 = vor.u32 %v1524_v7, %v1353_v6  ;;  %v538_v9 = vld [vmem:[%s2042_s2] sm:$0x7]  ;;  %s1804_s24 = smov 8   ;;  %s1805_s26 = smov 16   ;;  %vm952_vm2 = vcmask 130048   ;;  %vm954_vm3 = vcmask 195584  }
  0x32   : > { %678 = vmatpush.bf16.msra.mxu0 %v1382_v34  ;;  %v541_v10 = vperm.slane %v538_v9, 1  ;;  %v540_v13 = vperm.slane %v538_v9, 0  ;;  %v542_v22 = vperm.slane %v538_v9, 2  ;;  %s1806_s27 = smov 24   ;;  %vm977_vm4 = vcmask 261120  }
  0x33   : > { %691 = vmatpush.bf16.msra.mxu1 %v1386_v38 }
  0x34   : > { %703 = vmatpush.bf16.msra.mxu2 %v1402_v51 }
  0x36   : > { %679 = vmatpush.bf16.msra.mxu0 %v1370_v43 }
  0x37   : > { %692 = vmatpush.bf16.msra.mxu1 %v1374_v46 }
  0x38   : > { %704 = vmatpush.bf16.msra.mxu2 %v1390_v60 }
  0x3a   : > { %680 = vmatpush.bf16.msra.mxu0 %v1358_v52 }
  0x3b   : > { %693 = vmatpush.bf16.msra.mxu1 %v1362_v55 }
  0x3c   : > { %705 = vmatpush.bf16.msra.mxu2 %v1378_v1 }
  0x3e   : > { %681 = vmatpush.bf16.msra.mxu0 %v1346_v61 }
  0x3f   : > { %694 = vmatpush.bf16.msra.mxu1 %v1350_v0 }
  0x40   : > { %706 = vmatpush.bf16.msra.mxu2 %v1366_v5 }
  0x41   : > { %682 = vmatmul.bf16.vlgmr.msra.gmra.mxu0 %v1947_v2 }
  0x42   : > { %695 = vmatmul.bf16.vlgmr.msra.gmra.mxu1 %v1947_v2 }
  0x44   : > { %707 = vmatpush.bf16.msra.mxu2 %v1354_v8 }
  0x47   : > { %708 = vmatmul.bf16.vlgmr.msra.gmra.mxu2 %v1947_v2 }
  0xbe   : > { %v683_v11 = vpop.f32.mrf.mxu0 }
  0xbf   : > { %v696_v12 = vpop.f32.mrf.mxu1  ;;  %v684_v16 = vadd.f32 %v683_v11, %v540_v13 }
  0xc0   : > { %v697_v14 = vadd.f32 %v696_v12, %v541_v10 }
  0xc1   : > { %v713_v20 = vpack.c.bf16 %v684_v16, %v684_v16 }
  0xc2   : > { %v714_v15 = vpack.c.bf16 %v697_v14, %v697_v14 }
  0xc4   : > { %829 = vrot.lane.b32.xlu2 %v714_v15, %s1801_s21  ;;  %772 = vrot.lane.b32.xlu1 %v714_v15, %s1802_s22  ;;  %v721_v17 = vsel %vm716_vm0, %v714_v15, 0 }
  0xc5   : > { %730 = vmatpush.bf16.xpose.msrb.mxu0 %v721_v17 }
  0xc6   : > { %v685_v18 = vpop.f32.mrf.mxu0 }
  0xc7   : > { %v698_v19 = vpop.f32.mrf.mxu1 }
  0xca   : > { %v709_v21 = vpop.f32.mrf.mxu2 }
  0xcb   : > { %v710_v23 = vadd.f32 %v709_v21, %v542_v22 }
  0xcc   : > { %885 = vrot.lane.b32.xlu2 %v714_v15, %s1803_s23  ;;  %769 = vrot.lane.b32.xlu1 %v713_v20, %s1802_s22 }
  0xcd   : > { %1439 = vmatmul.msk.bf16.vlgmr.msrb.gmra.mxu0 %vm716_vm0, %v713_v20  ;;  %v1962_v25 = vpack.c.bf16 %v710_v23, %v710_v23 }
  0xcf   : > { %v753_v26 = vsel %vm751_vm1, %v1962_v25, 0 }
  0xd0   : > { %762 = vmatpush.bf16.msra.mxu3 %v753_v26 }
  0xd2   : > { %v711_v24 = vpop.f32.mrf.mxu2 }
  0xd4   : > { %883 = vrot.lane.b32.xlu1 %v713_v20, %s1803_s23 }
 0x11e   : > { %v830_v27 = vpop.permute.xlu2 %829 }
 0x11f   : > { %v835_v28 = vsel %vm716_vm0, %v830_v27, 0 }
 0x120   : > { %844 = vmatpush.bf16.xpose.msrb.mxu1 %v835_v28 }
 0x126   : > { %v886_v42 = vpop.permute.xlu2 %885 }
 0x127   : > { %v891_v44 = vsel %vm716_vm0, %v886_v42, 0 }
 0x136   : > { %v773_v29 = vpop.permute.xlu1 %772 }
 0x137   : > { %v778_v30 = vsel %vm716_vm0, %v773_v29, 0 }
 0x138   : > { %787 = vmatpush.bf16.xpose.msrb.mxu3 %v778_v30 }
 0x13e   : > { %v770_v46 = vpop.permute.xlu1 %769 }
 0x146   : > { %v884_v47 = vpop.permute.xlu1 %883 }
 0x14a   : > { %v732_v31 = vpop.f32.mrf.mxu0 }
 0x14b   : > { %v736_v32 = vsel %vm716_vm0, %v732_v31, -inf }
 0x14c   : > { %737 = vmax.xlane.f32.xlu0 %v736_v32 }
 0x152   : > { %v734_v33 = vpop.f32.mrf.mxu0 }
 0x1bf   : > { %v738_v34 = vpop.xlane.xlu0 %737 }
 0x1c0   : > { %v739_v35 = vsub.f32 %v732_v31, %v738_v34 }
 0x1c2   : > { %v740_v36 = vmul.f32 1.442695, %v739_v35  ;;  %v1547_v35 = vld [vmem:[#allocation4 + $0x8] sm:$0xff] }
 0x1c3   : > { %987 = vmatpush.bf16.msra.mxu1 %v1547_v35 }
 0x1c4   : > { %1631 = vpow2.f32 %v740_v36  ;;  %v1546_v36 = vld [vmem:[#allocation4] sm:$0xff] }
 0x1c7   : > { %988 = vmatpush.bf16.msra.mxu1 %v1546_v36 }
 0x1ca   : > { %v1632_v37 = vpop.eup %1631 }
 0x1cb   : > { %v742_v38 = vsel %vm716_vm0, %v1632_v37, 0.0 }
 0x1cc   : > { %743 = vadd.xlane.f32.xlu0 %v742_v38 }
 0x1e0   : > { %827 = vrot.lane.b32.xlu0 %v713_v20, %s1801_s21 }
 0x23f   : > { %v744_v39 = vpop.xlane.xlu0 %743 }
 0x240   : > { %1633 = vrcp.f32 %v744_v39 }
 0x246   : > { %v1634_v40 = vpop.eup %1633 }
 0x247   : > { %v746_v41 = vmul.f32 %v1634_v40, %v1632_v37 }
 0x249   : > { %v747_v43 = vpack.c.bf16 %v746_v41, %v746_v41 }
 0x24b   : > { %1440 = vmatmul.msk.bf16.vlgmr.msra.gmra.mxu3 %vm716_vm0, %v747_v43 }
 0x24c   : > { %900 = vmatpush.bf16.xpose.msra.mxu3 %v891_v44  ;;  %v1624_v44 = vld [vmem:[%s2044_s4] ss:$0 sm:$0xff] }
 0x252   : > { %v828_v45 = vpop.permute.xlu0 %827 }
 0x253   : > { %1443 = vmatmul.msk.bf16.vlgmr.msrb.gmra.mxu1 %vm716_vm0, %v828_v45  ;;  %v505_v45 = vunpack.c.l.bf16 %v1947_v2 }
 0x25b   : > { %1441 = vmatmul.msk.bf16.vlgmr.msrb.gmra.mxu3 %vm716_vm0, %v770_v46 }
 0x26b   : > { %1445 = vmatmul.msk.bf16.vlgmr.msra.gmra.mxu3 %vm716_vm0, %v884_v47 }
 0x2ce   : > { %v1976_v48 = vpop.f32.mrf.mxu3 }
 0x2d0   : > { %v846_v49 = vpop.f32.mrf.mxu1 }
 0x2d1   : > { %v850_v50 = vsel %vm716_vm0, %v846_v49, -inf }
 0x2d2   : > { %851 = vmax.xlane.f32.xlu1 %v850_v50 }
 0x2d6   : > { %v766_v51 = vpop.f32.mrf.mxu3 }
 0x2d7   : > { %v1555_v51 = vld [vmem:[#allocation6 + $0x38] sm:$0xff] }
 0x2d8   : > { %v848_v52 = vpop.f32.mrf.mxu1 }
 0x2d9   : > { %v1807_v52 = vmov 32.0  }
 0x2de   : > { %v789_v53 = vpop.f32.mrf.mxu3 }
 0x2df   : > { %v793_v54 = vsel %vm716_vm0, %v789_v53, -inf }
 0x2e0   : > { %794 = vmax.xlane.f32.xlu2 %v793_v54 }
 0x2e6   : > { %v791_v55 = vpop.f32.mrf.mxu3 }
 0x2e7   : > { %v1553_v55 = vld [vmem:[#allocation6 + $0x28] sm:$0xff] }
 0x2ee   : > { %v902_v56 = vpop.f32.mrf.mxu3 }
 0x2ef   : > { %v906_v57 = vsel %vm716_vm0, %v902_v56, -inf }
 0x2f0   : > { %907 = vmax.xlane.f32.xlu0 %v906_v57 }
 0x2f6   : > { %v904_v58 = vpop.f32.mrf.mxu3 }
 0x2f7   : > { %v1551_v58 = vld [vmem:[#allocation6 + $0x18] sm:$0xff] }
 0x304   : > { %862 = vrot.lane.b32.xlu0 %v1962_v25, %s1801_s21 }
 0x345   : > { %v852_v59 = vpop.xlane.xlu1 %851 }
 0x346   : > { %v853_v60 = vsub.f32 %v846_v49, %v852_v59 }
 0x348   : > { %v854_v61 = vmul.f32 1.442695, %v853_v60  ;;  %v1550_v60 = vld [vmem:[#allocation6 + $0x10] sm:$0xff] }
 0x34a   : > { %1635 = vpow2.f32 %v854_v61 }
 0x350   : > { %v1636_v62 = vpop.eup %1635 }
 0x351   : > { %v856_v63 = vsel %vm716_vm0, %v1636_v62, 0.0 }
 0x352   : > { %857 = vadd.xlane.f32.xlu1 %v856_v63  ;;  %v1548_v63 = vld [vmem:[#allocation6] sm:$0xff] }
 0x353   : > { %v795_v0 = vpop.xlane.xlu2 %794 }
 0x354   : > { %v796_v1 = vsub.f32 %v789_v53, %v795_v0  ;;  %v1554_v53 = vld [vmem:[#allocation6 + $0x30] sm:$0xff] }
 0x356   : > { %v797_v3 = vmul.f32 1.442695, %v796_v1 }
 0x358   : > { %1637 = vpow2.f32 %v797_v3 }
 0x35e   : > { %v1638_v4 = vpop.eup %1637 }
 0x35f   : > { %v799_v5 = vsel %vm716_vm0, %v1638_v4, 0.0 }
 0x360   : > { %800 = vadd.xlane.f32.xlu2 %v799_v5 }
 0x363   : > { %v908_v6 = vpop.xlane.xlu0 %907 }
 0x364   : > { %v909_v7 = vsub.f32 %v902_v56, %v908_v6  ;;  %v1552_v56 = vld [vmem:[#allocation6 + $0x20] sm:$0xff] }
 0x366   : > { %v910_v8 = vmul.f32 1.442695, %v909_v7  ;;  %v1563_v7 = vld [vmem:[#allocation7 + $0x38] sm:$0xff] }
 0x367   : > { %1186 = vmatpush.bf16.msrb.mxu3 %v1563_v7 }
 0x368   : > { %1639 = vpow2.f32 %v910_v8 }
 0x36e   : > { %v1640_v9 = vpop.eup %1639 }
 0x36f   : > { %v912_v10 = vsel %vm716_vm0, %v1640_v9, 0.0 }
 0x370   : > { %913 = vadd.xlane.f32.xlu1 %v912_v10 }
 0x376   : > { %v863_v11 = vpop.permute.xlu0 %862 }
 0x377   : > { %v868_v12 = vsel %vm751_vm1, %v863_v11, 0  ;;  %v1561_v11 = vld [vmem:[#allocation7 + $0x28] sm:$0xff] }
 0x378   : > { %806 = vrot.lane.b32.xlu2 %v1962_v25, %s1802_s22  ;;  %877 = vmatpush.bf16.msrb.mxu2 %v868_v12  ;;  %v1560_v12 = vld [vmem:[#allocation7 + $0x20] sm:$0xff] }
 0x37c   : > { %1103 = vmatpush.bf16.msra.mxu2 %v1555_v51 }
 0x380   : > { %1104 = vmatpush.bf16.msra.mxu2 %v1554_v53 }
 0x384   : > { %1105 = vmatpush.bf16.msra.mxu2 %v1553_v55 }
 0x388   : > { %1106 = vmatpush.bf16.msra.mxu2 %v1552_v56  ;;  %v1629_v56 = vld [vmem:[%s2051_s11] ss:$0 sm:$0xff] }
 0x389   : > { %918 = vrot.lane.b32.xlu1 %v1962_v25, %s1803_s23 }
 0x38c   : > { %1107 = vmatpush.bf16.msra.mxu2 %v1551_v58  ;;  %v1630_v58 = vld [vmem:[%s2052_s12] ss:$0 sm:$0xff] }
 0x390   : > { %1108 = vmatpush.bf16.msra.mxu2 %v1550_v60 }
 0x3c5   : > { %v858_v13 = vpop.xlane.xlu1 %857 }
 0x3c6   : > { %1641 = vrcp.f32 %v858_v13 }
 0x3cc   : > { %v1642_v14 = vpop.eup %1641 }
 0x3cd   : > { %v860_v15 = vmul.f32 %v1642_v14, %v1636_v62  ;;  %v1549_v62 = vld [vmem:[#allocation6 + $0x8] sm:$0xff] }
 0x3ce   : > { %1109 = vmatpush.bf16.msra.mxu2 %v1549_v62 }
 0x3cf   : > { %v861_v16 = vpack.c.bf16 %v860_v15, %v860_v15  ;;  %v1559_v15 = vld [vmem:[#allocation7 + $0x18] sm:$0xff] }
 0x3d1   : > { %1444 = vmatmul.msk.bf16.vlgmr.msrb.gmra.mxu2 %vm716_vm0, %v861_v16 }
 0x3d2   : > { %1110 = vmatpush.bf16.msra.mxu2 %v1548_v63 }
 0x3d3   : > { %v801_v17 = vpop.xlane.xlu2 %800 }
 0x3d4   : > { %1643 = vrcp.f32 %v801_v17 }
 0x3da   : > { %v1644_v18 = vpop.eup %1643 }
 0x3db   : > { %v803_v19 = vmul.f32 %v1644_v18, %v1638_v4  ;;  %v807_v20 = vpop.permute.xlu2 %806  ;;  %v1558_v18 = vld [vmem:[#allocation7 + $0x10] sm:$0xff] }
 0x3dc   : > { %v812_v21 = vsel %vm751_vm1, %v807_v20, 0 }
 0x3dd   : > { %v804_v22 = vpack.c.bf16 %v803_v19, %v803_v19  ;;  %821 = vmatpush.bf16.msra.mxu0 %v812_v21 }
 0x3e0   : > { %1442 = vmatmul.msk.bf16.vlgmr.msra.gmra.mxu0 %vm716_vm0, %v804_v22  ;;  %v1625_v22 = vld [vmem:[%s2045_s5] ss:$0 sm:$0xff] }
 0x3e3   : > { %v914_v23 = vpop.xlane.xlu1 %913 }
 0x3e4   : > { %1645 = vrcp.f32 %v914_v23 }
 0x3e5   : > { %1647 = vrcp.f32 %v1807_v52 }
 0x3ea   : > { %v1646_v24 = vpop.eup %1645 }
 0x3eb   : > { %v916_v25 = vmul.f32 %v1646_v24, %v1640_v9  ;;  %v1648_v54 = vpop.eup %1647  ;;  %v1562_v9 = vld [vmem:[#allocation7 + $0x30] sm:$0xff] }
 0x3ec   : > { %v1003_v2 = vmul.f32 32.0, %v1648_v54  ;;  %vm1007_vm5 = vweird.f32 %v1648_v54  ;;  %1187 = vmatpush.bf16.msrb.mxu3 %v1562_v9 }
 0x3ed   : > { %v917_v28 = vpack.c.bf16 %v916_v25, %v916_v25  ;;  %v1626_v25 = vld [vmem:[%s2046_s6] ss:$0 sm:$0xff] }
 0x3ee   : > { %v1004_v57 = vsub.f32 1.0, %v1003_v2 }
 0x3f0   : > { %v1005_v59 = vmul.f32 %v1648_v54, %v1004_v57  ;;  %1188 = vmatpush.bf16.msrb.mxu3 %v1561_v11 }
 0x3f2   : > { %v1006_v61 = vadd.f32 %v1648_v54, %v1005_v59 }
 0x3f4   : > { %v2007_v0 = vsel %vm1007_vm5, %v1648_v54, %v1006_v61  ;;  %1189 = vmatpush.bf16.msrb.mxu3 %v1560_v12 }
 0x3f8   : > { %1190 = vmatpush.bf16.msrb.mxu3 %v1559_v15 }
 0x3fb   : > { %v919_v26 = vpop.permute.xlu1 %918 }
 0x3fc   : > { %v924_v27 = vsel %vm751_vm1, %v919_v26, 0  ;;  %1191 = vmatpush.bf16.msrb.mxu3 %v1558_v18 }
 0x3fd   : > { %933 = vmatpush.bf16.msrb.mxu0 %v924_v27 }
 0x400   : > { %1446 = vmatmul.msk.bf16.vlgmr.msrb.gmra.mxu0 %vm716_vm0, %v917_v28 }
 0x454   : > { %v879_v29 = vpop.f32.mrf.mxu2 }
 0x45c   : > { %v881_v30 = vpop.f32.mrf.mxu2 }
 0x45d   : > { %v823_v31 = vpop.f32.mrf.mxu0  ;;  %v1556_v30 = vld [vmem:[#allocation7] sm:$0xff] }
 0x45e   : > { %940 = vrot.lane.b32.xlu2 %v823_v31, %s1804_s24  ;;  %v1627_v31 = vld [vmem:[%s2048_s8] ss:$0 sm:$0xff] }
 0x465   : > { %v825_v32 = vpop.f32.mrf.mxu0 }
 0x466   : > { %944 = vrot.lane.b32.xlu2 %v879_v29, %s1805_s26  ;;  %v1557_v29 = vld [vmem:[#allocation7 + $0x8] sm:$0xff] }
 0x467   : > { %1192 = vmatpush.bf16.msrb.mxu3 %v1557_v29 }
 0x46b   : > { %1193 = vmatpush.bf16.msrb.mxu3 %v1556_v30 }
 0x47d   : > { %v935_v33 = vpop.f32.mrf.mxu0 }
 0x47e   : > { %948 = vrot.lane.b32.xlu0 %v935_v33, %s1806_s27  ;;  %s502_s27 = scalar_lea.vmem %s2053_s13, %s1341_s1 }
 0x485   : > { %v937_v34 = vpop.f32.mrf.mxu0 }
 0x4b8   : > { %v941_v37 = vpop.permute.xlu2 %940 }
 0x4b9   : > { %v951_v39 = vsel %vm716_vm0, %v1976_v48, %v941_v37  ;;  %v1628_v37 = vld [vmem:[%s2050_s10] ss:$0 sm:$0xff] }
 0x4c0   : > { %v945_v38 = vpop.permute.xlu2 %944 }
 0x4c1   : > { %v953_v40 = vsel %vm952_vm2, %v951_v39, %v945_v38 }
 0x4f0   : > { %v949_v41 = vpop.permute.xlu0 %948 }
 0x4f1   : > { %v955_v42 = vsel %vm954_vm3, %v953_v40, %v949_v41 }
 0x4f2   : > { %v956_v43 = vpack.c.bf16 %v955_v42, %v955_v42 }
 0x4f4   : > { %1455 = vmatmul.msk.bf16.vlgmr.msra.gmra.mxu1 %vm977_vm4, %v956_v43 }
 0x571   : > { %v990_v46 = vpop.f32.mrf.mxu1 }
 0x572   : > { %v991_v47 = vadd.f32 %v1624_v44, %v990_v46 }
 0x574   : > { %v2002_v49 = vadd.f32 %v991_v47, %v505_v45 }
 0x576   : > { %997 = vadd.xlane.f32.xlu2 %v2002_v49  ;;  %v999_v48 = vmul.f32 %v2002_v49, %v2002_v49 }
 0x578   : > { %1000 = vadd.xlane.f32.xlu0 %v999_v48 }
 0x579   : > { %v992_v50 = vpop.f32.mrf.mxu1 }
 0x5e9   : > { %v998_v1 = vpop.xlane.xlu2 %997 }
 0x5ea   : > { %v1009_v3 = vmul.f32 %v2007_v0, %v998_v1 }
 0x5eb   : > { %v1001_v4 = vpop.xlane.xlu0 %1000 }
 0x5ec   : > { %v1011_v5 = vmul.f32 %v1009_v3, %v1009_v3  ;;  %v1010_v6 = vmul.f32 %v2007_v0, %v1001_v4  ;;  %v1013_v21 = vsub.f32 %v2002_v49, %v1009_v3 }
 0x5ee   : > { %v1012_v8 = vsub.f32 %v1010_v6, %v1011_v5 }
 0x5f0   : > { %v1014_v10 = vadd.f32 1e-05, %v1012_v8 }
 0x5f2   : > { %1649 = vrsqrt.f32 %v1014_v10  ;;  %vm1021_vm7 = vweird.f32 %v1014_v10 }
 0x5f8   : > { %v1650_v13 = vpop.eup %1649 }
 0x5f9   : > { %v1016_v14 = vmul.f32 %v1650_v13, %v1014_v10  ;;  %vm1022_vm6 = vweird.f32 %v1650_v13 }
 0x5fa   : > { %vm1023_vm8 = vmor %vm1021_vm7, %vm1022_vm6 }
 0x5fb   : > { %v1017_v16 = vmul.f32 %v1650_v13, %v1016_v14 }
 0x5fd   : > { %v1018_v17 = vmul.f32 0.5, %v1017_v16 }
 0x5ff   : > { %v1019_v19 = vsub.f32 1.5, %v1018_v17 }
 0x601   : > { %v1020_v20 = vmul.f32 %v1650_v13, %v1019_v19 }
 0x603   : > { %v1024_v23 = vsel %vm1023_vm8, %v1650_v13, %v1020_v20 }
 0x604   : > { %v1025_v24 = vmul.f32 %v1024_v23, %v1013_v21 }
 0x606   : > { %v1029_v26 = vmul.f32 %v1625_v22, %v1025_v24 }
 0x608   : > { %v1033_v27 = vadd.f32 %v1626_v25, %v1029_v26 }
 0x60a   : > { %v1034_v28 = vpack.c.bf16 %v1033_v27, %v1033_v27 }
 0x60c   : > { %1111 = vmatmul.bf16.vlgmr.msra.gmra.mxu2 %v1034_v28 }
 0x68f   : > { %v1112_v32 = vpop.f32.mrf.mxu2 }
 0x690   : > { %v1113_v33 = vadd.f32 %v1627_v31, %v1112_v32 }
 0x692   : > { %v1116_v34 = vmax.f32 %v1113_v33, 0.0 }
 0x694   : > { %v1117_v35 = vpack.c.bf16 %v1116_v34, %v1116_v34 }
 0x696   : > { %1194 = vmatmul.bf16.vlgmr.msrb.gmra.mxu3 %v1117_v35 }
 0x697   : > { %v1114_v36 = vpop.f32.mrf.mxu2 }
 0x719   : > { %v1195_v38 = vpop.f32.mrf.mxu3 }
 0x71a   : > { %v1196_v39 = vadd.f32 %v1628_v37, %v1195_v38 }
 0x71c   : > { %v1199_v40 = vadd.f32 %v1196_v39, %v1033_v27 }
 0x71e   : > { %1202 = vadd.xlane.f32.xlu1 %v1199_v40  ;;  %v1204_v41 = vmul.f32 %v1199_v40, %v1199_v40 }
 0x720   : > { %1205 = vadd.xlane.f32.xlu2 %v1204_v41 }
 0x721   : > { %v1197_v42 = vpop.f32.mrf.mxu3 }
 0x791   : > { %v1203_v43 = vpop.xlane.xlu1 %1202 }
 0x792   : > { %v1207_v44 = vmul.f32 %v1203_v43, %v2007_v0 }
 0x793   : > { %v1206_v45 = vpop.xlane.xlu2 %1205 }
 0x794   : > { %v1209_v46 = vmul.f32 %v1207_v44, %v1207_v44  ;;  %v1208_v47 = vmul.f32 %v1206_v45, %v2007_v0  ;;  %v1211_v2 = vsub.f32 %v1199_v40, %v1207_v44 }
 0x796   : > { %v1210_v49 = vsub.f32 %v1208_v47, %v1209_v46 }
 0x798   : > { %v1212_v48 = vadd.f32 1e-05, %v1210_v49 }
 0x79a   : > { %1651 = vrsqrt.f32 %v1212_v48  ;;  %vm1219_vm10 = vweird.f32 %v1212_v48 }
 0x7a0   : > { %v1652_v50 = vpop.eup %1651 }
 0x7a1   : > { %v1214_v51 = vmul.f32 %v1652_v50, %v1212_v48  ;;  %vm1220_vm9 = vweird.f32 %v1652_v50 }
 0x7a2   : > { %vm1221_vm11 = vmor %vm1219_vm10, %vm1220_vm9 }
 0x7a3   : > { %v1215_v52 = vmul.f32 %v1652_v50, %v1214_v51 }
 0x7a5   : > { %v1216_v53 = vmul.f32 0.5, %v1215_v52 }
 0x7a7   : > { %v1217_v54 = vsub.f32 1.5, %v1216_v53 }
 0x7a9   : > { %v1218_v55 = vmul.f32 %v1652_v50, %v1217_v54 }
 0x7ab   : > { %v1222_v57 = vsel %vm1221_vm11, %v1652_v50, %v1218_v55 }
 0x7ac   : > { %v1223_v59 = vmul.f32 %v1222_v57, %v1211_v2 }
 0x7ae   : > { %v1227_v60 = vmul.f32 %v1629_v56, %v1223_v59 }
 0x7b0   : > { %v1231_v61 = vadd.f32 %v1630_v58, %v1227_v60 }
 0x7b2   : > { %v1232_v62 = vpack.c.bf16 %v1231_v61, %v1231_v61 }
 0x7b4   : > { %1233 = vst [vmem:[%s502_s27] sm:$0xf] %v1232_v62 }
 0x7b5 PF: > { %s2062_s14 = sld [smem:[#allocation12_spill]] }
 0x7bb   : > { %s26_s25 = sadd.s32 1, %s2062_s14  }
 0x7bc   : > { %p23_p7 = scmp.ge.s32.totalorder %s26_s25, 4  }
 0x7be   :  { %25 = sbr.rel (!%p23_p7) target bundleno = 6 (0x6), region = 119 }
 0x7c3   :  { %1253 = vsyncpa [#allocation3], 1 }
 0x7c4   :  { %1255 = vsyncpa [#allocation3 + $0x1], 1 }
 0x7c5   :  { %1256 = vsyncpa [#allocation5], 1 }
 0x7c6   :  { %1257 = vsyncpa [#allocation8], 1 }

// kernel: transformer_forward.5
= control target key start
LH: loop header
LB: loop body
LE: loop exit
PB: predicated region body
PF: predicated region fallthrough
CT: control target
= control target key end

     0   :  { %18 = vsyncpa [#allocation3], 0  ;;  %s2087_s0 = inlined_call_operand.vmem [shape: bf16[2,8,128], index: 0, kind: input, shape index: {}]   ;;  %s2088_s1 = inlined_call_operand.vmem [shape: bf16[128,384], index: 1, kind: input, shape index: {}]   ;;  %s2089_s2 = inlined_call_operand.vmem [shape: f32[1,384], index: 2, kind: input, shape index: {}]   ;;  %s2090_s3 = inlined_call_operand.hbm [shape: bf16[128,128], index: 3, kind: input, shape index: {}]   ;;  %s2091_s4 = inlined_call_operand.vmem [shape: f32[1,128], index: 4, kind: input, shape index: {}]   ;;  %s2092_s5 = inlined_call_operand.vmem [shape: f32[1,128], index: 5, kind: input, shape index: {}]   ;;  %s2093_s6 = inlined_call_operand.vmem [shape: f32[1,128], index: 6, kind: input, shape index: {}]   ;;  %s2094_s7 = inlined_call_operand.hbm [shape: bf16[128,128], index: 7, kind: input, shape index: {}]   ;;  %s2095_s8 = inlined_call_operand.vmem [shape: f32[1,128], index: 8, kind: input, shape index: {}]   ;;  %s2096_s9 = inlined_call_operand.hbm [shape: bf16[128,128], index: 9, kind: input, shape index: {}]   ;;  %s2097_s10 = inlined_call_operand.vmem [shape: f32[1,128], index: 10, kind: input, shape index: {}]   ;;  %s2098_s11 = inlined_call_operand.vmem [shape: f32[1,128], index: 11, kind: input, shape index: {}]   ;;  %s2099_s12 = inlined_call_operand.vmem [shape: f32[1,128], index: 12, kind: input, shape index: {}]   ;;  %s2100_s13 = inlined_call_operand.vmem [shape: bf16[2,8,128], index: 13, kind: output, shape index: {}]  }
   0x1   :  { %19 = vsyncpa [#allocation5], 0  ;;  %s1800_s25 = smov 0  }
   0x2 LB: > { %s1806_s26 = sadd.s32 4294967295, %s1716_s25   ;;  %p1303_p0 = scmp.ge.s32.totalorder %s1716_s25, 1  ;;  %s1716_s25 = sphi %s1800_s25, %s25_s25  }
   0x3   : > { %p334_p1 = scmp.lt.s32.totalorder %s1716_s25, 3  ;;  %p1557_p2 = scmp.eq.s32.totalorder %s1806_s26, 0 }
   0x4   : > { %s374_s29 = sshll.u32 %s2094_s7, 4  ;;  %s351_s16 = sshll.u32 %s2090_s3, 4  ;;  %s375_s29 = int_to_ptr.hbm [resolvable:$true] %s374_s29  ;;  %s352_s16 = int_to_ptr.hbm [resolvable:$true] %s351_s16 }
   0x5   : > { %p1814_p3 = pnand %p1303_p0, %p334_p1  ;;  %s1718_s17 = smov [#allocation4]  }
   0x6   : > { %s376_s18 = sshll.u32 %s1718_s17, 4  ;;  %s1719_s19 = smov [#allocation2]   ;;  %s377_s18 = int_to_ptr.vmem [resolvable:$true] %s376_s18 }
   0x7   : > { %p1547_p4 = pneg %p1814_p3  ;;  %s353_s20 = sshll.u32 %s1719_s19, 4  ;;  %s354_s20 = int_to_ptr.vmem [resolvable:$true] %s353_s20 }
   0x8   : > { %s391_s23 = sshll.u32 %s2096_s9, 4  ;;  %s1720_s24 = smov 64   ;;  %s392_s23 = int_to_ptr.hbm [resolvable:$true] %s391_s23 }
   0x9   : > { %p1548_p5 = pnand %p1557_p2, %p1547_p4  ;;  %s1721_s27 = smov 4  }
   0xa   : > { %s1722_s28 = smov [#allocation6]   ;;  %425 = sbr.rel (%p1814_p3) target bundleno = 1960 (0x7a8), region = 72 }
   0xb   : > { %1553 = dma.hbm_to_vmem [thread:$0]  (!%p1548_p5), %s375_s29, 1024, %s377_s18, [#allocation5], %s1720_s24, %s1720_s24, %s1721_s27  }
   0xc   : > { %1550 = dma.hbm_to_vmem [thread:$0]  (!%p1548_p5), %s352_s16, 1024, %s354_s20, [#allocation3], %s1720_s24, %s1720_s24, %s1721_s27  }
   0xd   : > { %s393_s14 = sshll.u32 %s1722_s28, 4  ;;  %s394_s14 = int_to_ptr.vmem [resolvable:$true] %s393_s14 }
   0xe   : > { %1556 = dma.hbm_to_vmem [thread:$0]  (!%p1548_p5), %s392_s23, 1024, %s394_s14, [#allocation5], %s1720_s24, %s1720_s24, %s1721_s27  }
   0xf   : > { %1707 = dma.done.wait (%p1557_p2), [#allocation3], 1024  }
  0x10   : > { %1709 = vsyncadd (%p1557_p2), [#allocation3], 4294966272 }
  0x11   : > { %1711 = dma.done.wait (%p1557_p2), [#allocation5], 2048  }
  0x12   : > { %1713 = vsyncadd (%p1557_p2), [#allocation5], 4294965248  ;;  %v1400_v0 = vld [vmem:[%s2088_s1 + $0xa8] sm:$0xf]  ;;  %v1515_v1 = vld [vmem:[%s2088_s1 + $0xb0] sm:$0xf0] }
  0x13   : > { %v1514_v2 = vld [vmem:[%s2088_s1 + $0xac] sm:$0xf]  ;;  %v1401_v3 = vor.u32 %v1515_v1, %v1400_v0  ;;  %v1402_v4 = vld [vmem:[%s2088_s1 + $0xb4] sm:$0xf0]  ;;  %v1388_v5 = vld [vmem:[%s2088_s1 + $0x90] sm:$0xf] }
  0x14   : > { %v1512_v6 = vld [vmem:[%s2088_s1 + $0x98] sm:$0xf0]  ;;  %v1405_v7 = vor.u32 %v1514_v2, %v1402_v4  ;;  %v1511_v8 = vld [vmem:[%s2088_s1 + $0x94] sm:$0xf]  ;;  %v1390_v9 = vld [vmem:[%s2088_s1 + $0x9c] sm:$0xf0] }
  0x15   : > { %657 = vmatpush.bf16.msra.mxu0 %v1401_v3  ;;  %v1389_v10 = vor.u32 %v1512_v6, %v1388_v5  ;;  %v1393_v11 = vor.u32 %v1511_v8, %v1390_v9  ;;  %v1376_v12 = vld [vmem:[%s2088_s1 + $0x78] sm:$0xf]  ;;  %v1509_v13 = vld [vmem:[%s2088_s1 + $0x80] sm:$0xf0]  ;;  %v1508_v14 = vld [vmem:[%s2088_s1 + $0x7c] sm:$0xf] }
  0x16   : > { %670 = vmatpush.bf16.msra.mxu1 %v1405_v7  ;;  %v1378_v15 = vld [vmem:[%s2088_s1 + $0x84] sm:$0xf0]  ;;  %v1377_v16 = vor.u32 %v1509_v13, %v1376_v12  ;;  %v1364_v18 = vld [vmem:[%s2088_s1 + $0x60] sm:$0xf]  ;;  %v1506_v19 = vld [vmem:[%s2088_s1 + $0x68] sm:$0xf0] }
  0x17   : > { %v1381_v17 = vor.u32 %v1508_v14, %v1378_v15  ;;  %v1505_v20 = vld [vmem:[%s2088_s1 + $0x64] sm:$0xf]  ;;  %v1366_v21 = vld [vmem:[%s2088_s1 + $0x6c] sm:$0xf0]  ;;  %v1365_v22 = vor.u32 %v1506_v19, %v1364_v18  ;;  %v1516_v24 = vld [vmem:[%s2088_s1 + $0xb8] sm:$0xf0] }
  0x18   : > { %v1408_v23 = vld [vmem:[%s2088_s1 + $0xb0] sm:$0xf]  ;;  %v1396_v25 = vld [vmem:[%s2088_s1 + $0x98] sm:$0xf]  ;;  %v1369_v26 = vor.u32 %v1505_v20, %v1366_v21  ;;  %v1352_v27 = vld [vmem:[%s2088_s1 + $0x48] sm:$0xf] }
  0x19   : > { %658 = vmatpush.bf16.msra.mxu0 %v1389_v10  ;;  %v1503_v28 = vld [vmem:[%s2088_s1 + $0x50] sm:$0xf0]  ;;  %v1409_v29 = vor.u32 %v1516_v24, %v1408_v23  ;;  %v1513_v30 = vld [vmem:[%s2088_s1 + $0xa0] sm:$0xf0]  ;;  %v1502_v31 = vld [vmem:[%s2088_s1 + $0x4c] sm:$0xf] }
  0x1a   : > { %671 = vmatpush.bf16.msra.mxu1 %v1393_v11  ;;  %v1354_v32 = vld [vmem:[%s2088_s1 + $0x54] sm:$0xf0]  ;;  %p478_p6 = scmp.lt.s32.totalorder %s1806_s26, 1  ;;  %v1397_v33 = vor.u32 %v1513_v30, %v1396_v25  ;;  %v1353_v34 = vor.u32 %v1503_v28, %v1352_v27  ;;  %v1340_v35 = vld [vmem:[%s2088_s1 + $0x30] sm:$0xf]  ;;  %vm699_vm0 = vcmask 64512  }
  0x1b   : > { %683 = vmatpush.bf16.msra.mxu2 %v1409_v29  ;;  %v1384_v36 = vld [vmem:[%s2088_s1 + $0x80] sm:$0xf]  ;;  %v1510_v37 = vld [vmem:[%s2088_s1 + $0x88] sm:$0xf0]  ;;  %v1357_v38 = vor.u32 %v1502_v31, %v1354_v32  ;;  %v1500_v39 = vld [vmem:[%s2088_s1 + $0x38] sm:$0xf0] }
  0x1c   : > { %v1499_v40 = vld [vmem:[%s2088_s1 + $0x34] sm:$0xf]  ;;  %v1342_v41 = vld [vmem:[%s2088_s1 + $0x3c] sm:$0xf0]  ;;  %v1385_v42 = vor.u32 %v1510_v37, %v1384_v36  ;;  %v1341_v43 = vor.u32 %v1500_v39, %v1340_v35  ;;  %v1372_v44 = vld [vmem:[%s2088_s1 + $0x68] sm:$0xf] }
  0x1d   : > { %659 = vmatpush.bf16.msra.mxu0 %v1377_v16  ;;  %v1507_v45 = vld [vmem:[%s2088_s1 + $0x70] sm:$0xf0]  ;;  %v1345_v46 = vor.u32 %v1499_v40, %v1342_v41  ;;  %v1328_v47 = vld [vmem:[%s2088_s1 + $0x18] sm:$0xf]  ;;  %v1497_v48 = vld [vmem:[%s2088_s1 + $0x20] sm:$0xf0] }
  0x1e   : > { %672 = vmatpush.bf16.msra.mxu1 %v1381_v17  ;;  %v1496_v49 = vld [vmem:[%s2088_s1 + $0x1c] sm:$0xf]  ;;  %v1330_v50 = vld [vmem:[%s2088_s1 + $0x24] sm:$0xf0]  ;;  %s2103_s26 = smov (!%p478_p6, %s1806_s26), 1  ;;  %v1373_v51 = vor.u32 %v1507_v45, %v1372_v44  ;;  %v1329_v52 = vor.u32 %v1497_v48, %v1328_v47  ;;  %s1723_s28 = smov 112  }
  0x1f   : > { %684 = vmatpush.bf16.msra.mxu2 %v1397_v33  ;;  %v1360_v53 = vld [vmem:[%s2088_s1 + $0x50] sm:$0xf]  ;;  %v1504_v54 = vld [vmem:[%s2088_s1 + $0x58] sm:$0xf0]  ;;  %v1333_v55 = vor.u32 %v1496_v49, %v1330_v50  ;;  %v1316_v56 = vld [vmem:[%s2088_s1] sm:$0xf] }
  0x20   : > { %v1494_v57 = vld [vmem:[%s2088_s1 + $0x8] sm:$0xf0]  ;;  %v1493_v58 = vld [vmem:[%s2088_s1 + $0x4] sm:$0xf]  ;;  %v1318_v59 = vld [vmem:[%s2088_s1 + $0xc] sm:$0xf0]  ;;  %v1361_v60 = vor.u32 %v1504_v54, %v1360_v53 }
  0x21   : > { %660 = vmatpush.bf16.msra.mxu0 %v1365_v22  ;;  %s1312_s22 = sshll.u32 %s2103_s26, 2  ;;  %v1317_v61 = vor.u32 %v1494_v57, %v1316_v56  ;;  %v1348_v62 = vld [vmem:[%s2088_s1 + $0x38] sm:$0xf]  ;;  %v1501_v63 = vld [vmem:[%s2088_s1 + $0x40] sm:$0xf0]  ;;  %v1321_v0 = vor.u32 %v1493_v58, %v1318_v59  ;;  %s1724_s14 = smov 120  }
  0x22   : > { %673 = vmatpush.bf16.msra.mxu1 %v1369_v26  ;;  %s481_s15 = scalar_lea.vmem %s2087_s0, %s1312_s22  ;;  %v1349_v1 = vor.u32 %v1501_v63, %v1348_v62  ;;  %v1336_v3 = vld [vmem:[%s2088_s1 + $0x20] sm:$0xf]  ;;  %v1498_v4 = vld [vmem:[%s2088_s1 + $0x28] sm:$0xf0]  ;;  %v1324_v6 = vld [vmem:[%s2088_s1 + $0x8] sm:$0xf]  ;;  %s485_s19 = scalar_lea.vmem %s2100_s13, %s1312_s22 }
  0x23   : > { %685 = vmatpush.bf16.msra.mxu2 %v1385_v42  ;;  %v1982_v2 = vld [vmem:[%s481_s15] sm:$0xf]  ;;  %v1337_v5 = vor.u32 %v1498_v4, %v1336_v3  ;;  %v1495_v7 = vld [vmem:[%s2088_s1 + $0x10] sm:$0xf0]  ;;  %s1725_s29 = smov 104   ;;  %vm734_vm1 = vcmask 1043456  }
  0x24   : > { %v1325_v8 = vor.u32 %v1495_v7, %v1324_v6  ;;  %v521_v9 = vld [vmem:[%s2089_s2] sm:$0x7]  ;;  %s1726_s15 = smov 8   ;;  %s1727_s16 = smov 16   ;;  %vm935_vm2 = vcmask 130048   ;;  %vm937_vm3 = vcmask 195584  }
  0x25   : > { %661 = vmatpush.bf16.msra.mxu0 %v1353_v34  ;;  %v524_v10 = vperm.slane %v521_v9, 1  ;;  %v523_v13 = vperm.slane %v521_v9, 0  ;;  %v525_v22 = vperm.slane %v521_v9, 2  ;;  %s1728_s17 = smov 24   ;;  %vm960_vm4 = vcmask 261120  }
  0x26   : > { %674 = vmatpush.bf16.msra.mxu1 %v1357_v38 }
  0x27   : > { %686 = vmatpush.bf16.msra.mxu2 %v1373_v51 }
  0x29   : > { %662 = vmatpush.bf16.msra.mxu0 %v1341_v43 }
  0x2a   : > { %675 = vmatpush.bf16.msra.mxu1 %v1345_v46 }
  0x2b   : > { %687 = vmatpush.bf16.msra.mxu2 %v1361_v60 }
  0x2d   : > { %663 = vmatpush.bf16.msra.mxu0 %v1329_v52 }
  0x2e   : > { %676 = vmatpush.bf16.msra.mxu1 %v1333_v55 }
  0x2f   : > { %688 = vmatpush.bf16.msra.mxu2 %v1349_v1 }
  0x31   : > { %664 = vmatpush.bf16.msra.mxu0 %v1317_v61 }
  0x32   : > { %677 = vmatpush.bf16.msra.mxu1 %v1321_v0 }
  0x33   : > { %689 = vmatpush.bf16.msra.mxu2 %v1337_v5 }
  0x34   : > { %665 = vmatmul.bf16.vlgmr.msra.gmra.mxu0 %v1982_v2 }
  0x35   : > { %678 = vmatmul.bf16.vlgmr.msra.gmra.mxu1 %v1982_v2 }
  0x37   : > { %690 = vmatpush.bf16.msra.mxu2 %v1325_v8 }
  0x3a   : > { %691 = vmatmul.bf16.vlgmr.msra.gmra.mxu2 %v1982_v2 }
  0xb1   : > { %v666_v11 = vpop.f32.mrf.mxu0 }
  0xb2   : > { %v679_v12 = vpop.f32.mrf.mxu1  ;;  %v667_v16 = vadd.f32 %v666_v11, %v523_v13 }
  0xb3   : > { %v680_v14 = vadd.f32 %v679_v12, %v524_v10 }
  0xb4   : > { %v696_v20 = vpack.c.bf16 %v667_v16, %v667_v16 }
  0xb5   : > { %v697_v15 = vpack.c.bf16 %v680_v14, %v680_v14 }
  0xb7   : > { %812 = vrot.lane.b32.xlu2 %v697_v15, %s1723_s28  ;;  %755 = vrot.lane.b32.xlu1 %v697_v15, %s1724_s14  ;;  %v704_v17 = vsel %vm699_vm0, %v697_v15, 0 }
  0xb8   : > { %713 = vmatpush.bf16.xpose.msrb.mxu0 %v704_v17 }
  0xb9   : > { %v668_v18 = vpop.f32.mrf.mxu0 }
  0xba   : > { %v681_v19 = vpop.f32.mrf.mxu1 }
  0xbd   : > { %v692_v21 = vpop.f32.mrf.mxu2 }
  0xbe   : > { %v693_v23 = vadd.f32 %v692_v21, %v525_v22 }
  0xbf   : > { %868 = vrot.lane.b32.xlu2 %v697_v15, %s1725_s29  ;;  %752 = vrot.lane.b32.xlu1 %v696_v20, %s1724_s14 }
  0xc0   : > { %1410 = vmatmul.msk.bf16.vlgmr.msrb.gmra.mxu0 %vm699_vm0, %v696_v20  ;;  %v2009_v25 = vpack.c.bf16 %v693_v23, %v693_v23 }
  0xc2   : > { %v736_v26 = vsel %vm734_vm1, %v2009_v25, 0 }
  0xc3   : > { %745 = vmatpush.bf16.msra.mxu3 %v736_v26 }
  0xc5   : > { %v694_v24 = vpop.f32.mrf.mxu2 }
  0xc7   : > { %866 = vrot.lane.b32.xlu1 %v696_v20, %s1725_s29 }
 0x111   : > { %v813_v27 = vpop.permute.xlu2 %812 }
 0x112   : > { %v818_v28 = vsel %vm699_vm0, %v813_v27, 0 }
 0x113   : > { %827 = vmatpush.bf16.xpose.msrb.mxu1 %v818_v28 }
 0x119   : > { %v869_v42 = vpop.permute.xlu2 %868 }
 0x11a   : > { %v874_v44 = vsel %vm699_vm0, %v869_v42, 0 }
 0x129   : > { %v756_v29 = vpop.permute.xlu1 %755 }
 0x12a   : > { %v761_v30 = vsel %vm699_vm0, %v756_v29, 0 }
 0x12b   : > { %770 = vmatpush.bf16.xpose.msrb.mxu3 %v761_v30 }
 0x131   : > { %v753_v46 = vpop.permute.xlu1 %752 }
 0x139   : > { %v867_v47 = vpop.permute.xlu1 %866 }
 0x13d   : > { %v715_v31 = vpop.f32.mrf.mxu0 }
 0x13e   : > { %v719_v32 = vsel %vm699_vm0, %v715_v31, -inf }
 0x13f   : > { %720 = vmax.xlane.f32.xlu0 %v719_v32 }
 0x145   : > { %v717_v33 = vpop.f32.mrf.mxu0 }
 0x1b2   : > { %v721_v34 = vpop.xlane.xlu0 %720 }
 0x1b3   : > { %v722_v35 = vsub.f32 %v715_v31, %v721_v34 }
 0x1b5   : > { %v723_v36 = vmul.f32 1.442695, %v722_v35  ;;  %v1518_v35 = vld [vmem:[#allocation2 + $0x8] sm:$0xff] }
 0x1b6   : > { %970 = vmatpush.bf16.msra.mxu1 %v1518_v35 }
 0x1b7   : > { %1590 = vpow2.f32 %v723_v36  ;;  %v1517_v36 = vld [vmem:[#allocation2] sm:$0xff] }
 0x1ba   : > { %971 = vmatpush.bf16.msra.mxu1 %v1517_v36 }
 0x1bd   : > { %v1591_v37 = vpop.eup %1590 }
 0x1be   : > { %v725_v38 = vsel %vm699_vm0, %v1591_v37, 0.0 }
 0x1bf   : > { %726 = vadd.xlane.f32.xlu0 %v725_v38 }
 0x1d3   : > { %810 = vrot.lane.b32.xlu0 %v696_v20, %s1723_s28 }
 0x232   : > { %v727_v39 = vpop.xlane.xlu0 %726 }
 0x233   : > { %1592 = vrcp.f32 %v727_v39 }
 0x239   : > { %v1593_v40 = vpop.eup %1592 }
 0x23a   : > { %v729_v41 = vmul.f32 %v1593_v40, %v1591_v37 }
 0x23c   : > { %v730_v43 = vpack.c.bf16 %v729_v41, %v729_v41 }
 0x23e   : > { %1411 = vmatmul.msk.bf16.vlgmr.msra.gmra.mxu3 %vm699_vm0, %v730_v43 }
 0x23f   : > { %883 = vmatpush.bf16.xpose.msra.mxu3 %v874_v44  ;;  %v1583_v44 = vld [vmem:[%s2091_s4] ss:$0 sm:$0xff] }
 0x245   : > { %v811_v45 = vpop.permute.xlu0 %810 }
 0x246   : > { %1414 = vmatmul.msk.bf16.vlgmr.msrb.gmra.mxu1 %vm699_vm0, %v811_v45  ;;  %v488_v45 = vunpack.c.l.bf16 %v1982_v2 }
 0x24e   : > { %1412 = vmatmul.msk.bf16.vlgmr.msrb.gmra.mxu3 %vm699_vm0, %v753_v46 }
 0x25e   : > { %1416 = vmatmul.msk.bf16.vlgmr.msra.gmra.mxu3 %vm699_vm0, %v867_v47 }
 0x2c1   : > { %v2023_v48 = vpop.f32.mrf.mxu3 }
 0x2c3   : > { %v829_v49 = vpop.f32.mrf.mxu1 }
 0x2c4   : > { %v833_v50 = vsel %vm699_vm0, %v829_v49, -inf }
 0x2c5   : > { %834 = vmax.xlane.f32.xlu1 %v833_v50 }
 0x2c9   : > { %v749_v51 = vpop.f32.mrf.mxu3 }
 0x2ca   : > { %v1526_v51 = vld [vmem:[#allocation4 + $0x38] sm:$0xff] }
 0x2cb   : > { %v831_v52 = vpop.f32.mrf.mxu1 }
 0x2cc   : > { %v1729_v52 = vmov 32.0  }
 0x2d1   : > { %v772_v53 = vpop.f32.mrf.mxu3 }
 0x2d2   : > { %v776_v54 = vsel %vm699_vm0, %v772_v53, -inf }
 0x2d3   : > { %777 = vmax.xlane.f32.xlu2 %v776_v54 }
 0x2d9   : > { %v774_v55 = vpop.f32.mrf.mxu3 }
 0x2da   : > { %v1524_v55 = vld [vmem:[#allocation4 + $0x28] sm:$0xff] }
 0x2e1   : > { %v885_v56 = vpop.f32.mrf.mxu3 }
 0x2e2   : > { %v889_v57 = vsel %vm699_vm0, %v885_v56, -inf }
 0x2e3   : > { %890 = vmax.xlane.f32.xlu0 %v889_v57 }
 0x2e9   : > { %v887_v58 = vpop.f32.mrf.mxu3 }
 0x2ea   : > { %v1522_v58 = vld [vmem:[#allocation4 + $0x18] sm:$0xff] }
 0x2f7   : > { %845 = vrot.lane.b32.xlu0 %v2009_v25, %s1723_s28 }
 0x338   : > { %v835_v59 = vpop.xlane.xlu1 %834 }
 0x339   : > { %v836_v60 = vsub.f32 %v829_v49, %v835_v59 }
 0x33b   : > { %v837_v61 = vmul.f32 1.442695, %v836_v60  ;;  %v1521_v60 = vld [vmem:[#allocation4 + $0x10] sm:$0xff] }
 0x33d   : > { %1594 = vpow2.f32 %v837_v61 }
 0x343   : > { %v1595_v62 = vpop.eup %1594 }
 0x344   : > { %v839_v63 = vsel %vm699_vm0, %v1595_v62, 0.0 }
 0x345   : > { %840 = vadd.xlane.f32.xlu1 %v839_v63  ;;  %v1519_v63 = vld [vmem:[#allocation4] sm:$0xff] }
 0x346   : > { %v778_v0 = vpop.xlane.xlu2 %777 }
 0x347   : > { %v779_v1 = vsub.f32 %v772_v53, %v778_v0  ;;  %v1525_v53 = vld [vmem:[#allocation4 + $0x30] sm:$0xff] }
 0x349   : > { %v780_v3 = vmul.f32 1.442695, %v779_v1 }
 0x34b   : > { %1596 = vpow2.f32 %v780_v3 }
 0x351   : > { %v1597_v4 = vpop.eup %1596 }
 0x352   : > { %v782_v5 = vsel %vm699_vm0, %v1597_v4, 0.0 }
 0x353   : > { %783 = vadd.xlane.f32.xlu2 %v782_v5 }
 0x356   : > { %v891_v6 = vpop.xlane.xlu0 %890 }
 0x357   : > { %v892_v7 = vsub.f32 %v885_v56, %v891_v6  ;;  %v1523_v56 = vld [vmem:[#allocation4 + $0x20] sm:$0xff] }
 0x359   : > { %v893_v8 = vmul.f32 1.442695, %v892_v7  ;;  %v1534_v7 = vld [vmem:[#allocation6 + $0x38] sm:$0xff] }
 0x35a   : > { %1169 = vmatpush.bf16.msrb.mxu3 %v1534_v7 }
 0x35b   : > { %1598 = vpow2.f32 %v893_v8 }
 0x361   : > { %v1599_v9 = vpop.eup %1598 }
 0x362   : > { %v895_v10 = vsel %vm699_vm0, %v1599_v9, 0.0 }
 0x363   : > { %896 = vadd.xlane.f32.xlu1 %v895_v10 }
 0x369   : > { %v846_v11 = vpop.permute.xlu0 %845 }
 0x36a   : > { %v851_v12 = vsel %vm734_vm1, %v846_v11, 0  ;;  %v1532_v11 = vld [vmem:[#allocation6 + $0x28] sm:$0xff] }
 0x36b   : > { %789 = vrot.lane.b32.xlu2 %v2009_v25, %s1724_s14  ;;  %860 = vmatpush.bf16.msrb.mxu2 %v851_v12  ;;  %v1531_v12 = vld [vmem:[#allocation6 + $0x20] sm:$0xff] }
 0x36f   : > { %1086 = vmatpush.bf16.msra.mxu2 %v1526_v51 }
 0x373   : > { %1087 = vmatpush.bf16.msra.mxu2 %v1525_v53 }
 0x377   : > { %1088 = vmatpush.bf16.msra.mxu2 %v1524_v55 }
 0x37b   : > { %1089 = vmatpush.bf16.msra.mxu2 %v1523_v56  ;;  %v1588_v56 = vld [vmem:[%s2098_s11] ss:$0 sm:$0xff] }
 0x37c   : > { %901 = vrot.lane.b32.xlu1 %v2009_v25, %s1725_s29 }
 0x37f   : > { %1090 = vmatpush.bf16.msra.mxu2 %v1522_v58  ;;  %v1589_v58 = vld [vmem:[%s2099_s12] ss:$0 sm:$0xff] }
 0x383   : > { %1091 = vmatpush.bf16.msra.mxu2 %v1521_v60 }
 0x3b8   : > { %v841_v13 = vpop.xlane.xlu1 %840 }
 0x3b9   : > { %1600 = vrcp.f32 %v841_v13 }
 0x3bf   : > { %v1601_v14 = vpop.eup %1600 }
 0x3c0   : > { %v843_v15 = vmul.f32 %v1601_v14, %v1595_v62  ;;  %v1520_v62 = vld [vmem:[#allocation4 + $0x8] sm:$0xff] }
 0x3c1   : > { %1092 = vmatpush.bf16.msra.mxu2 %v1520_v62 }
 0x3c2   : > { %v844_v16 = vpack.c.bf16 %v843_v15, %v843_v15  ;;  %v1530_v15 = vld [vmem:[#allocation6 + $0x18] sm:$0xff] }
 0x3c4   : > { %1415 = vmatmul.msk.bf16.vlgmr.msrb.gmra.mxu2 %vm699_vm0, %v844_v16 }
 0x3c5   : > { %1093 = vmatpush.bf16.msra.mxu2 %v1519_v63 }
 0x3c6   : > { %v784_v17 = vpop.xlane.xlu2 %783 }
 0x3c7   : > { %1602 = vrcp.f32 %v784_v17 }
 0x3cd   : > { %v1603_v18 = vpop.eup %1602 }
 0x3ce   : > { %v786_v19 = vmul.f32 %v1603_v18, %v1597_v4  ;;  %v790_v20 = vpop.permute.xlu2 %789  ;;  %v1529_v18 = vld [vmem:[#allocation6 + $0x10] sm:$0xff] }
 0x3cf   : > { %v795_v21 = vsel %vm734_vm1, %v790_v20, 0 }
 0x3d0   : > { %v787_v22 = vpack.c.bf16 %v786_v19, %v786_v19  ;;  %804 = vmatpush.bf16.msra.mxu0 %v795_v21 }
 0x3d3   : > { %1413 = vmatmul.msk.bf16.vlgmr.msra.gmra.mxu0 %vm699_vm0, %v787_v22  ;;  %v1584_v22 = vld [vmem:[%s2092_s5] ss:$0 sm:$0xff] }
 0x3d6   : > { %v897_v23 = vpop.xlane.xlu1 %896 }
 0x3d7   : > { %1604 = vrcp.f32 %v897_v23 }
 0x3d8   : > { %1606 = vrcp.f32 %v1729_v52 }
 0x3dd   : > { %v1605_v24 = vpop.eup %1604 }
 0x3de   : > { %v899_v25 = vmul.f32 %v1605_v24, %v1599_v9  ;;  %v1607_v54 = vpop.eup %1606  ;;  %v1533_v9 = vld [vmem:[#allocation6 + $0x30] sm:$0xff] }
 0x3df   : > { %v986_v2 = vmul.f32 32.0, %v1607_v54  ;;  %vm990_vm5 = vweird.f32 %v1607_v54  ;;  %1170 = vmatpush.bf16.msrb.mxu3 %v1533_v9 }
 0x3e0   : > { %v900_v28 = vpack.c.bf16 %v899_v25, %v899_v25  ;;  %v1585_v25 = vld [vmem:[%s2093_s6] ss:$0 sm:$0xff] }
 0x3e1   : > { %v987_v57 = vsub.f32 1.0, %v986_v2 }
 0x3e3   : > { %v988_v59 = vmul.f32 %v1607_v54, %v987_v57  ;;  %1171 = vmatpush.bf16.msrb.mxu3 %v1532_v11 }
 0x3e5   : > { %v989_v61 = vadd.f32 %v1607_v54, %v988_v59 }
 0x3e7   : > { %v2054_v0 = vsel %vm990_vm5, %v1607_v54, %v989_v61  ;;  %1172 = vmatpush.bf16.msrb.mxu3 %v1531_v12 }
 0x3eb   : > { %1173 = vmatpush.bf16.msrb.mxu3 %v1530_v15 }
 0x3ee   : > { %v902_v26 = vpop.permute.xlu1 %901 }
 0x3ef   : > { %v907_v27 = vsel %vm734_vm1, %v902_v26, 0  ;;  %1174 = vmatpush.bf16.msrb.mxu3 %v1529_v18 }
 0x3f0   : > { %916 = vmatpush.bf16.msrb.mxu0 %v907_v27 }
 0x3f3   : > { %1417 = vmatmul.msk.bf16.vlgmr.msrb.gmra.mxu0 %vm699_vm0, %v900_v28 }
 0x447   : > { %v862_v29 = vpop.f32.mrf.mxu2 }
 0x44f   : > { %v864_v30 = vpop.f32.mrf.mxu2 }
 0x450   : > { %v806_v31 = vpop.f32.mrf.mxu0  ;;  %v1527_v30 = vld [vmem:[#allocation6] sm:$0xff] }
 0x451   : > { %923 = vrot.lane.b32.xlu2 %v806_v31, %s1726_s15  ;;  %v1586_v31 = vld [vmem:[%s2095_s8] ss:$0 sm:$0xff] }
 0x458   : > { %v808_v32 = vpop.f32.mrf.mxu0 }
 0x459   : > { %927 = vrot.lane.b32.xlu2 %v862_v29, %s1727_s16  ;;  %v1528_v29 = vld [vmem:[#allocation6 + $0x8] sm:$0xff] }
 0x45a   : > { %1175 = vmatpush.bf16.msrb.mxu3 %v1528_v29 }
 0x45e   : > { %1176 = vmatpush.bf16.msrb.mxu3 %v1527_v30 }
 0x470   : > { %v918_v33 = vpop.f32.mrf.mxu0 }
 0x471   : > { %931 = vrot.lane.b32.xlu0 %v918_v33, %s1728_s17 }
 0x478   : > { %v920_v34 = vpop.f32.mrf.mxu0 }
 0x4ab   : > { %v924_v37 = vpop.permute.xlu2 %923 }
 0x4ac   : > { %v934_v39 = vsel %vm699_vm0, %v2023_v48, %v924_v37  ;;  %v1587_v37 = vld [vmem:[%s2097_s10] ss:$0 sm:$0xff] }
 0x4b3   : > { %v928_v38 = vpop.permute.xlu2 %927 }
 0x4b4   : > { %v936_v40 = vsel %vm935_vm2, %v934_v39, %v928_v38 }
 0x4e3   : > { %v932_v41 = vpop.permute.xlu0 %931 }
 0x4e4   : > { %v938_v42 = vsel %vm937_vm3, %v936_v40, %v932_v41 }
 0x4e5   : > { %v939_v43 = vpack.c.bf16 %v938_v42, %v938_v42 }
 0x4e7   : > { %1426 = vmatmul.msk.bf16.vlgmr.msra.gmra.mxu1 %vm960_vm4, %v939_v43 }
 0x564   : > { %v973_v46 = vpop.f32.mrf.mxu1 }
 0x565   : > { %v974_v47 = vadd.f32 %v1583_v44, %v973_v46 }
 0x567   : > { %v2049_v49 = vadd.f32 %v974_v47, %v488_v45 }
 0x569   : > { %980 = vadd.xlane.f32.xlu2 %v2049_v49  ;;  %v982_v48 = vmul.f32 %v2049_v49, %v2049_v49 }
 0x56b   : > { %983 = vadd.xlane.f32.xlu0 %v982_v48 }
 0x56c   : > { %v975_v50 = vpop.f32.mrf.mxu1 }
 0x5dc   : > { %v981_v1 = vpop.xlane.xlu2 %980 }
 0x5dd   : > { %v992_v3 = vmul.f32 %v2054_v0, %v981_v1 }
 0x5de   : > { %v984_v4 = vpop.xlane.xlu0 %983 }
 0x5df   : > { %v994_v5 = vmul.f32 %v992_v3, %v992_v3  ;;  %v993_v6 = vmul.f32 %v2054_v0, %v984_v4  ;;  %v996_v21 = vsub.f32 %v2049_v49, %v992_v3 }
 0x5e1   : > { %v995_v8 = vsub.f32 %v993_v6, %v994_v5 }
 0x5e3   : > { %v997_v10 = vadd.f32 1e-05, %v995_v8 }
 0x5e5   : > { %1608 = vrsqrt.f32 %v997_v10  ;;  %vm1004_vm7 = vweird.f32 %v997_v10 }
 0x5eb   : > { %v1609_v13 = vpop.eup %1608 }
 0x5ec   : > { %v999_v14 = vmul.f32 %v1609_v13, %v997_v10  ;;  %vm1005_vm6 = vweird.f32 %v1609_v13 }
 0x5ed   : > { %vm1006_vm8 = vmor %vm1004_vm7, %vm1005_vm6 }
 0x5ee   : > { %v1000_v16 = vmul.f32 %v1609_v13, %v999_v14 }
 0x5f0   : > { %v1001_v17 = vmul.f32 0.5, %v1000_v16 }
 0x5f2   : > { %v1002_v19 = vsub.f32 1.5, %v1001_v17 }
 0x5f4   : > { %v1003_v20 = vmul.f32 %v1609_v13, %v1002_v19 }
 0x5f6   : > { %v1007_v23 = vsel %vm1006_vm8, %v1609_v13, %v1003_v20 }
 0x5f7   : > { %v1008_v24 = vmul.f32 %v1007_v23, %v996_v21 }
 0x5f9   : > { %v1012_v26 = vmul.f32 %v1584_v22, %v1008_v24 }
 0x5fb   : > { %v1016_v27 = vadd.f32 %v1585_v25, %v1012_v26 }
 0x5fd   : > { %v1017_v28 = vpack.c.bf16 %v1016_v27, %v1016_v27 }
 0x5ff   : > { %1094 = vmatmul.bf16.vlgmr.msra.gmra.mxu2 %v1017_v28 }
 0x682   : > { %v1095_v32 = vpop.f32.mrf.mxu2 }
 0x683   : > { %v1096_v33 = vadd.f32 %v1586_v31, %v1095_v32 }
 0x685   : > { %v1099_v34 = vmax.f32 %v1096_v33, 0.0 }
 0x687   : > { %v1100_v35 = vpack.c.bf16 %v1099_v34, %v1099_v34 }
 0x689   : > { %1177 = vmatmul.bf16.vlgmr.msrb.gmra.mxu3 %v1100_v35 }
 0x68a   : > { %v1097_v36 = vpop.f32.mrf.mxu2 }
 0x70c   : > { %v1178_v38 = vpop.f32.mrf.mxu3 }
 0x70d   : > { %v1179_v39 = vadd.f32 %v1587_v37, %v1178_v38 }
 0x70f   : > { %v1182_v40 = vadd.f32 %v1179_v39, %v1016_v27 }
 0x711   : > { %1185 = vadd.xlane.f32.xlu1 %v1182_v40  ;;  %v1187_v41 = vmul.f32 %v1182_v40, %v1182_v40 }
 0x713   : > { %1188 = vadd.xlane.f32.xlu2 %v1187_v41 }
 0x714   : > { %v1180_v42 = vpop.f32.mrf.mxu3 }
 0x784   : > { %v1186_v43 = vpop.xlane.xlu1 %1185 }
 0x785   : > { %v1190_v44 = vmul.f32 %v1186_v43, %v2054_v0 }
 0x786   : > { %v1189_v45 = vpop.xlane.xlu2 %1188 }
 0x787   : > { %v1192_v46 = vmul.f32 %v1190_v44, %v1190_v44  ;;  %v1191_v47 = vmul.f32 %v1189_v45, %v2054_v0  ;;  %v1194_v2 = vsub.f32 %v1182_v40, %v1190_v44 }
 0x789   : > { %v1193_v49 = vsub.f32 %v1191_v47, %v1192_v46 }
 0x78b   : > { %v1195_v48 = vadd.f32 1e-05, %v1193_v49 }
 0x78d   : > { %1610 = vrsqrt.f32 %v1195_v48  ;;  %vm1202_vm10 = vweird.f32 %v1195_v48 }
 0x793   : > { %v1611_v50 = vpop.eup %1610 }
 0x794   : > { %v1197_v51 = vmul.f32 %v1611_v50, %v1195_v48  ;;  %vm1203_vm9 = vweird.f32 %v1611_v50 }
 0x795   : > { %vm1204_vm11 = vmor %vm1202_vm10, %vm1203_vm9 }
 0x796   : > { %v1198_v52 = vmul.f32 %v1611_v50, %v1197_v51 }
 0x798   : > { %v1199_v53 = vmul.f32 0.5, %v1198_v52 }
 0x79a   : > { %v1200_v54 = vsub.f32 1.5, %v1199_v53 }
 0x79c   : > { %v1201_v55 = vmul.f32 %v1611_v50, %v1200_v54 }
 0x79e   : > { %v1205_v57 = vsel %vm1204_vm11, %v1611_v50, %v1201_v55 }
 0x79f   : > { %v1206_v59 = vmul.f32 %v1205_v57, %v1194_v2 }
 0x7a1   : > { %v1210_v60 = vmul.f32 %v1588_v56, %v1206_v59 }
 0x7a3   : > { %v1214_v61 = vadd.f32 %v1589_v58, %v1210_v60 }
 0x7a5   : > { %v1215_v62 = vpack.c.bf16 %v1214_v61, %v1214_v61 }
 0x7a7   : > { %1216 = vst [vmem:[%s485_s19] sm:$0xf] %v1215_v62 }
 0x7a8 PF: > { %s25_s25 = sadd.s32 1, %s1716_s25  }
 0x7a9   : > { %p22_p7 = scmp.ge.s32.totalorder %s25_s25, 4  }
 0x7ab   :  { %24 = sbr.rel (!%p22_p7) target bundleno = 2 (0x2), region = 115 }
 0x7b0   :  { %1236 = vsyncpa [#allocation3], 1 }
 0x7b1   :  { %1238 = vsyncpa [#allocation3 + $0x1], 1 }
 0x7b2   :  { %1239 = vsyncpa [#allocation5], 1 }

// kernel: transformer_forward.7
= control target key start
LH: loop header
LB: loop body
LE: loop exit
PB: predicated region body
PF: predicated region fallthrough
CT: control target
= control target key end

     0   :  { %s3391_s0 = inlined_call_operand.vmem [shape: bf16[2,8,128], index: 0, kind: input, shape index: {}]   ;;  %s3392_s1 = inlined_call_operand.vmem [shape: bf16[2,8,128], index: 1, kind: input, shape index: {}]   ;;  %s3393_s2 = inlined_call_operand.hbm [shape: bf16[128,384], index: 2, kind: input, shape index: {}]   ;;  %s3394_s3 = inlined_call_operand.vmem [shape: f32[1,384], index: 3, kind: input, shape index: {}]   ;;  %s3395_s4 = inlined_call_operand.hbm [shape: bf16[128,128], index: 4, kind: input, shape index: {}]   ;;  %s3396_s5 = inlined_call_operand.vmem [shape: f32[1,128], index: 5, kind: input, shape index: {}]   ;;  %s3397_s6 = inlined_call_operand.vmem [shape: f32[1,128], index: 6, kind: input, shape index: {}]   ;;  %s3398_s7 = inlined_call_operand.vmem [shape: f32[1,128], index: 7, kind: input, shape index: {}]   ;;  %s3399_s8 = inlined_call_operand.hbm [shape: bf16[128,128], index: 8, kind: input, shape index: {}]   ;;  %s3400_s9 = inlined_call_operand.vmem [shape: f32[1,128], index: 9, kind: input, shape index: {}]   ;;  %s3401_s10 = inlined_call_operand.vmem [shape: bf16[128,256], index: 10, kind: input, shape index: {}]   ;;  %s3402_s11 = inlined_call_operand.vmem [shape: f32[1,256], index: 11, kind: input, shape index: {}]   ;;  %s3403_s12 = inlined_call_operand.hbm [shape: bf16[128,128], index: 12, kind: input, shape index: {}]   ;;  %s3404_s13 = inlined_call_operand.vmem [shape: f32[1,128], index: 13, kind: input, shape index: {}]   ;;  %s3405_s14 = inlined_call_operand.vmem [shape: f32[1,128], index: 14, kind: input, shape index: {}]   ;;  %s3406_s15 = inlined_call_operand.vmem [shape: f32[1,128], index: 15, kind: input, shape index: {}]   ;;  %s3407_s16 = inlined_call_operand.hbm [shape: bf16[128,128], index: 16, kind: input, shape index: {}]   ;;  %s3408_s17 = inlined_call_operand.vmem [shape: f32[1,128], index: 17, kind: input, shape index: {}]   ;;  %s3409_s18 = inlined_call_operand.hbm [shape: bf16[128,128], index: 18, kind: input, shape index: {}]   ;;  %s3410_s19 = inlined_call_operand.vmem [shape: f32[1,128], index: 19, kind: input, shape index: {}]   ;;  %s3411_s20 = inlined_call_operand.vmem [shape: f32[1,128], index: 20, kind: input, shape index: {}]   ;;  %s3412_s21 = inlined_call_operand.vmem [shape: f32[1,128], index: 21, kind: input, shape index: {}]   ;;  %s3413_s22 = inlined_call_operand.vmem [shape: bf16[2,8,128], index: 22, kind: output, shape index: {}]  }
   0x1   :  { %3415 = sst [smem:[#allocation17_spill]] %s3391_s0 }
   0x2   :  { %3416 = sst [smem:[#allocation18_spill]] %s3392_s1 }
   0x3   :  { %3417 = sst [smem:[#allocation19_spill]] %s3393_s2 }
   0x4   :  { %3418 = sst [smem:[#allocation20_spill]] %s3394_s3 }
   0x5   :  { %3419 = sst [smem:[#allocation21_spill]] %s3395_s4 }
   0x6   :  { %3420 = sst [smem:[#allocation22_spill]] %s3396_s5 }
   0x7   :  { %3421 = sst [smem:[#allocation23_spill]] %s3397_s6 }
   0x8   :  { %3422 = sst [smem:[#allocation24_spill]] %s3403_s12 }
   0x9   :  { %3423 = sst [smem:[#allocation25_spill]] %s3412_s21 }
   0xa   :  { %3424 = sst [smem:[#allocation26_spill]] %s3413_s22 }
   0xb   :  { %27 = vsyncpa [#allocation3], 0 }
   0xc   :  { %28 = vsyncpa [#allocation5], 0 }
   0xd   :  { %29 = vsyncpa [#allocation8], 0 }
   0xe   :  { %30 = vsyncpa [#allocation11], 0  ;;  %s3027_s3 = smov 0  }
   0xf LB: > { %3425 = sst [smem:[#allocation16_spill]] %s2892_s3  ;;  %s3036_s0 = sadd.s32 4294967295, %s2892_s3   ;;  %s2892_s3 = sphi %s3027_s3, %s36_s3  }
  0x10   : > { %s3426_s30 = sld [smem:[#allocation21_spill]]  ;;  %p2180_p0 = scmp.ge.s32.totalorder %s2892_s3, 1 }
  0x11   : > { %p539_p1 = scmp.lt.s32.totalorder %s2892_s3, 3  ;;  %p2601_p2 = scmp.eq.s32.totalorder %s3036_s0, 0 }
  0x12   : > { %s2894_s1 = smov [#allocation4]   ;;  %s3428_s12 = sld [smem:[#allocation24_spill]] }
  0x13   : > { %p3041_p3 = pnand %p2180_p0, %p539_p1  ;;  %s569_s5 = sshll.u32 %s2894_s1, 4  ;;  %s570_s5 = int_to_ptr.vmem [resolvable:$true] %s569_s5 }
  0x14   : > { %s2895_s2 = smov [#allocation7]   ;;  %s2896_s3 = smov 64  }
  0x15   : > { %p2582_p4 = pneg %p3041_p3  ;;  %s615_s27 = sshll.u32 %s2895_s2, 4  ;;  %s616_s27 = int_to_ptr.vmem [resolvable:$true] %s615_s27 }
  0x16   : > { %s567_s4 = sshll.u32 %s3426_s30, 4  ;;  %s3430_s30 = sld [smem:[#allocation19_spill]]  ;;  %s568_s4 = int_to_ptr.hbm [resolvable:$true] %s567_s4 }
  0x17   : > { %p3052_p5 = pnand %p2601_p2, %p2582_p4  ;;  %s2897_s22 = smov 4  }
  0x18   : > { %s613_s25 = sshll.u32 %s3428_s12, 4  ;;  %s2898_s24 = smov [#allocation2]   ;;  %s614_s25 = int_to_ptr.hbm [resolvable:$true] %s613_s25 }
  0x19   : > { %2588 = dma.hbm_to_vmem [thread:$0]  (!%p3052_p5), %s568_s4, 1024, %s570_s5, [#allocation5], %s2896_s3, %s2896_s3, %s2897_s22  }
  0x1a   : > { %2594 = dma.hbm_to_vmem [thread:$0]  (!%p3052_p5), %s614_s25, 1024, %s616_s27, [#allocation8], %s2896_s3, %s2896_s3, %s2897_s22  }
  0x1b   : > { %s552_s6 = sshll.u32 %s2898_s24, 4  ;;  %s2899_s2 = smov 192   ;;  %s553_s6 = int_to_ptr.vmem [resolvable:$true] %s552_s6 }
  0x1c   : > { %s550_s1 = sshll.u32 %s3430_s30, 4  ;;  %s2900_s28 = smov 12   ;;  %s551_s1 = int_to_ptr.hbm [resolvable:$true] %s550_s1 }
  0x1d   : > { %2585 = dma.hbm_to_vmem [thread:$0]  (!%p3052_p5), %s551_s1, 3072, %s553_s6, [#allocation3], %s2899_s2, %s2899_s2, %s2900_s28  }
  0x1e   : > { %s590_s12 = sshll.u32 %s3399_s8, 4  ;;  %s2901_s4 = smov [#allocation6]   ;;  %s591_s12 = int_to_ptr.hbm [resolvable:$true] %s590_s12 }
  0x1f   : > { %s592_s5 = sshll.u32 %s2901_s4, 4  ;;  %s636_s27 = sshll.u32 %s3407_s16, 4  ;;  %s593_s5 = int_to_ptr.vmem [resolvable:$true] %s592_s5  ;;  %s637_s27 = int_to_ptr.hbm [resolvable:$true] %s636_s27 }
  0x20   : > { %2591 = dma.hbm_to_vmem [thread:$0]  (!%p3052_p5), %s591_s12, 1024, %s593_s5, [#allocation5], %s2896_s3, %s2896_s3, %s2897_s22  }
  0x21   : > { %s2902_s1 = smov [#allocation9]   ;;  %s653_s28 = sshll.u32 %s3409_s18, 4  ;;  %s654_s28 = int_to_ptr.hbm [resolvable:$true] %s653_s28 }
  0x22   : > { %s638_s24 = sshll.u32 %s2902_s1, 4  ;;  %s2903_s21 = smov [#allocation10]   ;;  %s639_s24 = int_to_ptr.vmem [resolvable:$true] %s638_s24 }
  0x23   : > { %2597 = dma.hbm_to_vmem [thread:$0]  (!%p3052_p5), %s637_s27, 1024, %s639_s24, [#allocation8], %s2896_s3, %s2896_s3, %s2897_s22  }
  0x24   : > { %s655_s29 = sshll.u32 %s2903_s21, 4  ;;  %694 = sbr.rel (%p3041_p3) target bundleno = 3213 (0xc8d), region = 108  ;;  %s656_s29 = int_to_ptr.vmem [resolvable:$true] %s655_s29 }
  0x25   : > { %2600 = dma.hbm_to_vmem [thread:$0]  (!%p3052_p5), %s654_s28, 1024, %s656_s29, [#allocation11], %s2896_s3, %s2896_s3, %s2897_s22  }
  0x29   : > { %2875 = dma.done.wait (%p2601_p2), [#allocation3], 3072  }
  0x2a   : > { %2877 = vsyncadd (%p2601_p2), [#allocation3], 4294964224 }
  0x2b   : > { %2879 = dma.done.wait (%p2601_p2), [#allocation5], 2048  }
  0x2c   : > { %2881 = vsyncadd (%p2601_p2), [#allocation5], 4294965248 }
  0x2d   : > { %2883 = dma.done.wait (%p2601_p2), [#allocation8], 2048  }
  0x2e   : > { %2885 = vsyncadd (%p2601_p2), [#allocation8], 4294965248 }
  0x2f   : > { %2887 = dma.done.wait (%p2601_p2), [#allocation11], 1024  }
  0x30   : > { %2889 = vsyncadd (%p2601_p2), [#allocation11], 4294966272  ;;  %v2284_v0 = vld [vmem:[#allocation2 + $0xa8] sm:$0xf]  ;;  %v2512_v1 = vld [vmem:[#allocation2 + $0xb0] sm:$0xf0] }
  0x31   : > { %v2511_v2 = vld [vmem:[#allocation2 + $0xac] sm:$0xf]  ;;  %v2285_v3 = vor.u32 %v2512_v1, %v2284_v0  ;;  %v2286_v4 = vld [vmem:[#allocation2 + $0xb4] sm:$0xf0]  ;;  %v2272_v5 = vld [vmem:[#allocation2 + $0x90] sm:$0xf] }
  0x32   : > { %v2509_v6 = vld [vmem:[#allocation2 + $0x98] sm:$0xf0]  ;;  %v2289_v7 = vor.u32 %v2511_v2, %v2286_v4  ;;  %v2508_v8 = vld [vmem:[#allocation2 + $0x94] sm:$0xf]  ;;  %v2274_v9 = vld [vmem:[#allocation2 + $0x9c] sm:$0xf0] }
  0x33   : > { %974 = vmatpush.bf16.msra.mxu0 %v2285_v3  ;;  %v2273_v10 = vor.u32 %v2509_v6, %v2272_v5  ;;  %v2277_v11 = vor.u32 %v2508_v8, %v2274_v9  ;;  %v2260_v12 = vld [vmem:[#allocation2 + $0x78] sm:$0xf]  ;;  %v2506_v13 = vld [vmem:[#allocation2 + $0x80] sm:$0xf0]  ;;  %v2505_v14 = vld [vmem:[#allocation2 + $0x7c] sm:$0xf] }
  0x34   : > { %987 = vmatpush.bf16.msra.mxu1 %v2289_v7  ;;  %v2262_v15 = vld [vmem:[#allocation2 + $0x84] sm:$0xf0]  ;;  %v2261_v16 = vor.u32 %v2506_v13, %v2260_v12  ;;  %v2248_v18 = vld [vmem:[#allocation2 + $0x60] sm:$0xf]  ;;  %v2503_v19 = vld [vmem:[#allocation2 + $0x68] sm:$0xf0] }
  0x35   : > { %v2265_v17 = vor.u32 %v2505_v14, %v2262_v15  ;;  %v2502_v20 = vld [vmem:[#allocation2 + $0x64] sm:$0xf]  ;;  %v2250_v21 = vld [vmem:[#allocation2 + $0x6c] sm:$0xf0]  ;;  %v2249_v22 = vor.u32 %v2503_v19, %v2248_v18  ;;  %v2513_v24 = vld [vmem:[#allocation2 + $0xb8] sm:$0xf0] }
  0x36   : > { %v2292_v23 = vld [vmem:[#allocation2 + $0xb0] sm:$0xf]  ;;  %v2280_v25 = vld [vmem:[#allocation2 + $0x98] sm:$0xf]  ;;  %v2253_v26 = vor.u32 %v2502_v20, %v2250_v21  ;;  %v2236_v27 = vld [vmem:[#allocation2 + $0x48] sm:$0xf] }
  0x37   : > { %975 = vmatpush.bf16.msra.mxu0 %v2273_v10  ;;  %v2500_v28 = vld [vmem:[#allocation2 + $0x50] sm:$0xf0]  ;;  %v2293_v29 = vor.u32 %v2513_v24, %v2292_v23  ;;  %v2510_v30 = vld [vmem:[#allocation2 + $0xa0] sm:$0xf0]  ;;  %v2499_v31 = vld [vmem:[#allocation2 + $0x4c] sm:$0xf] }
  0x38   : > { %988 = vmatpush.bf16.msra.mxu1 %v2277_v11  ;;  %v2238_v32 = vld [vmem:[#allocation2 + $0x54] sm:$0xf0]  ;;  %v2224_v33 = vld [vmem:[#allocation2 + $0x30] sm:$0xf]  ;;  %p784_p6 = scmp.lt.s32.totalorder %s3036_s0, 1  ;;  %v2281_v34 = vor.u32 %v2510_v30, %v2280_v25  ;;  %v2237_v35 = vor.u32 %v2500_v28, %v2236_v27  ;;  %s3431_s23 = sld [smem:[#allocation17_spill]] }
  0x39   : > { %1000 = vmatpush.bf16.msra.mxu2 %v2293_v29  ;;  %v2497_v36 = vld [vmem:[#allocation2 + $0x38] sm:$0xf0]  ;;  %v2268_v37 = vld [vmem:[#allocation2 + $0x80] sm:$0xf]  ;;  %v2507_v38 = vld [vmem:[#allocation2 + $0x88] sm:$0xf0]  ;;  %v2241_v39 = vor.u32 %v2499_v31, %v2238_v32  ;;  %v800_v29 = vlaneseq }
  0x3a   : > { %v2496_v40 = vld [vmem:[#allocation2 + $0x34] sm:$0xf]  ;;  %v2226_v41 = vld [vmem:[#allocation2 + $0x3c] sm:$0xf0]  ;;  %v2256_v42 = vld [vmem:[#allocation2 + $0x68] sm:$0xf]  ;;  %v2269_v45 = vor.u32 %v2507_v38, %v2268_v37  ;;  %v2225_v46 = vor.u32 %v2497_v36, %v2224_v33 }
  0x3b   : > { %976 = vmatpush.bf16.msra.mxu0 %v2261_v16  ;;  %v2504_v43 = vld [vmem:[#allocation2 + $0x70] sm:$0xf0]  ;;  %v2212_v44 = vld [vmem:[#allocation2 + $0x18] sm:$0xf]  ;;  %v2229_v47 = vor.u32 %v2496_v40, %v2226_v41  ;;  %v2494_v48 = vld [vmem:[#allocation2 + $0x20] sm:$0xf0] }
  0x3c   : > { %989 = vmatpush.bf16.msra.mxu1 %v2265_v17  ;;  %v2493_v49 = vld [vmem:[#allocation2 + $0x1c] sm:$0xf]  ;;  %v2214_v50 = vld [vmem:[#allocation2 + $0x24] sm:$0xf0]  ;;  %s3440_s0 = smov (!%p784_p6, %s3036_s0), 1  ;;  %v2257_v51 = vor.u32 %v2504_v43, %v2256_v42  ;;  %v2213_v52 = vor.u32 %v2494_v48, %v2212_v44  ;;  %s3432_s4 = sld [smem:[#allocation20_spill]] }
  0x3d   : > { %1001 = vmatpush.bf16.msra.mxu2 %v2281_v34  ;;  %v2244_v53 = vld [vmem:[#allocation2 + $0x50] sm:$0xf]  ;;  %v2501_v54 = vld [vmem:[#allocation2 + $0x58] sm:$0xf0]  ;;  %v2217_v55 = vor.u32 %v2493_v49, %v2214_v50  ;;  %v2200_v56 = vld [vmem:[#allocation2] sm:$0xf] }
  0x3e   : > { %v2491_v57 = vld [vmem:[#allocation2 + $0x8] sm:$0xf0]  ;;  %v2490_v58 = vld [vmem:[#allocation2 + $0x4] sm:$0xf]  ;;  %v2202_v59 = vld [vmem:[#allocation2 + $0xc] sm:$0xf0]  ;;  %v2245_v60 = vor.u32 %v2501_v54, %v2244_v53 }
  0x3f   : > { %977 = vmatpush.bf16.msra.mxu0 %v2249_v22  ;;  %s3117_s12 = sshll.u32 %s3440_s0, 2  ;;  %v2201_v61 = vor.u32 %v2491_v57, %v2200_v56  ;;  %v2232_v62 = vld [vmem:[#allocation2 + $0x38] sm:$0xf]  ;;  %v2498_v63 = vld [vmem:[#allocation2 + $0x40] sm:$0xf0]  ;;  %v2205_v0 = vor.u32 %v2490_v58, %v2202_v59  ;;  %vm1016_vm0 = vcmask 64512  }
  0x40   : > { %990 = vmatpush.bf16.msra.mxu1 %v2253_v26  ;;  %s787_s26 = scalar_lea.vmem %s3431_s23, %s3117_s12  ;;  %v2233_v1 = vor.u32 %v2498_v63, %v2232_v62  ;;  %v2220_v3 = vld [vmem:[#allocation2 + $0x20] sm:$0xf]  ;;  %v2495_v4 = vld [vmem:[#allocation2 + $0x28] sm:$0xf0]  ;;  %v2208_v6 = vld [vmem:[#allocation2 + $0x8] sm:$0xf] }
  0x41   : > { %1002 = vmatpush.bf16.msra.mxu2 %v2269_v45  ;;  %v3123_v2 = vld [vmem:[%s787_s26] sm:$0xf]  ;;  %v2221_v5 = vor.u32 %v2495_v4, %v2220_v3  ;;  %v2492_v7 = vld [vmem:[#allocation2 + $0x10] sm:$0xf0]  ;;  %s2904_s5 = smov 112   ;;  %s2905_s25 = smov 120  }
  0x42   : > { %v2209_v8 = vor.u32 %v2492_v7, %v2208_v6  ;;  %v838_v9 = vld [vmem:[%s3432_s4] sm:$0x7]  ;;  %s2906_s27 = smov 104   ;;  %vm1051_vm1 = vcmask 1043456   ;;  %v801_v30 = vshrl.u32 %v800_v29, 7  ;;  %v803_v31 = vand.u32 127, %v800_v29 }
  0x43   : > { %978 = vmatpush.bf16.msra.mxu0 %v2237_v35  ;;  %v841_v10 = vperm.slane %v838_v9, 1  ;;  %v840_v13 = vperm.slane %v838_v9, 0  ;;  %v842_v22 = vperm.slane %v838_v9, 2  ;;  %v2907_v32 = vmov -1e+30   ;;  %s2908_s1 = smov 8  }
  0x44   : > { %991 = vmatpush.bf16.msra.mxu1 %v2241_v39  ;;  %vm804_vm2 = vcmp.le.s32.totalorder %v803_v31, %v801_v30  ;;  %s2909_s24 = smov 16   ;;  %s2910_s6 = smov 24   ;;  %vm1252_vm3 = vcmask 130048   ;;  %vm1254_vm4 = vcmask 195584   ;;  %vm1277_vm5 = vcmask 261120  }
  0x45   : > { %1003 = vmatpush.bf16.msra.mxu2 %v2257_v51  ;;  %v805_v33 = vsel %vm804_vm2, 0.0, %v2907_v32  ;;  %s3433_s29 = sld [smem:[#allocation22_spill]] }
  0x46   : > { %s3434_s22 = sld [smem:[#allocation18_spill]] }
  0x47   : > { %979 = vmatpush.bf16.msra.mxu0 %v2225_v46  ;;  %s3435_s0 = sld [smem:[#allocation23_spill]] }
  0x48   : > { %992 = vmatpush.bf16.msra.mxu1 %v2229_v47  ;;  %s3436_s2 = sld [smem:[#allocation25_spill]] }
  0x49   : > { %1004 = vmatpush.bf16.msra.mxu2 %v2245_v60 }
  0x4b   : > { %980 = vmatpush.bf16.msra.mxu0 %v2213_v52 }
  0x4c   : > { %993 = vmatpush.bf16.msra.mxu1 %v2217_v55  ;;  %s791_s3 = scalar_lea.vmem %s3434_s22, %s3117_s12 }
  0x4d   : > { %1005 = vmatpush.bf16.msra.mxu2 %v2233_v1 }
  0x4f   : > { %981 = vmatpush.bf16.msra.mxu0 %v2201_v61 }
  0x50   : > { %994 = vmatpush.bf16.msra.mxu1 %v2205_v0 }
  0x51   : > { %1006 = vmatpush.bf16.msra.mxu2 %v2221_v5 }
  0x52   : > { %982 = vmatmul.bf16.vlgmr.msra.gmra.mxu0 %v3123_v2 }
  0x53   : > { %995 = vmatmul.bf16.vlgmr.msra.gmra.mxu1 %v3123_v2 }
  0x55   : > { %1007 = vmatpush.bf16.msra.mxu2 %v2209_v8 }
  0x58   : > { %1008 = vmatmul.bf16.vlgmr.msra.gmra.mxu2 %v3123_v2 }
  0xcf   : > { %v983_v11 = vpop.f32.mrf.mxu0 }
  0xd0   : > { %v996_v12 = vpop.f32.mrf.mxu1  ;;  %v984_v16 = vadd.f32 %v983_v11, %v840_v13 }
  0xd1   : > { %v997_v14 = vadd.f32 %v996_v12, %v841_v10 }
  0xd2   : > { %v1013_v20 = vpack.c.bf16 %v984_v16, %v984_v16 }
  0xd3   : > { %v1014_v15 = vpack.c.bf16 %v997_v14, %v997_v14 }
  0xd5   : > { %1129 = vrot.lane.b32.xlu2 %v1014_v15, %s2904_s5  ;;  %1072 = vrot.lane.b32.xlu1 %v1014_v15, %s2905_s25  ;;  %v1021_v17 = vsel %vm1016_vm0, %v1014_v15, 0 }
  0xd6   : > { %1030 = vmatpush.bf16.xpose.msra.mxu3 %v1021_v17 }
  0xd7   : > { %v985_v18 = vpop.f32.mrf.mxu0 }
  0xd8   : > { %v998_v19 = vpop.f32.mrf.mxu1 }
  0xdb   : > { %v1009_v21 = vpop.f32.mrf.mxu2 }
  0xdc   : > { %v1010_v24 = vadd.f32 %v1009_v21, %v842_v22 }
  0xdd   : > { %1127 = vrot.lane.b32.xlu2 %v1013_v20, %s2904_s5  ;;  %1069 = vrot.lane.b32.xlu1 %v1013_v20, %s2905_s25 }
  0xde   : > { %2294 = vmatmul.msk.bf16.vlgmr.msra.gmra.mxu3 %vm1016_vm0, %v1013_v20  ;;  %v3138_v25 = vpack.c.bf16 %v1010_v24, %v1010_v24 }
  0xe0   : > { %v1053_v26 = vsel %vm1051_vm1, %v3138_v25, 0 }
  0xe1   : > { %1062 = vmatpush.bf16.msrb.mxu3 %v1053_v26 }
  0xe3   : > { %v1011_v23 = vpop.f32.mrf.mxu2 }
  0xe5   : > { %1183 = vrot.lane.b32.xlu1 %v1013_v20, %s2906_s27 }
 0x12f   : > { %v1130_v46 = vpop.permute.xlu2 %1129 }
 0x130   : > { %v1135_v48 = vsel %vm1016_vm0, %v1130_v46, 0 }
 0x137   : > { %v1128_v52 = vpop.permute.xlu2 %1127 }
 0x147   : > { %v1073_v27 = vpop.permute.xlu1 %1072 }
 0x148   : > { %v1078_v28 = vsel %vm1016_vm0, %v1073_v27, 0 }
 0x149   : > { %1087 = vmatpush.bf16.xpose.msra.mxu3 %v1078_v28 }
 0x14f   : > { %v1070_v50 = vpop.permute.xlu1 %1069 }
 0x157   : > { %v1184_v53 = vpop.permute.xlu1 %1183 }
 0x161   : > { %v1032_v34 = vpop.f32.mrf.mxu3 }
 0x162   : > { %v1033_v35 = vadd.f32 %v1032_v34, %v805_v33 }
 0x164   : > { %v1036_v36 = vsel %vm1016_vm0, %v1033_v35, -inf }
 0x165   : > { %1037 = vmax.xlane.f32.xlu0 %v1036_v36 }
 0x169   : > { %v1034_v37 = vpop.f32.mrf.mxu3 }
 0x1d8   : > { %v1038_v38 = vpop.xlane.xlu0 %1037 }
 0x1d9   : > { %v1039_v39 = vsub.f32 %v1033_v35, %v1038_v38 }
 0x1db   : > { %v1040_v40 = vmul.f32 1.442695, %v1039_v39 }
 0x1dd   : > { %2650 = vpow2.f32 %v1040_v40 }
 0x1e3   : > { %v2651_v41 = vpop.eup %2650 }
 0x1e4   : > { %v1042_v42 = vsel %vm1016_vm0, %v2651_v41, 0.0 }
 0x1e5   : > { %1043 = vadd.xlane.f32.xlu0 %v1042_v42 }
 0x1f9   : > { %1185 = vrot.lane.b32.xlu0 %v1014_v15, %s2906_s27 }
 0x258   : > { %v1044_v43 = vpop.xlane.xlu0 %1043 }
 0x259   : > { %2652 = vrcp.f32 %v1044_v43 }
 0x25f   : > { %v2653_v44 = vpop.eup %2652 }
 0x260   : > { %v1046_v45 = vmul.f32 %v2653_v44, %v2651_v41  ;;  %v2515_v44 = vld [vmem:[#allocation4 + $0x8] sm:$0xff] }
 0x261   : > { %1287 = vmatpush.bf16.msrb.mxu1 %v2515_v44 }
 0x262   : > { %v1047_v47 = vpack.c.bf16 %v1046_v45, %v1046_v45  ;;  %v2514_v45 = vld [vmem:[#allocation4] sm:$0xff] }
 0x264   : > { %2295 = vmatmul.msk.bf16.vlgmr.msrb.gmra.mxu3 %vm1016_vm0, %v1047_v47 }
 0x265   : > { %1144 = vmatpush.bf16.xpose.msrb.mxu3 %v1135_v48  ;;  %1288 = vmatpush.bf16.msrb.mxu1 %v2514_v45 }
 0x26b   : > { %v1186_v49 = vpop.permute.xlu0 %1185 }
 0x26c   : > { %v1191_v51 = vsel %vm1016_vm0, %v1186_v49, 0 }
 0x274   : > { %2296 = vmatmul.msk.bf16.vlgmr.msra.gmra.mxu3 %vm1016_vm0, %v1070_v50 }
 0x275   : > { %1200 = vmatpush.bf16.xpose.msra.mxu3 %v1191_v51 }
 0x284   : > { %2298 = vmatmul.msk.bf16.vlgmr.msrb.gmra.mxu3 %vm1016_vm0, %v1128_v52 }
 0x294   : > { %2300 = vmatmul.msk.bf16.vlgmr.msra.gmra.mxu3 %vm1016_vm0, %v1184_v53  ;;  %v2401_v53 = vld [vmem:[%s3401_s10 + $0x70] sm:$0xf] }
 0x2e7   : > { %v3152_v54 = vpop.f32.mrf.mxu3 }
 0x2ef   : > { %v1066_v55 = vpop.f32.mrf.mxu3 }
 0x2f0   : > { %v2539_v55 = vld [vmem:[%s3401_s10 + $0x74] sm:$0xf0] }
 0x2f7   : > { %v1089_v56 = vpop.f32.mrf.mxu3 }
 0x2f8   : > { %v1090_v57 = vadd.f32 %v1089_v56, %v805_v33  ;;  %v2402_v56 = vor.u32 %v2539_v55, %v2401_v53  ;;  %v2641_v53 = vld [vmem:[%s3398_s7] ss:$0 sm:$0xff] }
 0x2fa   : > { %v1093_v58 = vsel %vm1016_vm0, %v1090_v57, -inf  ;;  %1518 = vmatpush.bf16.msrb.mxu3 %v2402_v56 }
 0x2fb   : > { %1094 = vmax.xlane.f32.xlu2 %v1093_v58 }
 0x2ff   : > { %v1091_v59 = vpop.f32.mrf.mxu3 }
 0x300   : > { %v2385_v59 = vld [vmem:[%s3401_s10 + $0x50] sm:$0xf] }
 0x307   : > { %v1146_v60 = vpop.f32.mrf.mxu3 }
 0x308   : > { %v1147_v61 = vadd.f32 %v1146_v60, %v805_v33  ;;  %v2535_v60 = vld [vmem:[%s3401_s10 + $0x54] sm:$0xf0] }
 0x30a   : > { %v1150_v62 = vsel %vm1016_vm0, %v1147_v61, -inf }
 0x30b   : > { %1151 = vmax.xlane.f32.xlu1 %v1150_v62  ;;  %v2639_v62 = vld [vmem:[%s3433_s29] ss:$0 sm:$0xff] }
 0x30f   : > { %v1148_v63 = vpop.f32.mrf.mxu3 }
 0x310   : > { %v799_v63 = vunpack.c.l.bf16 %v3123_v2 }
 0x317   : > { %v1202_v0 = vpop.f32.mrf.mxu3 }
 0x318   : > { %v1203_v1 = vadd.f32 %v1202_v0, %v805_v33 }
 0x31a   : > { %v1206_v3 = vsel %vm1016_vm0, %v1203_v1, -inf }
 0x31b   : > { %1207 = vmax.xlane.f32.xlu0 %v1206_v3 }
 0x31f   : > { %v1204_v4 = vpop.f32.mrf.mxu3 }
 0x32f   : > { %1162 = vrot.lane.b32.xlu0 %v3138_v25, %s2904_s5 }
 0x36e   : > { %v1095_v5 = vpop.xlane.xlu2 %1094 }
 0x36f   : > { %v1096_v6 = vsub.f32 %v1090_v57, %v1095_v5  ;;  %v2537_v57 = vld [vmem:[%s3401_s10 + $0x64] sm:$0xf0] }
 0x371   : > { %v1097_v7 = vmul.f32 1.442695, %v1096_v6  ;;  %v2377_v6 = vld [vmem:[%s3401_s10 + $0x40] sm:$0xf] }
 0x373   : > { %2654 = vpow2.f32 %v1097_v7  ;;  %v2533_v7 = vld [vmem:[%s3401_s10 + $0x44] sm:$0xf0] }
 0x374   : > { %v2378_v2 = vor.u32 %v2533_v7, %v2377_v6  ;;  %v2538_v6 = vld [vmem:[%s3401_s10 + $0x74] sm:$0xf]  ;;  %v2403_v7 = vld [vmem:[%s3401_s10 + $0x78] sm:$0xf0] }
 0x379   : > { %v2655_v8 = vpop.eup %2654 }
 0x37a   : > { %v1099_v9 = vsel %vm1016_vm0, %v2655_v8, 0.0 }
 0x37b   : > { %1100 = vadd.xlane.f32.xlu2 %v1099_v9  ;;  %v2531_v9 = vld [vmem:[%s3401_s10 + $0x34] sm:$0xf0] }
 0x37e   : > { %v1152_v10 = vpop.xlane.xlu1 %1151 }
 0x37f   : > { %v1153_v11 = vsub.f32 %v1147_v61, %v1152_v10  ;;  %v2386_v61 = vor.u32 %v2535_v60, %v2385_v59  ;;  %v2523_v10 = vld [vmem:[#allocation6 + $0x38] sm:$0xff] }
 0x381   : > { %v1154_v12 = vmul.f32 1.442695, %v1153_v11 }
 0x383   : > { %2656 = vpow2.f32 %v1154_v12  ;;  %v2911_v12 = vmov 32.0  }
 0x389   : > { %v2657_v13 = vpop.eup %2656 }
 0x38a   : > { %v1156_v14 = vsel %vm1016_vm0, %v2657_v13, 0.0 }
 0x38b   : > { %1157 = vadd.xlane.f32.xlu1 %v1156_v14  ;;  %v2529_v14 = vld [vmem:[%s3401_s10 + $0x24] sm:$0xf0] }
 0x38e   : > { %v1208_v15 = vpop.xlane.xlu0 %1207 }
 0x38f   : > { %v1209_v16 = vsub.f32 %v1203_v1, %v1208_v15  ;;  %v2522_v15 = vld [vmem:[#allocation6 + $0x30] sm:$0xff] }
 0x391   : > { %v1210_v17 = vmul.f32 1.442695, %v1209_v16 }
 0x393   : > { %2658 = vpow2.f32 %v1210_v17  ;;  %1106 = vrot.lane.b32.xlu2 %v3138_v25, %s2905_s25  ;;  %v2353_v17 = vld [vmem:[%s3401_s10 + $0x10] sm:$0xf] }
 0x399   : > { %v2659_v18 = vpop.eup %2658 }
 0x39a   : > { %v1212_v19 = vsel %vm1016_vm0, %v2659_v18, 0.0 }
 0x39b   : > { %1213 = vadd.xlane.f32.xlu1 %v1212_v19 }
 0x3a1   : > { %v1163_v20 = vpop.permute.xlu0 %1162 }
 0x3a2   : > { %v1168_v21 = vsel %vm1051_vm1, %v1163_v20, 0  ;;  %v2521_v20 = vld [vmem:[#allocation6 + $0x28] sm:$0xff] }
 0x3a3   : > { %1177 = vmatpush.bf16.msrb.mxu2 %v1168_v21 }
 0x3a7   : > { %1403 = vmatpush.bf16.msra.mxu2 %v2523_v10 }
 0x3ab   : > { %1404 = vmatpush.bf16.msra.mxu2 %v2522_v15  ;;  %v2379_v15 = vld [vmem:[%s3401_s10 + $0x48] sm:$0xf0] }
 0x3af   : > { %1405 = vmatpush.bf16.msra.mxu2 %v2521_v20  ;;  %v2371_v20 = vld [vmem:[%s3401_s10 + $0x38] sm:$0xf0] }
 0x3b4   : > { %1218 = vrot.lane.b32.xlu1 %v3138_v25, %s2906_s27 }
 0x3ee   : > { %v1101_v22 = vpop.xlane.xlu2 %1100 }
 0x3ef   : > { %2660 = vrcp.f32 %v1101_v22 }
 0x3f5   : > { %v2661_v23 = vpop.eup %2660 }
 0x3f6   : > { %v1103_v24 = vmul.f32 %v2661_v23, %v2655_v8  ;;  %v1107_v26 = vpop.permute.xlu2 %1106  ;;  %v2369_v8 = vld [vmem:[%s3401_s10 + $0x30] sm:$0xf]  ;;  %v2345_v23 = vld [vmem:[%s3401_s10] sm:$0xf] }
 0x3f7   : > { %v1112_v27 = vsel %vm1051_vm1, %v1107_v26, 0  ;;  %v2370_v11 = vor.u32 %v2531_v9, %v2369_v8  ;;  %v2520_v26 = vld [vmem:[#allocation6 + $0x20] sm:$0xff]  ;;  %v2406_v8 = vor.u32 %v2538_v6, %v2403_v7  ;;  %v2395_v9 = vld [vmem:[%s3401_s10 + $0x68] sm:$0xf0] }
 0x3f8   : > { %1121 = vmatpush.bf16.msrb.mxu0 %v1112_v27  ;;  %v1104_v28 = vpack.c.bf16 %v1103_v24, %v1103_v24  ;;  %v2525_v24 = vld [vmem:[%s3401_s10 + $0x4] sm:$0xf0]  ;;  %1406 = vmatpush.bf16.msra.mxu2 %v2520_v26  ;;  %v2526_v26 = vld [vmem:[%s3401_s10 + $0x14] sm:$0xf] }
 0x3f9   : > { %v2346_v27 = vor.u32 %v2525_v24, %v2345_v23  ;;  %v2363_v23 = vld [vmem:[%s3401_s10 + $0x28] sm:$0xf0] }
 0x3fb   : > { %2297 = vmatmul.msk.bf16.vlgmr.msrb.gmra.mxu0 %vm1016_vm0, %v1104_v28 }
 0x3fe   : > { %v1158_v29 = vpop.xlane.xlu1 %1157 }
 0x3ff   : > { %2662 = vrcp.f32 %v1158_v29  ;;  %v2519_v29 = vld [vmem:[#allocation6 + $0x18] sm:$0xff] }
 0x400   : > { %1407 = vmatpush.bf16.msra.mxu2 %v2519_v29  ;;  %v2524_v29 = vld [vmem:[%s3401_s10 + $0x4] sm:$0xf] }
 0x405   : > { %v2663_v30 = vpop.eup %2662 }
 0x406   : > { %v1160_v31 = vmul.f32 %v2663_v30, %v2657_v13  ;;  %v2361_v13 = vld [vmem:[%s3401_s10 + $0x20] sm:$0xf] }
 0x407   : > { %v2362_v16 = vor.u32 %v2529_v14, %v2361_v13  ;;  %v3241_v30 = vld [vmem:[%s791_s3] sm:$0xf]  ;;  %v2532_v14 = vld [vmem:[%s3401_s10 + $0x44] sm:$0xf] }
 0x408   : > { %v1161_v32 = vpack.c.bf16 %v1160_v31, %v1160_v31 }
 0x40a   : > { %2299 = vmatmul.msk.bf16.vlgmr.msrb.gmra.mxu2 %vm1016_vm0, %v1161_v32  ;;  %v2518_v32 = vld [vmem:[#allocation6 + $0x10] sm:$0xff] }
 0x40b   : > { %1408 = vmatpush.bf16.msra.mxu2 %v2518_v32 }
 0x40e   : > { %v1214_v33 = vpop.xlane.xlu1 %1213 }
 0x40f   : > { %2664 = vrcp.f32 %v1214_v33 }
 0x410   : > { %2666 = vrcp.f32 %v2911_v12  ;;  %v2387_v12 = vld [vmem:[%s3401_s10 + $0x58] sm:$0xf0] }
 0x415   : > { %v2665_v25 = vpop.eup %2664 }
 0x416   : > { %v1216_v34 = vmul.f32 %v2665_v25, %v2659_v18  ;;  %v2527_v18 = vld [vmem:[%s3401_s10 + $0x14] sm:$0xf0]  ;;  %v2667_v19 = vpop.eup %2666  ;;  %v2517_v25 = vld [vmem:[#allocation6 + $0x8] sm:$0xff] }
 0x417   : > { %v2354_v21 = vor.u32 %v2527_v18, %v2353_v17  ;;  %v1303_v22 = vmul.f32 32.0, %v2667_v19  ;;  %vm1307_vm6 = vweird.f32 %v2667_v19  ;;  %1409 = vmatpush.bf16.msra.mxu2 %v2517_v25  ;;  %v2382_v18 = vor.u32 %v2532_v14, %v2379_v15 }
 0x418   : > { %v1217_v37 = vpack.c.bf16 %v1216_v34, %v1216_v34  ;;  %v2516_v34 = vld [vmem:[#allocation6] sm:$0xff] }
 0x419   : > { %v1304_v28 = vsub.f32 1.0, %v1303_v22  ;;  %v2528_v22 = vld [vmem:[%s3401_s10 + $0x24] sm:$0xf] }
 0x41a   : > { %v2366_v24 = vor.u32 %v2528_v22, %v2363_v23 }
 0x41b   : > { %v1305_v31 = vmul.f32 %v2667_v19, %v1304_v28  ;;  %1410 = vmatpush.bf16.msra.mxu2 %v2516_v34 }
 0x41d   : > { %v1306_v33 = vadd.f32 %v2667_v19, %v1305_v31  ;;  %v2347_v31 = vld [vmem:[%s3401_s10 + $0x8] sm:$0xf0] }
 0x41e   : > { %v2350_v32 = vor.u32 %v2524_v29, %v2347_v31 }
 0x426   : > { %v1219_v35 = vpop.permute.xlu1 %1218 }
 0x427   : > { %v1224_v36 = vsel %vm1051_vm1, %v1219_v35, 0  ;;  %v3244_v35 = vsel %vm1307_vm6, %v2667_v19, %v1306_v33  ;;  %v2530_v19 = vld [vmem:[%s3401_s10 + $0x34] sm:$0xf] }
 0x428   : > { %1233 = vmatpush.bf16.msra.mxu0 %v1224_v36 }
 0x42b   : > { %2301 = vmatmul.msk.bf16.vlgmr.msra.gmra.mxu0 %vm1016_vm0, %v1217_v37 }
 0x42c   : > { %1531 = vmatpush.bf16.msrb.mxu0 %v2406_v8 }
 0x478   : > { %v1123_v38 = vpop.f32.mrf.mxu0 }
 0x479   : > { %1240 = vrot.lane.b32.xlu2 %v1123_v38, %s2908_s1 }
 0x480   : > { %v1125_v39 = vpop.f32.mrf.mxu0 }
 0x48d   : > { %v1179_v40 = vpop.f32.mrf.mxu2 }
 0x48e   : > { %1244 = vrot.lane.b32.xlu2 %v1179_v40, %s2909_s24 }
 0x495   : > { %v1181_v41 = vpop.f32.mrf.mxu2 }
 0x4a8   : > { %v1235_v42 = vpop.f32.mrf.mxu0 }
 0x4a9   : > { %1248 = vrot.lane.b32.xlu0 %v1235_v42, %s2910_s6 }
 0x4b0   : > { %v1237_v43 = vpop.f32.mrf.mxu0 }
 0x4d3   : > { %v1241_v46 = vpop.permute.xlu2 %1240 }
 0x4d4   : > { %v1251_v48 = vsel %vm1016_vm0, %v3152_v54, %v1241_v46  ;;  %v2393_v54 = vld [vmem:[%s3401_s10 + $0x60] sm:$0xf] }
 0x4d5   : > { %v2394_v58 = vor.u32 %v2537_v57, %v2393_v54  ;;  %v3262_v57 = vld [vmem:[%s3402_s11] sm:$0x3] }
 0x4d7   : > { %1519 = vmatpush.bf16.msrb.mxu3 %v2394_v58  ;;  %v1434_v58 = vperm.slane %v3262_v57, 0 }
 0x4db   : > { %1520 = vmatpush.bf16.msrb.mxu3 %v2386_v61 }
 0x4df   : > { %1521 = vmatpush.bf16.msrb.mxu3 %v2378_v2  ;;  %v2536_v2 = vld [vmem:[%s3401_s10 + $0x64] sm:$0xf] }
 0x4e0   : > { %v2398_v10 = vor.u32 %v2536_v2, %v2395_v9 }
 0x4e2   : > { %1532 = vmatpush.bf16.msrb.mxu0 %v2398_v10 }
 0x4e3   : > { %1522 = vmatpush.bf16.msrb.mxu3 %v2370_v11  ;;  %v2534_v11 = vld [vmem:[%s3401_s10 + $0x54] sm:$0xf] }
 0x4e4   : > { %v2390_v13 = vor.u32 %v2534_v11, %v2387_v12 }
 0x4e6   : > { %1533 = vmatpush.bf16.msrb.mxu0 %v2390_v13 }
 0x4e7   : > { %1523 = vmatpush.bf16.msrb.mxu3 %v2362_v16 }
 0x4e8   : > { %v1245_v47 = vpop.permute.xlu2 %1244 }
 0x4e9   : > { %v1253_v49 = vsel %vm1252_vm3, %v1251_v48, %v1245_v47 }
 0x4ea   : > { %1534 = vmatpush.bf16.msrb.mxu0 %v2382_v18 }
 0x4eb   : > { %1524 = vmatpush.bf16.msrb.mxu3 %v2354_v21  ;;  %v2374_v21 = vor.u32 %v2530_v19, %v2371_v20 }
 0x4ee   : > { %1535 = vmatpush.bf16.msrb.mxu0 %v2374_v21 }
 0x4ef   : > { %1525 = vmatpush.bf16.msrb.mxu3 %v2346_v27  ;;  %v2355_v27 = vld [vmem:[%s3401_s10 + $0x18] sm:$0xf0] }
 0x4f0   : > { %v2358_v28 = vor.u32 %v2526_v26, %v2355_v27 }
 0x4f2   : > { %1526 = vmatmul.bf16.vlgmr.msrb.gmra.mxu3 %v3241_v30  ;;  %1536 = vmatpush.bf16.msrb.mxu0 %v2366_v24 }
 0x4f6   : > { %1537 = vmatpush.bf16.msrb.mxu0 %v2358_v28 }
 0x4fa   : > { %1538 = vmatpush.bf16.msrb.mxu0 %v2350_v32 }
 0x4fd   : > { %1539 = vmatmul.bf16.vlgmr.msrb.gmra.mxu0 %v3241_v30 }
 0x51b   : > { %v1249_v50 = vpop.permute.xlu0 %1248 }
 0x51c   : > { %v1255_v51 = vsel %vm1254_vm4, %v1253_v49, %v1249_v50  ;;  %v2640_v50 = vld [vmem:[%s3435_s0] ss:$0 sm:$0xff] }
 0x51d   : > { %v1256_v52 = vpack.c.bf16 %v1255_v51, %v1255_v51 }
 0x51f   : > { %2310 = vmatmul.msk.bf16.vlgmr.msrb.gmra.mxu1 %vm1277_vm5, %v1256_v52 }
 0x575   : > { %v1527_v59 = vpop.f32.mrf.mxu3 }
 0x576   : > { %v1528_v60 = vadd.f32 %v1527_v59, %v1434_v58 }
 0x578   : > { %v1545_v61 = vpack.c.bf16 %v1528_v60, %v1528_v60 }
 0x57a   : > { %1601 = vrot.lane.b32.xlu1 %v1545_v61, %s2905_s25 }
 0x59c   : > { %v1290_v0 = vpop.f32.mrf.mxu1 }
 0x59d   : > { %v1291_v1 = vadd.f32 %v2639_v62, %v1290_v0  ;;  %v1551_v62 = vsel %vm1016_vm0, %v1545_v61, 0  ;;  %v2642_v0 = vld [vmem:[%s3400_s9] ss:$0 sm:$0xff] }
 0x59e   : > { %1560 = vmatpush.bf16.xpose.msra.mxu1 %v1551_v62 }
 0x59f   : > { %v3202_v3 = vadd.f32 %v1291_v1, %v799_v63  ;;  %v1529_v63 = vpop.f32.mrf.mxu3 }
 0x5a1   : > { %1297 = vadd.xlane.f32.xlu2 %v3202_v3  ;;  %v1299_v4 = vmul.f32 %v3202_v3, %v3202_v3 }
 0x5a3   : > { %1300 = vadd.xlane.f32.xlu0 %v1299_v4 }
 0x5a4   : > { %v1292_v5 = vpop.f32.mrf.mxu1 }
 0x5ec   : > { %v1602_v16 = vpop.permute.xlu1 %1601 }
 0x5ed   : > { %v1607_v17 = vsel %vm1016_vm0, %v1602_v16, 0 }
 0x5ee   : > { %1616 = vmatpush.bf16.xpose.msrb.mxu2 %v1607_v17 }
 0x614   : > { %v1298_v36 = vpop.xlane.xlu2 %1297 }
 0x615   : > { %v1309_v37 = vmul.f32 %v3244_v35, %v1298_v36 }
 0x616   : > { %v1301_v38 = vpop.xlane.xlu0 %1300 }
 0x617   : > { %v1311_v39 = vmul.f32 %v1309_v37, %v1309_v37  ;;  %v1310_v40 = vmul.f32 %v3244_v35, %v1301_v38  ;;  %v1313_v49 = vsub.f32 %v3202_v3, %v1309_v37 }
 0x619   : > { %v1312_v41 = vsub.f32 %v1310_v40, %v1311_v39 }
 0x61b   : > { %v1314_v42 = vadd.f32 1e-05, %v1312_v41 }
 0x61d   : > { %2668 = vrsqrt.f32 %v1314_v42  ;;  %vm1321_vm8 = vweird.f32 %v1314_v42 }
 0x623   : > { %v2669_v43 = vpop.eup %2668 }
 0x624   : > { %v1316_v44 = vmul.f32 %v2669_v43, %v1314_v42  ;;  %vm1322_vm7 = vweird.f32 %v2669_v43  ;;  %v1540_v42 = vpop.f32.mrf.mxu0 }
 0x625   : > { %vm1323_vm9 = vmor %vm1321_vm8, %vm1322_vm7 }
 0x626   : > { %v1317_v45 = vmul.f32 %v2669_v43, %v1316_v44 }
 0x628   : > { %v1318_v46 = vmul.f32 0.5, %v1317_v45 }
 0x62a   : > { %v1319_v47 = vsub.f32 1.5, %v1318_v46 }
 0x62c   : > { %v1320_v48 = vmul.f32 %v2669_v43, %v1319_v47  ;;  %v1542_v45 = vpop.f32.mrf.mxu0 }
 0x62d   : > { %v2541_v45 = vld [vmem:[#allocation7 + $0x8] sm:$0xff] }
 0x62e   : > { %v1324_v51 = vsel %vm1323_vm9, %v2669_v43, %v1320_v48  ;;  %v1435_v43 = vperm.slane %v3262_v57, 1 }
 0x62f   : > { %v1325_v52 = vmul.f32 %v1324_v51, %v1313_v49 }
 0x630   : > { %v1541_v44 = vadd.f32 %v1540_v42, %v1435_v43 }
 0x631   : > { %v1329_v55 = vmul.f32 %v2640_v50, %v1325_v52 }
 0x632   : > { %v1546_v46 = vpack.c.bf16 %v1541_v44, %v1541_v44 }
 0x633   : > { %v3255_v54 = vadd.f32 %v2641_v53, %v1329_v55 }
 0x634   : > { %v1582_v47 = vsel %vm1051_vm1, %v1546_v46, 0 }
 0x635   : > { %v1334_v56 = vpack.c.bf16 %v3255_v54, %v3255_v54  ;;  %1591 = vmatpush.bf16.msrb.mxu1 %v1582_v47 }
 0x637   : > { %1411 = vmatmul.bf16.vlgmr.msra.gmra.mxu2 %v1334_v56 }
 0x6ba   : > { %v1412_v1 = vpop.f32.mrf.mxu2 }
 0x6bb   : > { %v1413_v3 = vadd.f32 %v2642_v0, %v1412_v1 }
 0x6bd   : > { %v1544_v4 = vpack.c.bf16 %v1413_v3, %v1413_v3 }
 0x6bf   : > { %1656 = vrot.lane.b32.xlu2 %v1544_v4, %s2904_s5  ;;  %1598 = vrot.lane.b32.xlu1 %v1544_v4, %s2905_s25 }
 0x6c0   : > { %2407 = vmatmul.msk.bf16.vlgmr.msra.gmra.mxu1 %vm1016_vm0, %v1544_v4 }
 0x6c2   : > { %v1414_v5 = vpop.f32.mrf.mxu2 }
 0x6c7   : > { %1714 = vrot.lane.b32.xlu1 %v1545_v61, %s2906_s27 }
 0x6cf   : > { %1712 = vrot.lane.b32.xlu1 %v1544_v4, %s2906_s27 }
 0x6d7   : > { %1658 = vrot.lane.b32.xlu1 %v1545_v61, %s2904_s5 }
 0x719   : > { %v1657_v30 = vpop.permute.xlu2 %1656 }
 0x731   : > { %v1599_v33 = vpop.permute.xlu1 %1598 }
 0x732   : > { %2409 = vmatmul.msk.bf16.vlgmr.msrb.gmra.mxu2 %vm1016_vm0, %v1599_v33 }
 0x739   : > { %v1715_v25 = vpop.permute.xlu1 %1714 }
 0x73a   : > { %v1720_v34 = vsel %vm1016_vm0, %v1715_v25, 0 }
 0x73b   : > { %1729 = vmatpush.bf16.xpose.msra.mxu2 %v1720_v34 }
 0x73d   : > { %v1562_v36 = vpop.f32.mrf.mxu1 }
 0x73e   : > { %v1566_v37 = vsel %vm1016_vm0, %v1562_v36, -inf }
 0x73f   : > { %1567 = vmax.xlane.f32.xlu0 %v1566_v37 }
 0x741   : > { %v1713_v38 = vpop.permute.xlu1 %1712 }
 0x742   : > { %2413 = vmatmul.msk.bf16.vlgmr.msra.gmra.mxu2 %vm1016_vm0, %v1713_v38 }
 0x745   : > { %v1564_v39 = vpop.f32.mrf.mxu1 }
 0x749   : > { %v1659_v40 = vpop.permute.xlu1 %1658 }
 0x74a   : > { %v1664_v41 = vsel %vm1016_vm0, %v1659_v40, 0 }
 0x74b   : > { %1673 = vmatpush.bf16.xpose.msra.mxu0 %v1664_v41 }
 0x752   : > { %2411 = vmatmul.msk.bf16.vlgmr.msra.gmra.mxu0 %vm1016_vm0, %v1657_v30 }
 0x753   : > { %1813 = vmatpush.bf16.msrb.mxu0 %v2541_v45 }
 0x7b2   : > { %v1568_v52 = vpop.xlane.xlu0 %1567 }
 0x7b3   : > { %v1569_v55 = vsub.f32 %v1562_v36, %v1568_v52 }
 0x7b5   : > { %v1618_v48 = vpop.f32.mrf.mxu2  ;;  %v1570_v57 = vmul.f32 1.442695, %v1569_v55  ;;  %v2643_v55 = vld [vmem:[%s3404_s13] ss:$0 sm:$0xff] }
 0x7b6   : > { %v1622_v49 = vsel %vm1016_vm0, %v1618_v48, -inf }
 0x7b7   : > { %1623 = vmax.xlane.f32.xlu1 %v1622_v49  ;;  %2670 = vpow2.f32 %v1570_v57 }
 0x7bd   : > { %v1620_v50 = vpop.f32.mrf.mxu2  ;;  %v2671_v61 = vpop.eup %2670 }
 0x7be   : > { %v1572_v62 = vsel %vm1016_vm0, %v2671_v61, 0.0 }
 0x7c5   : > { %v1731_v51 = vpop.f32.mrf.mxu2 }
 0x7c6   : > { %v1735_v60 = vsel %vm1016_vm0, %v1731_v51, -inf }
 0x7cd   : > { %v1733_v53 = vpop.f32.mrf.mxu2 }
 0x7cf   : > { %v1675_v56 = vpop.f32.mrf.mxu0 }
 0x7d0   : > { %v1679_v58 = vsel %vm1016_vm0, %v1675_v56, -inf }
 0x7d1   : > { %1680 = vmax.xlane.f32.xlu0 %v1679_v58 }
 0x7d7   : > { %v1677_v59 = vpop.f32.mrf.mxu0 }
 0x7d9   : > { %1736 = vmax.xlane.f32.xlu0 %v1735_v60 }
 0x7e1   : > { %1573 = vadd.xlane.f32.xlu0 %v1572_v62  ;;  %v2548_v62 = vld [vmem:[#allocation9 + $0x30] sm:$0xff] }
 0x7f5   : > { %1635 = vrot.lane.b32.xlu0 %v1546_v46, %s2905_s25 }
 0x7fd   : > { %1747 = vrot.lane.b32.xlu0 %v1546_v46, %s2906_s27 }
 0x82a   : > { %v1624_v63 = vpop.xlane.xlu1 %1623 }
 0x82b   : > { %v1625_v0 = vsub.f32 %v1618_v48, %v1624_v63  ;;  %v2547_v63 = vld [vmem:[#allocation9 + $0x28] sm:$0xff] }
 0x82d   : > { %v1626_v1 = vmul.f32 1.442695, %v1625_v0  ;;  %v2546_v0 = vld [vmem:[#allocation9 + $0x20] sm:$0xff] }
 0x82f   : > { %2672 = vpow2.f32 %v1626_v1  ;;  %v2545_v1 = vld [vmem:[#allocation9 + $0x18] sm:$0xff] }
 0x835   : > { %v2673_v3 = vpop.eup %2672 }
 0x836   : > { %v1628_v4 = vsel %vm1016_vm0, %v2673_v3, 0.0 }
 0x837   : > { %1629 = vadd.xlane.f32.xlu2 %v1628_v4  ;;  %v2543_v4 = vld [vmem:[#allocation9 + $0x8] sm:$0xff] }
 0x844   : > { %v1681_v5 = vpop.xlane.xlu0 %1680 }
 0x845   : > { %v1682_v6 = vsub.f32 %v1675_v56, %v1681_v5  ;;  %v2542_v5 = vld [vmem:[#allocation9] sm:$0xff] }
 0x847   : > { %v1683_v7 = vmul.f32 1.442695, %v1682_v6 }
 0x849   : > { %2674 = vpow2.f32 %v1683_v7 }
 0x84c   : > { %v1737_v2 = vpop.xlane.xlu0 %1736 }
 0x84d   : > { %v1738_v8 = vsub.f32 %v1731_v51, %v1737_v2 }
 0x84f   : > { %v2675_v9 = vpop.eup %2674  ;;  %v1739_v10 = vmul.f32 1.442695, %v1738_v8 }
 0x850   : > { %v1685_v11 = vsel %vm1016_vm0, %v2675_v9, 0.0 }
 0x851   : > { %2676 = vpow2.f32 %v1739_v10  ;;  %1686 = vadd.xlane.f32.xlu1 %v1685_v11  ;;  %v2556_v11 = vld [vmem:[#allocation10 + $0x30] sm:$0xff] }
 0x854   : > { %v1574_v12 = vpop.xlane.xlu0 %1573 }
 0x855   : > { %2678 = vrcp.f32 %v1574_v12 }
 0x857   : > { %v2677_v13 = vpop.eup %2676 }
 0x858   : > { %v1741_v14 = vsel %vm1016_vm0, %v2677_v13, 0.0 }
 0x859   : > { %1742 = vadd.xlane.f32.xlu1 %v1741_v14  ;;  %v2554_v14 = vld [vmem:[#allocation10 + $0x20] sm:$0xff] }
 0x85b   : > { %v2679_v15 = vpop.eup %2678 }
 0x85c   : > { %v1576_v16 = vmul.f32 %v2679_v15, %v2671_v61  ;;  %v2549_v61 = vld [vmem:[#allocation9 + $0x38] sm:$0xff] }
 0x85e   : > { %v1577_v17 = vpack.c.bf16 %v1576_v16, %v1576_v16 }
 0x860   : > { %2408 = vmatmul.msk.bf16.vlgmr.msrb.gmra.mxu1 %vm1016_vm0, %v1577_v17  ;;  %v2553_v17 = vld [vmem:[#allocation10 + $0x18] sm:$0xff] }
 0x867   : > { %v1636_v18 = vpop.permute.xlu0 %1635 }
 0x868   : > { %v1641_v19 = vsel %vm1051_vm1, %v1636_v18, 0 }
 0x869   : > { %1650 = vmatpush.bf16.msra.mxu3 %v1641_v19 }
 0x86f   : > { %v1748_v20 = vpop.permute.xlu0 %1747 }
 0x870   : > { %v1753_v21 = vsel %vm1051_vm1, %v1748_v20, 0  ;;  %v2552_v20 = vld [vmem:[#allocation10 + $0x10] sm:$0xff] }
 0x871   : > { %1762 = vmatpush.bf16.msrb.mxu3 %v1753_v21 }
 0x872   : > { %1691 = vrot.lane.b32.xlu1 %v1546_v46, %s2904_s5  ;;  %v2540_v46 = vld [vmem:[#allocation7] sm:$0xff]  ;;  %s3437_s5 = sld [smem:[#allocation26_spill]] }
 0x873   : > { %1814 = vmatpush.bf16.msrb.mxu0 %v2540_v46 }
 0x878   : > { %s795_s25 = scalar_lea.vmem %s3437_s5, %s3117_s12 }
 0x8aa   : > { %v1630_v22 = vpop.xlane.xlu2 %1629 }
 0x8ab   : > { %2680 = vrcp.f32 %v1630_v22 }
 0x8b1   : > { %v2681_v23 = vpop.eup %2680 }
 0x8b2   : > { %v1632_v24 = vmul.f32 %v2681_v23, %v2673_v3  ;;  %v2544_v3 = vld [vmem:[#allocation9 + $0x10] sm:$0xff] }
 0x8b4   : > { %v1633_v26 = vpack.c.bf16 %v1632_v24, %v1632_v24  ;;  %v2644_v24 = vld [vmem:[%s3405_s14] ss:$0 sm:$0xff] }
 0x8b6   : > { %2410 = vmatmul.msk.bf16.vlgmr.msra.gmra.mxu3 %vm1016_vm0, %v1633_v26 }
 0x8c4   : > { %v1687_v27 = vpop.xlane.xlu1 %1686 }
 0x8cc   : > { %v1743_v28 = vpop.xlane.xlu1 %1742 }
 0x8cd   : > { %2682 = vrcp.f32 %v1743_v28  ;;  %v2645_v28 = vld [vmem:[%s3406_s15] ss:$0 sm:$0xff] }
 0x8ce   : > { %2684 = vrcp.f32 %v1687_v27 }
 0x8d3   : > { %v2683_v29 = vpop.eup %2682 }
 0x8d4   : > { %v1745_v31 = vmul.f32 %v2683_v29, %v2677_v13  ;;  %v2685_v25 = vpop.eup %2684  ;;  %v2555_v13 = vld [vmem:[#allocation10 + $0x28] sm:$0xff] }
 0x8d5   : > { %v1689_v34 = vmul.f32 %v2685_v25, %v2675_v9  ;;  %v2557_v9 = vld [vmem:[#allocation10 + $0x38] sm:$0xff]  ;;  %v2550_v25 = vld [vmem:[#allocation10] sm:$0xff] }
 0x8d6   : > { %v1746_v32 = vpack.c.bf16 %v1745_v31, %v1745_v31  ;;  %2005 = vmatpush.bf16.msrb.mxu2 %v2557_v9 }
 0x8d7   : > { %v1690_v39 = vpack.c.bf16 %v1689_v34, %v1689_v34  ;;  %v2646_v34 = vld [vmem:[%s3408_s17] ss:$0 sm:$0xff] }
 0x8d8   : > { %2414 = vmatmul.msk.bf16.vlgmr.msrb.gmra.mxu3 %vm1016_vm0, %v1746_v32 }
 0x8da   : > { %2006 = vmatpush.bf16.msrb.mxu2 %v2556_v11 }
 0x8dd   : > { %v1593_v33 = vpop.f32.mrf.mxu1 }
 0x8de   : > { %2007 = vmatpush.bf16.msrb.mxu2 %v2555_v13 }
 0x8e2   : > { %2008 = vmatpush.bf16.msrb.mxu2 %v2554_v14 }
 0x8e4   : > { %v1692_v36 = vpop.permute.xlu1 %1691 }
 0x8e5   : > { %v1697_v37 = vsel %vm1051_vm1, %v1692_v36, 0  ;;  %v1595_v38 = vpop.f32.mrf.mxu1 }
 0x8e6   : > { %1706 = vmatpush.bf16.msra.mxu1 %v1697_v37  ;;  %2009 = vmatpush.bf16.msrb.mxu2 %v2553_v17 }
 0x8e9   : > { %2412 = vmatmul.msk.bf16.vlgmr.msra.gmra.mxu1 %vm1016_vm0, %v1690_v39 }
 0x8ea   : > { %1922 = vmatpush.bf16.msrb.mxu1 %v2549_v61  ;;  %2010 = vmatpush.bf16.msrb.mxu2 %v2552_v20  ;;  %v2648_v61 = vld [vmem:[%s3411_s20] ss:$0 sm:$0xff] }
 0x8ee   : > { %1923 = vmatpush.bf16.msrb.mxu1 %v2548_v62 }
 0x8f2   : > { %1924 = vmatpush.bf16.msrb.mxu1 %v2547_v63 }
 0x8f6   : > { %1925 = vmatpush.bf16.msrb.mxu1 %v2546_v0 }
 0x8fa   : > { %1926 = vmatpush.bf16.msrb.mxu1 %v2545_v1 }
 0x8fe   : > { %1927 = vmatpush.bf16.msrb.mxu1 %v2544_v3 }
 0x902   : > { %1928 = vmatpush.bf16.msrb.mxu1 %v2543_v4 }
 0x906   : > { %1929 = vmatpush.bf16.msrb.mxu1 %v2542_v5 }
 0x939   : > { %v1652_v40 = vpop.f32.mrf.mxu3 }
 0x93a   : > { %1769 = vrot.lane.b32.xlu0 %v1652_v40, %s2908_s1 }
 0x941   : > { %v1654_v41 = vpop.f32.mrf.mxu3 }
 0x942   : > { %v2647_v41 = vld [vmem:[%s3410_s19] ss:$0 sm:$0xff] }
 0x95b   : > { %v1764_v30 = vpop.f32.mrf.mxu3 }
 0x95c   : > { %1777 = vrot.lane.b32.xlu0 %v1764_v30, %s2910_s6 }
 0x963   : > { %v1766_v42 = vpop.f32.mrf.mxu3 }
 0x966   : > { %v1708_v43 = vpop.f32.mrf.mxu1 }
 0x967   : > { %1773 = vrot.lane.b32.xlu2 %v1708_v43, %s2909_s24 }
 0x96e   : > { %v1710_v44 = vpop.f32.mrf.mxu1 }
 0x9ac   : > { %v1770_v47 = vpop.permute.xlu0 %1769 }
 0x9ad   : > { %v1780_v49 = vsel %vm1016_vm0, %v1593_v33, %v1770_v47  ;;  %v2551_v33 = vld [vmem:[#allocation10 + $0x8] sm:$0xff] }
 0x9ae   : > { %2011 = vmatpush.bf16.msrb.mxu2 %v2551_v33 }
 0x9b2   : > { %2012 = vmatpush.bf16.msrb.mxu2 %v2550_v25 }
 0x9c1   : > { %v1774_v48 = vpop.permute.xlu2 %1773 }
 0x9c2   : > { %v1781_v50 = vsel %vm1252_vm3, %v1780_v49, %v1774_v48 }
 0x9ce   : > { %v1778_v51 = vpop.permute.xlu0 %1777 }
 0x9cf   : > { %v1782_v52 = vsel %vm1254_vm4, %v1781_v50, %v1778_v51 }
 0x9d0   : > { %v1783_v53 = vpack.c.bf16 %v1782_v52, %v1782_v52 }
 0x9d2   : > { %2423 = vmatmul.msk.bf16.vlgmr.msrb.gmra.mxu0 %vm1277_vm5, %v1783_v53 }
 0xa4f   : > { %v1816_v56 = vpop.f32.mrf.mxu0 }
 0xa50   : > { %v1817_v58 = vadd.f32 %v2643_v55, %v1816_v56 }
 0xa52   : > { %v1820_v57 = vadd.f32 %v1817_v58, %v3255_v54 }
 0xa54   : > { %1823 = vadd.xlane.f32.xlu0 %v1820_v57  ;;  %v1825_v59 = vmul.f32 %v1820_v57, %v1820_v57 }
 0xa56   : > { %1826 = vadd.xlane.f32.xlu1 %v1825_v59 }
 0xa57   : > { %v1818_v60 = vpop.f32.mrf.mxu0 }
 0xac7   : > { %v1824_v54 = vpop.xlane.xlu0 %1823 }
 0xac8   : > { %v1828_v6 = vmul.f32 %v1824_v54, %v3244_v35 }
 0xac9   : > { %v1827_v7 = vpop.xlane.xlu1 %1826 }
 0xaca   : > { %v1830_v2 = vmul.f32 %v1828_v6, %v1828_v6  ;;  %v1829_v8 = vmul.f32 %v1827_v7, %v3244_v35  ;;  %v1832_v23 = vsub.f32 %v1820_v57, %v1828_v6 }
 0xacc   : > { %v1831_v10 = vsub.f32 %v1829_v8, %v1830_v2 }
 0xace   : > { %v1833_v12 = vadd.f32 1e-05, %v1831_v10 }
 0xad0   : > { %2686 = vrsqrt.f32 %v1833_v12  ;;  %vm1840_vm11 = vweird.f32 %v1833_v12 }
 0xad6   : > { %v2687_v15 = vpop.eup %2686 }
 0xad7   : > { %v1835_v16 = vmul.f32 %v2687_v15, %v1833_v12  ;;  %vm1841_vm10 = vweird.f32 %v2687_v15 }
 0xad8   : > { %vm1842_vm12 = vmor %vm1840_vm11, %vm1841_vm10 }
 0xad9   : > { %v1836_v18 = vmul.f32 %v2687_v15, %v1835_v16 }
 0xadb   : > { %v1837_v19 = vmul.f32 0.5, %v1836_v18 }
 0xadd   : > { %v1838_v21 = vsub.f32 1.5, %v1837_v19 }
 0xadf   : > { %v1839_v22 = vmul.f32 %v2687_v15, %v1838_v21 }
 0xae1   : > { %v1843_v26 = vsel %vm1842_vm12, %v2687_v15, %v1839_v22 }
 0xae2   : > { %v1844_v27 = vmul.f32 %v1843_v26, %v1832_v23 }
 0xae4   : > { %v1848_v29 = vmul.f32 %v2644_v24, %v1844_v27 }
 0xae6   : > { %v1852_v31 = vadd.f32 %v2645_v28, %v1848_v29 }
 0xae8   : > { %v1853_v32 = vpack.c.bf16 %v1852_v31, %v1852_v31 }
 0xaea   : > { %1930 = vmatmul.bf16.vlgmr.msrb.gmra.mxu1 %v1853_v32 }
 0xb67   : > { %v1931_v36 = vpop.f32.mrf.mxu1 }
 0xb68   : > { %v1932_v37 = vadd.f32 %v2646_v34, %v1931_v36 }
 0xb6a   : > { %v1935_v38 = vmax.f32 %v1932_v37, 0.0 }
 0xb6c   : > { %v1936_v39 = vpack.c.bf16 %v1935_v38, %v1935_v38 }
 0xb6e   : > { %2013 = vmatmul.bf16.vlgmr.msrb.gmra.mxu2 %v1936_v39 }
 0xb6f   : > { %v1933_v40 = vpop.f32.mrf.mxu1 }
 0xbf1   : > { %v2014_v30 = vpop.f32.mrf.mxu2 }
 0xbf2   : > { %v2015_v42 = vadd.f32 %v2647_v41, %v2014_v30 }
 0xbf4   : > { %v2018_v43 = vadd.f32 %v2015_v42, %v1852_v31 }
 0xbf6   : > { %2021 = vadd.xlane.f32.xlu2 %v2018_v43  ;;  %v2023_v44 = vmul.f32 %v2018_v43, %v2018_v43 }
 0xbf8   : > { %2024 = vadd.xlane.f32.xlu0 %v2023_v44 }
 0xbf9   : > { %v2016_v45 = vpop.f32.mrf.mxu2 }
 0xc69   : > { %v2022_v46 = vpop.xlane.xlu2 %2021 }
 0xc6a   : > { %v2026_v47 = vmul.f32 %v2022_v46, %v3244_v35 }
 0xc6b   : > { %v2025_v48 = vpop.xlane.xlu0 %2024 }
 0xc6c   : > { %v2028_v49 = vmul.f32 %v2026_v47, %v2026_v47  ;;  %v2027_v50 = vmul.f32 %v2025_v48, %v3244_v35  ;;  %v2030_v60 = vsub.f32 %v2018_v43, %v2026_v47  ;;  %v2649_v35 = vld [vmem:[%s3436_s2] ss:$0 sm:$0xff] }
 0xc6e   : > { %v2029_v51 = vsub.f32 %v2027_v50, %v2028_v49 }
 0xc70   : > { %v2031_v52 = vadd.f32 1e-05, %v2029_v51 }
 0xc72   : > { %2688 = vrsqrt.f32 %v2031_v52  ;;  %vm2038_vm14 = vweird.f32 %v2031_v52 }
 0xc78   : > { %v2689_v53 = vpop.eup %2688 }
 0xc79   : > { %v2033_v55 = vmul.f32 %v2689_v53, %v2031_v52  ;;  %vm2039_vm13 = vweird.f32 %v2689_v53 }
 0xc7a   : > { %vm2040_vm15 = vmor %vm2038_vm14, %vm2039_vm13 }
 0xc7b   : > { %v2034_v56 = vmul.f32 %v2689_v53, %v2033_v55 }
 0xc7d   : > { %v2035_v58 = vmul.f32 0.5, %v2034_v56 }
 0xc7f   : > { %v2036_v57 = vsub.f32 1.5, %v2035_v58 }
 0xc81   : > { %v2037_v59 = vmul.f32 %v2689_v53, %v2036_v57 }
 0xc83   : > { %v2041_v62 = vsel %vm2040_vm15, %v2689_v53, %v2037_v59 }
 0xc84   : > { %v2042_v63 = vmul.f32 %v2041_v62, %v2030_v60 }
 0xc86   : > { %v2046_v0 = vmul.f32 %v2648_v61, %v2042_v63 }
 0xc88   : > { %v2050_v1 = vadd.f32 %v2649_v35, %v2046_v0 }
 0xc8a   : > { %v2051_v3 = vpack.c.bf16 %v2050_v1, %v2050_v1 }
 0xc8c   : > { %2052 = vst [vmem:[%s795_s25] sm:$0xf] %v2051_v3 }
 0xc8d PF: > { %s3438_s27 = sld [smem:[#allocation16_spill]] }
 0xc93   : > { %s36_s3 = sadd.s32 1, %s3438_s27  }
 0xc94   : > { %p33_p7 = scmp.ge.s32.totalorder %s36_s3, 4  }
 0xc96   :  { %35 = sbr.rel (!%p33_p7) target bundleno = 15 (0xf), region = 166 }
 0xc9b   :  { %2072 = vsyncpa [#allocation3], 1 }
 0xc9c   :  { %2074 = vsyncpa [#allocation3 + $0x1], 1 }
 0xc9d   :  { %2075 = vsyncpa [#allocation5], 1 }
 0xc9e   :  { %2076 = vsyncpa [#allocation8], 1 }
 0xc9f   :  { %2077 = vsyncpa [#allocation11], 1 }

// kernel: transformer_forward.8
= control target key start
LH: loop header
LB: loop body
LE: loop exit
PB: predicated region body
PF: predicated region fallthrough
CT: control target
= control target key end

     0   :  { %s3888_s0 = inlined_call_operand.vmem [shape: bf16[2,8,128], index: 0, kind: input, shape index: {}]   ;;  %s3889_s1 = inlined_call_operand.vmem [shape: bf16[2,8,128], index: 1, kind: input, shape index: {}]   ;;  %s3890_s2 = inlined_call_operand.hbm [shape: bf16[128,384], index: 2, kind: input, shape index: {}]   ;;  %s3891_s3 = inlined_call_operand.vmem [shape: f32[1,384], index: 3, kind: input, shape index: {}]   ;;  %s3892_s4 = inlined_call_operand.hbm [shape: bf16[128,128], index: 4, kind: input, shape index: {}]   ;;  %s3893_s5 = inlined_call_operand.vmem [shape: f32[1,128], index: 5, kind: input, shape index: {}]   ;;  %s3894_s6 = inlined_call_operand.vmem [shape: f32[1,128], index: 6, kind: input, shape index: {}]   ;;  %s3895_s7 = inlined_call_operand.vmem [shape: f32[1,128], index: 7, kind: input, shape index: {}]   ;;  %s3896_s8 = inlined_call_operand.hbm [shape: bf16[128,128], index: 8, kind: input, shape index: {}]   ;;  %s3897_s9 = inlined_call_operand.vmem [shape: f32[1,128], index: 9, kind: input, shape index: {}]   ;;  %s3898_s10 = inlined_call_operand.hbm [shape: bf16[128,256], index: 10, kind: input, shape index: {}]   ;;  %s3899_s11 = inlined_call_operand.vmem [shape: f32[1,256], index: 11, kind: input, shape index: {}]   ;;  %s3900_s12 = inlined_call_operand.hbm [shape: bf16[128,128], index: 12, kind: input, shape index: {}]   ;;  %s3901_s13 = inlined_call_operand.hbm [shape: f32[1,128], index: 13, kind: input, shape index: {}]   ;;  %s3902_s14 = inlined_call_operand.hbm [shape: f32[1,128], index: 14, kind: input, shape index: {}]   ;;  %s3903_s15 = inlined_call_operand.hbm [shape: f32[1,128], index: 15, kind: input, shape index: {}]   ;;  %s3904_s16 = inlined_call_operand.hbm [shape: bf16[128,128], index: 16, kind: input, shape index: {}]   ;;  %s3905_s17 = inlined_call_operand.hbm [shape: f32[1,128], index: 17, kind: input, shape index: {}]   ;;  %s3906_s18 = inlined_call_operand.hbm [shape: bf16[128,128], index: 18, kind: input, shape index: {}]   ;;  %s3907_s19 = inlined_call_operand.hbm [shape: f32[1,128], index: 19, kind: input, shape index: {}]   ;;  %s3908_s20 = inlined_call_operand.hbm [shape: f32[1,128], index: 20, kind: input, shape index: {}]   ;;  %s3909_s21 = inlined_call_operand.hbm [shape: f32[1,128], index: 21, kind: input, shape index: {}]   ;;  %s3910_s22 = inlined_call_operand.vmem [shape: bf16[2,8,128], index: 22, kind: output, shape index: {}]  }
   0x1   :  { %3914 = sst [smem:[#allocation33_spill]] %s3888_s0 }
   0x2   :  { %3915 = sst [smem:[#allocation34_spill]] %s3889_s1 }
   0x3   :  { %3916 = sst [smem:[#allocation35_spill]] %s3890_s2 }
   0x4   :  { %3917 = sst [smem:[#allocation36_spill]] %s3891_s3 }
   0x5   :  { %3918 = sst [smem:[#allocation37_spill]] %s3892_s4 }
   0x6   :  { %3919 = sst [smem:[#allocation38_spill]] %s3893_s5 }
   0x7   :  { %3920 = sst [smem:[#allocation39_spill]] %s3894_s6 }
   0x8   :  { %3921 = sst [smem:[#allocation40_spill]] %s3897_s9 }
   0x9   :  { %3922 = sst [smem:[#allocation41_spill]] %s3898_s10 }
   0xa   :  { %3923 = sst [smem:[#allocation42_spill]] %s3899_s11 }
   0xb   :  { %3924 = sst [smem:[#allocation43_spill]] %s3910_s22 }
   0xc   :  { %27 = vsyncpa [#allocation3], 0 }
   0xd   :  { %28 = vsyncpa [#allocation5], 0 }
   0xe   :  { %29 = vsyncpa [#allocation8], 0 }
   0xf   :  { %30 = vsyncpa [#allocation11], 0 }
  0x10   :  { %31 = vsyncpa [#allocation14], 0 }
  0x11   :  { %32 = vsyncpa [#allocation17], 0 }
  0x12   :  { %33 = vsyncpa [#allocation20], 0 }
  0x13   :  { %34 = vsyncpa [#allocation23], 0  ;;  %s3585_s3 = smov 0  }
  0x14 LB: > { %3925 = sst [smem:[#allocation32_spill]] %s3440_s3  ;;  %s3594_s0 = sadd.s32 4294967295, %s3440_s3   ;;  %s3440_s3 = sphi %s3585_s3, %s40_s3  }
  0x15   : > { %s3926_s30 = sld [smem:[#allocation37_spill]]  ;;  %p2374_p0 = scmp.ge.s32.totalorder %s3440_s3, 1 }
  0x16   : > { %p543_p1 = scmp.lt.s32.totalorder %s3440_s3, 3  ;;  %p2867_p2 = scmp.eq.s32.totalorder %s3594_s0, 0 }
  0x17   : > { %s3442_s1 = smov [#allocation4]   ;;  %s3928_s10 = sld [smem:[#allocation41_spill]] }
  0x18   : > { %p3599_p3 = pnand %p2374_p0, %p543_p1  ;;  %s573_s5 = sshll.u32 %s3442_s1, 4  ;;  %s574_s5 = int_to_ptr.vmem [resolvable:$true] %s573_s5 }
  0x19   : > { %s3443_s2 = smov [#allocation7]   ;;  %s3912_s28 = smov 64  }
  0x1a   : > { %p2824_p4 = pneg %p3599_p3  ;;  %s613_s27 = sshll.u32 %s3443_s2, 4  ;;  %s614_s27 = int_to_ptr.vmem [resolvable:$true] %s613_s27 }
  0x1b   : > { %s571_s4 = sshll.u32 %s3926_s30, 4  ;;  %s3445_s29 = smov 4   ;;  %s572_s4 = int_to_ptr.hbm [resolvable:$true] %s571_s4 }
  0x1c   : > { %p3610_p5 = pnand %p2867_p2, %p2824_p4  ;;  %s643_s24 = sshll.u32 %s3901_s13, 4  ;;  %s644_s24 = int_to_ptr.hbm [resolvable:$true] %s643_s24 }
  0x1d   : > { %s611_s25 = sshll.u32 %s3928_s10, 4  ;;  %s3446_s6 = smov 128   ;;  %s612_s25 = int_to_ptr.hbm [resolvable:$true] %s611_s25 }
  0x1e   : > { %2830 = dma.hbm_to_vmem [thread:$0]  (!%p3610_p5), %s572_s4, 1024, %s574_s5, [#allocation5], %s3912_s28, %s3912_s28, %s3445_s29  }
  0x1f   : > { %s3447_s10 = smov 8   ;;  %s3448_s3 = smov [#allocation10]  }
  0x20   : > { %2836 = dma.hbm_to_vmem [thread:$0]  (!%p3610_p5), %s612_s25, 2048, %s614_s27, [#allocation8], %s3446_s6, %s3446_s6, %s3447_s10  }
  0x21   : > { %s645_s2 = sshll.u32 %s3448_s3, 4  ;;  %s667_s11 = sshll.u32 %s3903_s15, 4  ;;  %s646_s2 = int_to_ptr.vmem [resolvable:$true] %s645_s2  ;;  %s668_s11 = int_to_ptr.hbm [resolvable:$true] %s667_s11 }
  0x22   : > { %2842 = dma.hbm_to_vmem [thread:$0]  (!%p3610_p5), %s644_s24, 16, %s646_s2, [#allocation11]  }
  0x23   : > { %s693_s30 = sshll.u32 %s3905_s17, 4  ;;  %s3449_s1 = smov [#allocation13]   ;;  %s694_s30 = int_to_ptr.hbm [resolvable:$true] %s693_s30 }
  0x24   : > { %s669_s28 = sshll.u32 %s3449_s1, 4  ;;  %s3450_s10 = smov [#allocation16]   ;;  %s670_s28 = int_to_ptr.vmem [resolvable:$true] %s669_s28 }
  0x25   : > { %2848 = dma.hbm_to_vmem [thread:$0]  (!%p3610_p5), %s668_s11, 16, %s670_s28, [#allocation14]  }
  0x26   : > { %s695_s3 = sshll.u32 %s3450_s10, 4  ;;  %s719_s25 = sshll.u32 %s3907_s19, 4  ;;  %s696_s3 = int_to_ptr.vmem [resolvable:$true] %s695_s3  ;;  %s720_s25 = int_to_ptr.hbm [resolvable:$true] %s719_s25 }
  0x27   : > { %2854 = dma.hbm_to_vmem [thread:$0]  (!%p3610_p5), %s694_s30, 16, %s696_s3, [#allocation17]  }
  0x28   : > { %s3930_s6 = sld [smem:[#allocation35_spill]]  ;;  %s3451_s4 = smov [#allocation19]  }
  0x29   : > { %s721_s5 = sshll.u32 %s3451_s4, 4  ;;  %s3452_s11 = smov [#allocation2]   ;;  %s722_s5 = int_to_ptr.vmem [resolvable:$true] %s721_s5 }
  0x2a   : > { %2860 = dma.hbm_to_vmem [thread:$0]  (!%p3610_p5), %s720_s25, 16, %s722_s5, [#allocation20]  }
  0x2b   : > { %s556_s28 = sshll.u32 %s3452_s11, 4  ;;  %s3453_s1 = smov 192   ;;  %s557_s28 = int_to_ptr.vmem [resolvable:$true] %s556_s28 }
  0x2c   : > { %s3454_s10 = smov 12   ;;  %s594_s9 = sshll.u32 %s3896_s8, 4  ;;  %s595_s9 = int_to_ptr.hbm [resolvable:$true] %s594_s9 }
  0x2d   : > { %s3455_s22 = smov [#allocation6]   ;;  %s628_s25 = sshll.u32 %s3900_s12, 4  ;;  %s629_s25 = int_to_ptr.hbm [resolvable:$true] %s628_s25 }
  0x2e   : > { %s554_s2 = sshll.u32 %s3930_s6, 4  ;;  %s596_s27 = sshll.u32 %s3455_s22, 4  ;;  %s555_s2 = int_to_ptr.hbm [resolvable:$true] %s554_s2  ;;  %s597_s27 = int_to_ptr.vmem [resolvable:$true] %s596_s27 }
  0x2f   : > { %2827 = dma.hbm_to_vmem [thread:$0]  (!%p3610_p5), %s555_s2, 3072, %s557_s28, [#allocation3], %s3453_s1, %s3453_s1, %s3454_s10  }
  0x30   : > { %s3931_s4 = smov 64   ;;  %s3456_s2 = smov [#allocation9]  }
  0x31   : > { %2833 = dma.hbm_to_vmem [thread:$0]  (!%p3610_p5), %s595_s9, 1024, %s597_s27, [#allocation5], %s3931_s4, %s3931_s4, %s3445_s29  }
  0x32   : > { %s630_s5 = sshll.u32 %s3456_s2, 4  ;;  %s655_s1 = sshll.u32 %s3902_s14, 4  ;;  %s631_s5 = int_to_ptr.vmem [resolvable:$true] %s630_s5  ;;  %s656_s1 = int_to_ptr.hbm [resolvable:$true] %s655_s1 }
  0x33   : > { %2839 = dma.hbm_to_vmem [thread:$0]  (!%p3610_p5), %s629_s25, 1024, %s631_s5, [#allocation8], %s3931_s4, %s3931_s4, %s3445_s29  }
  0x34   : > { %s678_s3 = sshll.u32 %s3904_s16, 4  ;;  %s3457_s9 = smov [#allocation12]   ;;  %s679_s3 = int_to_ptr.hbm [resolvable:$true] %s678_s3 }
  0x35   : > { %s657_s22 = sshll.u32 %s3457_s9, 4  ;;  %s3458_s27 = smov [#allocation15]   ;;  %s658_s22 = int_to_ptr.vmem [resolvable:$true] %s657_s22 }
  0x36   : > { %2845 = dma.hbm_to_vmem [thread:$0]  (!%p3610_p5), %s656_s1, 16, %s658_s22, [#allocation11]  }
  0x37   : > { %s680_s24 = sshll.u32 %s3458_s27, 4  ;;  %s704_s11 = sshll.u32 %s3906_s18, 4  ;;  %s681_s24 = int_to_ptr.vmem [resolvable:$true] %s680_s24  ;;  %s705_s11 = int_to_ptr.hbm [resolvable:$true] %s704_s11 }
  0x38   : > { %2851 = dma.hbm_to_vmem [thread:$0]  (!%p3610_p5), %s679_s3, 1024, %s681_s24, [#allocation14], %s3931_s4, %s3931_s4, %s3445_s29  }
  0x39   : > { %s731_s28 = sshll.u32 %s3908_s20, 4  ;;  %s3459_s1 = smov [#allocation18]   ;;  %s732_s28 = int_to_ptr.hbm [resolvable:$true] %s731_s28 }
  0x3a   : > { %s706_s10 = sshll.u32 %s3459_s1, 4  ;;  %s3460_s30 = smov [#allocation21]   ;;  %s707_s10 = int_to_ptr.vmem [resolvable:$true] %s706_s10 }
  0x3b   : > { %2857 = dma.hbm_to_vmem [thread:$0]  (!%p3610_p5), %s705_s11, 1024, %s707_s10, [#allocation17], %s3931_s4, %s3931_s4, %s3445_s29  }
  0x3c   : > { %s733_s9 = sshll.u32 %s3460_s30, 4  ;;  %s743_s3 = sshll.u32 %s3909_s21, 4  ;;  %s734_s9 = int_to_ptr.vmem [resolvable:$true] %s733_s9  ;;  %s744_s3 = int_to_ptr.hbm [resolvable:$true] %s743_s3 }
  0x3d   : > { %2863 = dma.hbm_to_vmem [thread:$0]  (!%p3610_p5), %s732_s28, 16, %s734_s9, [#allocation20]  }
  0x3e   : > { %s3461_s24 = smov [#allocation22]   ;;  %772 = sbr.rel (%p3599_p3) target bundleno = 3247 (0xcaf), region = 108 }
  0x3f   : > { %s745_s6 = sshll.u32 %s3461_s24, 4  ;;  %s746_s6 = int_to_ptr.vmem [resolvable:$true] %s745_s6 }
  0x40   : > { %2866 = dma.hbm_to_vmem [thread:$0]  (!%p3610_p5), %s744_s3, 16, %s746_s6, [#allocation23]  }
  0x43   : > { %3407 = dma.done.wait (%p2867_p2), [#allocation3], 3072  }
  0x44   : > { %3409 = vsyncadd (%p2867_p2), [#allocation3], 4294964224 }
  0x45   : > { %3411 = dma.done.wait (%p2867_p2), [#allocation5], 2048  }
  0x46   : > { %3413 = vsyncadd (%p2867_p2), [#allocation5], 4294965248 }
  0x47   : > { %3415 = dma.done.wait (%p2867_p2), [#allocation8], 3072  }
  0x48   : > { %3417 = vsyncadd (%p2867_p2), [#allocation8], 4294964224 }
  0x49   : > { %3419 = dma.done.wait (%p2867_p2), [#allocation11], 32  }
  0x4a   : > { %3421 = vsyncadd (%p2867_p2), [#allocation11], 4294967264 }
  0x4b   : > { %3423 = dma.done.wait (%p2867_p2), [#allocation14], 1040  }
  0x4c   : > { %3425 = vsyncadd (%p2867_p2), [#allocation14], 4294966256 }
  0x4d   : > { %3427 = dma.done.wait (%p2867_p2), [#allocation17], 1040  }
  0x4e   : > { %3429 = vsyncadd (%p2867_p2), [#allocation17], 4294966256 }
  0x4f   : > { %3431 = dma.done.wait (%p2867_p2), [#allocation20], 32  }
  0x50   : > { %3433 = vsyncadd (%p2867_p2), [#allocation20], 4294967264 }
  0x51   : > { %3435 = dma.done.wait (%p2867_p2), [#allocation23], 16  }
  0x52   : > { %3437 = vsyncadd (%p2867_p2), [#allocation23], 4294967280  ;;  %v2494_v0 = vld [vmem:[#allocation2 + $0xa8] sm:$0xf]  ;;  %v2722_v1 = vld [vmem:[#allocation2 + $0xb0] sm:$0xf0] }
  0x53   : > { %v2721_v2 = vld [vmem:[#allocation2 + $0xac] sm:$0xf]  ;;  %v2495_v3 = vor.u32 %v2722_v1, %v2494_v0  ;;  %v2496_v4 = vld [vmem:[#allocation2 + $0xb4] sm:$0xf0]  ;;  %v2482_v5 = vld [vmem:[#allocation2 + $0x90] sm:$0xf] }
  0x54   : > { %v2719_v6 = vld [vmem:[#allocation2 + $0x98] sm:$0xf0]  ;;  %v2499_v7 = vor.u32 %v2721_v2, %v2496_v4  ;;  %v2718_v8 = vld [vmem:[#allocation2 + $0x94] sm:$0xf]  ;;  %v2484_v9 = vld [vmem:[#allocation2 + $0x9c] sm:$0xf0] }
  0x55   : > { %1092 = vmatpush.bf16.msra.mxu0 %v2495_v3  ;;  %v2483_v10 = vor.u32 %v2719_v6, %v2482_v5  ;;  %v2487_v11 = vor.u32 %v2718_v8, %v2484_v9  ;;  %v2470_v12 = vld [vmem:[#allocation2 + $0x78] sm:$0xf]  ;;  %v2716_v13 = vld [vmem:[#allocation2 + $0x80] sm:$0xf0]  ;;  %v2715_v14 = vld [vmem:[#allocation2 + $0x7c] sm:$0xf] }
  0x56   : > { %1105 = vmatpush.bf16.msra.mxu1 %v2499_v7  ;;  %v2472_v15 = vld [vmem:[#allocation2 + $0x84] sm:$0xf0]  ;;  %v2471_v16 = vor.u32 %v2716_v13, %v2470_v12  ;;  %v2458_v18 = vld [vmem:[#allocation2 + $0x60] sm:$0xf]  ;;  %v2713_v19 = vld [vmem:[#allocation2 + $0x68] sm:$0xf0] }
  0x57   : > { %v2475_v17 = vor.u32 %v2715_v14, %v2472_v15  ;;  %v2712_v20 = vld [vmem:[#allocation2 + $0x64] sm:$0xf]  ;;  %v2460_v21 = vld [vmem:[#allocation2 + $0x6c] sm:$0xf0]  ;;  %v2459_v22 = vor.u32 %v2713_v19, %v2458_v18  ;;  %v2723_v24 = vld [vmem:[#allocation2 + $0xb8] sm:$0xf0] }
  0x58   : > { %v2502_v23 = vld [vmem:[#allocation2 + $0xb0] sm:$0xf]  ;;  %v2490_v25 = vld [vmem:[#allocation2 + $0x98] sm:$0xf]  ;;  %v2463_v26 = vor.u32 %v2712_v20, %v2460_v21  ;;  %v2446_v27 = vld [vmem:[#allocation2 + $0x48] sm:$0xf] }
  0x59   : > { %1093 = vmatpush.bf16.msra.mxu0 %v2483_v10  ;;  %v2710_v28 = vld [vmem:[#allocation2 + $0x50] sm:$0xf0]  ;;  %v2503_v29 = vor.u32 %v2723_v24, %v2502_v23  ;;  %v2720_v30 = vld [vmem:[#allocation2 + $0xa0] sm:$0xf0]  ;;  %v2709_v31 = vld [vmem:[#allocation2 + $0x4c] sm:$0xf] }
  0x5a   : > { %1106 = vmatpush.bf16.msra.mxu1 %v2487_v11  ;;  %v2448_v32 = vld [vmem:[#allocation2 + $0x54] sm:$0xf0]  ;;  %v2434_v33 = vld [vmem:[#allocation2 + $0x30] sm:$0xf]  ;;  %p902_p6 = scmp.lt.s32.totalorder %s3594_s0, 1  ;;  %v2491_v34 = vor.u32 %v2720_v30, %v2490_v25  ;;  %v2447_v35 = vor.u32 %v2710_v28, %v2446_v27  ;;  %s3932_s4 = sld [smem:[#allocation33_spill]] }
  0x5b   : > { %1118 = vmatpush.bf16.msra.mxu2 %v2503_v29  ;;  %v2707_v36 = vld [vmem:[#allocation2 + $0x38] sm:$0xf0]  ;;  %v2478_v37 = vld [vmem:[#allocation2 + $0x80] sm:$0xf]  ;;  %v2717_v38 = vld [vmem:[#allocation2 + $0x88] sm:$0xf0]  ;;  %v2451_v39 = vor.u32 %v2709_v31, %v2448_v32  ;;  %v918_v29 = vlaneseq }
  0x5c   : > { %v2706_v40 = vld [vmem:[#allocation2 + $0x34] sm:$0xf]  ;;  %v2436_v41 = vld [vmem:[#allocation2 + $0x3c] sm:$0xf0]  ;;  %v2466_v42 = vld [vmem:[#allocation2 + $0x68] sm:$0xf]  ;;  %v2479_v45 = vor.u32 %v2717_v38, %v2478_v37  ;;  %v2435_v46 = vor.u32 %v2707_v36, %v2434_v33 }
  0x5d   : > { %1094 = vmatpush.bf16.msra.mxu0 %v2471_v16  ;;  %v2714_v43 = vld [vmem:[#allocation2 + $0x70] sm:$0xf0]  ;;  %v2422_v44 = vld [vmem:[#allocation2 + $0x18] sm:$0xf]  ;;  %v2439_v47 = vor.u32 %v2706_v40, %v2436_v41  ;;  %v2704_v48 = vld [vmem:[#allocation2 + $0x20] sm:$0xf0] }
  0x5e   : > { %1107 = vmatpush.bf16.msra.mxu1 %v2475_v17  ;;  %v2703_v49 = vld [vmem:[#allocation2 + $0x1c] sm:$0xf]  ;;  %v2424_v50 = vld [vmem:[#allocation2 + $0x24] sm:$0xf0]  ;;  %s3942_s0 = smov (!%p902_p6, %s3594_s0), 1  ;;  %v2467_v51 = vor.u32 %v2714_v43, %v2466_v42  ;;  %v2423_v52 = vor.u32 %v2704_v48, %v2422_v44  ;;  %s3933_s25 = sld [smem:[#allocation36_spill]] }
  0x5f   : > { %1119 = vmatpush.bf16.msra.mxu2 %v2491_v34  ;;  %v2454_v53 = vld [vmem:[#allocation2 + $0x50] sm:$0xf]  ;;  %v2711_v54 = vld [vmem:[#allocation2 + $0x58] sm:$0xf0]  ;;  %v2427_v55 = vor.u32 %v2703_v49, %v2424_v50  ;;  %v2410_v56 = vld [vmem:[#allocation2] sm:$0xf] }
  0x60   : > { %v2701_v57 = vld [vmem:[#allocation2 + $0x8] sm:$0xf0]  ;;  %v2700_v58 = vld [vmem:[#allocation2 + $0x4] sm:$0xf]  ;;  %v2412_v59 = vld [vmem:[#allocation2 + $0xc] sm:$0xf0]  ;;  %v2455_v60 = vor.u32 %v2711_v54, %v2454_v53 }
  0x61   : > { %1095 = vmatpush.bf16.msra.mxu0 %v2459_v22  ;;  %s3731_s23 = sshll.u32 %s3942_s0, 2  ;;  %v2411_v61 = vor.u32 %v2701_v57, %v2410_v56  ;;  %v2442_v62 = vld [vmem:[#allocation2 + $0x38] sm:$0xf]  ;;  %v2708_v63 = vld [vmem:[#allocation2 + $0x40] sm:$0xf0]  ;;  %v2415_v0 = vor.u32 %v2700_v58, %v2412_v59  ;;  %vm1134_vm0 = vcmask 64512  }
  0x62   : > { %1108 = vmatpush.bf16.msra.mxu1 %v2463_v26  ;;  %s905_s2 = scalar_lea.vmem %s3932_s4, %s3731_s23  ;;  %v2443_v1 = vor.u32 %v2708_v63, %v2442_v62  ;;  %v2430_v3 = vld [vmem:[#allocation2 + $0x20] sm:$0xf]  ;;  %v2705_v4 = vld [vmem:[#allocation2 + $0x28] sm:$0xf0]  ;;  %v2418_v6 = vld [vmem:[#allocation2 + $0x8] sm:$0xf] }
  0x63   : > { %1120 = vmatpush.bf16.msra.mxu2 %v2479_v45  ;;  %v3737_v2 = vld [vmem:[%s905_s2] sm:$0xf]  ;;  %v2431_v5 = vor.u32 %v2705_v4, %v2430_v3  ;;  %v2702_v7 = vld [vmem:[#allocation2 + $0x10] sm:$0xf0]  ;;  %s3462_s5 = smov 112   ;;  %s3463_s28 = smov 120  }
  0x64   : > { %v2419_v8 = vor.u32 %v2702_v7, %v2418_v6  ;;  %v956_v9 = vld [vmem:[%s3933_s25] sm:$0x7]  ;;  %s3464_s1 = smov 104   ;;  %vm1169_vm1 = vcmask 1043456   ;;  %v919_v30 = vshrl.u32 %v918_v29, 7  ;;  %v921_v31 = vand.u32 127, %v918_v29 }
  0x65   : > { %1096 = vmatpush.bf16.msra.mxu0 %v2447_v35  ;;  %v959_v10 = vperm.slane %v956_v9, 1  ;;  %v958_v13 = vperm.slane %v956_v9, 0  ;;  %v960_v22 = vperm.slane %v956_v9, 2  ;;  %v3465_v32 = vmov -1e+30   ;;  %s3466_s10 = smov 8  }
  0x66   : > { %1109 = vmatpush.bf16.msra.mxu1 %v2451_v39  ;;  %vm922_vm2 = vcmp.le.s32.totalorder %v921_v31, %v919_v30  ;;  %s3467_s30 = smov 16   ;;  %s3468_s9 = smov 24   ;;  %vm1370_vm3 = vcmask 130048   ;;  %vm1372_vm4 = vcmask 195584   ;;  %vm1395_vm5 = vcmask 261120  }
  0x67   : > { %1121 = vmatpush.bf16.msra.mxu2 %v2467_v51  ;;  %v923_v33 = vsel %vm922_vm2, 0.0, %v3465_v32  ;;  %s3934_s3 = sld [smem:[#allocation38_spill]] }
  0x68   : > { %s3935_s26 = sld [smem:[#allocation34_spill]] }
  0x69   : > { %1097 = vmatpush.bf16.msra.mxu0 %v2435_v46  ;;  %s3936_s0 = sld [smem:[#allocation39_spill]] }
  0x6a   : > { %1110 = vmatpush.bf16.msra.mxu1 %v2439_v47 }
  0x6b   : > { %1122 = vmatpush.bf16.msra.mxu2 %v2455_v60 }
  0x6d   : > { %1098 = vmatpush.bf16.msra.mxu0 %v2423_v52 }
  0x6e   : > { %1111 = vmatpush.bf16.msra.mxu1 %v2427_v55  ;;  %s909_s29 = scalar_lea.vmem %s3935_s26, %s3731_s23  ;;  %s3938_s26 = sld [smem:[#allocation40_spill]] }
  0x6f   : > { %1123 = vmatpush.bf16.msra.mxu2 %v2443_v1 }
  0x71   : > { %1099 = vmatpush.bf16.msra.mxu0 %v2411_v61 }
  0x72   : > { %1112 = vmatpush.bf16.msra.mxu1 %v2415_v0 }
  0x73   : > { %1124 = vmatpush.bf16.msra.mxu2 %v2431_v5 }
  0x74   : > { %1100 = vmatmul.bf16.vlgmr.msra.gmra.mxu0 %v3737_v2 }
  0x75   : > { %1113 = vmatmul.bf16.vlgmr.msra.gmra.mxu1 %v3737_v2 }
  0x77   : > { %1125 = vmatpush.bf16.msra.mxu2 %v2419_v8 }
  0x7a   : > { %1126 = vmatmul.bf16.vlgmr.msra.gmra.mxu2 %v3737_v2 }
  0xf1   : > { %v1101_v11 = vpop.f32.mrf.mxu0 }
  0xf2   : > { %v1114_v12 = vpop.f32.mrf.mxu1  ;;  %v1102_v16 = vadd.f32 %v1101_v11, %v958_v13 }
  0xf3   : > { %v1115_v14 = vadd.f32 %v1114_v12, %v959_v10 }
  0xf4   : > { %v1131_v20 = vpack.c.bf16 %v1102_v16, %v1102_v16 }
  0xf5   : > { %v1132_v15 = vpack.c.bf16 %v1115_v14, %v1115_v14 }
  0xf7   : > { %1247 = vrot.lane.b32.xlu2 %v1132_v15, %s3462_s5  ;;  %1190 = vrot.lane.b32.xlu1 %v1132_v15, %s3463_s28  ;;  %v1139_v17 = vsel %vm1134_vm0, %v1132_v15, 0 }
  0xf8   : > { %1148 = vmatpush.bf16.xpose.msra.mxu3 %v1139_v17 }
  0xf9   : > { %v1103_v18 = vpop.f32.mrf.mxu0 }
  0xfa   : > { %v1116_v19 = vpop.f32.mrf.mxu1 }
  0xfd   : > { %v1127_v21 = vpop.f32.mrf.mxu2 }
  0xfe   : > { %v1128_v24 = vadd.f32 %v1127_v21, %v960_v22 }
  0xff   : > { %1245 = vrot.lane.b32.xlu2 %v1131_v20, %s3462_s5  ;;  %1187 = vrot.lane.b32.xlu1 %v1131_v20, %s3463_s28 }
 0x100   : > { %2504 = vmatmul.msk.bf16.vlgmr.msra.gmra.mxu3 %vm1134_vm0, %v1131_v20  ;;  %v3752_v25 = vpack.c.bf16 %v1128_v24, %v1128_v24 }
 0x102   : > { %v1171_v26 = vsel %vm1169_vm1, %v3752_v25, 0 }
 0x103   : > { %1180 = vmatpush.bf16.msrb.mxu3 %v1171_v26 }
 0x105   : > { %v1129_v23 = vpop.f32.mrf.mxu2 }
 0x107   : > { %1301 = vrot.lane.b32.xlu1 %v1131_v20, %s3464_s1 }
 0x151   : > { %v1248_v46 = vpop.permute.xlu2 %1247 }
 0x152   : > { %v1253_v48 = vsel %vm1134_vm0, %v1248_v46, 0 }
 0x159   : > { %v1246_v52 = vpop.permute.xlu2 %1245 }
 0x169   : > { %v1191_v27 = vpop.permute.xlu1 %1190 }
 0x16a   : > { %v1196_v28 = vsel %vm1134_vm0, %v1191_v27, 0 }
 0x16b   : > { %1205 = vmatpush.bf16.xpose.msra.mxu3 %v1196_v28 }
 0x171   : > { %v1188_v50 = vpop.permute.xlu1 %1187 }
 0x179   : > { %v1302_v53 = vpop.permute.xlu1 %1301 }
 0x183   : > { %v1150_v34 = vpop.f32.mrf.mxu3 }
 0x184   : > { %v1151_v35 = vadd.f32 %v1150_v34, %v923_v33 }
 0x186   : > { %v1154_v36 = vsel %vm1134_vm0, %v1151_v35, -inf }
 0x187   : > { %1155 = vmax.xlane.f32.xlu0 %v1154_v36 }
 0x18b   : > { %v1152_v37 = vpop.f32.mrf.mxu3 }
 0x1fa   : > { %v1156_v38 = vpop.xlane.xlu0 %1155 }
 0x1fb   : > { %v1157_v39 = vsub.f32 %v1151_v35, %v1156_v38 }
 0x1fd   : > { %v1158_v40 = vmul.f32 1.442695, %v1157_v39 }
 0x1ff   : > { %2942 = vpow2.f32 %v1158_v40 }
 0x205   : > { %v2943_v41 = vpop.eup %2942 }
 0x206   : > { %v1160_v42 = vsel %vm1134_vm0, %v2943_v41, 0.0 }
 0x207   : > { %1161 = vadd.xlane.f32.xlu0 %v1160_v42 }
 0x21b   : > { %1303 = vrot.lane.b32.xlu0 %v1132_v15, %s3464_s1 }
 0x27a   : > { %v1162_v43 = vpop.xlane.xlu0 %1161 }
 0x27b   : > { %2944 = vrcp.f32 %v1162_v43 }
 0x281   : > { %v2945_v44 = vpop.eup %2944 }
 0x282   : > { %v1164_v45 = vmul.f32 %v2945_v44, %v2943_v41  ;;  %v2725_v44 = vld [vmem:[#allocation4 + $0x8] sm:$0xff] }
 0x283   : > { %1405 = vmatpush.bf16.msrb.mxu1 %v2725_v44 }
 0x284   : > { %v1165_v47 = vpack.c.bf16 %v1164_v45, %v1164_v45  ;;  %v2724_v45 = vld [vmem:[#allocation4] sm:$0xff] }
 0x286   : > { %2505 = vmatmul.msk.bf16.vlgmr.msrb.gmra.mxu3 %vm1134_vm0, %v1165_v47 }
 0x287   : > { %1262 = vmatpush.bf16.xpose.msrb.mxu3 %v1253_v48  ;;  %1406 = vmatpush.bf16.msrb.mxu1 %v2724_v45 }
 0x28d   : > { %v1304_v49 = vpop.permute.xlu0 %1303 }
 0x28e   : > { %v1309_v51 = vsel %vm1134_vm0, %v1304_v49, 0 }
 0x296   : > { %2506 = vmatmul.msk.bf16.vlgmr.msra.gmra.mxu3 %vm1134_vm0, %v1188_v50 }
 0x297   : > { %1318 = vmatpush.bf16.xpose.msra.mxu3 %v1309_v51 }
 0x2a6   : > { %2508 = vmatmul.msk.bf16.vlgmr.msrb.gmra.mxu3 %vm1134_vm0, %v1246_v52 }
 0x2b6   : > { %2510 = vmatmul.msk.bf16.vlgmr.msra.gmra.mxu3 %vm1134_vm0, %v1302_v53  ;;  %v2611_v53 = vld [vmem:[#allocation7 + $0x70] sm:$0xf] }
 0x309   : > { %v3766_v54 = vpop.f32.mrf.mxu3 }
 0x311   : > { %v1184_v55 = vpop.f32.mrf.mxu3 }
 0x312   : > { %v2749_v55 = vld [vmem:[#allocation7 + $0x74] sm:$0xf0] }
 0x319   : > { %v1207_v56 = vpop.f32.mrf.mxu3 }
 0x31a   : > { %v1208_v57 = vadd.f32 %v1207_v56, %v923_v33  ;;  %v2603_v56 = vld [vmem:[#allocation7 + $0x60] sm:$0xf] }
 0x31c   : > { %v1211_v58 = vsel %vm1134_vm0, %v1208_v57, -inf }
 0x31d   : > { %1212 = vmax.xlane.f32.xlu2 %v1211_v58  ;;  %v2747_v58 = vld [vmem:[#allocation7 + $0x64] sm:$0xf0] }
 0x321   : > { %v1209_v59 = vpop.f32.mrf.mxu3 }
 0x322   : > { %v2604_v59 = vor.u32 %v2747_v58, %v2603_v56 }
 0x329   : > { %v1264_v60 = vpop.f32.mrf.mxu3 }
 0x32a   : > { %v1265_v61 = vadd.f32 %v1264_v60, %v923_v33  ;;  %v2595_v60 = vld [vmem:[#allocation7 + $0x50] sm:$0xf] }
 0x32c   : > { %v1268_v62 = vsel %vm1134_vm0, %v1265_v61, -inf }
 0x32d   : > { %1269 = vmax.xlane.f32.xlu1 %v1268_v62  ;;  %v2931_v62 = vld [vmem:[%s3934_s3] ss:$0 sm:$0xff]  ;;  %s3937_s3 = sld [smem:[#allocation42_spill]] }
 0x331   : > { %v1266_v63 = vpop.f32.mrf.mxu3 }
 0x332   : > { %v917_v63 = vunpack.c.l.bf16 %v3737_v2  ;;  %v3469_v2 = vmov 32.0  }
 0x333   : > { %v3828_v58 = vld [vmem:[%s3937_s3] sm:$0x3] }
 0x339   : > { %v1320_v0 = vpop.f32.mrf.mxu3 }
 0x33a   : > { %v1321_v1 = vadd.f32 %v1320_v0, %v923_v33 }
 0x33c   : > { %v1324_v3 = vsel %vm1134_vm0, %v1321_v1, -inf }
 0x33d   : > { %1325 = vmax.xlane.f32.xlu0 %v1324_v3 }
 0x341   : > { %v1322_v4 = vpop.f32.mrf.mxu3 }
 0x351   : > { %1280 = vrot.lane.b32.xlu0 %v3752_v25, %s3462_s5 }
 0x390   : > { %v1213_v5 = vpop.xlane.xlu2 %1212 }
 0x391   : > { %v1214_v6 = vsub.f32 %v1208_v57, %v1213_v5  ;;  %v2612_v57 = vor.u32 %v2749_v55, %v2611_v53  ;;  %v2933_v53 = vld [vmem:[%s3895_s7] ss:$0 sm:$0xff] }
 0x393   : > { %v1215_v7 = vmul.f32 1.442695, %v1214_v6  ;;  %1636 = vmatpush.bf16.msrb.mxu3 %v2612_v57  ;;  %v2587_v6 = vld [vmem:[#allocation7 + $0x40] sm:$0xf] }
 0x395   : > { %2946 = vpow2.f32 %v1215_v7  ;;  %v2743_v7 = vld [vmem:[#allocation7 + $0x44] sm:$0xf0] }
 0x397   : > { %1637 = vmatpush.bf16.msrb.mxu3 %v2604_v59  ;;  %v1552_v59 = vperm.slane %v3828_v58, 0 }
 0x39b   : > { %v2947_v8 = vpop.eup %2946 }
 0x39c   : > { %v1217_v9 = vsel %vm1134_vm0, %v2947_v8, 0.0 }
 0x39d   : > { %1218 = vadd.xlane.f32.xlu2 %v1217_v9  ;;  %v2579_v9 = vld [vmem:[#allocation7 + $0x30] sm:$0xf] }
 0x3a0   : > { %v1270_v10 = vpop.xlane.xlu1 %1269 }
 0x3a1   : > { %v1271_v11 = vsub.f32 %v1265_v61, %v1270_v10  ;;  %v2745_v61 = vld [vmem:[#allocation7 + $0x54] sm:$0xf0] }
 0x3a2   : > { %v2741_v10 = vld [vmem:[#allocation7 + $0x34] sm:$0xf0] }
 0x3a3   : > { %v1272_v12 = vmul.f32 1.442695, %v1271_v11  ;;  %v2733_v11 = vld [vmem:[#allocation6 + $0x38] sm:$0xff] }
 0x3a5   : > { %2948 = vpow2.f32 %v1272_v12  ;;  %v2580_v12 = vor.u32 %v2741_v10, %v2579_v9  ;;  %v2605_v10 = vld [vmem:[#allocation7 + $0x68] sm:$0xf0] }
 0x3ab   : > { %v2949_v13 = vpop.eup %2948 }
 0x3ac   : > { %v1274_v14 = vsel %vm1134_vm0, %v2949_v13, 0.0 }
 0x3ad   : > { %1275 = vadd.xlane.f32.xlu1 %v1274_v14  ;;  %v2739_v14 = vld [vmem:[#allocation7 + $0x24] sm:$0xf0] }
 0x3b0   : > { %v1326_v15 = vpop.xlane.xlu0 %1325 }
 0x3b1   : > { %v1327_v16 = vsub.f32 %v1321_v1, %v1326_v15  ;;  %v2732_v15 = vld [vmem:[#allocation6 + $0x30] sm:$0xff] }
 0x3b3   : > { %v1328_v17 = vmul.f32 1.442695, %v1327_v16 }
 0x3b5   : > { %2950 = vpow2.f32 %v1328_v17  ;;  %1224 = vrot.lane.b32.xlu2 %v3752_v25, %s3463_s28  ;;  %v2563_v17 = vld [vmem:[#allocation7 + $0x10] sm:$0xf] }
 0x3bb   : > { %v2951_v18 = vpop.eup %2950 }
 0x3bc   : > { %v1330_v19 = vsel %vm1134_vm0, %v2951_v18, 0.0 }
 0x3bd   : > { %1331 = vadd.xlane.f32.xlu1 %v1330_v19 }
 0x3c3   : > { %v1281_v20 = vpop.permute.xlu0 %1280 }
 0x3c4   : > { %v1286_v21 = vsel %vm1169_vm1, %v1281_v20, 0  ;;  %v2731_v20 = vld [vmem:[#allocation6 + $0x28] sm:$0xff] }
 0x3c5   : > { %1295 = vmatpush.bf16.msrb.mxu2 %v1286_v21 }
 0x3c9   : > { %1521 = vmatpush.bf16.msra.mxu2 %v2733_v11 }
 0x3cd   : > { %1522 = vmatpush.bf16.msra.mxu2 %v2732_v15  ;;  %v2589_v15 = vld [vmem:[#allocation7 + $0x48] sm:$0xf0] }
 0x3d1   : > { %1523 = vmatpush.bf16.msra.mxu2 %v2731_v20  ;;  %v2581_v20 = vld [vmem:[#allocation7 + $0x38] sm:$0xf0] }
 0x3d6   : > { %1336 = vrot.lane.b32.xlu1 %v3752_v25, %s3464_s1 }
 0x410   : > { %v1219_v22 = vpop.xlane.xlu2 %1218 }
 0x411   : > { %2952 = vrcp.f32 %v1219_v22 }
 0x417   : > { %v2953_v23 = vpop.eup %2952 }
 0x418   : > { %v1221_v24 = vmul.f32 %v2953_v23, %v2947_v8  ;;  %v1225_v26 = vpop.permute.xlu2 %1224  ;;  %v2588_v8 = vor.u32 %v2743_v7, %v2587_v6  ;;  %v2555_v23 = vld [vmem:[#allocation7] sm:$0xf]  ;;  %v2748_v6 = vld [vmem:[#allocation7 + $0x74] sm:$0xf]  ;;  %v2613_v7 = vld [vmem:[#allocation7 + $0x78] sm:$0xf0] }
 0x419   : > { %v1230_v27 = vsel %vm1169_vm1, %v1225_v26, 0  ;;  %v2730_v26 = vld [vmem:[#allocation6 + $0x20] sm:$0xff]  ;;  %v2616_v9 = vor.u32 %v2748_v6, %v2613_v7 }
 0x41a   : > { %1239 = vmatpush.bf16.msrb.mxu0 %v1230_v27  ;;  %v1222_v28 = vpack.c.bf16 %v1221_v24, %v1221_v24  ;;  %v2735_v24 = vld [vmem:[#allocation7 + $0x4] sm:$0xf0]  ;;  %1524 = vmatpush.bf16.msra.mxu2 %v2730_v26  ;;  %v2736_v26 = vld [vmem:[#allocation7 + $0x14] sm:$0xf] }
 0x41b   : > { %v2556_v27 = vor.u32 %v2735_v24, %v2555_v23  ;;  %v2573_v23 = vld [vmem:[#allocation7 + $0x28] sm:$0xf0] }
 0x41d   : > { %2507 = vmatmul.msk.bf16.vlgmr.msrb.gmra.mxu0 %vm1134_vm0, %v1222_v28 }
 0x420   : > { %v1276_v29 = vpop.xlane.xlu1 %1275 }
 0x421   : > { %2954 = vrcp.f32 %v1276_v29  ;;  %v2729_v29 = vld [vmem:[#allocation6 + $0x18] sm:$0xff] }
 0x422   : > { %1525 = vmatpush.bf16.msra.mxu2 %v2729_v29  ;;  %v2734_v29 = vld [vmem:[#allocation7 + $0x4] sm:$0xf] }
 0x427   : > { %v2955_v30 = vpop.eup %2954 }
 0x428   : > { %v1278_v31 = vmul.f32 %v2955_v30, %v2949_v13  ;;  %v2571_v13 = vld [vmem:[#allocation7 + $0x20] sm:$0xf] }
 0x429   : > { %v2572_v16 = vor.u32 %v2739_v14, %v2571_v13  ;;  %v3807_v30 = vld [vmem:[%s909_s29] sm:$0xf]  ;;  %v2742_v14 = vld [vmem:[#allocation7 + $0x44] sm:$0xf] }
 0x42a   : > { %v1279_v32 = vpack.c.bf16 %v1278_v31, %v1278_v31 }
 0x42c   : > { %2509 = vmatmul.msk.bf16.vlgmr.msrb.gmra.mxu2 %vm1134_vm0, %v1279_v32  ;;  %v2728_v32 = vld [vmem:[#allocation6 + $0x10] sm:$0xff] }
 0x42d   : > { %1526 = vmatpush.bf16.msra.mxu2 %v2728_v32 }
 0x430   : > { %v1332_v33 = vpop.xlane.xlu1 %1331 }
 0x431   : > { %2956 = vrcp.f32 %v1332_v33 }
 0x432   : > { %2958 = vrcp.f32 %v3469_v2  ;;  %v2597_v2 = vld [vmem:[#allocation7 + $0x58] sm:$0xf0] }
 0x437   : > { %v2957_v25 = vpop.eup %2956 }
 0x438   : > { %v1334_v34 = vmul.f32 %v2957_v25, %v2951_v18  ;;  %v2737_v18 = vld [vmem:[#allocation7 + $0x14] sm:$0xf0]  ;;  %v2959_v19 = vpop.eup %2958  ;;  %v2727_v25 = vld [vmem:[#allocation6 + $0x8] sm:$0xff] }
 0x439   : > { %v2564_v21 = vor.u32 %v2737_v18, %v2563_v17  ;;  %v1421_v22 = vmul.f32 32.0, %v2959_v19  ;;  %vm1425_vm6 = vweird.f32 %v2959_v19  ;;  %1527 = vmatpush.bf16.msra.mxu2 %v2727_v25  ;;  %v2592_v18 = vor.u32 %v2742_v14, %v2589_v15 }
 0x43a   : > { %v1335_v37 = vpack.c.bf16 %v1334_v34, %v1334_v34  ;;  %v2726_v34 = vld [vmem:[#allocation6] sm:$0xff] }
 0x43b   : > { %v1422_v28 = vsub.f32 1.0, %v1421_v22  ;;  %v2738_v22 = vld [vmem:[#allocation7 + $0x24] sm:$0xf] }
 0x43c   : > { %v2576_v24 = vor.u32 %v2738_v22, %v2573_v23 }
 0x43d   : > { %v1423_v31 = vmul.f32 %v2959_v19, %v1422_v28  ;;  %1528 = vmatpush.bf16.msra.mxu2 %v2726_v34 }
 0x43f   : > { %v1424_v33 = vadd.f32 %v2959_v19, %v1423_v31  ;;  %v2557_v31 = vld [vmem:[#allocation7 + $0x8] sm:$0xf0] }
 0x440   : > { %v2560_v32 = vor.u32 %v2734_v29, %v2557_v31 }
 0x448   : > { %v1337_v35 = vpop.permute.xlu1 %1336 }
 0x449   : > { %v1342_v36 = vsel %vm1169_vm1, %v1337_v35, 0  ;;  %v3810_v35 = vsel %vm1425_vm6, %v2959_v19, %v1424_v33  ;;  %v2740_v19 = vld [vmem:[#allocation7 + $0x34] sm:$0xf] }
 0x44a   : > { %1351 = vmatpush.bf16.msra.mxu0 %v1342_v36 }
 0x44d   : > { %2511 = vmatmul.msk.bf16.vlgmr.msra.gmra.mxu0 %vm1134_vm0, %v1335_v37 }
 0x44e   : > { %1649 = vmatpush.bf16.msrb.mxu0 %v2616_v9 }
 0x49a   : > { %v1241_v38 = vpop.f32.mrf.mxu0 }
 0x49b   : > { %1358 = vrot.lane.b32.xlu2 %v1241_v38, %s3466_s10 }
 0x4a2   : > { %v1243_v39 = vpop.f32.mrf.mxu0 }
 0x4af   : > { %v1297_v40 = vpop.f32.mrf.mxu2 }
 0x4b0   : > { %1362 = vrot.lane.b32.xlu2 %v1297_v40, %s3467_s30 }
 0x4b7   : > { %v1299_v41 = vpop.f32.mrf.mxu2 }
 0x4ca   : > { %v1353_v42 = vpop.f32.mrf.mxu0 }
 0x4cb   : > { %1366 = vrot.lane.b32.xlu0 %v1353_v42, %s3468_s9 }
 0x4d2   : > { %v1355_v43 = vpop.f32.mrf.mxu0 }
 0x4f5   : > { %v1359_v46 = vpop.permute.xlu2 %1358 }
 0x4f6   : > { %v1369_v48 = vsel %vm1134_vm0, %v3766_v54, %v1359_v46  ;;  %v2596_v54 = vor.u32 %v2745_v61, %v2595_v60 }
 0x4f8   : > { %1638 = vmatpush.bf16.msrb.mxu3 %v2596_v54 }
 0x4fc   : > { %1639 = vmatpush.bf16.msrb.mxu3 %v2588_v8  ;;  %v2746_v8 = vld [vmem:[#allocation7 + $0x64] sm:$0xf] }
 0x4fd   : > { %v2608_v11 = vor.u32 %v2746_v8, %v2605_v10 }
 0x4ff   : > { %1650 = vmatpush.bf16.msrb.mxu0 %v2608_v11 }
 0x500   : > { %1640 = vmatpush.bf16.msrb.mxu3 %v2580_v12  ;;  %v2744_v12 = vld [vmem:[#allocation7 + $0x54] sm:$0xf] }
 0x501   : > { %v2600_v13 = vor.u32 %v2744_v12, %v2597_v2 }
 0x503   : > { %1651 = vmatpush.bf16.msrb.mxu0 %v2600_v13 }
 0x504   : > { %1641 = vmatpush.bf16.msrb.mxu3 %v2572_v16 }
 0x507   : > { %1652 = vmatpush.bf16.msrb.mxu0 %v2592_v18 }
 0x508   : > { %1642 = vmatpush.bf16.msrb.mxu3 %v2564_v21  ;;  %v2584_v21 = vor.u32 %v2740_v19, %v2581_v20 }
 0x50a   : > { %v1363_v47 = vpop.permute.xlu2 %1362 }
 0x50b   : > { %v1371_v49 = vsel %vm1370_vm3, %v1369_v48, %v1363_v47  ;;  %1653 = vmatpush.bf16.msrb.mxu0 %v2584_v21 }
 0x50c   : > { %1643 = vmatpush.bf16.msrb.mxu3 %v2556_v27  ;;  %v2565_v27 = vld [vmem:[#allocation7 + $0x18] sm:$0xf0] }
 0x50d   : > { %v2568_v28 = vor.u32 %v2736_v26, %v2565_v27 }
 0x50f   : > { %1644 = vmatmul.bf16.vlgmr.msrb.gmra.mxu3 %v3807_v30  ;;  %1654 = vmatpush.bf16.msrb.mxu0 %v2576_v24 }
 0x513   : > { %1655 = vmatpush.bf16.msrb.mxu0 %v2568_v28 }
 0x517   : > { %1656 = vmatpush.bf16.msrb.mxu0 %v2560_v32 }
 0x51a   : > { %1657 = vmatmul.bf16.vlgmr.msrb.gmra.mxu0 %v3807_v30 }
 0x53d   : > { %v1367_v50 = vpop.permute.xlu0 %1366 }
 0x53e   : > { %v1373_v51 = vsel %vm1372_vm4, %v1371_v49, %v1367_v50  ;;  %v2932_v50 = vld [vmem:[%s3936_s0] ss:$0 sm:$0xff] }
 0x53f   : > { %v1374_v52 = vpack.c.bf16 %v1373_v51, %v1373_v51 }
 0x541   : > { %2520 = vmatmul.msk.bf16.vlgmr.msrb.gmra.mxu1 %vm1395_vm5, %v1374_v52 }
 0x592   : > { %v1645_v60 = vpop.f32.mrf.mxu3 }
 0x593   : > { %v1646_v61 = vadd.f32 %v1645_v60, %v1552_v59 }
 0x595   : > { %v1663_v54 = vpack.c.bf16 %v1646_v61, %v1646_v61 }
 0x597   : > { %1719 = vrot.lane.b32.xlu1 %v1663_v54, %s3463_s28 }
 0x5be   : > { %v1408_v0 = vpop.f32.mrf.mxu1 }
 0x5bf   : > { %v1409_v1 = vadd.f32 %v2931_v62, %v1408_v0  ;;  %v1669_v62 = vsel %vm1134_vm0, %v1663_v54, 0  ;;  %v2934_v0 = vld [vmem:[%s3938_s26] ss:$0 sm:$0xff] }
 0x5c0   : > { %1678 = vmatpush.bf16.xpose.msra.mxu1 %v1669_v62 }
 0x5c1   : > { %v3798_v3 = vadd.f32 %v1409_v1, %v917_v63  ;;  %v1647_v63 = vpop.f32.mrf.mxu3 }
 0x5c3   : > { %1415 = vadd.xlane.f32.xlu2 %v3798_v3  ;;  %v1417_v4 = vmul.f32 %v3798_v3, %v3798_v3 }
 0x5c5   : > { %1418 = vadd.xlane.f32.xlu0 %v1417_v4 }
 0x5c6   : > { %v1410_v5 = vpop.f32.mrf.mxu1 }
 0x609   : > { %v1720_v16 = vpop.permute.xlu1 %1719 }
 0x60a   : > { %v1725_v17 = vsel %vm1134_vm0, %v1720_v16, 0 }
 0x60b   : > { %1734 = vmatpush.bf16.xpose.msrb.mxu2 %v1725_v17 }
 0x636   : > { %v1416_v36 = vpop.xlane.xlu2 %1415 }
 0x637   : > { %v1427_v37 = vmul.f32 %v3810_v35, %v1416_v36 }
 0x638   : > { %v1419_v38 = vpop.xlane.xlu0 %1418 }
 0x639   : > { %v1429_v39 = vmul.f32 %v1427_v37, %v1427_v37  ;;  %v1428_v40 = vmul.f32 %v3810_v35, %v1419_v38  ;;  %v1431_v49 = vsub.f32 %v3798_v3, %v1427_v37 }
 0x63b   : > { %v1430_v41 = vsub.f32 %v1428_v40, %v1429_v39 }
 0x63d   : > { %v1432_v42 = vadd.f32 1e-05, %v1430_v41 }
 0x63f   : > { %2960 = vrsqrt.f32 %v1432_v42  ;;  %vm1439_vm8 = vweird.f32 %v1432_v42 }
 0x645   : > { %v2961_v43 = vpop.eup %2960 }
 0x646   : > { %v1434_v44 = vmul.f32 %v2961_v43, %v1432_v42  ;;  %vm1440_vm7 = vweird.f32 %v2961_v43  ;;  %v1658_v42 = vpop.f32.mrf.mxu0 }
 0x647   : > { %vm1441_vm9 = vmor %vm1439_vm8, %vm1440_vm7 }
 0x648   : > { %v1435_v45 = vmul.f32 %v2961_v43, %v1434_v44 }
 0x64a   : > { %v1436_v46 = vmul.f32 0.5, %v1435_v45 }
 0x64c   : > { %v1437_v47 = vsub.f32 1.5, %v1436_v46 }
 0x64e   : > { %v1438_v48 = vmul.f32 %v2961_v43, %v1437_v47  ;;  %v1660_v45 = vpop.f32.mrf.mxu0 }
 0x64f   : > { %v2751_v45 = vld [vmem:[#allocation9 + $0x8] sm:$0xff] }
 0x650   : > { %v1442_v51 = vsel %vm1441_vm9, %v2961_v43, %v1438_v48  ;;  %v1553_v43 = vperm.slane %v3828_v58, 1 }
 0x651   : > { %v1443_v52 = vmul.f32 %v1442_v51, %v1431_v49 }
 0x652   : > { %v1659_v44 = vadd.f32 %v1658_v42, %v1553_v43 }
 0x653   : > { %v1447_v55 = vmul.f32 %v2932_v50, %v1443_v52 }
 0x654   : > { %v1664_v46 = vpack.c.bf16 %v1659_v44, %v1659_v44 }
 0x655   : > { %v3821_v56 = vadd.f32 %v2933_v53, %v1447_v55 }
 0x656   : > { %v1700_v47 = vsel %vm1169_vm1, %v1664_v46, 0 }
 0x657   : > { %v1452_v57 = vpack.c.bf16 %v3821_v56, %v3821_v56  ;;  %1709 = vmatpush.bf16.msrb.mxu1 %v1700_v47 }
 0x659   : > { %1529 = vmatmul.bf16.vlgmr.msra.gmra.mxu2 %v1452_v57 }
 0x6dc   : > { %v1530_v1 = vpop.f32.mrf.mxu2 }
 0x6dd   : > { %v1531_v3 = vadd.f32 %v2934_v0, %v1530_v1 }
 0x6df   : > { %v1662_v4 = vpack.c.bf16 %v1531_v3, %v1531_v3 }
 0x6e1   : > { %1774 = vrot.lane.b32.xlu2 %v1662_v4, %s3462_s5  ;;  %1716 = vrot.lane.b32.xlu1 %v1662_v4, %s3463_s28 }
 0x6e2   : > { %2617 = vmatmul.msk.bf16.vlgmr.msra.gmra.mxu1 %vm1134_vm0, %v1662_v4 }
 0x6e4   : > { %v1532_v5 = vpop.f32.mrf.mxu2 }
 0x6e9   : > { %1832 = vrot.lane.b32.xlu1 %v1663_v54, %s3464_s1 }
 0x6f1   : > { %1830 = vrot.lane.b32.xlu1 %v1662_v4, %s3464_s1 }
 0x6f9   : > { %1776 = vrot.lane.b32.xlu1 %v1663_v54, %s3462_s5 }
 0x73b   : > { %v1775_v30 = vpop.permute.xlu2 %1774 }
 0x753   : > { %v1717_v33 = vpop.permute.xlu1 %1716 }
 0x754   : > { %2619 = vmatmul.msk.bf16.vlgmr.msrb.gmra.mxu2 %vm1134_vm0, %v1717_v33 }
 0x75b   : > { %v1833_v25 = vpop.permute.xlu1 %1832 }
 0x75c   : > { %v1838_v34 = vsel %vm1134_vm0, %v1833_v25, 0 }
 0x75d   : > { %1847 = vmatpush.bf16.xpose.msra.mxu2 %v1838_v34 }
 0x75f   : > { %v1680_v36 = vpop.f32.mrf.mxu1 }
 0x760   : > { %v1684_v37 = vsel %vm1134_vm0, %v1680_v36, -inf }
 0x761   : > { %1685 = vmax.xlane.f32.xlu0 %v1684_v37 }
 0x763   : > { %v1831_v38 = vpop.permute.xlu1 %1830 }
 0x764   : > { %2623 = vmatmul.msk.bf16.vlgmr.msra.gmra.mxu2 %vm1134_vm0, %v1831_v38 }
 0x767   : > { %v1682_v39 = vpop.f32.mrf.mxu1 }
 0x76b   : > { %v1777_v40 = vpop.permute.xlu1 %1776 }
 0x76c   : > { %v1782_v41 = vsel %vm1134_vm0, %v1777_v40, 0 }
 0x76d   : > { %1791 = vmatpush.bf16.xpose.msra.mxu0 %v1782_v41 }
 0x774   : > { %2621 = vmatmul.msk.bf16.vlgmr.msra.gmra.mxu0 %vm1134_vm0, %v1775_v30 }
 0x775   : > { %1931 = vmatpush.bf16.msrb.mxu0 %v2751_v45 }
 0x7d4   : > { %v1686_v52 = vpop.xlane.xlu0 %1685 }
 0x7d5   : > { %v1687_v55 = vsub.f32 %v1680_v36, %v1686_v52 }
 0x7d7   : > { %v1736_v48 = vpop.f32.mrf.mxu2  ;;  %v1688_v58 = vmul.f32 1.442695, %v1687_v55  ;;  %v2935_v55 = vld [vmem:[#allocation10] ss:$0 sm:$0xff] }
 0x7d8   : > { %v1740_v49 = vsel %vm1134_vm0, %v1736_v48, -inf }
 0x7d9   : > { %1741 = vmax.xlane.f32.xlu1 %v1740_v49  ;;  %2962 = vpow2.f32 %v1688_v58 }
 0x7df   : > { %v1738_v50 = vpop.f32.mrf.mxu2  ;;  %v2963_v54 = vpop.eup %2962 }
 0x7e0   : > { %v1690_v62 = vsel %vm1134_vm0, %v2963_v54, 0.0 }
 0x7e7   : > { %v1849_v51 = vpop.f32.mrf.mxu2 }
 0x7e8   : > { %v1853_v61 = vsel %vm1134_vm0, %v1849_v51, -inf }
 0x7ef   : > { %v1851_v53 = vpop.f32.mrf.mxu2 }
 0x7f1   : > { %v1793_v57 = vpop.f32.mrf.mxu0 }
 0x7f2   : > { %v1797_v59 = vsel %vm1134_vm0, %v1793_v57, -inf }
 0x7f3   : > { %1798 = vmax.xlane.f32.xlu0 %v1797_v59 }
 0x7f9   : > { %v1795_v60 = vpop.f32.mrf.mxu0 }
 0x7fb   : > { %1854 = vmax.xlane.f32.xlu0 %v1853_v61 }
 0x803   : > { %1691 = vadd.xlane.f32.xlu0 %v1690_v62  ;;  %v2758_v62 = vld [vmem:[#allocation15 + $0x30] sm:$0xff] }
 0x817   : > { %1753 = vrot.lane.b32.xlu0 %v1664_v46, %s3463_s28 }
 0x81f   : > { %1865 = vrot.lane.b32.xlu0 %v1664_v46, %s3464_s1  ;;  %s3939_s1 = sld [smem:[#allocation43_spill]] }
 0x84c   : > { %v1742_v63 = vpop.xlane.xlu1 %1741 }
 0x84d   : > { %v1743_v0 = vsub.f32 %v1736_v48, %v1742_v63  ;;  %v2757_v63 = vld [vmem:[#allocation15 + $0x28] sm:$0xff] }
 0x84f   : > { %v1744_v1 = vmul.f32 1.442695, %v1743_v0  ;;  %v2756_v0 = vld [vmem:[#allocation15 + $0x20] sm:$0xff] }
 0x851   : > { %2964 = vpow2.f32 %v1744_v1  ;;  %v2755_v1 = vld [vmem:[#allocation15 + $0x18] sm:$0xff] }
 0x857   : > { %v2965_v3 = vpop.eup %2964 }
 0x858   : > { %v1746_v4 = vsel %vm1134_vm0, %v2965_v3, 0.0 }
 0x859   : > { %1747 = vadd.xlane.f32.xlu2 %v1746_v4  ;;  %v2753_v4 = vld [vmem:[#allocation15 + $0x8] sm:$0xff] }
 0x866   : > { %v1799_v5 = vpop.xlane.xlu0 %1798 }
 0x867   : > { %v1800_v6 = vsub.f32 %v1793_v57, %v1799_v5  ;;  %v2752_v5 = vld [vmem:[#allocation15] sm:$0xff] }
 0x869   : > { %v1801_v7 = vmul.f32 1.442695, %v1800_v6 }
 0x86b   : > { %2966 = vpow2.f32 %v1801_v7 }
 0x86e   : > { %v1855_v8 = vpop.xlane.xlu0 %1854 }
 0x86f   : > { %v1856_v9 = vsub.f32 %v1849_v51, %v1855_v8 }
 0x871   : > { %v2967_v10 = vpop.eup %2966  ;;  %v1857_v11 = vmul.f32 1.442695, %v1856_v9 }
 0x872   : > { %v1803_v12 = vsel %vm1134_vm0, %v2967_v10, 0.0 }
 0x873   : > { %2968 = vpow2.f32 %v1857_v11  ;;  %1804 = vadd.xlane.f32.xlu1 %v1803_v12  ;;  %v2766_v12 = vld [vmem:[#allocation18 + $0x30] sm:$0xff] }
 0x876   : > { %v1692_v2 = vpop.xlane.xlu0 %1691 }
 0x877   : > { %2970 = vrcp.f32 %v1692_v2 }
 0x879   : > { %v2969_v13 = vpop.eup %2968 }
 0x87a   : > { %v1859_v14 = vsel %vm1134_vm0, %v2969_v13, 0.0 }
 0x87b   : > { %1860 = vadd.xlane.f32.xlu1 %v1859_v14  ;;  %v2764_v14 = vld [vmem:[#allocation18 + $0x20] sm:$0xff] }
 0x87d   : > { %v2971_v15 = vpop.eup %2970 }
 0x87e   : > { %v1694_v16 = vmul.f32 %v2971_v15, %v2963_v54  ;;  %v2759_v54 = vld [vmem:[#allocation15 + $0x38] sm:$0xff] }
 0x880   : > { %v1695_v17 = vpack.c.bf16 %v1694_v16, %v1694_v16 }
 0x882   : > { %2618 = vmatmul.msk.bf16.vlgmr.msrb.gmra.mxu1 %vm1134_vm0, %v1695_v17  ;;  %v2763_v17 = vld [vmem:[#allocation18 + $0x18] sm:$0xff] }
 0x889   : > { %v1754_v18 = vpop.permute.xlu0 %1753 }
 0x88a   : > { %v1759_v19 = vsel %vm1169_vm1, %v1754_v18, 0 }
 0x88b   : > { %1768 = vmatpush.bf16.msra.mxu3 %v1759_v19 }
 0x891   : > { %v1866_v20 = vpop.permute.xlu0 %1865 }
 0x892   : > { %v1871_v21 = vsel %vm1169_vm1, %v1866_v20, 0  ;;  %v2762_v20 = vld [vmem:[#allocation18 + $0x10] sm:$0xff] }
 0x893   : > { %1880 = vmatpush.bf16.msrb.mxu3 %v1871_v21 }
 0x894   : > { %1809 = vrot.lane.b32.xlu1 %v1664_v46, %s3462_s5  ;;  %v2750_v46 = vld [vmem:[#allocation9] sm:$0xff] }
 0x895   : > { %1932 = vmatpush.bf16.msrb.mxu0 %v2750_v46 }
 0x8cc   : > { %v1748_v22 = vpop.xlane.xlu2 %1747 }
 0x8cd   : > { %2972 = vrcp.f32 %v1748_v22 }
 0x8d3   : > { %v2973_v23 = vpop.eup %2972 }
 0x8d4   : > { %v1750_v24 = vmul.f32 %v2973_v23, %v2965_v3  ;;  %v2754_v3 = vld [vmem:[#allocation15 + $0x10] sm:$0xff] }
 0x8d6   : > { %v1751_v26 = vpack.c.bf16 %v1750_v24, %v1750_v24  ;;  %v2936_v24 = vld [vmem:[#allocation12] ss:$0 sm:$0xff] }
 0x8d8   : > { %2620 = vmatmul.msk.bf16.vlgmr.msra.gmra.mxu3 %vm1134_vm0, %v1751_v26 }
 0x8e6   : > { %v1805_v27 = vpop.xlane.xlu1 %1804 }
 0x8ee   : > { %v1861_v28 = vpop.xlane.xlu1 %1860 }
 0x8ef   : > { %2974 = vrcp.f32 %v1861_v28  ;;  %v2937_v28 = vld [vmem:[#allocation13] ss:$0 sm:$0xff] }
 0x8f0   : > { %2976 = vrcp.f32 %v1805_v27 }
 0x8f5   : > { %v2975_v29 = vpop.eup %2974 }
 0x8f6   : > { %v1863_v31 = vmul.f32 %v2975_v29, %v2969_v13  ;;  %v2977_v25 = vpop.eup %2976  ;;  %v2765_v13 = vld [vmem:[#allocation18 + $0x28] sm:$0xff] }
 0x8f7   : > { %v1807_v34 = vmul.f32 %v2977_v25, %v2967_v10  ;;  %v2767_v10 = vld [vmem:[#allocation18 + $0x38] sm:$0xff]  ;;  %v2760_v25 = vld [vmem:[#allocation18] sm:$0xff] }
 0x8f8   : > { %v1864_v32 = vpack.c.bf16 %v1863_v31, %v1863_v31  ;;  %2123 = vmatpush.bf16.msrb.mxu2 %v2767_v10 }
 0x8f9   : > { %v1808_v39 = vpack.c.bf16 %v1807_v34, %v1807_v34  ;;  %v2938_v34 = vld [vmem:[#allocation16] ss:$0 sm:$0xff] }
 0x8fa   : > { %2624 = vmatmul.msk.bf16.vlgmr.msrb.gmra.mxu3 %vm1134_vm0, %v1864_v32 }
 0x8fc   : > { %2124 = vmatpush.bf16.msrb.mxu2 %v2766_v12 }
 0x8ff   : > { %v1711_v33 = vpop.f32.mrf.mxu1 }
 0x900   : > { %2125 = vmatpush.bf16.msrb.mxu2 %v2765_v13 }
 0x904   : > { %2126 = vmatpush.bf16.msrb.mxu2 %v2764_v14 }
 0x906   : > { %v1810_v36 = vpop.permute.xlu1 %1809 }
 0x907   : > { %v1815_v37 = vsel %vm1169_vm1, %v1810_v36, 0  ;;  %v1713_v38 = vpop.f32.mrf.mxu1 }
 0x908   : > { %1824 = vmatpush.bf16.msra.mxu1 %v1815_v37  ;;  %2127 = vmatpush.bf16.msrb.mxu2 %v2763_v17 }
 0x90b   : > { %2622 = vmatmul.msk.bf16.vlgmr.msra.gmra.mxu1 %vm1134_vm0, %v1808_v39 }
 0x90c   : > { %2040 = vmatpush.bf16.msrb.mxu1 %v2759_v54  ;;  %2128 = vmatpush.bf16.msrb.mxu2 %v2762_v20  ;;  %v2940_v54 = vld [vmem:[#allocation21] ss:$0 sm:$0xff] }
 0x910   : > { %2041 = vmatpush.bf16.msrb.mxu1 %v2758_v62 }
 0x914   : > { %2042 = vmatpush.bf16.msrb.mxu1 %v2757_v63  ;;  %v2941_v63 = vld [vmem:[#allocation22] ss:$0 sm:$0xff] }
 0x918   : > { %2043 = vmatpush.bf16.msrb.mxu1 %v2756_v0 }
 0x91c   : > { %2044 = vmatpush.bf16.msrb.mxu1 %v2755_v1 }
 0x920   : > { %2045 = vmatpush.bf16.msrb.mxu1 %v2754_v3 }
 0x924   : > { %2046 = vmatpush.bf16.msrb.mxu1 %v2753_v4 }
 0x928   : > { %2047 = vmatpush.bf16.msrb.mxu1 %v2752_v5 }
 0x95b   : > { %v1770_v40 = vpop.f32.mrf.mxu3 }
 0x95c   : > { %1887 = vrot.lane.b32.xlu0 %v1770_v40, %s3466_s10  ;;  %s913_s10 = scalar_lea.vmem %s3939_s1, %s3731_s23 }
 0x963   : > { %v1772_v41 = vpop.f32.mrf.mxu3 }
 0x964   : > { %v2939_v41 = vld [vmem:[#allocation19] ss:$0 sm:$0xff] }
 0x97d   : > { %v1882_v30 = vpop.f32.mrf.mxu3 }
 0x97e   : > { %1895 = vrot.lane.b32.xlu0 %v1882_v30, %s3468_s9 }
 0x985   : > { %v1884_v42 = vpop.f32.mrf.mxu3 }
 0x988   : > { %v1826_v43 = vpop.f32.mrf.mxu1 }
 0x989   : > { %1891 = vrot.lane.b32.xlu2 %v1826_v43, %s3467_s30 }
 0x990   : > { %v1828_v44 = vpop.f32.mrf.mxu1 }
 0x9ce   : > { %v1888_v47 = vpop.permute.xlu0 %1887 }
 0x9cf   : > { %v1898_v49 = vsel %vm1134_vm0, %v1711_v33, %v1888_v47  ;;  %v2761_v33 = vld [vmem:[#allocation18 + $0x8] sm:$0xff] }
 0x9d0   : > { %2129 = vmatpush.bf16.msrb.mxu2 %v2761_v33 }
 0x9d4   : > { %2130 = vmatpush.bf16.msrb.mxu2 %v2760_v25 }
 0x9e3   : > { %v1892_v48 = vpop.permute.xlu2 %1891 }
 0x9e4   : > { %v1899_v50 = vsel %vm1370_vm3, %v1898_v49, %v1892_v48 }
 0x9f0   : > { %v1896_v51 = vpop.permute.xlu0 %1895 }
 0x9f1   : > { %v1900_v52 = vsel %vm1372_vm4, %v1899_v50, %v1896_v51 }
 0x9f2   : > { %v1901_v53 = vpack.c.bf16 %v1900_v52, %v1900_v52 }
 0x9f4   : > { %2633 = vmatmul.msk.bf16.vlgmr.msrb.gmra.mxu0 %vm1395_vm5, %v1901_v53 }
 0xa71   : > { %v1934_v57 = vpop.f32.mrf.mxu0 }
 0xa72   : > { %v1935_v59 = vadd.f32 %v2935_v55, %v1934_v57 }
 0xa74   : > { %v1938_v58 = vadd.f32 %v1935_v59, %v3821_v56 }
 0xa76   : > { %1941 = vadd.xlane.f32.xlu0 %v1938_v58  ;;  %v1943_v60 = vmul.f32 %v1938_v58, %v1938_v58 }
 0xa78   : > { %1944 = vadd.xlane.f32.xlu1 %v1943_v60 }
 0xa79   : > { %v1936_v61 = vpop.f32.mrf.mxu0 }
 0xae9   : > { %v1942_v56 = vpop.xlane.xlu0 %1941 }
 0xaea   : > { %v1946_v6 = vmul.f32 %v1942_v56, %v3810_v35 }
 0xaeb   : > { %v1945_v7 = vpop.xlane.xlu1 %1944 }
 0xaec   : > { %v1948_v8 = vmul.f32 %v1946_v6, %v1946_v6  ;;  %v1947_v9 = vmul.f32 %v1945_v7, %v3810_v35  ;;  %v1950_v23 = vsub.f32 %v1938_v58, %v1946_v6 }
 0xaee   : > { %v1949_v11 = vsub.f32 %v1947_v9, %v1948_v8 }
 0xaf0   : > { %v1951_v2 = vadd.f32 1e-05, %v1949_v11 }
 0xaf2   : > { %2978 = vrsqrt.f32 %v1951_v2  ;;  %vm1958_vm11 = vweird.f32 %v1951_v2 }
 0xaf8   : > { %v2979_v15 = vpop.eup %2978 }
 0xaf9   : > { %v1953_v16 = vmul.f32 %v2979_v15, %v1951_v2  ;;  %vm1959_vm10 = vweird.f32 %v2979_v15 }
 0xafa   : > { %vm1960_vm12 = vmor %vm1958_vm11, %vm1959_vm10 }
 0xafb   : > { %v1954_v18 = vmul.f32 %v2979_v15, %v1953_v16 }
 0xafd   : > { %v1955_v19 = vmul.f32 0.5, %v1954_v18 }
 0xaff   : > { %v1956_v21 = vsub.f32 1.5, %v1955_v19 }
 0xb01   : > { %v1957_v22 = vmul.f32 %v2979_v15, %v1956_v21 }
 0xb03   : > { %v1961_v26 = vsel %vm1960_vm12, %v2979_v15, %v1957_v22 }
 0xb04   : > { %v1962_v27 = vmul.f32 %v1961_v26, %v1950_v23 }
 0xb06   : > { %v1966_v29 = vmul.f32 %v2936_v24, %v1962_v27 }
 0xb08   : > { %v1970_v31 = vadd.f32 %v2937_v28, %v1966_v29 }
 0xb0a   : > { %v1971_v32 = vpack.c.bf16 %v1970_v31, %v1970_v31 }
 0xb0c   : > { %2048 = vmatmul.bf16.vlgmr.msrb.gmra.mxu1 %v1971_v32 }
 0xb89   : > { %v2049_v36 = vpop.f32.mrf.mxu1 }
 0xb8a   : > { %v2050_v37 = vadd.f32 %v2938_v34, %v2049_v36 }
 0xb8c   : > { %v2053_v38 = vmax.f32 %v2050_v37, 0.0 }
 0xb8e   : > { %v2054_v39 = vpack.c.bf16 %v2053_v38, %v2053_v38 }
 0xb90   : > { %2131 = vmatmul.bf16.vlgmr.msrb.gmra.mxu2 %v2054_v39 }
 0xb91   : > { %v2051_v40 = vpop.f32.mrf.mxu1 }
 0xc13   : > { %v2132_v30 = vpop.f32.mrf.mxu2 }
 0xc14   : > { %v2133_v42 = vadd.f32 %v2939_v41, %v2132_v30 }
 0xc16   : > { %v2136_v43 = vadd.f32 %v2133_v42, %v1970_v31 }
 0xc18   : > { %2139 = vadd.xlane.f32.xlu2 %v2136_v43  ;;  %v2141_v44 = vmul.f32 %v2136_v43, %v2136_v43 }
 0xc1a   : > { %2142 = vadd.xlane.f32.xlu0 %v2141_v44 }
 0xc1b   : > { %v2134_v45 = vpop.f32.mrf.mxu2 }
 0xc8b   : > { %v2140_v46 = vpop.xlane.xlu2 %2139 }
 0xc8c   : > { %v2144_v47 = vmul.f32 %v2140_v46, %v3810_v35 }
 0xc8d   : > { %v2143_v48 = vpop.xlane.xlu0 %2142 }
 0xc8e   : > { %v2146_v49 = vmul.f32 %v2144_v47, %v2144_v47  ;;  %v2145_v50 = vmul.f32 %v2143_v48, %v3810_v35  ;;  %v2148_v61 = vsub.f32 %v2136_v43, %v2144_v47 }
 0xc90   : > { %v2147_v51 = vsub.f32 %v2145_v50, %v2146_v49 }
 0xc92   : > { %v2149_v52 = vadd.f32 1e-05, %v2147_v51 }
 0xc94   : > { %2980 = vrsqrt.f32 %v2149_v52  ;;  %vm2156_vm14 = vweird.f32 %v2149_v52 }
 0xc9a   : > { %v2981_v53 = vpop.eup %2980 }
 0xc9b   : > { %v2151_v55 = vmul.f32 %v2981_v53, %v2149_v52  ;;  %vm2157_vm13 = vweird.f32 %v2981_v53 }
 0xc9c   : > { %vm2158_vm15 = vmor %vm2156_vm14, %vm2157_vm13 }
 0xc9d   : > { %v2152_v57 = vmul.f32 %v2981_v53, %v2151_v55 }
 0xc9f   : > { %v2153_v59 = vmul.f32 0.5, %v2152_v57 }
 0xca1   : > { %v2154_v58 = vsub.f32 1.5, %v2153_v59 }
 0xca3   : > { %v2155_v60 = vmul.f32 %v2981_v53, %v2154_v58 }
 0xca5   : > { %v2159_v62 = vsel %vm2158_vm15, %v2981_v53, %v2155_v60 }
 0xca6   : > { %v2160_v0 = vmul.f32 %v2159_v62, %v2148_v61 }
 0xca8   : > { %v2164_v1 = vmul.f32 %v2940_v54, %v2160_v0 }
 0xcaa   : > { %v2168_v35 = vadd.f32 %v2941_v63, %v2164_v1 }
 0xcac   : > { %v2169_v3 = vpack.c.bf16 %v2168_v35, %v2168_v35 }
 0xcae   : > { %2170 = vst [vmem:[%s913_s10] sm:$0xf] %v2169_v3 }
 0xcaf PF: > { %s3940_s30 = sld [smem:[#allocation32_spill]] }
 0xcb5   : > { %s40_s3 = sadd.s32 1, %s3940_s30  }
 0xcb6   : > { %p37_p7 = scmp.ge.s32.totalorder %s40_s3, 4  }
 0xcb8   :  { %39 = sbr.rel (!%p37_p7) target bundleno = 20 (0x14), region = 198 }
 0xcbd   :  { %2190 = vsyncpa [#allocation3], 1 }
 0xcbe   :  { %2192 = vsyncpa [#allocation3 + $0x1], 1 }
 0xcbf   :  { %2193 = vsyncpa [#allocation5], 1 }
 0xcc0   :  { %2194 = vsyncpa [#allocation8], 1 }
 0xcc1   :  { %2195 = vsyncpa [#allocation11], 1 }
 0xcc2   :  { %2196 = vsyncpa [#allocation14], 1 }
 0xcc3   :  { %2197 = vsyncpa [#allocation17], 1 }
 0xcc4   :  { %2198 = vsyncpa [#allocation20], 1 }
 0xcc5   :  { %2199 = vsyncpa [#allocation23], 1 }

// kernel: transformer_forward.9
= control target key start
LH: loop header
LB: loop body
LE: loop exit
PB: predicated region body
PF: predicated region fallthrough
CT: control target
= control target key end

     0   :  { %10 = vsyncpa [#allocation3], 0  ;;  %s730_s0 = inlined_call_operand.vmem [shape: bf16[2,8,128], index: 0, kind: input, shape index: {}]   ;;  %s731_s1 = inlined_call_operand.vmem [shape: f32[1,128], index: 1, kind: input, shape index: {}]   ;;  %s732_s2 = inlined_call_operand.vmem [shape: f32[1,128], index: 2, kind: input, shape index: {}]   ;;  %s733_s3 = inlined_call_operand.vmem [shape: bf16[128,48], index: 3, kind: input, shape index: {}]   ;;  %s734_s4 = inlined_call_operand.vmem [shape: f32[1,48], index: 4, kind: input, shape index: {}]   ;;  %s735_s5 = inlined_call_operand.hbm [shape: f32[2,8,48], index: 5, kind: output, shape index: {}]  }
   0x1   :  { %12 = vsyncpa [#allocation3 + $0x1], 0  ;;  %s612_s18 = smov 0   ;;  %s614_s19 = smov 0  }
   0x2   :  { %s616_s20 = smov 0   ;;  %s618_s21 = smov 0  }
   0x3 LB: > { %s633_s22 = sadd.s32 4294967295, %s579_s21   ;;  %s420_s23 = sadd.s32 4294967294, %s579_s21   ;;  %s579_s21 = sphi %s618_s21, %s741_s21   ;;  %s575_s20 = sphi %s616_s20, %s740_s20   ;;  %s571_s19 = sphi %s614_s19, %s739_s19   ;;  %s567_s18 = sphi %s612_s18, %s738_s18  }
   0x4   : > { %s637_s24 = sadd.s32 1, %s579_s21   ;;  %s135_s25 = sadd.s32 1, %s575_s20 }
   0x5   : > { %s132_s26 = ssub.s32 %s579_s21, %s637_s24  ;;  %p145_p0 = scmp.ne.s32.totalorder %s575_s20, %s571_s19 }
   0x6   : > { %p133_p1 = scmp.eq.s32.totalorder %s132_s26, 0  ;;  %p146_p2 = scmp.eq.s32.totalorder %s633_s22, 1 }
   0x7   : > { %p151_p3 = scmp.ne.s32.totalorder %s571_s19, %s567_s18  ;;  %p152_p4 = scmp.eq.s32.totalorder %s420_s23, 1 }
   0x8   : > { %s648_s27 = scalar_select %p133_p1, %s575_s20, %s135_s25  }
   0x9   : > { %p650_p5 = por %p146_p2, %p145_p0  ;;  %p654_p6 = por %p152_p4, %p151_p3 }
   0xa   : > { %p423_p7 = scmp.ge.s32.totalorder %s579_s21, 1  ;;  %p189_p8 = scmp.lt.s32.totalorder %s579_s21, 3 }
   0xc   : > { %p190_p9 = pnand %p423_p7, %p189_p8 }
   0xd   : > { %p216_p10 = scmp.lt.s32.totalorder (!%p190_p9), %s633_s22, 1  ;;  %s213_s14 = sand.u32 (!%p190_p9), 1, %s571_s19  }
   0xe   : > { %193 = sbr.rel (%p190_p9) target bundleno = 316 (0x13c), region = 40  ;;  %s459_s15 = sshll.u32 (!%p190_p9), %s633_s22, 3 }
   0xf   : > { %s424_s16 = sshll.u32 (!%p190_p9), %s213_s14, 3  ;;  %s356_s25 = scalar_lea.hbm (!%p190_p9), %s735_s5, %s459_s15 }
  0x10   : > { %s360_s8 = sshll.u32 (!%p190_p9), %s356_s25, 4  ;;  %s537_s13 = scalar_lea.hbm (!%p190_p9), %s735_s5, 16  ;;  %s361_s8 = int_to_ptr.hbm [resolvable:$true] %s360_s8 }
  0x13   : > { %s217_s30 = scalar_select %p216_p10, %s633_s22, 1  ;;  %v469_v3 = vld [vmem:[%s733_s3 + $0x38] sm:$0xff]  ;;  %v581_v4 = vmov 32.0   ;;  %v468_v5 = vld [vmem:[%s733_s3 + $0x30] sm:$0xff]  ;;  %v467_v7 = vld [vmem:[%s733_s3 + $0x28] sm:$0xff]  ;;  %vm343_vm4 = vcmask 392192  }
  0x14   : > { %513 = vrcp.f32 %v581_v4  ;;  %330 = vmatpush.bf16.msra.mxu0 %v469_v3  ;;  %v466_v9 = vld [vmem:[%s733_s3 + $0x20] sm:$0xff]  ;;  %v465_v11 = vld [vmem:[%s733_s3 + $0x18] sm:$0xff]  ;;  %v464_v13 = vld [vmem:[%s733_s3 + $0x10] sm:$0xff]  ;;  %s346_s22 = scalar_lea.sflag [#allocation3], %s213_s14 }
  0x15   : > { %s425_s6 = sshll.u32 %s217_s30, 2  ;;  %v463_v15 = vld [vmem:[%s733_s3 + $0x8] sm:$0xff]  ;;  %v462_v18 = vld [vmem:[%s733_s3] sm:$0xff] }
  0x16   : > { %s219_s9 = scalar_lea.vmem %s730_s0, %s425_s6  ;;  %v510_v32 = vld [vmem:[%s731_s1] ss:$0 sm:$0xff]  ;;  %s215_s6 = scalar_lea.vmem [#allocation2], %s424_s16 }
  0x17   : > { %v220_v0 = vld [vmem:[%s219_s9] sm:$0xf]  ;;  %s358_s7 = sshll.u32 %s215_s6, 4  ;;  %s531_s9 = sshra.s32 %s361_s8, 4  ;;  %s359_s7 = int_to_ptr.vmem [resolvable:$true] %s358_s7  ;;  %s532_s9 = int_to_ptr.hbm [resolvable:$true] %s531_s9 }
  0x18   : > { %v221_v1 = vunpack.c.l.bf16 %v220_v0  ;;  %331 = vmatpush.bf16.msra.mxu0 %v468_v5  ;;  %v511_v35 = vld [vmem:[%s732_s2] ss:$0 sm:$0xff]  ;;  %s533_s10 = scalar_lea.hbm %s532_s9, 8  ;;  %p538_p0 = scmp.lt.s32.totalorder %s532_s9, %s735_s5 }
  0x19   : > { %v512_v39 = vld [vmem:[%s734_s4] ss:$0 sm:$0xff]  ;;  %p534_p11 = scmp.ne.s32.totalorder %s532_s9, %s533_s10  ;;  %p539_p1 = scmp.lt.s32.totalorder %s537_s13, %s533_s10 }
  0x1a   : > { %224 = vadd.xlane.f32.xlu0 %v221_v1  ;;  %v226_v2 = vmul.f32 %v221_v1, %v221_v1  ;;  %v514_v6 = vpop.eup %513 }
  0x1b   : > { %v230_v8 = vmul.f32 32.0, %v514_v6  ;;  %vm234_vm0 = vweird.f32 %v514_v6  ;;  %p535_p12 = pnand %p534_p11, %p650_p5  ;;  %p540_p2 = por %p539_p1, %p538_p0 }
  0x1c   : > { %332 = vmatpush.bf16.msra.mxu0 %v467_v7 }
  0x1d   : > { %v231_v10 = vsub.f32 1.0, %v230_v8  ;;  %p536_p13 = pneg %p535_p12 }
  0x1f   : > { %v232_v12 = vmul.f32 %v514_v6, %v231_v10  ;;  %p541_p3 = pnand %p540_p2, %p536_p13 }
  0x20   : > { %333 = vmatpush.bf16.msra.mxu0 %v466_v9 }
  0x21   : > { %v233_v14 = vadd.f32 %v514_v6, %v232_v12 }
  0x22   : > { %227 = vadd.xlane.f32.xlu0 %v226_v2 }
  0x23   : > { %v235_v17 = vsel %vm234_vm0, %v514_v6, %v233_v14 }
  0x24   : > { %334 = vmatpush.bf16.msra.mxu0 %v465_v11 }
  0x28   : > { %335 = vmatpush.bf16.msra.mxu0 %v464_v13 }
  0x2c   : > { %336 = vmatpush.bf16.msra.mxu0 %v463_v15 }
  0x30   : > { %337 = vmatpush.bf16.msra.mxu0 %v462_v18 }
  0x8d   : > { %v225_v16 = vpop.xlane.xlu0 %224 }
  0x8e   : > { %v236_v19 = vmul.f32 %v235_v17, %v225_v16 }
  0x90   : > { %v238_v21 = vmul.f32 %v236_v19, %v236_v19  ;;  %v240_v31 = vsub.f32 %v221_v1, %v236_v19 }
  0x95   : > { %v228_v20 = vpop.xlane.xlu0 %227 }
  0x96   : > { %v237_v22 = vmul.f32 %v235_v17, %v228_v20 }
  0x98   : > { %v239_v23 = vsub.f32 %v237_v22, %v238_v21 }
  0x9a   : > { %v241_v24 = vadd.f32 1e-05, %v239_v23 }
  0x9c   : > { %515 = vrsqrt.f32 %v241_v24  ;;  %vm248_vm2 = vweird.f32 %v241_v24 }
  0xa2   : > { %v516_v25 = vpop.eup %515 }
  0xa3   : > { %v243_v26 = vmul.f32 %v516_v25, %v241_v24  ;;  %vm249_vm1 = vweird.f32 %v516_v25 }
  0xa4   : > { %vm250_vm3 = vmor %vm248_vm2, %vm249_vm1 }
  0xa5   : > { %v244_v27 = vmul.f32 %v516_v25, %v243_v26 }
  0xa7   : > { %v245_v28 = vmul.f32 0.5, %v244_v27 }
  0xa9   : > { %v246_v29 = vsub.f32 1.5, %v245_v28 }
  0xab   : > { %v247_v30 = vmul.f32 %v516_v25, %v246_v29 }
  0xad   : > { %v251_v33 = vsel %vm250_vm3, %v516_v25, %v247_v30 }
  0xae   : > { %v252_v34 = vmul.f32 %v251_v33, %v240_v31 }
  0xb0   : > { %v256_v36 = vmul.f32 %v510_v32, %v252_v34 }
  0xb2   : > { %v260_v37 = vadd.f32 %v511_v35, %v256_v36 }
  0xb4   : > { %v261_v38 = vpack.c.bf16 %v260_v37, %v260_v37 }
  0xb6   : > { %338 = vmatmul.bf16.vlgmr.msra.gmra.mxu0 %v261_v38 }
 0x133   : > { %v339_v40 = vpop.f32.mrf.mxu0 }
 0x134   : > { %v340_v41 = vadd.f32 %v512_v39, %v339_v40 }
 0x136   : > { %344 = vst.msk [vmem:[%s215_s6] sm:$0xff] %vm343_vm4, %v340_v41 }
 0x137   : > { %544 = shalt.err (!%p541_p3)
}
 0x138   : > { %470 = dma.vmem_to_hbm [thread:$0]  (%p650_p5), %s359_s7, 128, %s361_s8, %s346_s22  }
 0x13b   : > { %v341_v42 = vpop.f32.mrf.mxu0 }
 0x13c PF: > { %p476_p4 = scmp.ge.s32.totalorder %s579_s21, 2  ;;  %s372_s14 = sand.u32 1, %s567_s18  }
 0x13d   : > { %s373_s17 = scalar_lea.sflag [#allocation3], %s372_s14 }
 0x13e   : > { %p473_p7 = pnand %p476_p4, %p654_p6 }
 0x140   : > { %p474_p8 = pneg %p473_p7 }
 0x142   : > { %562 = dma.done.wait (%p474_p8), %s373_s17, 128  }
 0x143   : > { %564 = vsyncadd (%p474_p8), %s373_s17, 4294967168  ;;  %p15_p9 = scmp.ge.s32.totalorder %s637_s24, 4   ;;  %s738_s18 = smov %s571_s19 }
 0x144   : > { %s739_s19 = smov %s575_s20  ;;  %s740_s20 = smov %s648_s27 }
 0x145   : > { %s741_s21 = smov %s637_s24  ;;  %17 = sbr.rel (!%p15_p9) target bundleno = 3 (0x3), region = 75 }
 0x14a   :  { %379 = vsyncpa [#allocation3], 1 }
 0x14b   :  { %381 = vsyncpa [#allocation3 + $0x1], 1 }

</bundles_post_ra>
